<compile_context>
chip_gen: v7x
topology: tpu7x:2x2x1
jax: 0.10.0
libtpu: 0.0.40
codegen_flags: <defaults>
</compile_context>

<pallas_src>
import functools

import numpy as np
import jax
import jax.numpy as jnp
from jax.experimental import pallas as pl
from jax.experimental.pallas import tpu as pltpu


def _round_up(n, m):
    return ((n + m - 1) // m) * m


# ------------------------------- fused Pallas kernel --------------------------------


def _bn_lrelu_f32(y, gamma, beta, m_valid):
    """Training-mode BatchNorm over rows (masked to the valid rows) + LeakyReLU(0.2)."""
    rows = jax.lax.broadcasted_iota(jnp.int32, y.shape, 0)
    mask = (rows < m_valid).astype(jnp.float32)
    inv_m = 1.0 / float(m_valid)
    mean = jnp.sum(y * mask, axis=0, keepdims=True) * inv_m
    cent = (y - mean) * mask
    var = jnp.sum(cent * cent, axis=0, keepdims=True) * inv_m          # biased (train mode)
    yn = (y - mean) * jax.lax.rsqrt(var + 1e-5) * gamma + beta
    return jnp.where(yn >= 0.0, yn, 0.2 * yn)


def _discriminator_kernel(x1_ref, w1_ref, b1_ref,
                          s2_ref, w2_ref, b2_ref, g2_ref, be2_ref,
                          s3_ref, w3_ref, b3_ref, g3_ref, be3_ref,
                          wlt_ref, bl_ref,
                          o_ref,
                          h1_s, h2_s,
                          *, m2, m3, batch, n_pos):
    f32, bf16 = jnp.float32, jnp.bfloat16

    # ---- layer 1: conv1 (wrapper im2col patch matmul) + bias + LeakyReLU ------------
    y1 = jnp.dot(x1_ref[...], w1_ref[...], preferred_element_type=f32) + b1_ref[...]
    h1_s[...] = jnp.where(y1 >= 0.0, y1, 0.2 * y1).astype(bf16)        # [M1P, 64] in VMEM

    # ---- layer 2: conv2 via 16 gather-matmul taps + bias + BN + LeakyReLU -----------
    # tap k: s2[k] is a one-hot row-selection matrix (exact gather), w2[k] = W[kh,kw].
    m2p = s2_ref.shape[1]
    acc2 = jnp.zeros((m2p, w2_ref.shape[2]), f32)
    for k in range(s2_ref.shape[0]):
        t = jnp.dot(s2_ref[k], h1_s[...], preferred_element_type=f32)  # lossless gather
        acc2 = acc2 + jnp.dot(t.astype(bf16), w2_ref[k], preferred_element_type=f32)
    h2 = _bn_lrelu_f32(acc2 + b2_ref[...], g2_ref[...], be2_ref[...], m2)
    h2_s[...] = h2.astype(bf16)                                        # [M2P, 128] in VMEM

    # ---- layer 3: conv3 (same scheme) + bias + BN + LeakyReLU ------------------------
    m3p = s3_ref.shape[1]
    acc3 = jnp.zeros((m3p, w3_ref.shape[2]), f32)
    for k in range(s3_ref.shape[0]):
        t = jnp.dot(s3_ref[k], h2_s[...], preferred_element_type=f32)
        acc3 = acc3 + jnp.dot(t.astype(bf16), w3_ref[k], preferred_element_type=f32)
    h3 = _bn_lrelu_f32(acc3 + b3_ref[...], g3_ref[...], be3_ref[...], m3)   # [M3P, 256] f32

    # ---- head: Linear(256*3*3 -> 1) + Sigmoid ---------------------------------------
    # z[m, p] = <h3[m, :], wl[p, :]> for spatial position p (<n_pos); f32 matmul (tiny).
    z = jnp.dot(h3, wlt_ref[...], preferred_element_type=f32)          # [M3P, 128]
    rows = jax.lax.broadcasted_iota(jnp.int32, z.shape, 0)             # m
    cols = jax.lax.broadcasted_iota(jnp.int32, z.shape, 1)             # p
    # diag mask: keep p == m mod n_pos for valid rows; built without integer div/mod.
    d = jnp.zeros(z.shape, f32)
    for b in range(batch):      # TODO(synk): O(batch) unroll; fine for the small-batch regime
        d = d + ((rows - cols == n_pos * b) & (cols < n_pos)).astype(f32)
    zr = jnp.sum(z * d, axis=-1, keepdims=True)                        # [M3P, 1] (XLU reduce)
    # per-sample segmented sum over its n_pos rows (tiny f32 matmul).
    bp = o_ref.shape[0]
    brow = jax.lax.broadcasted_iota(jnp.int32, (bp, m3p), 0)
    mcol = jax.lax.broadcasted_iota(jnp.int32, (bp, m3p), 1)
    sel = ((mcol >= n_pos * brow) & (mcol < n_pos * brow + n_pos)
           & (brow < batch)).astype(f32)                               # [Bp, M3P]
    zr_b = jnp.broadcast_to(zr, (m3p, o_ref.shape[1]))                 # lane-dense
    logit = jnp.dot(sel, zr_b, preferred_element_type=f32) + bl_ref[0, 0]
    o_ref[...] = jax.nn.sigmoid(logit)                                 # dense [Bp, 128] store


# -------------------------------- pallas_call wrapper --------------------------------


def _call_fused(cols1, p, s2, s3, *, m2, m3, batch, n_pos, b_pad):
    kernel = functools.partial(_discriminator_kernel,
                               m2=m2, m3=m3, batch=batch, n_pos=n_pos)
    args = (cols1, p["w1"], p["b1"],
            s2, p["w2"], p["b2"], p["g2"], p["be2"],
            s3, p["w3"], p["b3"], p["g3"], p["be3"],
            p["wlt"], p["bl"])

    def full_spec(a):
        nd = a.ndim
        return pl.BlockSpec(a.shape, lambda i, nd=nd: (0,) * nd)

    in_specs = [full_spec(a) for a in args[:-1]]
    in_specs.append(pl.BlockSpec(memory_space=pltpu.MemorySpace.SMEM))   # scalar bias

    m1p = cols1.shape[0]
    m2p = s2.shape[1]
    return pl.pallas_call(
        kernel,
        out_shape=jax.ShapeDtypeStruct((b_pad, 128), jnp.float32),
        grid=(1,),
        in_specs=in_specs,
        out_specs=pl.BlockSpec((b_pad, 128), lambda i: (0, 0)),
        scratch_shapes=[pltpu.VMEM((m1p, p["w1"].shape[1]), jnp.bfloat16),   # h1 resident
                        pltpu.VMEM((m2p, p["w2"].shape[2]), jnp.bfloat16)],  # h2 resident
        compiler_params=pltpu.CompilerParams(dimension_semantics=("arbitrary",)),
    )(*args)


# ---------------------------------- JAX glue ------------------------------------------


def _geometry(batch, img_size):
    o1 = (img_size + 2 - 4) // 2 + 1
    o2 = (o1 + 2 - 4) // 2 + 1
    o3 = (o2 + 2 - 4) // 2 + 1
    m1, m2, m3 = batch * o1 * o1, batch * o2 * o2, batch * o3 * o3
    return dict(o1=o1, o2=o2, o3=o3, m1=m1, m2=m2, m3=m3,
                m1p=_round_up(m1, 128), m2p=_round_up(m2, 128),
                m3p=_round_up(m3, 16), b_pad=_round_up(batch, 8))


def _im2col_nhwc(x, k=4, s=2, p=1):
    """NHWC -> patch matrix [B*OH*OW, k*k*C], columns in (kh, kw, c) order."""
    x = jnp.pad(x, ((0, 0), (p, p), (p, p), (0, 0)))
    B, H, W, C = x.shape
    OH = (H - k) // s + 1
    OW = (W - k) // s + 1
    cols = [x[:, i:i + s * OH:s, j:j + s * OW:s, :] for i in range(k) for j in range(k)]
    cols = jnp.concatenate(cols, axis=-1)
    return cols.reshape(B * OH * OW, k * k * C)


def _gather_taps(batch, h_in, w_in, *, m_out_pad, m_in_pad, k=4, s=2, p=1):
    """One-hot row-selection matrices [k*k, M_out_pad, M_in_pad]; zero rows encode
    spatial zero-padding and M padding."""
    oh = (h_in + 2 * p - k) // s + 1
    ow = (w_in + 2 * p - k) // s + 1
    taps = np.zeros((k * k, m_out_pad, m_in_pad), np.float32)
    for b in range(batch):
        for oy in range(oh):
            for ox in range(ow):
                mo = (b * oh + oy) * ow + ox
                for kh in range(k):
                    for kw in range(k):
                        iy, ix = s * oy + kh - p, s * ox + kw - p
                        if 0 <= iy < h_in and 0 <= ix < w_in:
                            mi = (b * h_in + iy) * w_in + ix
                            taps[kh * k + kw, mo, mi] = 1.0
    return jnp.asarray(taps, jnp.bfloat16)


def build_gather_constants(batch, img_size):
    g = _geometry(batch, img_size)
    s2 = _gather_taps(batch, g["o1"], g["o1"], m_out_pad=g["m2p"], m_in_pad=g["m1p"])
    s3 = _gather_taps(batch, g["o2"], g["o2"], m_out_pad=g["m3p"], m_in_pad=g["m2p"])
    return {"s2": s2, "s3": s3}


def _spectral_normalize(w_mat, n_iter=50):
    """Converged power iteration applied once at init (sigma is layout-invariant)."""
    u = jnp.full((w_mat.shape[0],), 1.0 / jnp.sqrt(float(w_mat.shape[0])), jnp.float32)

    def body(_, u):
        v = w_mat.T @ u
        v = v / (jnp.linalg.norm(v) + 1e-12)
        u = w_mat @ v
        u = u / (jnp.linalg.norm(u) + 1e-12)
        return u

    u = jax.lax.fori_loop(0, n_iter, body, u)
    v = w_mat.T @ u
    v = v / (jnp.linalg.norm(v) + 1e-12)
    sigma = u @ (w_mat @ v)
    return w_mat / sigma


def init_params(key, num_classes, img_channels, img_size=28):
    c_in = img_channels + num_classes
    keys = jax.random.split(key, 8)
    p = {}

    # conv1: [(kh,kw,cin), 64]; K lane-padded to 128 with zero rows.
    k1 = 16 * c_in
    k1p = _round_up(k1, 128)
    w1 = _spectral_normalize(jax.random.normal(keys[0], (k1, 64), jnp.float32) * 0.05)
    p["w1"] = jnp.pad(w1, ((0, k1p - k1), (0, 0))).astype(jnp.bfloat16)       # [128, 64]
    p["b1"] = jax.random.normal(keys[1], (1, 64), jnp.float32) * 0.01

    # conv2: real K only (64 in-channels), stored as per-tap slices [16, 64, 128].
    w2 = _spectral_normalize(jax.random.normal(keys[2], (16 * 64, 128), jnp.float32) * 0.05)
    p["w2"] = w2.reshape(16, 64, 128).astype(jnp.bfloat16)
    p["b2"] = jax.random.normal(keys[3], (1, 128), jnp.float32) * 0.01
    p["g2"] = jnp.ones((1, 128), jnp.float32)
    p["be2"] = jnp.zeros((1, 128), jnp.float32)

    # conv3: [16, 128, 256].
    w3 = _spectral_normalize(jax.random.normal(keys[4], (16 * 128, 256), jnp.float32) * 0.05)
    p["w3"] = w3.reshape(16, 128, 256).astype(jnp.bfloat16)
    p["b3"] = jax.random.normal(keys[5], (1, 256), jnp.float32) * 0.01
    p["g3"] = jnp.ones((1, 256), jnp.float32)
    p["be3"] = jnp.zeros((1, 256), jnp.float32)

    # Head Linear(256*3*3 -> 1) in (spatial-position, channel) order; transposed to
    # [256, 128] (lanes = spatial position, padded).  Random init, so the permutation
    # vs PyTorch's CHW flatten is immaterial.
    o = img_size
    for _ in range(3):
        o = (o + 2 - 4) // 2 + 1
    n_pos = o * o
    wl = _spectral_normalize(jax.random.normal(keys[6], (1, n_pos * 256), jnp.float32) * 0.02)
    wl = wl.reshape(n_pos, 256)
    p["wlt"] = jnp.pad(wl.T, ((0, 0), (0, 128 - n_pos)))                      # [256, 128] f32
    p["bl"] = jax.random.normal(keys[7], (1, 1), jnp.float32) * 0.01          # SMEM scalar
    return p


def discriminator_forward(img, labels, params, consts, num_classes, img_size):
    B = img.shape[0]
    g = _geometry(B, img_size)

    # NHWC once; concat one-hot label maps on channels (matches torch cat on dim=1).
    x = jnp.transpose(img, (0, 2, 3, 1))
    labels_map = jnp.broadcast_to(labels.reshape(B, 1, 1, num_classes),
                                  (B, img_size, img_size, num_classes))
    x = jnp.concatenate([x, labels_map], axis=-1)                              # [B,28,28,Cin]

    # Layer-1 im2col on the raw input (tiny); everything after stays in VMEM.
    cols1 = _im2col_nhwc(x)                                                    # [m1, 16*Cin]
    cols1 = jnp.pad(cols1, ((0, g["m1p"] - g["m1"]),
                            (0, params["w1"].shape[0] - cols1.shape[1])))
    cols1 = cols1.astype(jnp.bfloat16)                                         # [M1P, 128]

    out = _call_fused(cols1, params, consts["s2"], consts["s3"],
                      m2=g["m2"], m3=g["m3"], batch=B,
                      n_pos=g["o3"] * g["o3"], b_pad=g["b_pad"])               # [Bp, 128]
    return out[:B, :1]                                                         # [B, 1]


if __name__ == "__main__":
    num_classes, img_channels, img_size, batch = 4, 1, 28, 2

    key = jax.random.PRNGKey(0)
    k_img, k_lbl, k_par = jax.random.split(key, 3)
    img = jax.random.normal(k_img, (batch, img_channels, img_size, img_size), jnp.float32)
    label_idx = jax.random.randint(k_lbl, (batch,), 0, num_classes)
    labels = jax.nn.one_hot(label_idx, num_classes, dtype=jnp.float32)

    params = init_params(k_par, num_classes, img_channels, img_size)
    consts = build_gather_constants(batch, img_size)

    fwd = jax.jit(functools.partial(discriminator_forward,
                                    num_classes=num_classes, img_size=img_size))
    out = jax.block_until_ready(fwd(img, labels, params, consts))

    assert out.shape == (batch, 1), out.shape
    assert bool(jnp.all(jnp.isfinite(out)))
    assert bool(jnp.all((out >= 0.0) & (out <= 1.0)))
    print("KERNEL_OK")
</pallas_src>

<mosaic_0001>
module attributes {stable_mosaic.version = 11 : i64} {
  func.func @_discriminator_kernel(%arg0: i32, %arg1: memref<512x128xbf16, #tpu.memory_space<vmem>>, %arg2: memref<128x64xbf16, #tpu.memory_space<vmem>>, %arg3: memref<1x64xf32, #tpu.memory_space<vmem>>, %arg4: memref<16x128x512xbf16, #tpu.memory_space<vmem>>, %arg5: memref<16x64x128xbf16, #tpu.memory_space<vmem>>, %arg6: memref<1x128xf32, #tpu.memory_space<vmem>>, %arg7: memref<1x128xf32, #tpu.memory_space<vmem>>, %arg8: memref<1x128xf32, #tpu.memory_space<vmem>>, %arg9: memref<16x32x128xbf16, #tpu.memory_space<vmem>>, %arg10: memref<16x128x256xbf16, #tpu.memory_space<vmem>>, %arg11: memref<1x256xf32, #tpu.memory_space<vmem>>, %arg12: memref<1x256xf32, #tpu.memory_space<vmem>>, %arg13: memref<1x256xf32, #tpu.memory_space<vmem>>, %arg14: memref<256x128xf32, #tpu.memory_space<vmem>>, %arg15: memref<1x1xf32, #tpu.memory_space<smem>>, %arg16: memref<8x128xf32, #tpu.memory_space<vmem>>, %arg17: memref<512x64xbf16, #tpu.memory_space<vmem>>, %arg18: memref<128x128xbf16, #tpu.memory_space<vmem>>) attributes {dimension_semantics = [#tpu.dimension_semantics<arbitrary>], iteration_bounds = array<i64: 1>, scalar_prefetch = 0 : i64, scratch_operands = 2 : i64, tpu.core_type = #tpu.core_type<tc>, window_params = [{pipeline_mode = #tpu.pipeline_mode<synchronous>, transform_indices = @transform_0, window_bounds = array<i64: 512, 128>}, {pipeline_mode = #tpu.pipeline_mode<synchronous>, transform_indices = @transform_1, window_bounds = array<i64: 128, 64>}, {pipeline_mode = #tpu.pipeline_mode<synchronous>, transform_indices = @transform_2, window_bounds = array<i64: 1, 64>}, {pipeline_mode = #tpu.pipeline_mode<synchronous>, transform_indices = @transform_3, window_bounds = array<i64: 16, 128, 512>}, {pipeline_mode = #tpu.pipeline_mode<synchronous>, transform_indices = @transform_4, window_bounds = array<i64: 16, 64, 128>}, {pipeline_mode = #tpu.pipeline_mode<synchronous>, transform_indices = @transform_5, window_bounds = array<i64: 1, 128>}, {pipeline_mode = #tpu.pipeline_mode<synchronous>, transform_indices = @transform_6, window_bounds = array<i64: 1, 128>}, {pipeline_mode = #tpu.pipeline_mode<synchronous>, transform_indices = @transform_7, window_bounds = array<i64: 1, 128>}, {pipeline_mode = #tpu.pipeline_mode<synchronous>, transform_indices = @transform_8, window_bounds = array<i64: 16, 32, 128>}, {pipeline_mode = #tpu.pipeline_mode<synchronous>, transform_indices = @transform_9, window_bounds = array<i64: 16, 128, 256>}, {pipeline_mode = #tpu.pipeline_mode<synchronous>, transform_indices = @transform_10, window_bounds = array<i64: 1, 256>}, {pipeline_mode = #tpu.pipeline_mode<synchronous>, transform_indices = @transform_11, window_bounds = array<i64: 1, 256>}, {pipeline_mode = #tpu.pipeline_mode<synchronous>, transform_indices = @transform_12, window_bounds = array<i64: 1, 256>}, {pipeline_mode = #tpu.pipeline_mode<synchronous>, transform_indices = @transform_13, window_bounds = array<i64: 256, 128>}, {transform_indices = @transform_14, window_bounds = array<i64: 1, 1>}, {pipeline_mode = #tpu.pipeline_mode<synchronous>, transform_indices = @transform_15, window_bounds = array<i64: 8, 128>}]} {
    %c0 = arith.constant 0 : index
    %c0_0 = arith.constant 0 : index
    %0 = vector.load %arg1[%c0, %c0_0] : memref<512x128xbf16, #tpu.memory_space<vmem>>, vector<512x128xbf16>
    %c0_1 = arith.constant 0 : index
    %c0_2 = arith.constant 0 : index
    %1 = vector.load %arg2[%c0_1, %c0_2] : memref<128x64xbf16, #tpu.memory_space<vmem>>, vector<128x64xbf16>
    %cst = arith.constant dense<0.000000e+00> : vector<512x64xf32>
    %2 = tpu.matmul %0, %1, %cst {dimension_numbers = #tpu.dot_dimension_numbers<[1], [0], [0], [1], [0, 0, 1, 1], [], []>} : vector<512x128xbf16>, vector<128x64xbf16>, vector<512x64xf32> -> vector<512x64xf32>
    %c0_3 = arith.constant 0 : index
    %c0_4 = arith.constant 0 : index
    %3 = vector.load %arg3[%c0_3, %c0_4] : memref<1x64xf32, #tpu.memory_space<vmem>>, vector<1x64xf32>
    %4 = vector.broadcast %3 : vector<1x64xf32> to vector<512x64xf32>
    %5 = arith.addf %2, %4 : vector<512x64xf32>
    %cst_5 = arith.constant 0.000000e+00 : f32
    %6 = vector.broadcast %cst_5 : f32 to vector<512x64xf32>
    %7 = arith.cmpf oge, %5, %6 : vector<512x64xf32>
    %cst_6 = arith.constant 2.000000e-01 : f32
    %8 = vector.broadcast %cst_6 : f32 to vector<512x64xf32>
    %9 = arith.mulf %8, %5 : vector<512x64xf32>
    %10 = arith.select %7, %5, %9 : vector<512x64xi1>, vector<512x64xf32>
    %11 = arith.truncf %10 : vector<512x64xf32> to vector<512x64xbf16>
    %c0_7 = arith.constant 0 : index
    %c0_8 = arith.constant 0 : index
    %12 = vector.load %arg17[%c0_7, %c0_8] : memref<512x64xbf16, #tpu.memory_space<vmem>>, vector<512x64xbf16>
    tpu.vector_store %arg17[%c0_7, %c0_8], %11 {strides = array<i32>} : memref<512x64xbf16, #tpu.memory_space<vmem>>, vector<512x64xbf16>,
    %cst_9 = arith.constant 0.000000e+00 : f32
    %13 = vector.broadcast %cst_9 : f32 to vector<128x128xf32>
    %c0_10 = arith.constant 0 : index
    %c0_11 = arith.constant 0 : index
    %c0_12 = arith.constant 0 : index
    %14 = vector.load %arg4[%c0_10, %c0_11, %c0_12] : memref<16x128x512xbf16, #tpu.memory_space<vmem>>, vector<1x128x512xbf16>
    %15 = vector.shape_cast %14 : vector<1x128x512xbf16> to vector<128x512xbf16>
    %c0_13 = arith.constant 0 : index
    %c0_14 = arith.constant 0 : index
    %16 = vector.load %arg17[%c0_13, %c0_14] : memref<512x64xbf16, #tpu.memory_space<vmem>>, vector<512x64xbf16>
    %cst_15 = arith.constant dense<0.000000e+00> : vector<128x64xf32>
    %17 = tpu.matmul %15, %16, %cst_15 {dimension_numbers = #tpu.dot_dimension_numbers<[1], [0], [0], [1], [0, 0, 1, 1], [], []>} : vector<128x512xbf16>, vector<512x64xbf16>, vector<128x64xf32> -> vector<128x64xf32>
    %18 = arith.truncf %17 : vector<128x64xf32> to vector<128x64xbf16>
    %c0_16 = arith.constant 0 : index
    %c0_17 = arith.constant 0 : index
    %c0_18 = arith.constant 0 : index
    %19 = vector.load %arg5[%c0_16, %c0_17, %c0_18] : memref<16x64x128xbf16, #tpu.memory_space<vmem>>, vector<1x64x128xbf16>
    %20 = vector.shape_cast %19 : vector<1x64x128xbf16> to vector<64x128xbf16>
    %cst_19 = arith.constant dense<0.000000e+00> : vector<128x128xf32>
    %21 = tpu.matmul %18, %20, %cst_19 {dimension_numbers = #tpu.dot_dimension_numbers<[1], [0], [0], [1], [0, 0, 1, 1], [], []>} : vector<128x64xbf16>, vector<64x128xbf16>, vector<128x128xf32> -> vector<128x128xf32>
    %22 = arith.addf %13, %21 : vector<128x128xf32>
    %c1 = arith.constant 1 : index
    %c0_20 = arith.constant 0 : index
    %c0_21 = arith.constant 0 : index
    %23 = vector.load %arg4[%c1, %c0_20, %c0_21] : memref<16x128x512xbf16, #tpu.memory_space<vmem>>, vector<1x128x512xbf16>
    %24 = vector.shape_cast %23 : vector<1x128x512xbf16> to vector<128x512xbf16>
    %c0_22 = arith.constant 0 : index
    %c0_23 = arith.constant 0 : index
    %25 = vector.load %arg17[%c0_22, %c0_23] : memref<512x64xbf16, #tpu.memory_space<vmem>>, vector<512x64xbf16>
    %cst_24 = arith.constant dense<0.000000e+00> : vector<128x64xf32>
    %26 = tpu.matmul %24, %25, %cst_24 {dimension_numbers = #tpu.dot_dimension_numbers<[1], [0], [0], [1], [0, 0, 1, 1], [], []>} : vector<128x512xbf16>, vector<512x64xbf16>, vector<128x64xf32> -> vector<128x64xf32>
    %27 = arith.truncf %26 : vector<128x64xf32> to vector<128x64xbf16>
    %c1_25 = arith.constant 1 : index
    %c0_26 = arith.constant 0 : index
    %c0_27 = arith.constant 0 : index
    %28 = vector.load %arg5[%c1_25, %c0_26, %c0_27] : memref<16x64x128xbf16, #tpu.memory_space<vmem>>, vector<1x64x128xbf16>
    %29 = vector.shape_cast %28 : vector<1x64x128xbf16> to vector<64x128xbf16>
    %cst_28 = arith.constant dense<0.000000e+00> : vector<128x128xf32>
    %30 = tpu.matmul %27, %29, %cst_28 {dimension_numbers = #tpu.dot_dimension_numbers<[1], [0], [0], [1], [0, 0, 1, 1], [], []>} : vector<128x64xbf16>, vector<64x128xbf16>, vector<128x128xf32> -> vector<128x128xf32>
    %31 = arith.addf %22, %30 : vector<128x128xf32>
    %c2 = arith.constant 2 : index
    %c0_29 = arith.constant 0 : index
    %c0_30 = arith.constant 0 : index
    %32 = vector.load %arg4[%c2, %c0_29, %c0_30] : memref<16x128x512xbf16, #tpu.memory_space<vmem>>, vector<1x128x512xbf16>
    %33 = vector.shape_cast %32 : vector<1x128x512xbf16> to vector<128x512xbf16>
    %c0_31 = arith.constant 0 : index
    %c0_32 = arith.constant 0 : index
    %34 = vector.load %arg17[%c0_31, %c0_32] : memref<512x64xbf16, #tpu.memory_space<vmem>>, vector<512x64xbf16>
    %cst_33 = arith.constant dense<0.000000e+00> : vector<128x64xf32>
    %35 = tpu.matmul %33, %34, %cst_33 {dimension_numbers = #tpu.dot_dimension_numbers<[1], [0], [0], [1], [0, 0, 1, 1], [], []>} : vector<128x512xbf16>, vector<512x64xbf16>, vector<128x64xf32> -> vector<128x64xf32>
    %36 = arith.truncf %35 : vector<128x64xf32> to vector<128x64xbf16>
    %c2_34 = arith.constant 2 : index
    %c0_35 = arith.constant 0 : index
    %c0_36 = arith.constant 0 : index
    %37 = vector.load %arg5[%c2_34, %c0_35, %c0_36] : memref<16x64x128xbf16, #tpu.memory_space<vmem>>, vector<1x64x128xbf16>
    %38 = vector.shape_cast %37 : vector<1x64x128xbf16> to vector<64x128xbf16>
    %cst_37 = arith.constant dense<0.000000e+00> : vector<128x128xf32>
    %39 = tpu.matmul %36, %38, %cst_37 {dimension_numbers = #tpu.dot_dimension_numbers<[1], [0], [0], [1], [0, 0, 1, 1], [], []>} : vector<128x64xbf16>, vector<64x128xbf16>, vector<128x128xf32> -> vector<128x128xf32>
    %40 = arith.addf %31, %39 : vector<128x128xf32>
    %c3 = arith.constant 3 : index
    %c0_38 = arith.constant 0 : index
    %c0_39 = arith.constant 0 : index
    %41 = vector.load %arg4[%c3, %c0_38, %c0_39] : memref<16x128x512xbf16, #tpu.memory_space<vmem>>, vector<1x128x512xbf16>
    %42 = vector.shape_cast %41 : vector<1x128x512xbf16> to vector<128x512xbf16>
    %c0_40 = arith.constant 0 : index
    %c0_41 = arith.constant 0 : index
    %43 = vector.load %arg17[%c0_40, %c0_41] : memref<512x64xbf16, #tpu.memory_space<vmem>>, vector<512x64xbf16>
    %cst_42 = arith.constant dense<0.000000e+00> : vector<128x64xf32>
    %44 = tpu.matmul %42, %43, %cst_42 {dimension_numbers = #tpu.dot_dimension_numbers<[1], [0], [0], [1], [0, 0, 1, 1], [], []>} : vector<128x512xbf16>, vector<512x64xbf16>, vector<128x64xf32> -> vector<128x64xf32>
    %45 = arith.truncf %44 : vector<128x64xf32> to vector<128x64xbf16>
    %c3_43 = arith.constant 3 : index
    %c0_44 = arith.constant 0 : index
    %c0_45 = arith.constant 0 : index
    %46 = vector.load %arg5[%c3_43, %c0_44, %c0_45] : memref<16x64x128xbf16, #tpu.memory_space<vmem>>, vector<1x64x128xbf16>
    %47 = vector.shape_cast %46 : vector<1x64x128xbf16> to vector<64x128xbf16>
    %cst_46 = arith.constant dense<0.000000e+00> : vector<128x128xf32>
    %48 = tpu.matmul %45, %47, %cst_46 {dimension_numbers = #tpu.dot_dimension_numbers<[1], [0], [0], [1], [0, 0, 1, 1], [], []>} : vector<128x64xbf16>, vector<64x128xbf16>, vector<128x128xf32> -> vector<128x128xf32>
    %49 = arith.addf %40, %48 : vector<128x128xf32>
    %c4 = arith.constant 4 : index
    %c0_47 = arith.constant 0 : index
    %c0_48 = arith.constant 0 : index
    %50 = vector.load %arg4[%c4, %c0_47, %c0_48] : memref<16x128x512xbf16, #tpu.memory_space<vmem>>, vector<1x128x512xbf16>
    %51 = vector.shape_cast %50 : vector<1x128x512xbf16> to vector<128x512xbf16>
    %c0_49 = arith.constant 0 : index
    %c0_50 = arith.constant 0 : index
    %52 = vector.load %arg17[%c0_49, %c0_50] : memref<512x64xbf16, #tpu.memory_space<vmem>>, vector<512x64xbf16>
    %cst_51 = arith.constant dense<0.000000e+00> : vector<128x64xf32>
    %53 = tpu.matmul %51, %52, %cst_51 {dimension_numbers = #tpu.dot_dimension_numbers<[1], [0], [0], [1], [0, 0, 1, 1], [], []>} : vector<128x512xbf16>, vector<512x64xbf16>, vector<128x64xf32> -> vector<128x64xf32>
    %54 = arith.truncf %53 : vector<128x64xf32> to vector<128x64xbf16>
    %c4_52 = arith.constant 4 : index
    %c0_53 = arith.constant 0 : index
    %c0_54 = arith.constant 0 : index
    %55 = vector.load %arg5[%c4_52, %c0_53, %c0_54] : memref<16x64x128xbf16, #tpu.memory_space<vmem>>, vector<1x64x128xbf16>
    %56 = vector.shape_cast %55 : vector<1x64x128xbf16> to vector<64x128xbf16>
    %cst_55 = arith.constant dense<0.000000e+00> : vector<128x128xf32>
    %57 = tpu.matmul %54, %56, %cst_55 {dimension_numbers = #tpu.dot_dimension_numbers<[1], [0], [0], [1], [0, 0, 1, 1], [], []>} : vector<128x64xbf16>, vector<64x128xbf16>, vector<128x128xf32> -> vector<128x128xf32>
    %58 = arith.addf %49, %57 : vector<128x128xf32>
    %c5 = arith.constant 5 : index
    %c0_56 = arith.constant 0 : index
    %c0_57 = arith.constant 0 : index
    %59 = vector.load %arg4[%c5, %c0_56, %c0_57] : memref<16x128x512xbf16, #tpu.memory_space<vmem>>, vector<1x128x512xbf16>
    %60 = vector.shape_cast %59 : vector<1x128x512xbf16> to vector<128x512xbf16>
    %c0_58 = arith.constant 0 : index
    %c0_59 = arith.constant 0 : index
    %61 = vector.load %arg17[%c0_58, %c0_59] : memref<512x64xbf16, #tpu.memory_space<vmem>>, vector<512x64xbf16>
    %cst_60 = arith.constant dense<0.000000e+00> : vector<128x64xf32>
    %62 = tpu.matmul %60, %61, %cst_60 {dimension_numbers = #tpu.dot_dimension_numbers<[1], [0], [0], [1], [0, 0, 1, 1], [], []>} : vector<128x512xbf16>, vector<512x64xbf16>, vector<128x64xf32> -> vector<128x64xf32>
    %63 = arith.truncf %62 : vector<128x64xf32> to vector<128x64xbf16>
    %c5_61 = arith.constant 5 : index
    %c0_62 = arith.constant 0 : index
    %c0_63 = arith.constant 0 : index
    %64 = vector.load %arg5[%c5_61, %c0_62, %c0_63] : memref<16x64x128xbf16, #tpu.memory_space<vmem>>, vector<1x64x128xbf16>
    %65 = vector.shape_cast %64 : vector<1x64x128xbf16> to vector<64x128xbf16>
    %cst_64 = arith.constant dense<0.000000e+00> : vector<128x128xf32>
    %66 = tpu.matmul %63, %65, %cst_64 {dimension_numbers = #tpu.dot_dimension_numbers<[1], [0], [0], [1], [0, 0, 1, 1], [], []>} : vector<128x64xbf16>, vector<64x128xbf16>, vector<128x128xf32> -> vector<128x128xf32>
    %67 = arith.addf %58, %66 : vector<128x128xf32>
    %c6 = arith.constant 6 : index
    %c0_65 = arith.constant 0 : index
    %c0_66 = arith.constant 0 : index
    %68 = vector.load %arg4[%c6, %c0_65, %c0_66] : memref<16x128x512xbf16, #tpu.memory_space<vmem>>, vector<1x128x512xbf16>
    %69 = vector.shape_cast %68 : vector<1x128x512xbf16> to vector<128x512xbf16>
    %c0_67 = arith.constant 0 : index
    %c0_68 = arith.constant 0 : index
    %70 = vector.load %arg17[%c0_67, %c0_68] : memref<512x64xbf16, #tpu.memory_space<vmem>>, vector<512x64xbf16>
    %cst_69 = arith.constant dense<0.000000e+00> : vector<128x64xf32>
    %71 = tpu.matmul %69, %70, %cst_69 {dimension_numbers = #tpu.dot_dimension_numbers<[1], [0], [0], [1], [0, 0, 1, 1], [], []>} : vector<128x512xbf16>, vector<512x64xbf16>, vector<128x64xf32> -> vector<128x64xf32>
    %72 = arith.truncf %71 : vector<128x64xf32> to vector<128x64xbf16>
    %c6_70 = arith.constant 6 : index
    %c0_71 = arith.constant 0 : index
    %c0_72 = arith.constant 0 : index
    %73 = vector.load %arg5[%c6_70, %c0_71, %c0_72] : memref<16x64x128xbf16, #tpu.memory_space<vmem>>, vector<1x64x128xbf16>
    %74 = vector.shape_cast %73 : vector<1x64x128xbf16> to vector<64x128xbf16>
    %cst_73 = arith.constant dense<0.000000e+00> : vector<128x128xf32>
    %75 = tpu.matmul %72, %74, %cst_73 {dimension_numbers = #tpu.dot_dimension_numbers<[1], [0], [0], [1], [0, 0, 1, 1], [], []>} : vector<128x64xbf16>, vector<64x128xbf16>, vector<128x128xf32> -> vector<128x128xf32>
    %76 = arith.addf %67, %75 : vector<128x128xf32>
    %c7 = arith.constant 7 : index
    %c0_74 = arith.constant 0 : index
    %c0_75 = arith.constant 0 : index
    %77 = vector.load %arg4[%c7, %c0_74, %c0_75] : memref<16x128x512xbf16, #tpu.memory_space<vmem>>, vector<1x128x512xbf16>
    %78 = vector.shape_cast %77 : vector<1x128x512xbf16> to vector<128x512xbf16>
    %c0_76 = arith.constant 0 : index
    %c0_77 = arith.constant 0 : index
    %79 = vector.load %arg17[%c0_76, %c0_77] : memref<512x64xbf16, #tpu.memory_space<vmem>>, vector<512x64xbf16>
    %cst_78 = arith.constant dense<0.000000e+00> : vector<128x64xf32>
    %80 = tpu.matmul %78, %79, %cst_78 {dimension_numbers = #tpu.dot_dimension_numbers<[1], [0], [0], [1], [0, 0, 1, 1], [], []>} : vector<128x512xbf16>, vector<512x64xbf16>, vector<128x64xf32> -> vector<128x64xf32>
    %81 = arith.truncf %80 : vector<128x64xf32> to vector<128x64xbf16>
    %c7_79 = arith.constant 7 : index
    %c0_80 = arith.constant 0 : index
    %c0_81 = arith.constant 0 : index
    %82 = vector.load %arg5[%c7_79, %c0_80, %c0_81] : memref<16x64x128xbf16, #tpu.memory_space<vmem>>, vector<1x64x128xbf16>
    %83 = vector.shape_cast %82 : vector<1x64x128xbf16> to vector<64x128xbf16>
    %cst_82 = arith.constant dense<0.000000e+00> : vector<128x128xf32>
    %84 = tpu.matmul %81, %83, %cst_82 {dimension_numbers = #tpu.dot_dimension_numbers<[1], [0], [0], [1], [0, 0, 1, 1], [], []>} : vector<128x64xbf16>, vector<64x128xbf16>, vector<128x128xf32> -> vector<128x128xf32>
    %85 = arith.addf %76, %84 : vector<128x128xf32>
    %c8 = arith.constant 8 : index
    %c0_83 = arith.constant 0 : index
    %c0_84 = arith.constant 0 : index
    %86 = vector.load %arg4[%c8, %c0_83, %c0_84] : memref<16x128x512xbf16, #tpu.memory_space<vmem>>, vector<1x128x512xbf16>
    %87 = vector.shape_cast %86 : vector<1x128x512xbf16> to vector<128x512xbf16>
    %c0_85 = arith.constant 0 : index
    %c0_86 = arith.constant 0 : index
    %88 = vector.load %arg17[%c0_85, %c0_86] : memref<512x64xbf16, #tpu.memory_space<vmem>>, vector<512x64xbf16>
    %cst_87 = arith.constant dense<0.000000e+00> : vector<128x64xf32>
    %89 = tpu.matmul %87, %88, %cst_87 {dimension_numbers = #tpu.dot_dimension_numbers<[1], [0], [0], [1], [0, 0, 1, 1], [], []>} : vector<128x512xbf16>, vector<512x64xbf16>, vector<128x64xf32> -> vector<128x64xf32>
    %90 = arith.truncf %89 : vector<128x64xf32> to vector<128x64xbf16>
    %c8_88 = arith.constant 8 : index
    %c0_89 = arith.constant 0 : index
    %c0_90 = arith.constant 0 : index
    %91 = vector.load %arg5[%c8_88, %c0_89, %c0_90] : memref<16x64x128xbf16, #tpu.memory_space<vmem>>, vector<1x64x128xbf16>
    %92 = vector.shape_cast %91 : vector<1x64x128xbf16> to vector<64x128xbf16>
    %cst_91 = arith.constant dense<0.000000e+00> : vector<128x128xf32>
    %93 = tpu.matmul %90, %92, %cst_91 {dimension_numbers = #tpu.dot_dimension_numbers<[1], [0], [0], [1], [0, 0, 1, 1], [], []>} : vector<128x64xbf16>, vector<64x128xbf16>, vector<128x128xf32> -> vector<128x128xf32>
    %94 = arith.addf %85, %93 : vector<128x128xf32>
    %c9 = arith.constant 9 : index
    %c0_92 = arith.constant 0 : index
    %c0_93 = arith.constant 0 : index
    %95 = vector.load %arg4[%c9, %c0_92, %c0_93] : memref<16x128x512xbf16, #tpu.memory_space<vmem>>, vector<1x128x512xbf16>
    %96 = vector.shape_cast %95 : vector<1x128x512xbf16> to vector<128x512xbf16>
    %c0_94 = arith.constant 0 : index
    %c0_95 = arith.constant 0 : index
    %97 = vector.load %arg17[%c0_94, %c0_95] : memref<512x64xbf16, #tpu.memory_space<vmem>>, vector<512x64xbf16>
    %cst_96 = arith.constant dense<0.000000e+00> : vector<128x64xf32>
    %98 = tpu.matmul %96, %97, %cst_96 {dimension_numbers = #tpu.dot_dimension_numbers<[1], [0], [0], [1], [0, 0, 1, 1], [], []>} : vector<128x512xbf16>, vector<512x64xbf16>, vector<128x64xf32> -> vector<128x64xf32>
    %99 = arith.truncf %98 : vector<128x64xf32> to vector<128x64xbf16>
    %c9_97 = arith.constant 9 : index
    %c0_98 = arith.constant 0 : index
    %c0_99 = arith.constant 0 : index
    %100 = vector.load %arg5[%c9_97, %c0_98, %c0_99] : memref<16x64x128xbf16, #tpu.memory_space<vmem>>, vector<1x64x128xbf16>
    %101 = vector.shape_cast %100 : vector<1x64x128xbf16> to vector<64x128xbf16>
    %cst_100 = arith.constant dense<0.000000e+00> : vector<128x128xf32>
    %102 = tpu.matmul %99, %101, %cst_100 {dimension_numbers = #tpu.dot_dimension_numbers<[1], [0], [0], [1], [0, 0, 1, 1], [], []>} : vector<128x64xbf16>, vector<64x128xbf16>, vector<128x128xf32> -> vector<128x128xf32>
    %103 = arith.addf %94, %102 : vector<128x128xf32>
    %c10 = arith.constant 10 : index
    %c0_101 = arith.constant 0 : index
    %c0_102 = arith.constant 0 : index
    %104 = vector.load %arg4[%c10, %c0_101, %c0_102] : memref<16x128x512xbf16, #tpu.memory_space<vmem>>, vector<1x128x512xbf16>
    %105 = vector.shape_cast %104 : vector<1x128x512xbf16> to vector<128x512xbf16>
    %c0_103 = arith.constant 0 : index
    %c0_104 = arith.constant 0 : index
    %106 = vector.load %arg17[%c0_103, %c0_104] : memref<512x64xbf16, #tpu.memory_space<vmem>>, vector<512x64xbf16>
    %cst_105 = arith.constant dense<0.000000e+00> : vector<128x64xf32>
    %107 = tpu.matmul %105, %106, %cst_105 {dimension_numbers = #tpu.dot_dimension_numbers<[1], [0], [0], [1], [0, 0, 1, 1], [], []>} : vector<128x512xbf16>, vector<512x64xbf16>, vector<128x64xf32> -> vector<128x64xf32>
    %108 = arith.truncf %107 : vector<128x64xf32> to vector<128x64xbf16>
    %c10_106 = arith.constant 10 : index
    %c0_107 = arith.constant 0 : index
    %c0_108 = arith.constant 0 : index
    %109 = vector.load %arg5[%c10_106, %c0_107, %c0_108] : memref<16x64x128xbf16, #tpu.memory_space<vmem>>, vector<1x64x128xbf16>
    %110 = vector.shape_cast %109 : vector<1x64x128xbf16> to vector<64x128xbf16>
    %cst_109 = arith.constant dense<0.000000e+00> : vector<128x128xf32>
    %111 = tpu.matmul %108, %110, %cst_109 {dimension_numbers = #tpu.dot_dimension_numbers<[1], [0], [0], [1], [0, 0, 1, 1], [], []>} : vector<128x64xbf16>, vector<64x128xbf16>, vector<128x128xf32> -> vector<128x128xf32>
    %112 = arith.addf %103, %111 : vector<128x128xf32>
    %c11 = arith.constant 11 : index
    %c0_110 = arith.constant 0 : index
    %c0_111 = arith.constant 0 : index
    %113 = vector.load %arg4[%c11, %c0_110, %c0_111] : memref<16x128x512xbf16, #tpu.memory_space<vmem>>, vector<1x128x512xbf16>
    %114 = vector.shape_cast %113 : vector<1x128x512xbf16> to vector<128x512xbf16>
    %c0_112 = arith.constant 0 : index
    %c0_113 = arith.constant 0 : index
    %115 = vector.load %arg17[%c0_112, %c0_113] : memref<512x64xbf16, #tpu.memory_space<vmem>>, vector<512x64xbf16>
    %cst_114 = arith.constant dense<0.000000e+00> : vector<128x64xf32>
    %116 = tpu.matmul %114, %115, %cst_114 {dimension_numbers = #tpu.dot_dimension_numbers<[1], [0], [0], [1], [0, 0, 1, 1], [], []>} : vector<128x512xbf16>, vector<512x64xbf16>, vector<128x64xf32> -> vector<128x64xf32>
    %117 = arith.truncf %116 : vector<128x64xf32> to vector<128x64xbf16>
    %c11_115 = arith.constant 11 : index
    %c0_116 = arith.constant 0 : index
    %c0_117 = arith.constant 0 : index
    %118 = vector.load %arg5[%c11_115, %c0_116, %c0_117] : memref<16x64x128xbf16, #tpu.memory_space<vmem>>, vector<1x64x128xbf16>
    %119 = vector.shape_cast %118 : vector<1x64x128xbf16> to vector<64x128xbf16>
    %cst_118 = arith.constant dense<0.000000e+00> : vector<128x128xf32>
    %120 = tpu.matmul %117, %119, %cst_118 {dimension_numbers = #tpu.dot_dimension_numbers<[1], [0], [0], [1], [0, 0, 1, 1], [], []>} : vector<128x64xbf16>, vector<64x128xbf16>, vector<128x128xf32> -> vector<128x128xf32>
    %121 = arith.addf %112, %120 : vector<128x128xf32>
    %c12 = arith.constant 12 : index
    %c0_119 = arith.constant 0 : index
    %c0_120 = arith.constant 0 : index
    %122 = vector.load %arg4[%c12, %c0_119, %c0_120] : memref<16x128x512xbf16, #tpu.memory_space<vmem>>, vector<1x128x512xbf16>
    %123 = vector.shape_cast %122 : vector<1x128x512xbf16> to vector<128x512xbf16>
    %c0_121 = arith.constant 0 : index
    %c0_122 = arith.constant 0 : index
    %124 = vector.load %arg17[%c0_121, %c0_122] : memref<512x64xbf16, #tpu.memory_space<vmem>>, vector<512x64xbf16>
    %cst_123 = arith.constant dense<0.000000e+00> : vector<128x64xf32>
    %125 = tpu.matmul %123, %124, %cst_123 {dimension_numbers = #tpu.dot_dimension_numbers<[1], [0], [0], [1], [0, 0, 1, 1], [], []>} : vector<128x512xbf16>, vector<512x64xbf16>, vector<128x64xf32> -> vector<128x64xf32>
    %126 = arith.truncf %125 : vector<128x64xf32> to vector<128x64xbf16>
    %c12_124 = arith.constant 12 : index
    %c0_125 = arith.constant 0 : index
    %c0_126 = arith.constant 0 : index
    %127 = vector.load %arg5[%c12_124, %c0_125, %c0_126] : memref<16x64x128xbf16, #tpu.memory_space<vmem>>, vector<1x64x128xbf16>
    %128 = vector.shape_cast %127 : vector<1x64x128xbf16> to vector<64x128xbf16>
    %cst_127 = arith.constant dense<0.000000e+00> : vector<128x128xf32>
    %129 = tpu.matmul %126, %128, %cst_127 {dimension_numbers = #tpu.dot_dimension_numbers<[1], [0], [0], [1], [0, 0, 1, 1], [], []>} : vector<128x64xbf16>, vector<64x128xbf16>, vector<128x128xf32> -> vector<128x128xf32>
    %130 = arith.addf %121, %129 : vector<128x128xf32>
    %c13 = arith.constant 13 : index
    %c0_128 = arith.constant 0 : index
    %c0_129 = arith.constant 0 : index
    %131 = vector.load %arg4[%c13, %c0_128, %c0_129] : memref<16x128x512xbf16, #tpu.memory_space<vmem>>, vector<1x128x512xbf16>
    %132 = vector.shape_cast %131 : vector<1x128x512xbf16> to vector<128x512xbf16>
    %c0_130 = arith.constant 0 : index
    %c0_131 = arith.constant 0 : index
    %133 = vector.load %arg17[%c0_130, %c0_131] : memref<512x64xbf16, #tpu.memory_space<vmem>>, vector<512x64xbf16>
    %cst_132 = arith.constant dense<0.000000e+00> : vector<128x64xf32>
    %134 = tpu.matmul %132, %133, %cst_132 {dimension_numbers = #tpu.dot_dimension_numbers<[1], [0], [0], [1], [0, 0, 1, 1], [], []>} : vector<128x512xbf16>, vector<512x64xbf16>, vector<128x64xf32> -> vector<128x64xf32>
    %135 = arith.truncf %134 : vector<128x64xf32> to vector<128x64xbf16>
    %c13_133 = arith.constant 13 : index
    %c0_134 = arith.constant 0 : index
    %c0_135 = arith.constant 0 : index
    %136 = vector.load %arg5[%c13_133, %c0_134, %c0_135] : memref<16x64x128xbf16, #tpu.memory_space<vmem>>, vector<1x64x128xbf16>
    %137 = vector.shape_cast %136 : vector<1x64x128xbf16> to vector<64x128xbf16>
    %cst_136 = arith.constant dense<0.000000e+00> : vector<128x128xf32>
    %138 = tpu.matmul %135, %137, %cst_136 {dimension_numbers = #tpu.dot_dimension_numbers<[1], [0], [0], [1], [0, 0, 1, 1], [], []>} : vector<128x64xbf16>, vector<64x128xbf16>, vector<128x128xf32> -> vector<128x128xf32>
    %139 = arith.addf %130, %138 : vector<128x128xf32>
    %c14 = arith.constant 14 : index
    %c0_137 = arith.constant 0 : index
    %c0_138 = arith.constant 0 : index
    %140 = vector.load %arg4[%c14, %c0_137, %c0_138] : memref<16x128x512xbf16, #tpu.memory_space<vmem>>, vector<1x128x512xbf16>
    %141 = vector.shape_cast %140 : vector<1x128x512xbf16> to vector<128x512xbf16>
    %c0_139 = arith.constant 0 : index
    %c0_140 = arith.constant 0 : index
    %142 = vector.load %arg17[%c0_139, %c0_140] : memref<512x64xbf16, #tpu.memory_space<vmem>>, vector<512x64xbf16>
    %cst_141 = arith.constant dense<0.000000e+00> : vector<128x64xf32>
    %143 = tpu.matmul %141, %142, %cst_141 {dimension_numbers = #tpu.dot_dimension_numbers<[1], [0], [0], [1], [0, 0, 1, 1], [], []>} : vector<128x512xbf16>, vector<512x64xbf16>, vector<128x64xf32> -> vector<128x64xf32>
    %144 = arith.truncf %143 : vector<128x64xf32> to vector<128x64xbf16>
    %c14_142 = arith.constant 14 : index
    %c0_143 = arith.constant 0 : index
    %c0_144 = arith.constant 0 : index
    %145 = vector.load %arg5[%c14_142, %c0_143, %c0_144] : memref<16x64x128xbf16, #tpu.memory_space<vmem>>, vector<1x64x128xbf16>
    %146 = vector.shape_cast %145 : vector<1x64x128xbf16> to vector<64x128xbf16>
    %cst_145 = arith.constant dense<0.000000e+00> : vector<128x128xf32>
    %147 = tpu.matmul %144, %146, %cst_145 {dimension_numbers = #tpu.dot_dimension_numbers<[1], [0], [0], [1], [0, 0, 1, 1], [], []>} : vector<128x64xbf16>, vector<64x128xbf16>, vector<128x128xf32> -> vector<128x128xf32>
    %148 = arith.addf %139, %147 : vector<128x128xf32>
    %c15 = arith.constant 15 : index
    %c0_146 = arith.constant 0 : index
    %c0_147 = arith.constant 0 : index
    %149 = vector.load %arg4[%c15, %c0_146, %c0_147] : memref<16x128x512xbf16, #tpu.memory_space<vmem>>, vector<1x128x512xbf16>
    %150 = vector.shape_cast %149 : vector<1x128x512xbf16> to vector<128x512xbf16>
    %c0_148 = arith.constant 0 : index
    %c0_149 = arith.constant 0 : index
    %151 = vector.load %arg17[%c0_148, %c0_149] : memref<512x64xbf16, #tpu.memory_space<vmem>>, vector<512x64xbf16>
    %cst_150 = arith.constant dense<0.000000e+00> : vector<128x64xf32>
    %152 = tpu.matmul %150, %151, %cst_150 {dimension_numbers = #tpu.dot_dimension_numbers<[1], [0], [0], [1], [0, 0, 1, 1], [], []>} : vector<128x512xbf16>, vector<512x64xbf16>, vector<128x64xf32> -> vector<128x64xf32>
    %153 = arith.truncf %152 : vector<128x64xf32> to vector<128x64xbf16>
    %c15_151 = arith.constant 15 : index
    %c0_152 = arith.constant 0 : index
    %c0_153 = arith.constant 0 : index
    %154 = vector.load %arg5[%c15_151, %c0_152, %c0_153] : memref<16x64x128xbf16, #tpu.memory_space<vmem>>, vector<1x64x128xbf16>
    %155 = vector.shape_cast %154 : vector<1x64x128xbf16> to vector<64x128xbf16>
    %cst_154 = arith.constant dense<0.000000e+00> : vector<128x128xf32>
    %156 = tpu.matmul %153, %155, %cst_154 {dimension_numbers = #tpu.dot_dimension_numbers<[1], [0], [0], [1], [0, 0, 1, 1], [], []>} : vector<128x64xbf16>, vector<64x128xbf16>, vector<128x128xf32> -> vector<128x128xf32>
    %157 = arith.addf %148, %156 : vector<128x128xf32>
    %c0_155 = arith.constant 0 : index
    %c0_156 = arith.constant 0 : index
    %158 = vector.load %arg6[%c0_155, %c0_156] : memref<1x128xf32, #tpu.memory_space<vmem>>, vector<1x128xf32>
    %159 = vector.broadcast %158 : vector<1x128xf32> to vector<128x128xf32>
    %160 = arith.addf %157, %159 : vector<128x128xf32>
    %c0_157 = arith.constant 0 : index
    %c0_158 = arith.constant 0 : index
    %161 = vector.load %arg7[%c0_157, %c0_158] : memref<1x128xf32, #tpu.memory_space<vmem>>, vector<1x128xf32>
    %c0_159 = arith.constant 0 : index
    %c0_160 = arith.constant 0 : index
    %162 = vector.load %arg8[%c0_159, %c0_160] : memref<1x128xf32, #tpu.memory_space<vmem>>, vector<1x128xf32>
    %163 = tpu.iota {dimensions = array<i32: 0>} : vector<128x128xi32>
    %c98_i32 = arith.constant 98 : i32
    %164 = vector.broadcast %c98_i32 : i32 to vector<128x128xi32>
    %165 = arith.cmpi slt, %163, %164 : vector<128x128xi32>
    %166 = arith.extui %165 : vector<128x128xi1> to vector<128x128xi32>
    %167 = arith.sitofp %166 : vector<128x128xi32> to vector<128x128xf32>
    %168 = arith.mulf %160, %167 : vector<128x128xf32>
    %cst_161 = arith.constant dense<0.000000e+00> : vector<128xf32>
    %169 = vector.multi_reduction <add>, %168, %cst_161 [0] : vector<128x128xf32> to vector<128xf32>
    %170 = vector.shape_cast %169 : vector<128xf32> to vector<1x128xf32>
    %cst_162 = arith.constant 0.0102040814 : f32
    %171 = vector.broadcast %cst_162 : f32 to vector<1x128xf32>
    %172 = arith.mulf %170, %171 : vector<1x128xf32>
    %173 = vector.broadcast %172 : vector<1x128xf32> to vector<128x128xf32>
    %174 = arith.subf %160, %173 : vector<128x128xf32>
    %175 = arith.mulf %174, %167 : vector<128x128xf32>
    %176 = arith.mulf %175, %175 : vector<128x128xf32>
    %cst_163 = arith.constant dense<0.000000e+00> : vector<128xf32>
    %177 = vector.multi_reduction <add>, %176, %cst_163 [0] : vector<128x128xf32> to vector<128xf32>
    %178 = vector.shape_cast %177 : vector<128xf32> to vector<1x128xf32>
    %cst_164 = arith.constant 0.0102040814 : f32
    %179 = vector.broadcast %cst_164 : f32 to vector<1x128xf32>
    %180 = arith.mulf %178, %179 : vector<1x128xf32>
    %181 = vector.broadcast %172 : vector<1x128xf32> to vector<128x128xf32>
    %182 = arith.subf %160, %181 : vector<128x128xf32>
    %cst_165 = arith.constant 9.99999974E-6 : f32
    %183 = vector.broadcast %cst_165 : f32 to vector<1x128xf32>
    %184 = arith.addf %180, %183 : vector<1x128xf32>
    %185 = math.rsqrt %184 : vector<1x128xf32>
    %186 = vector.broadcast %185 : vector<1x128xf32> to vector<128x128xf32>
    %187 = arith.mulf %182, %186 : vector<128x128xf32>
    %188 = vector.broadcast %161 : vector<1x128xf32> to vector<128x128xf32>
    %189 = arith.mulf %187, %188 : vector<128x128xf32>
    %190 = vector.broadcast %162 : vector<1x128xf32> to vector<128x128xf32>
    %191 = arith.addf %189, %190 : vector<128x128xf32>
    %cst_166 = arith.constant 0.000000e+00 : f32
    %192 = vector.broadcast %cst_166 : f32 to vector<128x128xf32>
    %193 = arith.cmpf oge, %191, %192 : vector<128x128xf32>
    %cst_167 = arith.constant 2.000000e-01 : f32
    %194 = vector.broadcast %cst_167 : f32 to vector<128x128xf32>
    %195 = arith.mulf %194, %191 : vector<128x128xf32>
    %196 = arith.select %193, %191, %195 : vector<128x128xi1>, vector<128x128xf32>
    %197 = arith.truncf %196 : vector<128x128xf32> to vector<128x128xbf16>
    %c0_168 = arith.constant 0 : index
    %c0_169 = arith.constant 0 : index
    %198 = vector.load %arg18[%c0_168, %c0_169] : memref<128x128xbf16, #tpu.memory_space<vmem>>, vector<128x128xbf16>
    tpu.vector_store %arg18[%c0_168, %c0_169], %197 {strides = array<i32>} : memref<128x128xbf16, #tpu.memory_space<vmem>>, vector<128x128xbf16>,
    %cst_170 = arith.constant 0.000000e+00 : f32
    %199 = vector.broadcast %cst_170 : f32 to vector<32x256xf32>
    %c0_171 = arith.constant 0 : index
    %c0_172 = arith.constant 0 : index
    %c0_173 = arith.constant 0 : index
    %200 = vector.load %arg9[%c0_171, %c0_172, %c0_173] : memref<16x32x128xbf16, #tpu.memory_space<vmem>>, vector<1x32x128xbf16>
    %201 = vector.shape_cast %200 : vector<1x32x128xbf16> to vector<32x128xbf16>
    %c0_174 = arith.constant 0 : index
    %c0_175 = arith.constant 0 : index
    %202 = vector.load %arg18[%c0_174, %c0_175] : memref<128x128xbf16, #tpu.memory_space<vmem>>, vector<128x128xbf16>
    %cst_176 = arith.constant dense<0.000000e+00> : vector<32x128xf32>
    %203 = tpu.matmul %201, %202, %cst_176 {dimension_numbers = #tpu.dot_dimension_numbers<[1], [0], [0], [1], [0, 0, 1, 1], [], []>} : vector<32x128xbf16>, vector<128x128xbf16>, vector<32x128xf32> -> vector<32x128xf32>
    %204 = arith.truncf %203 : vector<32x128xf32> to vector<32x128xbf16>
    %c0_177 = arith.constant 0 : index
    %c0_178 = arith.constant 0 : index
    %c0_179 = arith.constant 0 : index
    %205 = vector.load %arg10[%c0_177, %c0_178, %c0_179] : memref<16x128x256xbf16, #tpu.memory_space<vmem>>, vector<1x128x256xbf16>
    %206 = vector.shape_cast %205 : vector<1x128x256xbf16> to vector<128x256xbf16>
    %cst_180 = arith.constant dense<0.000000e+00> : vector<32x256xf32>
    %207 = tpu.matmul %204, %206, %cst_180 {dimension_numbers = #tpu.dot_dimension_numbers<[1], [0], [0], [1], [0, 0, 1, 1], [], []>} : vector<32x128xbf16>, vector<128x256xbf16>, vector<32x256xf32> -> vector<32x256xf32>
    %208 = arith.addf %199, %207 : vector<32x256xf32>
    %c1_181 = arith.constant 1 : index
    %c0_182 = arith.constant 0 : index
    %c0_183 = arith.constant 0 : index
    %209 = vector.load %arg9[%c1_181, %c0_182, %c0_183] : memref<16x32x128xbf16, #tpu.memory_space<vmem>>, vector<1x32x128xbf16>
    %210 = vector.shape_cast %209 : vector<1x32x128xbf16> to vector<32x128xbf16>
    %c0_184 = arith.constant 0 : index
    %c0_185 = arith.constant 0 : index
    %211 = vector.load %arg18[%c0_184, %c0_185] : memref<128x128xbf16, #tpu.memory_space<vmem>>, vector<128x128xbf16>
    %cst_186 = arith.constant dense<0.000000e+00> : vector<32x128xf32>
    %212 = tpu.matmul %210, %211, %cst_186 {dimension_numbers = #tpu.dot_dimension_numbers<[1], [0], [0], [1], [0, 0, 1, 1], [], []>} : vector<32x128xbf16>, vector<128x128xbf16>, vector<32x128xf32> -> vector<32x128xf32>
    %213 = arith.truncf %212 : vector<32x128xf32> to vector<32x128xbf16>
    %c1_187 = arith.constant 1 : index
    %c0_188 = arith.constant 0 : index
    %c0_189 = arith.constant 0 : index
    %214 = vector.load %arg10[%c1_187, %c0_188, %c0_189] : memref<16x128x256xbf16, #tpu.memory_space<vmem>>, vector<1x128x256xbf16>
    %215 = vector.shape_cast %214 : vector<1x128x256xbf16> to vector<128x256xbf16>
    %cst_190 = arith.constant dense<0.000000e+00> : vector<32x256xf32>
    %216 = tpu.matmul %213, %215, %cst_190 {dimension_numbers = #tpu.dot_dimension_numbers<[1], [0], [0], [1], [0, 0, 1, 1], [], []>} : vector<32x128xbf16>, vector<128x256xbf16>, vector<32x256xf32> -> vector<32x256xf32>
    %217 = arith.addf %208, %216 : vector<32x256xf32>
    %c2_191 = arith.constant 2 : index
    %c0_192 = arith.constant 0 : index
    %c0_193 = arith.constant 0 : index
    %218 = vector.load %arg9[%c2_191, %c0_192, %c0_193] : memref<16x32x128xbf16, #tpu.memory_space<vmem>>, vector<1x32x128xbf16>
    %219 = vector.shape_cast %218 : vector<1x32x128xbf16> to vector<32x128xbf16>
    %c0_194 = arith.constant 0 : index
    %c0_195 = arith.constant 0 : index
    %220 = vector.load %arg18[%c0_194, %c0_195] : memref<128x128xbf16, #tpu.memory_space<vmem>>, vector<128x128xbf16>
    %cst_196 = arith.constant dense<0.000000e+00> : vector<32x128xf32>
    %221 = tpu.matmul %219, %220, %cst_196 {dimension_numbers = #tpu.dot_dimension_numbers<[1], [0], [0], [1], [0, 0, 1, 1], [], []>} : vector<32x128xbf16>, vector<128x128xbf16>, vector<32x128xf32> -> vector<32x128xf32>
    %222 = arith.truncf %221 : vector<32x128xf32> to vector<32x128xbf16>
    %c2_197 = arith.constant 2 : index
    %c0_198 = arith.constant 0 : index
    %c0_199 = arith.constant 0 : index
    %223 = vector.load %arg10[%c2_197, %c0_198, %c0_199] : memref<16x128x256xbf16, #tpu.memory_space<vmem>>, vector<1x128x256xbf16>
    %224 = vector.shape_cast %223 : vector<1x128x256xbf16> to vector<128x256xbf16>
    %cst_200 = arith.constant dense<0.000000e+00> : vector<32x256xf32>
    %225 = tpu.matmul %222, %224, %cst_200 {dimension_numbers = #tpu.dot_dimension_numbers<[1], [0], [0], [1], [0, 0, 1, 1], [], []>} : vector<32x128xbf16>, vector<128x256xbf16>, vector<32x256xf32> -> vector<32x256xf32>
    %226 = arith.addf %217, %225 : vector<32x256xf32>
    %c3_201 = arith.constant 3 : index
    %c0_202 = arith.constant 0 : index
    %c0_203 = arith.constant 0 : index
    %227 = vector.load %arg9[%c3_201, %c0_202, %c0_203] : memref<16x32x128xbf16, #tpu.memory_space<vmem>>, vector<1x32x128xbf16>
    %228 = vector.shape_cast %227 : vector<1x32x128xbf16> to vector<32x128xbf16>
    %c0_204 = arith.constant 0 : index
    %c0_205 = arith.constant 0 : index
    %229 = vector.load %arg18[%c0_204, %c0_205] : memref<128x128xbf16, #tpu.memory_space<vmem>>, vector<128x128xbf16>
    %cst_206 = arith.constant dense<0.000000e+00> : vector<32x128xf32>
    %230 = tpu.matmul %228, %229, %cst_206 {dimension_numbers = #tpu.dot_dimension_numbers<[1], [0], [0], [1], [0, 0, 1, 1], [], []>} : vector<32x128xbf16>, vector<128x128xbf16>, vector<32x128xf32> -> vector<32x128xf32>
    %231 = arith.truncf %230 : vector<32x128xf32> to vector<32x128xbf16>
    %c3_207 = arith.constant 3 : index
    %c0_208 = arith.constant 0 : index
    %c0_209 = arith.constant 0 : index
    %232 = vector.load %arg10[%c3_207, %c0_208, %c0_209] : memref<16x128x256xbf16, #tpu.memory_space<vmem>>, vector<1x128x256xbf16>
    %233 = vector.shape_cast %232 : vector<1x128x256xbf16> to vector<128x256xbf16>
    %cst_210 = arith.constant dense<0.000000e+00> : vector<32x256xf32>
    %234 = tpu.matmul %231, %233, %cst_210 {dimension_numbers = #tpu.dot_dimension_numbers<[1], [0], [0], [1], [0, 0, 1, 1], [], []>} : vector<32x128xbf16>, vector<128x256xbf16>, vector<32x256xf32> -> vector<32x256xf32>
    %235 = arith.addf %226, %234 : vector<32x256xf32>
    %c4_211 = arith.constant 4 : index
    %c0_212 = arith.constant 0 : index
    %c0_213 = arith.constant 0 : index
    %236 = vector.load %arg9[%c4_211, %c0_212, %c0_213] : memref<16x32x128xbf16, #tpu.memory_space<vmem>>, vector<1x32x128xbf16>
    %237 = vector.shape_cast %236 : vector<1x32x128xbf16> to vector<32x128xbf16>
    %c0_214 = arith.constant 0 : index
    %c0_215 = arith.constant 0 : index
    %238 = vector.load %arg18[%c0_214, %c0_215] : memref<128x128xbf16, #tpu.memory_space<vmem>>, vector<128x128xbf16>
    %cst_216 = arith.constant dense<0.000000e+00> : vector<32x128xf32>
    %239 = tpu.matmul %237, %238, %cst_216 {dimension_numbers = #tpu.dot_dimension_numbers<[1], [0], [0], [1], [0, 0, 1, 1], [], []>} : vector<32x128xbf16>, vector<128x128xbf16>, vector<32x128xf32> -> vector<32x128xf32>
    %240 = arith.truncf %239 : vector<32x128xf32> to vector<32x128xbf16>
    %c4_217 = arith.constant 4 : index
    %c0_218 = arith.constant 0 : index
    %c0_219 = arith.constant 0 : index
    %241 = vector.load %arg10[%c4_217, %c0_218, %c0_219] : memref<16x128x256xbf16, #tpu.memory_space<vmem>>, vector<1x128x256xbf16>
    %242 = vector.shape_cast %241 : vector<1x128x256xbf16> to vector<128x256xbf16>
    %cst_220 = arith.constant dense<0.000000e+00> : vector<32x256xf32>
    %243 = tpu.matmul %240, %242, %cst_220 {dimension_numbers = #tpu.dot_dimension_numbers<[1], [0], [0], [1], [0, 0, 1, 1], [], []>} : vector<32x128xbf16>, vector<128x256xbf16>, vector<32x256xf32> -> vector<32x256xf32>
    %244 = arith.addf %235, %243 : vector<32x256xf32>
    %c5_221 = arith.constant 5 : index
    %c0_222 = arith.constant 0 : index
    %c0_223 = arith.constant 0 : index
    %245 = vector.load %arg9[%c5_221, %c0_222, %c0_223] : memref<16x32x128xbf16, #tpu.memory_space<vmem>>, vector<1x32x128xbf16>
    %246 = vector.shape_cast %245 : vector<1x32x128xbf16> to vector<32x128xbf16>
    %c0_224 = arith.constant 0 : index
    %c0_225 = arith.constant 0 : index
    %247 = vector.load %arg18[%c0_224, %c0_225] : memref<128x128xbf16, #tpu.memory_space<vmem>>, vector<128x128xbf16>
    %cst_226 = arith.constant dense<0.000000e+00> : vector<32x128xf32>
    %248 = tpu.matmul %246, %247, %cst_226 {dimension_numbers = #tpu.dot_dimension_numbers<[1], [0], [0], [1], [0, 0, 1, 1], [], []>} : vector<32x128xbf16>, vector<128x128xbf16>, vector<32x128xf32> -> vector<32x128xf32>
    %249 = arith.truncf %248 : vector<32x128xf32> to vector<32x128xbf16>
    %c5_227 = arith.constant 5 : index
    %c0_228 = arith.constant 0 : index
    %c0_229 = arith.constant 0 : index
    %250 = vector.load %arg10[%c5_227, %c0_228, %c0_229] : memref<16x128x256xbf16, #tpu.memory_space<vmem>>, vector<1x128x256xbf16>
    %251 = vector.shape_cast %250 : vector<1x128x256xbf16> to vector<128x256xbf16>
    %cst_230 = arith.constant dense<0.000000e+00> : vector<32x256xf32>
    %252 = tpu.matmul %249, %251, %cst_230 {dimension_numbers = #tpu.dot_dimension_numbers<[1], [0], [0], [1], [0, 0, 1, 1], [], []>} : vector<32x128xbf16>, vector<128x256xbf16>, vector<32x256xf32> -> vector<32x256xf32>
    %253 = arith.addf %244, %252 : vector<32x256xf32>
    %c6_231 = arith.constant 6 : index
    %c0_232 = arith.constant 0 : index
    %c0_233 = arith.constant 0 : index
    %254 = vector.load %arg9[%c6_231, %c0_232, %c0_233] : memref<16x32x128xbf16, #tpu.memory_space<vmem>>, vector<1x32x128xbf16>
    %255 = vector.shape_cast %254 : vector<1x32x128xbf16> to vector<32x128xbf16>
    %c0_234 = arith.constant 0 : index
    %c0_235 = arith.constant 0 : index
    %256 = vector.load %arg18[%c0_234, %c0_235] : memref<128x128xbf16, #tpu.memory_space<vmem>>, vector<128x128xbf16>
    %cst_236 = arith.constant dense<0.000000e+00> : vector<32x128xf32>
    %257 = tpu.matmul %255, %256, %cst_236 {dimension_numbers = #tpu.dot_dimension_numbers<[1], [0], [0], [1], [0, 0, 1, 1], [], []>} : vector<32x128xbf16>, vector<128x128xbf16>, vector<32x128xf32> -> vector<32x128xf32>
    %258 = arith.truncf %257 : vector<32x128xf32> to vector<32x128xbf16>
    %c6_237 = arith.constant 6 : index
    %c0_238 = arith.constant 0 : index
    %c0_239 = arith.constant 0 : index
    %259 = vector.load %arg10[%c6_237, %c0_238, %c0_239] : memref<16x128x256xbf16, #tpu.memory_space<vmem>>, vector<1x128x256xbf16>
    %260 = vector.shape_cast %259 : vector<1x128x256xbf16> to vector<128x256xbf16>
    %cst_240 = arith.constant dense<0.000000e+00> : vector<32x256xf32>
    %261 = tpu.matmul %258, %260, %cst_240 {dimension_numbers = #tpu.dot_dimension_numbers<[1], [0], [0], [1], [0, 0, 1, 1], [], []>} : vector<32x128xbf16>, vector<128x256xbf16>, vector<32x256xf32> -> vector<32x256xf32>
    %262 = arith.addf %253, %261 : vector<32x256xf32>
    %c7_241 = arith.constant 7 : index
    %c0_242 = arith.constant 0 : index
    %c0_243 = arith.constant 0 : index
    %263 = vector.load %arg9[%c7_241, %c0_242, %c0_243] : memref<16x32x128xbf16, #tpu.memory_space<vmem>>, vector<1x32x128xbf16>
    %264 = vector.shape_cast %263 : vector<1x32x128xbf16> to vector<32x128xbf16>
    %c0_244 = arith.constant 0 : index
    %c0_245 = arith.constant 0 : index
    %265 = vector.load %arg18[%c0_244, %c0_245] : memref<128x128xbf16, #tpu.memory_space<vmem>>, vector<128x128xbf16>
    %cst_246 = arith.constant dense<0.000000e+00> : vector<32x128xf32>
    %266 = tpu.matmul %264, %265, %cst_246 {dimension_numbers = #tpu.dot_dimension_numbers<[1], [0], [0], [1], [0, 0, 1, 1], [], []>} : vector<32x128xbf16>, vector<128x128xbf16>, vector<32x128xf32> -> vector<32x128xf32>
    %267 = arith.truncf %266 : vector<32x128xf32> to vector<32x128xbf16>
    %c7_247 = arith.constant 7 : index
    %c0_248 = arith.constant 0 : index
    %c0_249 = arith.constant 0 : index
    %268 = vector.load %arg10[%c7_247, %c0_248, %c0_249] : memref<16x128x256xbf16, #tpu.memory_space<vmem>>, vector<1x128x256xbf16>
    %269 = vector.shape_cast %268 : vector<1x128x256xbf16> to vector<128x256xbf16>
    %cst_250 = arith.constant dense<0.000000e+00> : vector<32x256xf32>
    %270 = tpu.matmul %267, %269, %cst_250 {dimension_numbers = #tpu.dot_dimension_numbers<[1], [0], [0], [1], [0, 0, 1, 1], [], []>} : vector<32x128xbf16>, vector<128x256xbf16>, vector<32x256xf32> -> vector<32x256xf32>
    %271 = arith.addf %262, %270 : vector<32x256xf32>
    %c8_251 = arith.constant 8 : index
    %c0_252 = arith.constant 0 : index
    %c0_253 = arith.constant 0 : index
    %272 = vector.load %arg9[%c8_251, %c0_252, %c0_253] : memref<16x32x128xbf16, #tpu.memory_space<vmem>>, vector<1x32x128xbf16>
    %273 = vector.shape_cast %272 : vector<1x32x128xbf16> to vector<32x128xbf16>
    %c0_254 = arith.constant 0 : index
    %c0_255 = arith.constant 0 : index
    %274 = vector.load %arg18[%c0_254, %c0_255] : memref<128x128xbf16, #tpu.memory_space<vmem>>, vector<128x128xbf16>
    %cst_256 = arith.constant dense<0.000000e+00> : vector<32x128xf32>
    %275 = tpu.matmul %273, %274, %cst_256 {dimension_numbers = #tpu.dot_dimension_numbers<[1], [0], [0], [1], [0, 0, 1, 1], [], []>} : vector<32x128xbf16>, vector<128x128xbf16>, vector<32x128xf32> -> vector<32x128xf32>
    %276 = arith.truncf %275 : vector<32x128xf32> to vector<32x128xbf16>
    %c8_257 = arith.constant 8 : index
    %c0_258 = arith.constant 0 : index
    %c0_259 = arith.constant 0 : index
    %277 = vector.load %arg10[%c8_257, %c0_258, %c0_259] : memref<16x128x256xbf16, #tpu.memory_space<vmem>>, vector<1x128x256xbf16>
    %278 = vector.shape_cast %277 : vector<1x128x256xbf16> to vector<128x256xbf16>
    %cst_260 = arith.constant dense<0.000000e+00> : vector<32x256xf32>
    %279 = tpu.matmul %276, %278, %cst_260 {dimension_numbers = #tpu.dot_dimension_numbers<[1], [0], [0], [1], [0, 0, 1, 1], [], []>} : vector<32x128xbf16>, vector<128x256xbf16>, vector<32x256xf32> -> vector<32x256xf32>
    %280 = arith.addf %271, %279 : vector<32x256xf32>
    %c9_261 = arith.constant 9 : index
    %c0_262 = arith.constant 0 : index
    %c0_263 = arith.constant 0 : index
    %281 = vector.load %arg9[%c9_261, %c0_262, %c0_263] : memref<16x32x128xbf16, #tpu.memory_space<vmem>>, vector<1x32x128xbf16>
    %282 = vector.shape_cast %281 : vector<1x32x128xbf16> to vector<32x128xbf16>
    %c0_264 = arith.constant 0 : index
    %c0_265 = arith.constant 0 : index
    %283 = vector.load %arg18[%c0_264, %c0_265] : memref<128x128xbf16, #tpu.memory_space<vmem>>, vector<128x128xbf16>
    %cst_266 = arith.constant dense<0.000000e+00> : vector<32x128xf32>
    %284 = tpu.matmul %282, %283, %cst_266 {dimension_numbers = #tpu.dot_dimension_numbers<[1], [0], [0], [1], [0, 0, 1, 1], [], []>} : vector<32x128xbf16>, vector<128x128xbf16>, vector<32x128xf32> -> vector<32x128xf32>
    %285 = arith.truncf %284 : vector<32x128xf32> to vector<32x128xbf16>
    %c9_267 = arith.constant 9 : index
    %c0_268 = arith.constant 0 : index
    %c0_269 = arith.constant 0 : index
    %286 = vector.load %arg10[%c9_267, %c0_268, %c0_269] : memref<16x128x256xbf16, #tpu.memory_space<vmem>>, vector<1x128x256xbf16>
    %287 = vector.shape_cast %286 : vector<1x128x256xbf16> to vector<128x256xbf16>
    %cst_270 = arith.constant dense<0.000000e+00> : vector<32x256xf32>
    %288 = tpu.matmul %285, %287, %cst_270 {dimension_numbers = #tpu.dot_dimension_numbers<[1], [0], [0], [1], [0, 0, 1, 1], [], []>} : vector<32x128xbf16>, vector<128x256xbf16>, vector<32x256xf32> -> vector<32x256xf32>
    %289 = arith.addf %280, %288 : vector<32x256xf32>
    %c10_271 = arith.constant 10 : index
    %c0_272 = arith.constant 0 : index
    %c0_273 = arith.constant 0 : index
    %290 = vector.load %arg9[%c10_271, %c0_272, %c0_273] : memref<16x32x128xbf16, #tpu.memory_space<vmem>>, vector<1x32x128xbf16>
    %291 = vector.shape_cast %290 : vector<1x32x128xbf16> to vector<32x128xbf16>
    %c0_274 = arith.constant 0 : index
    %c0_275 = arith.constant 0 : index
    %292 = vector.load %arg18[%c0_274, %c0_275] : memref<128x128xbf16, #tpu.memory_space<vmem>>, vector<128x128xbf16>
    %cst_276 = arith.constant dense<0.000000e+00> : vector<32x128xf32>
    %293 = tpu.matmul %291, %292, %cst_276 {dimension_numbers = #tpu.dot_dimension_numbers<[1], [0], [0], [1], [0, 0, 1, 1], [], []>} : vector<32x128xbf16>, vector<128x128xbf16>, vector<32x128xf32> -> vector<32x128xf32>
    %294 = arith.truncf %293 : vector<32x128xf32> to vector<32x128xbf16>
    %c10_277 = arith.constant 10 : index
    %c0_278 = arith.constant 0 : index
    %c0_279 = arith.constant 0 : index
    %295 = vector.load %arg10[%c10_277, %c0_278, %c0_279] : memref<16x128x256xbf16, #tpu.memory_space<vmem>>, vector<1x128x256xbf16>
    %296 = vector.shape_cast %295 : vector<1x128x256xbf16> to vector<128x256xbf16>
    %cst_280 = arith.constant dense<0.000000e+00> : vector<32x256xf32>
    %297 = tpu.matmul %294, %296, %cst_280 {dimension_numbers = #tpu.dot_dimension_numbers<[1], [0], [0], [1], [0, 0, 1, 1], [], []>} : vector<32x128xbf16>, vector<128x256xbf16>, vector<32x256xf32> -> vector<32x256xf32>
    %298 = arith.addf %289, %297 : vector<32x256xf32>
    %c11_281 = arith.constant 11 : index
    %c0_282 = arith.constant 0 : index
    %c0_283 = arith.constant 0 : index
    %299 = vector.load %arg9[%c11_281, %c0_282, %c0_283] : memref<16x32x128xbf16, #tpu.memory_space<vmem>>, vector<1x32x128xbf16>
    %300 = vector.shape_cast %299 : vector<1x32x128xbf16> to vector<32x128xbf16>
    %c0_284 = arith.constant 0 : index
    %c0_285 = arith.constant 0 : index
    %301 = vector.load %arg18[%c0_284, %c0_285] : memref<128x128xbf16, #tpu.memory_space<vmem>>, vector<128x128xbf16>
    %cst_286 = arith.constant dense<0.000000e+00> : vector<32x128xf32>
    %302 = tpu.matmul %300, %301, %cst_286 {dimension_numbers = #tpu.dot_dimension_numbers<[1], [0], [0], [1], [0, 0, 1, 1], [], []>} : vector<32x128xbf16>, vector<128x128xbf16>, vector<32x128xf32> -> vector<32x128xf32>
    %303 = arith.truncf %302 : vector<32x128xf32> to vector<32x128xbf16>
    %c11_287 = arith.constant 11 : index
    %c0_288 = arith.constant 0 : index
    %c0_289 = arith.constant 0 : index
    %304 = vector.load %arg10[%c11_287, %c0_288, %c0_289] : memref<16x128x256xbf16, #tpu.memory_space<vmem>>, vector<1x128x256xbf16>
    %305 = vector.shape_cast %304 : vector<1x128x256xbf16> to vector<128x256xbf16>
    %cst_290 = arith.constant dense<0.000000e+00> : vector<32x256xf32>
    %306 = tpu.matmul %303, %305, %cst_290 {dimension_numbers = #tpu.dot_dimension_numbers<[1], [0], [0], [1], [0, 0, 1, 1], [], []>} : vector<32x128xbf16>, vector<128x256xbf16>, vector<32x256xf32> -> vector<32x256xf32>
    %307 = arith.addf %298, %306 : vector<32x256xf32>
    %c12_291 = arith.constant 12 : index
    %c0_292 = arith.constant 0 : index
    %c0_293 = arith.constant 0 : index
    %308 = vector.load %arg9[%c12_291, %c0_292, %c0_293] : memref<16x32x128xbf16, #tpu.memory_space<vmem>>, vector<1x32x128xbf16>
    %309 = vector.shape_cast %308 : vector<1x32x128xbf16> to vector<32x128xbf16>
    %c0_294 = arith.constant 0 : index
    %c0_295 = arith.constant 0 : index
    %310 = vector.load %arg18[%c0_294, %c0_295] : memref<128x128xbf16, #tpu.memory_space<vmem>>, vector<128x128xbf16>
    %cst_296 = arith.constant dense<0.000000e+00> : vector<32x128xf32>
    %311 = tpu.matmul %309, %310, %cst_296 {dimension_numbers = #tpu.dot_dimension_numbers<[1], [0], [0], [1], [0, 0, 1, 1], [], []>} : vector<32x128xbf16>, vector<128x128xbf16>, vector<32x128xf32> -> vector<32x128xf32>
    %312 = arith.truncf %311 : vector<32x128xf32> to vector<32x128xbf16>
    %c12_297 = arith.constant 12 : index
    %c0_298 = arith.constant 0 : index
    %c0_299 = arith.constant 0 : index
    %313 = vector.load %arg10[%c12_297, %c0_298, %c0_299] : memref<16x128x256xbf16, #tpu.memory_space<vmem>>, vector<1x128x256xbf16>
    %314 = vector.shape_cast %313 : vector<1x128x256xbf16> to vector<128x256xbf16>
    %cst_300 = arith.constant dense<0.000000e+00> : vector<32x256xf32>
    %315 = tpu.matmul %312, %314, %cst_300 {dimension_numbers = #tpu.dot_dimension_numbers<[1], [0], [0], [1], [0, 0, 1, 1], [], []>} : vector<32x128xbf16>, vector<128x256xbf16>, vector<32x256xf32> -> vector<32x256xf32>
    %316 = arith.addf %307, %315 : vector<32x256xf32>
    %c13_301 = arith.constant 13 : index
    %c0_302 = arith.constant 0 : index
    %c0_303 = arith.constant 0 : index
    %317 = vector.load %arg9[%c13_301, %c0_302, %c0_303] : memref<16x32x128xbf16, #tpu.memory_space<vmem>>, vector<1x32x128xbf16>
    %318 = vector.shape_cast %317 : vector<1x32x128xbf16> to vector<32x128xbf16>
    %c0_304 = arith.constant 0 : index
    %c0_305 = arith.constant 0 : index
    %319 = vector.load %arg18[%c0_304, %c0_305] : memref<128x128xbf16, #tpu.memory_space<vmem>>, vector<128x128xbf16>
    %cst_306 = arith.constant dense<0.000000e+00> : vector<32x128xf32>
    %320 = tpu.matmul %318, %319, %cst_306 {dimension_numbers = #tpu.dot_dimension_numbers<[1], [0], [0], [1], [0, 0, 1, 1], [], []>} : vector<32x128xbf16>, vector<128x128xbf16>, vector<32x128xf32> -> vector<32x128xf32>
    %321 = arith.truncf %320 : vector<32x128xf32> to vector<32x128xbf16>
    %c13_307 = arith.constant 13 : index
    %c0_308 = arith.constant 0 : index
    %c0_309 = arith.constant 0 : index
    %322 = vector.load %arg10[%c13_307, %c0_308, %c0_309] : memref<16x128x256xbf16, #tpu.memory_space<vmem>>, vector<1x128x256xbf16>
    %323 = vector.shape_cast %322 : vector<1x128x256xbf16> to vector<128x256xbf16>
    %cst_310 = arith.constant dense<0.000000e+00> : vector<32x256xf32>
    %324 = tpu.matmul %321, %323, %cst_310 {dimension_numbers = #tpu.dot_dimension_numbers<[1], [0], [0], [1], [0, 0, 1, 1], [], []>} : vector<32x128xbf16>, vector<128x256xbf16>, vector<32x256xf32> -> vector<32x256xf32>
    %325 = arith.addf %316, %324 : vector<32x256xf32>
    %c14_311 = arith.constant 14 : index
    %c0_312 = arith.constant 0 : index
    %c0_313 = arith.constant 0 : index
    %326 = vector.load %arg9[%c14_311, %c0_312, %c0_313] : memref<16x32x128xbf16, #tpu.memory_space<vmem>>, vector<1x32x128xbf16>
    %327 = vector.shape_cast %326 : vector<1x32x128xbf16> to vector<32x128xbf16>
    %c0_314 = arith.constant 0 : index
    %c0_315 = arith.constant 0 : index
    %328 = vector.load %arg18[%c0_314, %c0_315] : memref<128x128xbf16, #tpu.memory_space<vmem>>, vector<128x128xbf16>
    %cst_316 = arith.constant dense<0.000000e+00> : vector<32x128xf32>
    %329 = tpu.matmul %327, %328, %cst_316 {dimension_numbers = #tpu.dot_dimension_numbers<[1], [0], [0], [1], [0, 0, 1, 1], [], []>} : vector<32x128xbf16>, vector<128x128xbf16>, vector<32x128xf32> -> vector<32x128xf32>
    %330 = arith.truncf %329 : vector<32x128xf32> to vector<32x128xbf16>
    %c14_317 = arith.constant 14 : index
    %c0_318 = arith.constant 0 : index
    %c0_319 = arith.constant 0 : index
    %331 = vector.load %arg10[%c14_317, %c0_318, %c0_319] : memref<16x128x256xbf16, #tpu.memory_space<vmem>>, vector<1x128x256xbf16>
    %332 = vector.shape_cast %331 : vector<1x128x256xbf16> to vector<128x256xbf16>
    %cst_320 = arith.constant dense<0.000000e+00> : vector<32x256xf32>
    %333 = tpu.matmul %330, %332, %cst_320 {dimension_numbers = #tpu.dot_dimension_numbers<[1], [0], [0], [1], [0, 0, 1, 1], [], []>} : vector<32x128xbf16>, vector<128x256xbf16>, vector<32x256xf32> -> vector<32x256xf32>
    %334 = arith.addf %325, %333 : vector<32x256xf32>
    %c15_321 = arith.constant 15 : index
    %c0_322 = arith.constant 0 : index
    %c0_323 = arith.constant 0 : index
    %335 = vector.load %arg9[%c15_321, %c0_322, %c0_323] : memref<16x32x128xbf16, #tpu.memory_space<vmem>>, vector<1x32x128xbf16>
    %336 = vector.shape_cast %335 : vector<1x32x128xbf16> to vector<32x128xbf16>
    %c0_324 = arith.constant 0 : index
    %c0_325 = arith.constant 0 : index
    %337 = vector.load %arg18[%c0_324, %c0_325] : memref<128x128xbf16, #tpu.memory_space<vmem>>, vector<128x128xbf16>
    %cst_326 = arith.constant dense<0.000000e+00> : vector<32x128xf32>
    %338 = tpu.matmul %336, %337, %cst_326 {dimension_numbers = #tpu.dot_dimension_numbers<[1], [0], [0], [1], [0, 0, 1, 1], [], []>} : vector<32x128xbf16>, vector<128x128xbf16>, vector<32x128xf32> -> vector<32x128xf32>
    %339 = arith.truncf %338 : vector<32x128xf32> to vector<32x128xbf16>
    %c15_327 = arith.constant 15 : index
    %c0_328 = arith.constant 0 : index
    %c0_329 = arith.constant 0 : index
    %340 = vector.load %arg10[%c15_327, %c0_328, %c0_329] : memref<16x128x256xbf16, #tpu.memory_space<vmem>>, vector<1x128x256xbf16>
    %341 = vector.shape_cast %340 : vector<1x128x256xbf16> to vector<128x256xbf16>
    %cst_330 = arith.constant dense<0.000000e+00> : vector<32x256xf32>
    %342 = tpu.matmul %339, %341, %cst_330 {dimension_numbers = #tpu.dot_dimension_numbers<[1], [0], [0], [1], [0, 0, 1, 1], [], []>} : vector<32x128xbf16>, vector<128x256xbf16>, vector<32x256xf32> -> vector<32x256xf32>
    %343 = arith.addf %334, %342 : vector<32x256xf32>
    %c0_331 = arith.constant 0 : index
    %c0_332 = arith.constant 0 : index
    %344 = vector.load %arg11[%c0_331, %c0_332] : memref<1x256xf32, #tpu.memory_space<vmem>>, vector<1x256xf32>
    %345 = vector.broadcast %344 : vector<1x256xf32> to vector<32x256xf32>
    %346 = arith.addf %343, %345 : vector<32x256xf32>
    %c0_333 = arith.constant 0 : index
    %c0_334 = arith.constant 0 : index
    %347 = vector.load %arg12[%c0_333, %c0_334] : memref<1x256xf32, #tpu.memory_space<vmem>>, vector<1x256xf32>
    %c0_335 = arith.constant 0 : index
    %c0_336 = arith.constant 0 : index
    %348 = vector.load %arg13[%c0_335, %c0_336] : memref<1x256xf32, #tpu.memory_space<vmem>>, vector<1x256xf32>
    %349 = tpu.iota {dimensions = array<i32: 0>} : vector<32x256xi32>
    %c18_i32 = arith.constant 18 : i32
    %350 = vector.broadcast %c18_i32 : i32 to vector<32x256xi32>
    %351 = arith.cmpi slt, %349, %350 : vector<32x256xi32>
    %352 = arith.extui %351 : vector<32x256xi1> to vector<32x256xi32>
    %353 = arith.sitofp %352 : vector<32x256xi32> to vector<32x256xf32>
    %354 = arith.mulf %346, %353 : vector<32x256xf32>
    %cst_337 = arith.constant dense<0.000000e+00> : vector<256xf32>
    %355 = vector.multi_reduction <add>, %354, %cst_337 [0] : vector<32x256xf32> to vector<256xf32>
    %356 = vector.shape_cast %355 : vector<256xf32> to vector<1x256xf32>
    %cst_338 = arith.constant 0.055555556 : f32
    %357 = vector.broadcast %cst_338 : f32 to vector<1x256xf32>
    %358 = arith.mulf %356, %357 : vector<1x256xf32>
    %359 = vector.broadcast %358 : vector<1x256xf32> to vector<32x256xf32>
    %360 = arith.subf %346, %359 : vector<32x256xf32>
    %361 = arith.mulf %360, %353 : vector<32x256xf32>
    %362 = arith.mulf %361, %361 : vector<32x256xf32>
    %cst_339 = arith.constant dense<0.000000e+00> : vector<256xf32>
    %363 = vector.multi_reduction <add>, %362, %cst_339 [0] : vector<32x256xf32> to vector<256xf32>
    %364 = vector.shape_cast %363 : vector<256xf32> to vector<1x256xf32>
    %cst_340 = arith.constant 0.055555556 : f32
    %365 = vector.broadcast %cst_340 : f32 to vector<1x256xf32>
    %366 = arith.mulf %364, %365 : vector<1x256xf32>
    %367 = vector.broadcast %358 : vector<1x256xf32> to vector<32x256xf32>
    %368 = arith.subf %346, %367 : vector<32x256xf32>
    %cst_341 = arith.constant 9.99999974E-6 : f32
    %369 = vector.broadcast %cst_341 : f32 to vector<1x256xf32>
    %370 = arith.addf %366, %369 : vector<1x256xf32>
    %371 = math.rsqrt %370 : vector<1x256xf32>
    %372 = vector.broadcast %371 : vector<1x256xf32> to vector<32x256xf32>
    %373 = arith.mulf %368, %372 : vector<32x256xf32>
    %374 = vector.broadcast %347 : vector<1x256xf32> to vector<32x256xf32>
    %375 = arith.mulf %373, %374 : vector<32x256xf32>
    %376 = vector.broadcast %348 : vector<1x256xf32> to vector<32x256xf32>
    %377 = arith.addf %375, %376 : vector<32x256xf32>
    %cst_342 = arith.constant 0.000000e+00 : f32
    %378 = vector.broadcast %cst_342 : f32 to vector<32x256xf32>
    %379 = arith.cmpf oge, %377, %378 : vector<32x256xf32>
    %cst_343 = arith.constant 2.000000e-01 : f32
    %380 = vector.broadcast %cst_343 : f32 to vector<32x256xf32>
    %381 = arith.mulf %380, %377 : vector<32x256xf32>
    %382 = arith.select %379, %377, %381 : vector<32x256xi1>, vector<32x256xf32>
    %c0_344 = arith.constant 0 : index
    %c0_345 = arith.constant 0 : index
    %383 = vector.load %arg14[%c0_344, %c0_345] : memref<256x128xf32, #tpu.memory_space<vmem>>, vector<256x128xf32>
    %cst_346 = arith.constant dense<0.000000e+00> : vector<32x128xf32>
    %384 = tpu.matmul %382, %383, %cst_346 {dimension_numbers = #tpu.dot_dimension_numbers<[1], [0], [0], [1], [0, 0, 1, 1], [], []>} : vector<32x256xf32>, vector<256x128xf32>, vector<32x128xf32> -> vector<32x128xf32>
    %385 = tpu.iota {dimensions = array<i32: 0>} : vector<32x128xi32>
    %386 = tpu.iota {dimensions = array<i32: 1>} : vector<32x128xi32>
    %cst_347 = arith.constant 0.000000e+00 : f32
    %387 = vector.broadcast %cst_347 : f32 to vector<32x128xf32>
    %388 = arith.subi %385, %386 : vector<32x128xi32>
    %c0_i32 = arith.constant 0 : i32
    %389 = vector.broadcast %c0_i32 : i32 to vector<32x128xi32>
    %390 = arith.cmpi eq, %388, %389 : vector<32x128xi32>
    %c9_i32 = arith.constant 9 : i32
    %391 = vector.broadcast %c9_i32 : i32 to vector<32x128xi32>
    %392 = arith.cmpi slt, %386, %391 : vector<32x128xi32>
    %393 = arith.andi %390, %392 : vector<32x128xi1>
    %394 = arith.extui %393 : vector<32x128xi1> to vector<32x128xi32>
    %395 = arith.sitofp %394 : vector<32x128xi32> to vector<32x128xf32>
    %396 = arith.addf %387, %395 : vector<32x128xf32>
    %397 = arith.subi %385, %386 : vector<32x128xi32>
    %c9_i32_348 = arith.constant 9 : i32
    %398 = vector.broadcast %c9_i32_348 : i32 to vector<32x128xi32>
    %399 = arith.cmpi eq, %397, %398 : vector<32x128xi32>
    %c9_i32_349 = arith.constant 9 : i32
    %400 = vector.broadcast %c9_i32_349 : i32 to vector<32x128xi32>
    %401 = arith.cmpi slt, %386, %400 : vector<32x128xi32>
    %402 = arith.andi %399, %401 : vector<32x128xi1>
    %403 = arith.extui %402 : vector<32x128xi1> to vector<32x128xi32>
    %404 = arith.sitofp %403 : vector<32x128xi32> to vector<32x128xf32>
    %405 = arith.addf %396, %404 : vector<32x128xf32>
    %406 = arith.mulf %384, %405 : vector<32x128xf32>
    %cst_350 = arith.constant dense<0.000000e+00> : vector<32xf32>
    %407 = vector.multi_reduction <add>, %406, %cst_350 [1] : vector<32x128xf32> to vector<32xf32>
    %408 = vector.shape_cast %407 : vector<32xf32> to vector<32x1xf32>
    %409 = tpu.iota {dimensions = array<i32: 0>} : vector<8x32xi32>
    %410 = tpu.iota {dimensions = array<i32: 1>} : vector<8x32xi32>
    %c9_i32_351 = arith.constant 9 : i32
    %411 = vector.broadcast %c9_i32_351 : i32 to vector<8x32xi32>
    %412 = arith.muli %411, %409 : vector<8x32xi32>
    %413 = arith.cmpi sge, %410, %412 : vector<8x32xi32>
    %c9_i32_352 = arith.constant 9 : i32
    %414 = vector.broadcast %c9_i32_352 : i32 to vector<8x32xi32>
    %415 = arith.muli %414, %409 : vector<8x32xi32>
    %c9_i32_353 = arith.constant 9 : i32
    %416 = vector.broadcast %c9_i32_353 : i32 to vector<8x32xi32>
    %417 = arith.addi %415, %416 : vector<8x32xi32>
    %418 = arith.cmpi slt, %410, %417 : vector<8x32xi32>
    %419 = arith.andi %413, %418 : vector<8x32xi1>
    %c2_i32 = arith.constant 2 : i32
    %420 = vector.broadcast %c2_i32 : i32 to vector<8x32xi32>
    %421 = arith.cmpi slt, %409, %420 : vector<8x32xi32>
    %422 = arith.andi %419, %421 : vector<8x32xi1>
    %423 = arith.extui %422 : vector<8x32xi1> to vector<8x32xi32>
    %424 = arith.sitofp %423 : vector<8x32xi32> to vector<8x32xf32>
    %425 = vector.shape_cast %408 : vector<32x1xf32> to vector<32x1xf32>
    %426 = vector.broadcast %425 : vector<32x1xf32> to vector<32x128xf32>
    %cst_354 = arith.constant dense<0.000000e+00> : vector<8x128xf32>
    %427 = tpu.matmul %424, %426, %cst_354 {dimension_numbers = #tpu.dot_dimension_numbers<[1], [0], [0], [1], [0, 0, 1, 1], [], []>} : vector<8x32xf32>, vector<32x128xf32>, vector<8x128xf32> -> vector<8x128xf32>
    %c0_355 = arith.constant 0 : index
    %c0_356 = arith.constant 0 : index
    %428 = memref.load %arg15[%c0_355, %c0_356] : memref<1x1xf32, #tpu.memory_space<smem>>
    %429 = vector.broadcast %428 : f32 to vector<8x128xf32>
    %430 = arith.addf %427, %429 : vector<8x128xf32>
    %431 = arith.negf %430 : vector<8x128xf32>
    %432 = math.exp %431 : vector<8x128xf32>
    %cst_357 = arith.constant 1.000000e+00 : f32
    %433 = vector.broadcast %cst_357 : f32 to vector<8x128xf32>
    %434 = arith.addf %433, %432 : vector<8x128xf32>
    %435 = arith.divf %433, %434 : vector<8x128xf32>
    %c0_358 = arith.constant 0 : index
    %c0_359 = arith.constant 0 : index
    %436 = vector.load %arg16[%c0_358, %c0_359] : memref<8x128xf32, #tpu.memory_space<vmem>>, vector<8x128xf32>
    tpu.vector_store %arg16[%c0_358, %c0_359], %435 {strides = array<i32>} : memref<8x128xf32, #tpu.memory_space<vmem>>, vector<8x128xf32>,
    return
  }
  func.func @transform_0(%arg0: i32) -> (i32, i32) {
    %c0_i32 = arith.constant 0 : i32
    %c0_i32_0 = arith.constant 0 : i32
    %c0_i32_1 = arith.constant 0 : i32
    return %c0_i32, %c0_i32_0 : i32, i32
  }
  func.func @transform_1(%arg0: i32) -> (i32, i32) {
    %c0_i32 = arith.constant 0 : i32
    %c0_i32_0 = arith.constant 0 : i32
    %c0_i32_1 = arith.constant 0 : i32
    return %c0_i32, %c0_i32_0 : i32, i32
  }
  func.func @transform_2(%arg0: i32) -> (i32, i32) {
    %c0_i32 = arith.constant 0 : i32
    %c0_i32_0 = arith.constant 0 : i32
    %c0_i32_1 = arith.constant 0 : i32
    return %c0_i32, %c0_i32_0 : i32, i32
  }
  func.func @transform_3(%arg0: i32) -> (i32, i32, i32) {
    %c0_i32 = arith.constant 0 : i32
    %c0_i32_0 = arith.constant 0 : i32
    %c0_i32_1 = arith.constant 0 : i32
    %c0_i32_2 = arith.constant 0 : i32
    return %c0_i32, %c0_i32_0, %c0_i32_1 : i32, i32, i32
  }
  func.func @transform_4(%arg0: i32) -> (i32, i32, i32) {
    %c0_i32 = arith.constant 0 : i32
    %c0_i32_0 = arith.constant 0 : i32
    %c0_i32_1 = arith.constant 0 : i32
    %c0_i32_2 = arith.constant 0 : i32
    return %c0_i32, %c0_i32_0, %c0_i32_1 : i32, i32, i32
  }
  func.func @transform_5(%arg0: i32) -> (i32, i32) {
    %c0_i32 = arith.constant 0 : i32
    %c0_i32_0 = arith.constant 0 : i32
    %c0_i32_1 = arith.constant 0 : i32
    return %c0_i32, %c0_i32_0 : i32, i32
  }
  func.func @transform_6(%arg0: i32) -> (i32, i32) {
    %c0_i32 = arith.constant 0 : i32
    %c0_i32_0 = arith.constant 0 : i32
    %c0_i32_1 = arith.constant 0 : i32
    return %c0_i32, %c0_i32_0 : i32, i32
  }
  func.func @transform_7(%arg0: i32) -> (i32, i32) {
    %c0_i32 = arith.constant 0 : i32
    %c0_i32_0 = arith.constant 0 : i32
    %c0_i32_1 = arith.constant 0 : i32
    return %c0_i32, %c0_i32_0 : i32, i32
  }
  func.func @transform_8(%arg0: i32) -> (i32, i32, i32) {
    %c0_i32 = arith.constant 0 : i32
    %c0_i32_0 = arith.constant 0 : i32
    %c0_i32_1 = arith.constant 0 : i32
    %c0_i32_2 = arith.constant 0 : i32
    return %c0_i32, %c0_i32_0, %c0_i32_1 : i32, i32, i32
  }
  func.func @transform_9(%arg0: i32) -> (i32, i32, i32) {
    %c0_i32 = arith.constant 0 : i32
    %c0_i32_0 = arith.constant 0 : i32
    %c0_i32_1 = arith.constant 0 : i32
    %c0_i32_2 = arith.constant 0 : i32
    return %c0_i32, %c0_i32_0, %c0_i32_1 : i32, i32, i32
  }
  func.func @transform_10(%arg0: i32) -> (i32, i32) {
    %c0_i32 = arith.constant 0 : i32
    %c0_i32_0 = arith.constant 0 : i32
    %c0_i32_1 = arith.constant 0 : i32
    return %c0_i32, %c0_i32_0 : i32, i32
  }
  func.func @transform_11(%arg0: i32) -> (i32, i32) {
    %c0_i32 = arith.constant 0 : i32
    %c0_i32_0 = arith.constant 0 : i32
    %c0_i32_1 = arith.constant 0 : i32
    return %c0_i32, %c0_i32_0 : i32, i32
  }
  func.func @transform_12(%arg0: i32) -> (i32, i32) {
    %c0_i32 = arith.constant 0 : i32
    %c0_i32_0 = arith.constant 0 : i32
    %c0_i32_1 = arith.constant 0 : i32
    return %c0_i32, %c0_i32_0 : i32, i32
  }
  func.func @transform_13(%arg0: i32) -> (i32, i32) {
    %c0_i32 = arith.constant 0 : i32
    %c0_i32_0 = arith.constant 0 : i32
    %c0_i32_1 = arith.constant 0 : i32
    return %c0_i32, %c0_i32_0 : i32, i32
  }
  func.func @transform_14(%arg0: i32) -> (i32, i32) {
    %c0_i32 = arith.constant 0 : i32
    %c0_i32_0 = arith.constant 0 : i32
    %c0_i32_1 = arith.constant 0 : i32
    return %c0_i32, %c0_i32_0 : i32, i32
  }
  func.func @transform_15(%arg0: i32) -> (i32, i32) {
    %c0_i32 = arith.constant 0 : i32
    %c0_i32_0 = arith.constant 0 : i32
    %c0_i32_1 = arith.constant 0 : i32
    return %c0_i32, %c0_i32_0 : i32, i32
  }
}

</mosaic_0001>

<bundles_post_ra>
// kernel: discriminator_forward.1
= control target key start
LH: loop header
LB: loop body
LE: loop exit
PB: predicated region body
PF: predicated region fallthrough
CT: control target
= control target key end

     0   :  { %vm892_vm4 = vcmask 523264   ;;  %s27023_s1 = inlined_call_operand.vmem [shape: bf16[128,64], index: 1, kind: input, shape index: {}]   ;;  %s27024_s0 = inlined_call_operand.vmem [shape: bf16[512,128], index: 0, kind: input, shape index: {}]   ;;  %s27025_s3 = inlined_call_operand.vmem [shape: bf16[16,128,512], index: 3, kind: input, shape index: {}]   ;;  %s27026_s2 = inlined_call_operand.vmem [shape: f32[1,64], index: 2, kind: input, shape index: {}]   ;;  %s27027_s4 = inlined_call_operand.vmem [shape: bf16[16,64,128], index: 4, kind: input, shape index: {}]   ;;  %s27028_s5 = inlined_call_operand.vmem [shape: f32[1,128], index: 5, kind: input, shape index: {}]   ;;  %s27029_s8 = inlined_call_operand.vmem [shape: bf16[16,32,128], index: 8, kind: input, shape index: {}]   ;;  %s27030_s6 = inlined_call_operand.vmem [shape: f32[1,128], index: 6, kind: input, shape index: {}]   ;;  %s27031_s7 = inlined_call_operand.vmem [shape: f32[1,128], index: 7, kind: input, shape index: {}]   ;;  %s27032_s9 = inlined_call_operand.vmem [shape: bf16[16,128,256], index: 9, kind: input, shape index: {}]   ;;  %s27033_s13 = inlined_call_operand.vmem [shape: f32[256,128], index: 13, kind: input, shape index: {}]   ;;  %s27034_s10 = inlined_call_operand.vmem [shape: f32[1,256], index: 10, kind: input, shape index: {}]   ;;  %s27035_s11 = inlined_call_operand.vmem [shape: f32[1,256], index: 11, kind: input, shape index: {}]   ;;  %s27036_s12 = inlined_call_operand.vmem [shape: f32[1,256], index: 12, kind: input, shape index: {}]   ;;  %s27037_s14 = inlined_call_operand.<no memory space> [shape: f32[1,1], index: 14, kind: input, shape index: {}]   ;;  %s27038_s15 = inlined_call_operand.vmem [shape: f32[8,128], index: 15, kind: output, shape index: {}]  }
   0x1   :  { %v19979_v0 = vld [vmem:[%s27023_s1] sm:$0xff]   ;;  %v19980_v1 = vld [vmem:[%s27023_s1 + $0x8] sm:$0xff]   ;;  %v19981_v2 = vld [vmem:[%s27023_s1 + $0x10] sm:$0xff]  }
   0x2   :  { %18782 = vmatprep.subr.bf16.mxu0 %v19979_v0  ;;  %v19982_v3 = vld [vmem:[%s27023_s1 + $0x18] sm:$0xff]   ;;  %v19987_v4 = vld [vmem:[%s27024_s0] sm:$0xff]   ;;  %v19984_v6 = vld [vmem:[%s27023_s1 + $0x28] sm:$0xff]  }
   0x3   :  { %18783 = vmatpush3.bf16.msra.mxu0 %v19979_v0  ;;  %18798 = vmatprep.mubr.bf16.mxu0 %v19987_v4  ;;  %v19983_v5 = vld [vmem:[%s27023_s1 + $0x20] sm:$0xff]   ;;  %v19985_v7 = vld [vmem:[%s27023_s1 + $0x30] sm:$0xff]   ;;  %v19986_v8 = vld [vmem:[%s27023_s1 + $0x38] sm:$0xff]  }
   0x4   :  { %18784 = vmatprep.subr.bf16.mxu0 %v19980_v1  ;;  %v19988_v9 = vld [vmem:[%s27024_s0 + $0x8] sm:$0xff]   ;;  %v19989_v10 = vld [vmem:[%s27024_s0 + $0x10] sm:$0xff]   ;;  %v19990_v11 = vld [vmem:[%s27024_s0 + $0x18] sm:$0xff]  }
   0x5   :  { %v19991_v12 = vld [vmem:[%s27024_s0 + $0x20] sm:$0xff]   ;;  %v19992_v13 = vld [vmem:[%s27024_s0 + $0x28] sm:$0xff]   ;;  %v19993_v14 = vld [vmem:[%s27024_s0 + $0x30] sm:$0xff]  }
   0x6   :  { %v19994_v15 = vld [vmem:[%s27024_s0 + $0x38] sm:$0xff]   ;;  %v19995_v16 = vld [vmem:[%s27024_s0 + $0x40] sm:$0xff]   ;;  %v19996_v17 = vld [vmem:[%s27024_s0 + $0x48] sm:$0xff]  }
   0x7   :  { %18785 = vmatpush3.bf16.msra.mxu0 %v19980_v1  ;;  %v19997_v18 = vld [vmem:[%s27024_s0 + $0x50] sm:$0xff]   ;;  %v19998_v19 = vld [vmem:[%s27024_s0 + $0x58] sm:$0xff]   ;;  %v19999_v20 = vld [vmem:[%s27024_s0 + $0x60] sm:$0xff]  }
   0x8   :  { %18786 = vmatprep.subr.bf16.mxu0 %v19981_v2  ;;  %v20000_v21 = vld [vmem:[%s27024_s0 + $0x68] sm:$0xff]   ;;  %v20001_v22 = vld [vmem:[%s27024_s0 + $0x70] sm:$0xff]   ;;  %v20002_v23 = vld [vmem:[%s27024_s0 + $0x78] sm:$0xff]  }
   0x9   :  { %v20003_v24 = vld [vmem:[%s27024_s0 + $0x80] sm:$0xff]   ;;  %v20004_v25 = vld [vmem:[%s27024_s0 + $0x88] sm:$0xff]   ;;  %v20005_v26 = vld [vmem:[%s27024_s0 + $0x90] sm:$0xff]  }
   0xa   :  { %v20006_v27 = vld [vmem:[%s27024_s0 + $0x98] sm:$0xff]   ;;  %v20007_v28 = vld [vmem:[%s27024_s0 + $0xa0] sm:$0xff]   ;;  %v20008_v29 = vld [vmem:[%s27024_s0 + $0xa8] sm:$0xff]  }
   0xb   :  { %18787 = vmatpush3.bf16.msra.mxu0 %v19981_v2  ;;  %v20009_v30 = vld [vmem:[%s27024_s0 + $0xb0] sm:$0xff]   ;;  %v20010_v31 = vld [vmem:[%s27024_s0 + $0xb8] sm:$0xff]   ;;  %v20011_v32 = vld [vmem:[%s27024_s0 + $0xc0] sm:$0xff]  }
   0xc   :  { %18788 = vmatprep.subr.bf16.mxu0 %v19982_v3  ;;  %v20012_v33 = vld [vmem:[%s27024_s0 + $0xc8] sm:$0xff]   ;;  %v20013_v34 = vld [vmem:[%s27024_s0 + $0xd0] sm:$0xff]   ;;  %v20014_v35 = vld [vmem:[%s27024_s0 + $0xd8] sm:$0xff]  }
   0xd   :  { %v20015_v36 = vld [vmem:[%s27024_s0 + $0xe0] sm:$0xff]   ;;  %v20016_v37 = vld [vmem:[%s27024_s0 + $0xe8] sm:$0xff]   ;;  %v20017_v38 = vld [vmem:[%s27024_s0 + $0xf0] sm:$0xff]  }
   0xe   :  { %v20018_v39 = vld [vmem:[%s27024_s0 + $0xf8] sm:$0xff]   ;;  %v20021_v40 = vld [vmem:[%s27025_s3 + $0x4] ss:$16 sps:$4 sm:$0xff]   ;;  %v21662_v41 = vld [vmem:[%s27026_s2] ss:$0 sm:$0xff] }
   0xf   :  { %18789 = vmatpush3.bf16.msra.mxu0 %v19982_v3  ;;  %1181 = vmatprep.mubr.bf16.mxu1 %v20021_v40 }
  0x10   :  { %18790 = vmatprep.subr.bf16.mxu0 %v19983_v5 }
  0x13   :  { %18791 = vmatpush3.bf16.msra.mxu0 %v19983_v5 }
  0x14   :  { %18792 = vmatprep.subr.bf16.mxu0 %v19984_v6 }
  0x17   :  { %18793 = vmatpush3.bf16.msra.mxu0 %v19984_v6 }
  0x18   :  { %18794 = vmatprep.subr.bf16.mxu0 %v19985_v7 }
  0x1b   :  { %18795 = vmatpush3.bf16.msra.mxu0 %v19985_v7 }
  0x1c   :  { %18796 = vmatprep.subr.bf16.mxu0 %v19986_v8 }
  0x1f   :  { %18797 = vmatpush3.bf16.msra.mxu0 %v19986_v8 }
  0x22   :  { %18799 = vmatmul.mubr.bf16.vlgmr.msra.gmra.mrb[0].mxu0 %v19988_v9 }
  0x23   :  { %18802 = vmatprep.mubr.bf16.mxu0 %v19989_v10 }
  0x2a   :  { %18803 = vmatmul.mubr.bf16.gmra.mrb[4].mxu0 %v19990_v11 }
  0x2b   :  { %18806 = vmatprep.mubr.bf16.mxu0 %v19991_v12 }
  0x32   :  { %18807 = vmatmul.mubr.bf16.gmra.mrb[8].mxu0 %v19992_v13 }
  0x33   :  { %18810 = vmatprep.mubr.bf16.mxu0 %v19993_v14 }
  0x3a   :  { %18811 = vmatmul.mubr.bf16.gmra.mrb[12].mxu0 %v19994_v15 }
  0x3b   :  { %18814 = vmatprep.mubr.bf16.mxu0 %v19995_v16 }
  0x42   :  { %18815 = vmatmul.mubr.bf16.gmra.mrb[16].mxu0 %v19996_v17 }
  0x43   :  { %18818 = vmatprep.mubr.bf16.mxu0 %v19997_v18 }
  0x4a   :  { %18819 = vmatmul.mubr.bf16.gmra.mrb[20].mxu0 %v19998_v19 }
  0x4b   :  { %18822 = vmatprep.mubr.bf16.mxu0 %v19999_v20 }
  0x52   :  { %18823 = vmatmul.mubr.bf16.gmra.mrb[24].mxu0 %v20000_v21 }
  0x53   :  { %18826 = vmatprep.mubr.bf16.mxu0 %v20001_v22 }
  0x5a   :  { %18827 = vmatmul.mubr.bf16.gmra.mrb[28].mxu0 %v20002_v23 }
  0x5b   :  { %18830 = vmatprep.mubr.bf16.mxu0 %v20003_v24 }
  0x62   :  { %18831 = vmatmul.mubr.bf16.gmra.mrb[32].mxu0 %v20004_v25 }
  0x63   :  { %18834 = vmatprep.mubr.bf16.mxu0 %v20005_v26 }
  0x6a   :  { %18835 = vmatmul.mubr.bf16.gmra.mrb[36].mxu0 %v20006_v27 }
  0x6b   :  { %18838 = vmatprep.mubr.bf16.mxu0 %v20007_v28 }
  0x72   :  { %18839 = vmatmul.mubr.bf16.gmra.mrb[40].mxu0 %v20008_v29 }
  0x73   :  { %18842 = vmatprep.mubr.bf16.mxu0 %v20009_v30 }
  0x7a   :  { %18843 = vmatmul.mubr.bf16.gmra.mrb[44].mxu0 %v20010_v31 }
  0x7b   :  { %18846 = vmatprep.mubr.bf16.mxu0 %v20011_v32 }
  0x82   :  { %18847 = vmatmul.mubr.bf16.gmra.mrb[48].mxu0 %v20012_v33 }
  0x83   :  { %18850 = vmatprep.mubr.bf16.mxu0 %v20013_v34 }
  0x8a   :  { %18851 = vmatmul.mubr.bf16.gmra.mrb[52].mxu0 %v20014_v35 }
  0x8b   :  { %18854 = vmatprep.mubr.bf16.mxu0 %v20015_v36 }
  0x92   :  { %18855 = vmatmul.mubr.bf16.gmra.mrb[56].mxu0 %v20016_v37 }
  0x93   :  { %18858 = vmatprep.mubr.bf16.mxu0 %v20017_v38 }
  0x9a   :  { %18859 = vmatmul.mubr.bf16.gmra.mrb[60].mxu0 %v20018_v39 }
  0xf5   :  { %v18800_v42 = vpop.f32.mrb[0].mxu0 }
  0xf6   :  { %v422_v43 = vadd.f32 %v18800_v42, %v21662_v41  ;;  %v413_v44 = vpop.f32.mrb[1].mxu0 }
  0xf7   :  { %v414_v45 = vadd.f32 %v21662_v41, %v413_v44  ;;  %v18801_v46 = vpop.f32.mrb[2].mxu0 }
  0xf8   :  { %vm670_vm0 = vcmp.ge.f32.partialorder %v422_v43, 0.0  ;;  %v734_v47 = vmul.f32 0.2, %v422_v43  ;;  %v425_v48 = vadd.f32 %v18801_v46, %v21662_v41  ;;  %v416_v49 = vpop.f32.mrb[3].mxu0 }
  0xf9   :  { %vm668_vm1 = vcmp.ge.f32.partialorder %v414_v45, 0.0  ;;  %v732_v50 = vmul.f32 0.2, %v414_v45  ;;  %v417_v51 = vadd.f32 %v21662_v41, %v416_v49 }
  0xfa   :  { %vm671_vm2 = vcmp.ge.f32.partialorder %v425_v48, 0.0  ;;  %v735_v52 = vmul.f32 0.2, %v425_v48  ;;  %v798_v54 = vsel %vm670_vm0, %v422_v43, %v734_v47 }
  0xfb   :  { %vm669_vm3 = vcmp.ge.f32.partialorder %v417_v51, 0.0  ;;  %v733_v53 = vmul.f32 0.2, %v417_v51  ;;  %v796_v56 = vsel %vm668_vm1, %v414_v45, %v732_v50 }
  0xfc   :  { %v799_v55 = vsel %vm671_vm2, %v425_v48, %v735_v52 }
  0xfd   :  { %v861_v57 = vpack.c.bf16 %v799_v55, %v798_v54  ;;  %v797_v58 = vsel %vm669_vm3, %v417_v51, %v733_v53  ;;  %v18804_v59 = vpop.f32.mrb[4].mxu0 }
  0xfe   :  { %v860_v60 = vpack.c.bf16 %v797_v58, %v796_v56  ;;  %v438_v61 = vadd.f32 %v18804_v59, %v21662_v41  ;;  %v429_v62 = vpop.f32.mrb[5].mxu0 }
  0xff   :  { %894 = vst.msk [vmem:[#allocation2 + $0x8] sm:$0xff] %vm892_vm4, %v861_v57  ;;  %v430_v63 = vadd.f32 %v21662_v41, %v429_v62  ;;  %v18805_v0 = vpop.f32.mrb[6].mxu0 }
 0x100   :  { %893 = vst.msk [vmem:[#allocation2] sm:$0xff] %vm892_vm4, %v860_v60  ;;  %vm674_vm5 = vcmp.ge.f32.partialorder %v438_v61, 0.0  ;;  %v738_v1 = vmul.f32 0.2, %v438_v61  ;;  %v441_v2 = vadd.f32 %v18805_v0, %v21662_v41  ;;  %v432_v3 = vpop.f32.mrb[7].mxu0 }
 0x101   :  { %vm672_vm6 = vcmp.ge.f32.partialorder %v430_v63, 0.0  ;;  %v736_v4 = vmul.f32 0.2, %v430_v63  ;;  %v433_v5 = vadd.f32 %v21662_v41, %v432_v3 }
 0x102   :  { %vm675_vm7 = vcmp.ge.f32.partialorder %v441_v2, 0.0  ;;  %v739_v6 = vmul.f32 0.2, %v441_v2  ;;  %v802_v8 = vsel %vm674_vm5, %v438_v61, %v738_v1 }
 0x103   :  { %vm673_vm8 = vcmp.ge.f32.partialorder %v433_v5, 0.0  ;;  %v737_v7 = vmul.f32 0.2, %v433_v5  ;;  %v800_v10 = vsel %vm672_vm6, %v430_v63, %v736_v4 }
 0x104   :  { %v803_v9 = vsel %vm675_vm7, %v441_v2, %v739_v6 }
 0x105   :  { %v863_v11 = vpack.c.bf16 %v803_v9, %v802_v8  ;;  %v801_v12 = vsel %vm673_vm8, %v433_v5, %v737_v7  ;;  %v18808_v13 = vpop.f32.mrb[8].mxu0 }
 0x106   :  { %v862_v14 = vpack.c.bf16 %v801_v12, %v800_v10  ;;  %v454_v15 = vadd.f32 %v18808_v13, %v21662_v41  ;;  %v445_v16 = vpop.f32.mrb[9].mxu0 }
 0x107   :  { %896 = vst.msk [vmem:[#allocation2 + $0x18] sm:$0xff] %vm892_vm4, %v863_v11  ;;  %v446_v17 = vadd.f32 %v21662_v41, %v445_v16  ;;  %v18809_v18 = vpop.f32.mrb[10].mxu0 }
 0x108   :  { %895 = vst.msk [vmem:[#allocation2 + $0x10] sm:$0xff] %vm892_vm4, %v862_v14  ;;  %vm678_vm9 = vcmp.ge.f32.partialorder %v454_v15, 0.0  ;;  %v742_v19 = vmul.f32 0.2, %v454_v15  ;;  %v457_v20 = vadd.f32 %v18809_v18, %v21662_v41  ;;  %v448_v21 = vpop.f32.mrb[11].mxu0 }
 0x109   :  { %vm676_vm10 = vcmp.ge.f32.partialorder %v446_v17, 0.0  ;;  %v740_v22 = vmul.f32 0.2, %v446_v17  ;;  %v449_v23 = vadd.f32 %v21662_v41, %v448_v21 }
 0x10a   :  { %vm679_vm11 = vcmp.ge.f32.partialorder %v457_v20, 0.0  ;;  %v743_v24 = vmul.f32 0.2, %v457_v20  ;;  %v806_v26 = vsel %vm678_vm9, %v454_v15, %v742_v19 }
 0x10b   :  { %vm677_vm12 = vcmp.ge.f32.partialorder %v449_v23, 0.0  ;;  %v741_v25 = vmul.f32 0.2, %v449_v23  ;;  %v804_v28 = vsel %vm676_vm10, %v446_v17, %v740_v22 }
 0x10c   :  { %v807_v27 = vsel %vm679_vm11, %v457_v20, %v743_v24 }
 0x10d   :  { %v865_v29 = vpack.c.bf16 %v807_v27, %v806_v26  ;;  %v805_v30 = vsel %vm677_vm12, %v449_v23, %v741_v25  ;;  %v18812_v31 = vpop.f32.mrb[12].mxu0 }
 0x10e   :  { %v864_v32 = vpack.c.bf16 %v805_v30, %v804_v28  ;;  %v470_v33 = vadd.f32 %v18812_v31, %v21662_v41  ;;  %v461_v34 = vpop.f32.mrb[13].mxu0 }
 0x10f   :  { %898 = vst.msk [vmem:[#allocation2 + $0x28] sm:$0xff] %vm892_vm4, %v865_v29  ;;  %v462_v35 = vadd.f32 %v21662_v41, %v461_v34  ;;  %v18813_v36 = vpop.f32.mrb[14].mxu0  ;;  %v957_v29 = vld [vmem:[#allocation2] sm:$0xff] }
 0x110   :  { %897 = vst.msk [vmem:[#allocation2 + $0x20] sm:$0xff] %vm892_vm4, %v864_v32  ;;  %vm682_vm13 = vcmp.ge.f32.partialorder %v470_v33, 0.0  ;;  %v746_v37 = vmul.f32 0.2, %v470_v33  ;;  %v473_v38 = vadd.f32 %v18813_v36, %v21662_v41  ;;  %v464_v39 = vpop.f32.mrb[15].mxu0  ;;  %v958_v36 = vld [vmem:[#allocation2 + $0x8] sm:$0xff] }
 0x111   :  { %vm680_vm14 = vcmp.ge.f32.partialorder %v462_v35, 0.0  ;;  %v744_v40 = vmul.f32 0.2, %v462_v35  ;;  %v465_v42 = vadd.f32 %v21662_v41, %v464_v39 }
 0x112   :  { %vm683_vm15 = vcmp.ge.f32.partialorder %v473_v38, 0.0  ;;  %v747_v43 = vmul.f32 0.2, %v473_v38  ;;  %v810_v45 = vsel %vm682_vm13, %v470_v33, %v746_v37 }
 0x113   :  { %vm681_vm0 = vcmp.ge.f32.partialorder %v465_v42, 0.0  ;;  %v745_v44 = vmul.f32 0.2, %v465_v42  ;;  %v808_v47 = vsel %vm680_vm14, %v462_v35, %v744_v40 }
 0x114   :  { %v811_v46 = vsel %vm683_vm15, %v473_v38, %v747_v43 }
 0x115   :  { %v867_v48 = vpack.c.bf16 %v811_v46, %v810_v45  ;;  %v809_v49 = vsel %vm681_vm0, %v465_v42, %v745_v44  ;;  %v18816_v50 = vpop.f32.mrb[16].mxu0 }
 0x116   :  { %v866_v51 = vpack.c.bf16 %v809_v49, %v808_v47  ;;  %v486_v52 = vadd.f32 %v18816_v50, %v21662_v41  ;;  %v477_v53 = vpop.f32.mrb[17].mxu0 }
 0x117   :  { %900 = vst.msk [vmem:[#allocation2 + $0x38] sm:$0xff] %vm892_vm4, %v867_v48  ;;  %v478_v54 = vadd.f32 %v21662_v41, %v477_v53  ;;  %v18817_v55 = vpop.f32.mrb[18].mxu0 }
 0x118   :  { %899 = vst.msk [vmem:[#allocation2 + $0x30] sm:$0xff] %vm892_vm4, %v866_v51  ;;  %vm686_vm1 = vcmp.ge.f32.partialorder %v486_v52, 0.0  ;;  %v750_v56 = vmul.f32 0.2, %v486_v52  ;;  %v489_v57 = vadd.f32 %v18817_v55, %v21662_v41  ;;  %v480_v58 = vpop.f32.mrb[19].mxu0 }
 0x119   :  { %vm684_vm2 = vcmp.ge.f32.partialorder %v478_v54, 0.0  ;;  %v748_v59 = vmul.f32 0.2, %v478_v54  ;;  %v481_v60 = vadd.f32 %v21662_v41, %v480_v58 }
 0x11a   :  { %vm687_vm3 = vcmp.ge.f32.partialorder %v489_v57, 0.0  ;;  %v751_v61 = vmul.f32 0.2, %v489_v57  ;;  %v814_v63 = vsel %vm686_vm1, %v486_v52, %v750_v56  ;;  %v959_v52 = vld [vmem:[#allocation2 + $0x10] sm:$0xff] }
 0x11b   :  { %vm685_vm5 = vcmp.ge.f32.partialorder %v481_v60, 0.0  ;;  %v749_v62 = vmul.f32 0.2, %v481_v60  ;;  %v812_v1 = vsel %vm684_vm2, %v478_v54, %v748_v59  ;;  %v960_v59 = vld [vmem:[#allocation2 + $0x18] sm:$0xff] }
 0x11c   :  { %v815_v0 = vsel %vm687_vm3, %v489_v57, %v751_v61 }
 0x11d   :  { %v869_v2 = vpack.c.bf16 %v815_v0, %v814_v63  ;;  %v813_v3 = vsel %vm685_vm5, %v481_v60, %v749_v62  ;;  %v18820_v4 = vpop.f32.mrb[20].mxu0 }
 0x11e   :  { %v868_v5 = vpack.c.bf16 %v813_v3, %v812_v1  ;;  %v502_v6 = vadd.f32 %v18820_v4, %v21662_v41  ;;  %v493_v7 = vpop.f32.mrb[21].mxu0 }
 0x11f   :  { %902 = vst.msk [vmem:[#allocation2 + $0x48] sm:$0xff] %vm892_vm4, %v869_v2  ;;  %v494_v8 = vadd.f32 %v21662_v41, %v493_v7  ;;  %v18821_v9 = vpop.f32.mrb[22].mxu0 }
 0x120   :  { %901 = vst.msk [vmem:[#allocation2 + $0x40] sm:$0xff] %vm892_vm4, %v868_v5  ;;  %vm690_vm6 = vcmp.ge.f32.partialorder %v502_v6, 0.0  ;;  %v754_v10 = vmul.f32 0.2, %v502_v6  ;;  %v505_v11 = vadd.f32 %v18821_v9, %v21662_v41  ;;  %v496_v12 = vpop.f32.mrb[23].mxu0 }
 0x121   :  { %vm688_vm7 = vcmp.ge.f32.partialorder %v494_v8, 0.0  ;;  %v752_v13 = vmul.f32 0.2, %v494_v8  ;;  %v497_v14 = vadd.f32 %v21662_v41, %v496_v12 }
 0x122   :  { %vm691_vm8 = vcmp.ge.f32.partialorder %v505_v11, 0.0  ;;  %v755_v15 = vmul.f32 0.2, %v505_v11  ;;  %v818_v17 = vsel %vm690_vm6, %v502_v6, %v754_v10  ;;  %v961_v10 = vld [vmem:[#allocation2 + $0x20] sm:$0xff] }
 0x123   :  { %vm689_vm9 = vcmp.ge.f32.partialorder %v497_v14, 0.0  ;;  %v753_v16 = vmul.f32 0.2, %v497_v14  ;;  %v816_v19 = vsel %vm688_vm7, %v494_v8, %v752_v13 }
 0x124   :  { %v819_v18 = vsel %vm691_vm8, %v505_v11, %v755_v15 }
 0x125   :  { %v871_v20 = vpack.c.bf16 %v819_v18, %v818_v17  ;;  %v817_v21 = vsel %vm689_vm9, %v497_v14, %v753_v16  ;;  %v18824_v22 = vpop.f32.mrb[24].mxu0  ;;  %v962_v17 = vld [vmem:[#allocation2 + $0x28] sm:$0xff] }
 0x126   :  { %v870_v23 = vpack.c.bf16 %v817_v21, %v816_v19  ;;  %v518_v24 = vadd.f32 %v18824_v22, %v21662_v41  ;;  %v509_v25 = vpop.f32.mrb[25].mxu0  ;;  %v966_v33 = vld [vmem:[#allocation2 + $0x48] sm:$0xff] }
 0x127   :  { %v965_v26 = vld [vmem:[#allocation2 + $0x40] sm:$0xff]  ;;  %904 = vst.msk [vmem:[#allocation2 + $0x58] sm:$0xff] %vm892_vm4, %v871_v20  ;;  %v510_v27 = vadd.f32 %v21662_v41, %v509_v25  ;;  %v18825_v28 = vpop.f32.mrb[26].mxu0 }
 0x128   :  { %903 = vst.msk [vmem:[#allocation2 + $0x50] sm:$0xff] %vm892_vm4, %v870_v23  ;;  %v758_v30 = vmul.f32 0.2, %v518_v24  ;;  %v521_v31 = vadd.f32 %v18825_v28, %v21662_v41  ;;  %v512_v32 = vpop.f32.mrb[27].mxu0  ;;  %16333 = vmatprep.subr.bf16.mxu1 %v965_v26  ;;  %16461 = vmatprep.subr.bf16.mxu0 %v965_v26  ;;  %vm694_vm10 = vcmp.ge.f32.partialorder %v518_v24, 0.0 }
 0x129   :  { %vm692_vm11 = vcmp.ge.f32.partialorder %v510_v27, 0.0  ;;  %v756_v34 = vmul.f32 0.2, %v510_v27  ;;  %v513_v35 = vadd.f32 %v21662_v41, %v512_v32  ;;  %16334 = vmatpush3.bf16.msra.mxu1 %v957_v29  ;;  %16462 = vmatpush3.bf16.msra.mxu0 %v957_v29  ;;  %v963_v32 = vld [vmem:[#allocation2 + $0x30] sm:$0xff] }
 0x12a   :  { %vm695_vm12 = vcmp.ge.f32.partialorder %v521_v31, 0.0  ;;  %v759_v37 = vmul.f32 0.2, %v521_v31  ;;  %16335 = vmatprep.subr.bf16.mxu1 %v966_v33  ;;  %16463 = vmatprep.subr.bf16.mxu0 %v966_v33  ;;  %v822_v39 = vsel %vm694_vm10, %v518_v24, %v758_v30 }
 0x12b   :  { %vm693_vm13 = vcmp.ge.f32.partialorder %v513_v35, 0.0  ;;  %v757_v38 = vmul.f32 0.2, %v513_v35  ;;  %v820_v42 = vsel %vm692_vm11, %v510_v27, %v756_v34 }
 0x12c   :  { %v823_v40 = vsel %vm695_vm12, %v521_v31, %v759_v37 }
 0x12d   :  { %v873_v43 = vpack.c.bf16 %v823_v40, %v822_v39  ;;  %v821_v44 = vsel %vm693_vm13, %v513_v35, %v757_v38  ;;  %v18828_v45 = vpop.f32.mrb[28].mxu0  ;;  %16336 = vmatpush3.bf16.msra.mxu1 %v958_v36  ;;  %16464 = vmatpush3.bf16.msra.mxu0 %v958_v36  ;;  %v20064_v39 = vld [vmem:[%s27025_s3 + $0x104] ss:$16 sps:$4 sm:$0xff]   ;;  %v964_v40 = vld [vmem:[#allocation2 + $0x38] sm:$0xff] }
 0x12e   :  { %v872_v46 = vpack.c.bf16 %v821_v44, %v820_v42  ;;  %v534_v47 = vadd.f32 %v18828_v45, %v21662_v41  ;;  %v525_v48 = vpop.f32.mrb[29].mxu0  ;;  %v968_v56 = vld [vmem:[#allocation2 + $0x58] sm:$0xff]  ;;  %v20022_v45 = vld [vmem:[%s27025_s3 + $0x24] ss:$16 sps:$4 sm:$0xff]   ;;  %1584 = vmatprep.mubr.bf16.mxu0 %v20064_v39 }
 0x12f   :  { %v967_v49 = vld [vmem:[#allocation2 + $0x50] sm:$0xff]  ;;  %906 = vst.msk [vmem:[#allocation2 + $0x68] sm:$0xff] %vm892_vm4, %v873_v43  ;;  %v526_v50 = vadd.f32 %v21662_v41, %v525_v48  ;;  %v18829_v51 = vpop.f32.mrb[30].mxu0 }
 0x130   :  { %905 = vst.msk [vmem:[#allocation2 + $0x60] sm:$0xff] %vm892_vm4, %v872_v46  ;;  %v762_v53 = vmul.f32 0.2, %v534_v47  ;;  %v537_v54 = vadd.f32 %v18829_v51, %v21662_v41  ;;  %v528_v55 = vpop.f32.mrb[31].mxu0  ;;  %16337 = vmatprep.subr.bf16.mxu1 %v967_v49  ;;  %16465 = vmatprep.subr.bf16.mxu0 %v967_v49  ;;  %vm698_vm14 = vcmp.ge.f32.partialorder %v534_v47, 0.0 }
 0x131   :  { %vm696_vm15 = vcmp.ge.f32.partialorder %v526_v50, 0.0  ;;  %v760_v57 = vmul.f32 0.2, %v526_v50  ;;  %v529_v58 = vadd.f32 %v21662_v41, %v528_v55  ;;  %16338 = vmatpush3.bf16.msra.mxu1 %v959_v52  ;;  %16466 = vmatpush3.bf16.msra.mxu0 %v959_v52  ;;  %v20019_v43 = vld [vmem:[%s27025_s3] ss:$16 sps:$4 sm:$0xff]  }
 0x132   :  { %vm699_vm0 = vcmp.ge.f32.partialorder %v537_v54, 0.0  ;;  %v763_v60 = vmul.f32 0.2, %v537_v54  ;;  %16339 = vmatprep.subr.bf16.mxu1 %v968_v56  ;;  %16467 = vmatprep.subr.bf16.mxu0 %v968_v56  ;;  %v826_v62 = vsel %vm698_vm14, %v534_v47, %v762_v53  ;;  %v20062_v46 = vld [vmem:[%s27025_s3 + $0x100] ss:$16 sps:$4 sm:$0xff]  }
 0x133   :  { %vm697_vm1 = vcmp.ge.f32.partialorder %v529_v58, 0.0  ;;  %v761_v61 = vmul.f32 0.2, %v529_v58  ;;  %v824_v0 = vsel %vm696_vm15, %v526_v50, %v760_v57 }
 0x134   :  { %v827_v63 = vsel %vm699_vm0, %v537_v54, %v763_v60 }
 0x135   :  { %v875_v1 = vpack.c.bf16 %v827_v63, %v826_v62  ;;  %v825_v2 = vsel %vm697_vm1, %v529_v58, %v761_v61  ;;  %v18832_v3 = vpop.f32.mrb[32].mxu0  ;;  %16340 = vmatpush3.bf16.msra.mxu1 %v960_v59  ;;  %16468 = vmatpush3.bf16.msra.mxu0 %v960_v59  ;;  %v929_v58 = vld [vmem:[%s27025_s3 + $0x20] sm:$0xff]  ;;  %v931_v59 = vld [vmem:[%s27025_s3 + $0x30] sm:$0xff] }
 0x136   :  { %v874_v4 = vpack.c.bf16 %v825_v2, %v824_v0  ;;  %v550_v5 = vadd.f32 %v18832_v3, %v21662_v41  ;;  %v541_v6 = vpop.f32.mrb[33].mxu0  ;;  %v970_v14 = vld [vmem:[#allocation2 + $0x68] sm:$0xff]  ;;  %v20068_v2 = vld [vmem:[%s27025_s3 + $0x124] ss:$16 sps:$4 sm:$0xff]  }
 0x137   :  { %v969_v7 = vld [vmem:[#allocation2 + $0x60] sm:$0xff]  ;;  %908 = vst.msk [vmem:[#allocation2 + $0x78] sm:$0xff] %vm892_vm4, %v875_v1  ;;  %v542_v8 = vadd.f32 %v21662_v41, %v541_v6  ;;  %v18833_v9 = vpop.f32.mrb[34].mxu0 }
 0x138   :  { %907 = vst.msk [vmem:[#allocation2 + $0x70] sm:$0xff] %vm892_vm4, %v874_v4  ;;  %v766_v11 = vmul.f32 0.2, %v550_v5  ;;  %v553_v12 = vadd.f32 %v18833_v9, %v21662_v41  ;;  %v544_v13 = vpop.f32.mrb[35].mxu0  ;;  %16341 = vmatprep.subr.bf16.mxu1 %v969_v7  ;;  %16469 = vmatprep.subr.bf16.mxu0 %v969_v7  ;;  %vm702_vm2 = vcmp.ge.f32.partialorder %v550_v5, 0.0  ;;  %v14390_v7 = vcombine.low %v929_v58, %v931_v59 }
 0x139   :  { %vm700_vm3 = vcmp.ge.f32.partialorder %v542_v8, 0.0  ;;  %v764_v15 = vmul.f32 0.2, %v542_v8  ;;  %v545_v16 = vadd.f32 %v21662_v41, %v544_v13  ;;  %16342 = vmatpush3.bf16.msra.mxu1 %v961_v10  ;;  %16470 = vmatpush3.bf16.msra.mxu0 %v961_v10  ;;  %v20024_v4 = vld [vmem:[%s27025_s3 + $0x44] ss:$16 sps:$4 sm:$0xff]  }
 0x13a   :  { %vm703_vm5 = vcmp.ge.f32.partialorder %v553_v12, 0.0  ;;  %v767_v18 = vmul.f32 0.2, %v553_v12  ;;  %16343 = vmatprep.subr.bf16.mxu1 %v970_v14  ;;  %16471 = vmatprep.subr.bf16.mxu0 %v970_v14  ;;  %v830_v20 = vsel %vm702_vm2, %v550_v5, %v766_v11  ;;  %v21760_v13 = vld [vmem:[%s27026_s2] ss:$0 sm:$0xff] }
 0x13b   :  { %vm701_vm6 = vcmp.ge.f32.partialorder %v545_v16, 0.0  ;;  %v765_v19 = vmul.f32 0.2, %v545_v16  ;;  %v828_v22 = vsel %vm700_vm3, %v542_v8, %v764_v15 }
 0x13c   :  { %v831_v21 = vsel %vm703_vm5, %v553_v12, %v767_v18  ;;  %v933_v18 = vld [vmem:[%s27025_s3 + $0x40] sm:$0xff] }
 0x13d   :  { %v877_v23 = vpack.c.bf16 %v831_v21, %v830_v20  ;;  %v829_v24 = vsel %vm701_vm6, %v545_v16, %v765_v19  ;;  %v18836_v25 = vpop.f32.mrb[36].mxu0  ;;  %16344 = vmatpush3.bf16.msra.mxu1 %v962_v17  ;;  %16472 = vmatpush3.bf16.msra.mxu0 %v962_v17  ;;  %v935_v19 = vld [vmem:[%s27025_s3 + $0x50] sm:$0xff] }
 0x13e   :  { %v876_v26 = vpack.c.bf16 %v829_v24, %v828_v22  ;;  %v566_v27 = vadd.f32 %v18836_v25, %v21662_v41  ;;  %v557_v28 = vpop.f32.mrb[37].mxu0  ;;  %v972_v33 = vld [vmem:[#allocation2 + $0x78] sm:$0xff] }
 0x13f   :  { %v971_v29 = vld [vmem:[#allocation2 + $0x70] sm:$0xff]  ;;  %910 = vst.msk [vmem:[#allocation2 + $0x88] sm:$0xff] %vm892_vm4, %v877_v23  ;;  %v558_v30 = vadd.f32 %v21662_v41, %v557_v28  ;;  %v18837_v31 = vpop.f32.mrb[38].mxu0 }
 0x140   :  { %909 = vst.msk [vmem:[#allocation2 + $0x80] sm:$0xff] %vm892_vm4, %v876_v26  ;;  %v770_v34 = vmul.f32 0.2, %v566_v27  ;;  %v569_v35 = vadd.f32 %v18837_v31, %v21662_v41  ;;  %v560_v36 = vpop.f32.mrb[39].mxu0  ;;  %16345 = vmatprep.subr.bf16.mxu1 %v971_v29  ;;  %16473 = vmatprep.subr.bf16.mxu0 %v971_v29  ;;  %vm706_vm7 = vcmp.ge.f32.partialorder %v566_v27, 0.0  ;;  %v14394_v31 = vcombine.low %v933_v18, %v935_v19 }
 0x141   :  { %v768_v37 = vmul.f32 0.2, %v558_v30  ;;  %v561_v38 = vadd.f32 %v21662_v41, %v560_v36  ;;  %16346 = vmatpush3.bf16.msra.mxu1 %v963_v32  ;;  %16474 = vmatpush3.bf16.msra.mxu0 %v963_v32  ;;  %vm704_vm8 = vcmp.ge.f32.partialorder %v558_v30, 0.0  ;;  %v20074_v26 = vld [vmem:[%s27025_s3 + $0x144] ss:$16 sps:$4 sm:$0xff]  }
 0x142   :  { %vm707_vm9 = vcmp.ge.f32.partialorder %v569_v35, 0.0  ;;  %v771_v42 = vmul.f32 0.2, %v569_v35  ;;  %16347 = vmatprep.subr.bf16.mxu1 %v972_v33  ;;  %16475 = vmatprep.subr.bf16.mxu0 %v972_v33  ;;  %v834_v47 = vsel %vm706_vm7, %v566_v27, %v770_v34  ;;  %v20026_v28 = vld [vmem:[%s27025_s3 + $0x64] ss:$16 sps:$4 sm:$0xff]  }
 0x143   :  { %vm705_vm10 = vcmp.ge.f32.partialorder %v561_v38, 0.0  ;;  %v769_v44 = vmul.f32 0.2, %v561_v38  ;;  %v832_v49 = vsel %vm704_vm8, %v558_v30, %v768_v37  ;;  %v20076_v32 = vld [vmem:[%s27025_s3 + $0x140] ss:$16 sps:$4 sm:$0xff]  }
 0x144   :  { %v835_v48 = vsel %vm707_vm9, %v569_v35, %v771_v42 }
 0x145   :  { %v879_v50 = vpack.c.bf16 %v835_v48, %v834_v47  ;;  %v833_v51 = vsel %vm705_vm10, %v561_v38, %v769_v44  ;;  %v18840_v52 = vpop.f32.mrb[40].mxu0  ;;  %16348 = vmatpush3.bf16.msra.mxu1 %v964_v40  ;;  %16476 = vmatpush3.bf16.msra.mxu0 %v964_v40  ;;  %v939_v44 = vld [vmem:[%s27025_s3 + $0x70] sm:$0xff] }
 0x146   :  { %v878_v53 = vpack.c.bf16 %v833_v51, %v832_v49  ;;  %v582_v54 = vadd.f32 %v18840_v52, %v21662_v41  ;;  %v573_v55 = vpop.f32.mrb[41].mxu0  ;;  %v20080_v51 = vld [vmem:[%s27025_s3 + $0x164] ss:$16 sps:$4 sm:$0xff]  }
 0x147   :  { %912 = vst.msk [vmem:[#allocation2 + $0x98] sm:$0xff] %vm892_vm4, %v879_v50  ;;  %v574_v56 = vadd.f32 %v21662_v41, %v573_v55  ;;  %v18841_v57 = vpop.f32.mrb[42].mxu0 }
 0x148   :  { %911 = vst.msk [vmem:[#allocation2 + $0x90] sm:$0xff] %vm892_vm4, %v878_v53  ;;  %vm710_vm11 = vcmp.ge.f32.partialorder %v582_v54, 0.0  ;;  %v774_v60 = vmul.f32 0.2, %v582_v54  ;;  %v585_v61 = vadd.f32 %v18841_v57, %v21662_v41  ;;  %v576_v62 = vpop.f32.mrb[43].mxu0  ;;  %1182 = vmatmul.mubr.bf16.vlgmr.msra.gmra.mrb[0].mxu1 %v20019_v43  ;;  %1585 = vmatmul.mubr.bf16.vlgmr.msra.gmra.mrb[64].mxu0 %v20062_v46  ;;  %v937_v43 = vld [vmem:[%s27025_s3 + $0x60] sm:$0xff] }
 0x149   :  { %vm708_vm12 = vcmp.ge.f32.partialorder %v574_v56, 0.0  ;;  %v772_v63 = vmul.f32 0.2, %v574_v56  ;;  %v577_v0 = vadd.f32 %v21662_v41, %v576_v62  ;;  %1189 = vmatprep.mubr.bf16.mxu1 %v20022_v45  ;;  %1592 = vmatprep.mubr.bf16.mxu0 %v20068_v2  ;;  %v20070_v41 = vld [vmem:[%s27025_s3 + $0x120] ss:$16 sps:$4 sm:$0xff]  }
 0x14a   :  { %vm711_vm13 = vcmp.ge.f32.partialorder %v585_v61, 0.0  ;;  %v775_v1 = vmul.f32 0.2, %v585_v61  ;;  %v838_v5 = vsel %vm710_vm11, %v582_v54, %v774_v60  ;;  %v20028_v53 = vld [vmem:[%s27025_s3 + $0x84] ss:$16 sps:$4 sm:$0xff]  }
 0x14b   :  { %vm709_vm14 = vcmp.ge.f32.partialorder %v577_v0, 0.0  ;;  %v773_v3 = vmul.f32 0.2, %v577_v0  ;;  %v836_v8 = vsel %vm708_vm12, %v574_v56, %v772_v63  ;;  %v14398_v56 = vcombine.low %v937_v43, %v939_v44  ;;  %v20082_v57 = vld [vmem:[%s27025_s3 + $0x160] ss:$16 sps:$4 sm:$0xff]  }
 0x14c   :  { %v839_v6 = vsel %vm711_vm13, %v585_v61, %v775_v1 }
 0x14d   :  { %v881_v9 = vpack.c.bf16 %v839_v6, %v838_v5  ;;  %v837_v10 = vsel %vm709_vm14, %v577_v0, %v773_v3  ;;  %v18844_v11 = vpop.f32.mrb[44].mxu0  ;;  %v941_v3 = vld [vmem:[%s27025_s3 + $0x80] sm:$0xff] }
 0x14e   :  { %v880_v12 = vpack.c.bf16 %v837_v10, %v836_v8  ;;  %v598_v14 = vadd.f32 %v21760_v13, %v18844_v11  ;;  %v589_v15 = vpop.f32.mrb[45].mxu0  ;;  %v20086_v10 = vld [vmem:[%s27025_s3 + $0x184] ss:$16 sps:$4 sm:$0xff]  }
 0x14f   :  { %914 = vst.msk [vmem:[#allocation2 + $0xa8] sm:$0xff] %vm892_vm4, %v881_v9  ;;  %v590_v16 = vadd.f32 %v21760_v13, %v589_v15  ;;  %v18845_v17 = vpop.f32.mrb[46].mxu0 }
 0x150   :  { %913 = vst.msk [vmem:[#allocation2 + $0xa0] sm:$0xff] %vm892_vm4, %v880_v12  ;;  %vm714_vm15 = vcmp.ge.f32.partialorder %v598_v14, 0.0  ;;  %v778_v20 = vmul.f32 0.2, %v598_v14  ;;  %v601_v21 = vadd.f32 %v21760_v13, %v18845_v17  ;;  %v592_v22 = vpop.f32.mrb[47].mxu0  ;;  %1190 = vmatmul.mubr.bf16.gmra.mrb[4].mxu1 %v14390_v7  ;;  %1593 = vmatmul.mubr.bf16.gmra.mrb[68].mxu0 %v20070_v41 }
 0x151   :  { %vm712_vm0 = vcmp.ge.f32.partialorder %v590_v16, 0.0  ;;  %v776_v23 = vmul.f32 0.2, %v590_v16  ;;  %v593_v24 = vadd.f32 %v21760_v13, %v592_v22  ;;  %1197 = vmatprep.mubr.bf16.mxu1 %v20024_v4  ;;  %1600 = vmatprep.mubr.bf16.mxu0 %v20074_v26  ;;  %v943_v4 = vld [vmem:[%s27025_s3 + $0x90] sm:$0xff] }
 0x152   :  { %vm715_vm1 = vcmp.ge.f32.partialorder %v601_v21, 0.0  ;;  %v779_v25 = vmul.f32 0.2, %v601_v21  ;;  %v842_v29 = vsel %vm714_vm15, %v598_v14, %v778_v20  ;;  %v14402_v15 = vcombine.low %v941_v3, %v943_v4  ;;  %v976_v3 = vld [vmem:[#allocation2 + $0x98] sm:$0xff] }
 0x153   :  { %vm713_vm2 = vcmp.ge.f32.partialorder %v593_v24, 0.0  ;;  %v777_v27 = vmul.f32 0.2, %v593_v24  ;;  %v840_v33 = vsel %vm712_vm0, %v590_v16, %v776_v23  ;;  %v20030_v16 = vld [vmem:[%s27025_s3 + $0xa4] ss:$16 sps:$4 sm:$0xff]  }
 0x154   :  { %v843_v30 = vsel %vm715_vm1, %v601_v21, %v779_v25 }
 0x155   :  { %v883_v34 = vpack.c.bf16 %v843_v30, %v842_v29  ;;  %v841_v35 = vsel %vm713_vm2, %v593_v24, %v777_v27  ;;  %v18848_v36 = vpop.f32.mrb[48].mxu0  ;;  %v20088_v24 = vld [vmem:[%s27025_s3 + $0x180] ss:$16 sps:$4 sm:$0xff]  }
 0x156   :  { %v882_v37 = vpack.c.bf16 %v841_v35, %v840_v33  ;;  %v614_v38 = vadd.f32 %v21760_v13, %v18848_v36  ;;  %v605_v39 = vpop.f32.mrb[49].mxu0  ;;  %v21835_v29 = vld [vmem:[#allocation2 + $0x80] sm:$0xff] }
 0x157   :  { %916 = vst.msk [vmem:[#allocation2 + $0xb8] sm:$0xff] %vm892_vm4, %v883_v34  ;;  %v606_v40 = vadd.f32 %v21760_v13, %v605_v39  ;;  %v18849_v42 = vpop.f32.mrb[50].mxu0  ;;  %v20092_v33 = vld [vmem:[%s27025_s3 + $0x1a4] ss:$16 sps:$4 sm:$0xff]   ;;  %v21851_v39 = vld [vmem:[#allocation2 + $0x88] sm:$0xff] }
 0x158   :  { %915 = vst.msk [vmem:[#allocation2 + $0xb0] sm:$0xff] %vm892_vm4, %v882_v37  ;;  %vm718_vm3 = vcmp.ge.f32.partialorder %v614_v38, 0.0  ;;  %v782_v45 = vmul.f32 0.2, %v614_v38  ;;  %v617_v46 = vadd.f32 %v21760_v13, %v18849_v42  ;;  %v608_v47 = vpop.f32.mrb[51].mxu0  ;;  %1198 = vmatmul.mubr.bf16.gmra.mrb[8].mxu1 %v14394_v31  ;;  %1601 = vmatmul.mubr.bf16.gmra.mrb[72].mxu0 %v20076_v32  ;;  %v947_v37 = vld [vmem:[%s27025_s3 + $0xb0] sm:$0xff] }
 0x159   :  { %vm716_vm5 = vcmp.ge.f32.partialorder %v606_v40, 0.0  ;;  %v780_v48 = vmul.f32 0.2, %v606_v40  ;;  %v609_v49 = vadd.f32 %v21760_v13, %v608_v47  ;;  %1205 = vmatprep.mubr.bf16.mxu1 %v20026_v28  ;;  %1608 = vmatprep.mubr.bf16.mxu0 %v20080_v51  ;;  %v945_v28 = vld [vmem:[%s27025_s3 + $0xa0] sm:$0xff] }
 0x15a   :  { %vm719_vm6 = vcmp.ge.f32.partialorder %v617_v46, 0.0  ;;  %v783_v50 = vmul.f32 0.2, %v617_v46  ;;  %v846_v54 = vsel %vm718_vm3, %v614_v38, %v782_v45  ;;  %v20032_v42 = vld [vmem:[%s27025_s3 + $0xc4] ss:$16 sps:$4 sm:$0xff]   ;;  %v14406_v45 = vcombine.low %v945_v28, %v947_v37 }
 0x15b   :  { %vm717_vm7 = vcmp.ge.f32.partialorder %v609_v49, 0.0  ;;  %v781_v52 = vmul.f32 0.2, %v609_v49  ;;  %v844_v58 = vsel %vm716_vm5, %v606_v40, %v780_v48  ;;  %v20044_v28 = vld [vmem:[%s27025_s3 + $0x4c] ss:$16 sps:$4 sm:$0xff]  }
 0x15c   :  { %v847_v55 = vsel %vm719_vm6, %v617_v46, %v783_v50  ;;  %v20056_v37 = vld [vmem:[%s27025_s3 + $0xcc] ss:$16 sps:$4 sm:$0xff]  }
 0x15d   :  { %v885_v59 = vpack.c.bf16 %v847_v55, %v846_v54  ;;  %v845_v60 = vsel %vm717_vm7, %v609_v49, %v781_v52  ;;  %v18852_v61 = vpop.f32.mrb[52].mxu0 }
 0x15e   :  { %v884_v62 = vpack.c.bf16 %v845_v60, %v844_v58  ;;  %v630_v63 = vadd.f32 %v21760_v13, %v18852_v61  ;;  %v621_v0 = vpop.f32.mrb[53].mxu0  ;;  %v20098_v61 = vld [vmem:[%s27025_s3 + $0x1c4] ss:$16 sps:$4 sm:$0xff]  }
 0x15f   :  { %918 = vst.msk [vmem:[#allocation2 + $0xc8] sm:$0xff] %vm892_vm4, %v885_v59  ;;  %v622_v1 = vadd.f32 %v21760_v13, %v621_v0  ;;  %v18853_v2 = vpop.f32.mrb[54].mxu0 }
 0x160   :  { %917 = vst.msk [vmem:[#allocation2 + $0xc0] sm:$0xff] %vm892_vm4, %v884_v62  ;;  %vm722_vm8 = vcmp.ge.f32.partialorder %v630_v63, 0.0  ;;  %v786_v5 = vmul.f32 0.2, %v630_v63  ;;  %v633_v6 = vadd.f32 %v21760_v13, %v18853_v2  ;;  %v624_v7 = vpop.f32.mrb[55].mxu0  ;;  %1206 = vmatmul.mubr.bf16.gmra.mrb[12].mxu1 %v14398_v56  ;;  %1609 = vmatmul.mubr.bf16.gmra.mrb[76].mxu0 %v20082_v57  ;;  %v21866_v57 = vld [vmem:[#allocation2 + $0x90] sm:$0xff] }
 0x161   :  { %vm720_vm9 = vcmp.ge.f32.partialorder %v622_v1, 0.0  ;;  %v784_v41 = vmul.f32 0.2, %v622_v1  ;;  %v625_v8 = vadd.f32 %v21760_v13, %v624_v7  ;;  %1213 = vmatprep.mubr.bf16.mxu1 %v20028_v53  ;;  %1616 = vmatprep.mubr.bf16.mxu0 %v20086_v10  ;;  %v20094_v53 = vld [vmem:[%s27025_s3 + $0x1a0] ss:$16 sps:$4 sm:$0xff]  }
 0x162   :  { %vm723_vm10 = vcmp.ge.f32.partialorder %v633_v6, 0.0  ;;  %v787_v9 = vmul.f32 0.2, %v633_v6  ;;  %v850_v12 = vsel %vm722_vm8, %v630_v63, %v786_v5  ;;  %v20034_v2 = vld [vmem:[%s27025_s3 + $0xc0] ss:$16 sps:$4 sm:$0xff]  }
 0x163   :  { %vm721_vm11 = vcmp.ge.f32.partialorder %v625_v8, 0.0  ;;  %v785_v11 = vmul.f32 0.2, %v625_v8  ;;  %v848_v17 = vsel %vm720_vm9, %v622_v1, %v784_v41  ;;  %v20100_v10 = vld [vmem:[%s27025_s3 + $0x1c0] ss:$16 sps:$4 sm:$0xff]  }
 0x164   :  { %v851_v14 = vsel %vm723_vm10, %v633_v6, %v787_v9 }
 0x165   :  { %v887_v18 = vpack.c.bf16 %v851_v14, %v850_v12  ;;  %v849_v19 = vsel %vm721_vm11, %v625_v8, %v785_v11  ;;  %v18856_v20 = vpop.f32.mrb[56].mxu0  ;;  %v977_v12 = vld [vmem:[#allocation2 + $0xa0] sm:$0xff] }
 0x166   :  { %v886_v21 = vpack.c.bf16 %v849_v19, %v848_v17  ;;  %v646_v22 = vadd.f32 %v21760_v13, %v18856_v20  ;;  %v637_v23 = vpop.f32.mrb[57].mxu0  ;;  %v21843_v34 = vld [vmem:[#allocation2 + $0xc8] sm:$0xff]  ;;  %v20104_v14 = vld [vmem:[%s27025_s3 + $0x1e4] ss:$16 sps:$4 sm:$0xff]   ;;  %v20037_v17 = vld [vmem:[%s27025_s3 + $0xe0] ss:$16 sps:$4 sm:$0xff]  }
 0x167   :  { %v21828_v25 = vld [vmem:[#allocation2 + $0xc0] sm:$0xff]  ;;  %920 = vst.msk [vmem:[#allocation2 + $0xd8] sm:$0xff] %vm892_vm4, %v887_v18  ;;  %v638_v26 = vadd.f32 %v21760_v13, %v637_v23  ;;  %v18857_v27 = vpop.f32.mrb[58].mxu0  ;;  %v20040_v18 = vld [vmem:[%s27025_s3 + $0xc] ss:$16 sps:$4 sm:$0xff]  }
 0x168   :  { %919 = vst.msk [vmem:[#allocation2 + $0xd0] sm:$0xff] %vm892_vm4, %v886_v21  ;;  %v790_v30 = vmul.f32 0.2, %v646_v22  ;;  %v649_v31 = vadd.f32 %v21760_v13, %v18857_v27  ;;  %v640_v32 = vpop.f32.mrb[59].mxu0  ;;  %1214 = vmatmul.mubr.bf16.gmra.mrb[16].mxu1 %v14402_v15  ;;  %16397 = vmatprep.subr.bf16.mxu1 %v21828_v25  ;;  %vm726_vm12 = vcmp.ge.f32.partialorder %v646_v22, 0.0  ;;  %v21905_v21 = vld [vmem:[#allocation2 + $0xb0] sm:$0xff] }
 0x169   :  { %v788_v35 = vmul.f32 0.2, %v638_v26  ;;  %v641_v36 = vadd.f32 %v21760_v13, %v640_v32  ;;  %16398 = vmatpush3.bf16.msra.mxu1 %v21835_v29  ;;  %1221 = vmatprep.mubr.bf16.mxu1 %v20030_v16  ;;  %vm724_vm13 = vcmp.ge.f32.partialorder %v638_v26, 0.0  ;;  %v978_v16 = vld [vmem:[#allocation2 + $0xa8] sm:$0xff]  ;;  %v20106_v19 = vld [vmem:[%s27025_s3 + $0x1e0] ss:$16 sps:$4 sm:$0xff]  }
 0x16a   :  { %vm727_vm14 = vcmp.ge.f32.partialorder %v649_v31, 0.0  ;;  %v791_v38 = vmul.f32 0.2, %v649_v31  ;;  %16399 = vmatprep.subr.bf16.mxu1 %v21843_v34  ;;  %1617 = vmatmul.mubr.bf16.gmra.mrb[80].mxu0 %v20088_v24  ;;  %v854_v43 = vsel %vm726_vm12, %v646_v22, %v790_v30  ;;  %v21911_v23 = vld [vmem:[#allocation2 + $0xb8] sm:$0xff] }
 0x16b   :  { %vm725_vm15 = vcmp.ge.f32.partialorder %v641_v36, 0.0  ;;  %v789_v40 = vmul.f32 0.2, %v641_v36  ;;  %1624 = vmatprep.mubr.bf16.mxu0 %v20092_v33  ;;  %v852_v46 = vsel %vm724_vm13, %v638_v26, %v788_v35  ;;  %v20038_v24 = vld [vmem:[%s27025_s3 + $0x8] ss:$16 sps:$4 sm:$0xff]   ;;  %v21956_v35 = vld [vmem:[#allocation2 + $0x40] sm:$0xff] }
 0x16c   :  { %v855_v44 = vsel %vm727_vm14, %v649_v31, %v791_v38  ;;  %v20041_v26 = vld [vmem:[%s27025_s3 + $0x2c] ss:$16 sps:$4 sm:$0xff]   ;;  %v20043_v27 = vld [vmem:[%s27025_s3 + $0x28] ss:$16 sps:$4 sm:$0xff]  }
 0x16d   :  { %v889_v47 = vpack.c.bf16 %v855_v44, %v854_v43  ;;  %v853_v48 = vsel %vm725_vm15, %v641_v36, %v789_v40  ;;  %v18860_v49 = vpop.f32.mrb[60].mxu0  ;;  %16400 = vmatpush3.bf16.msra.mxu1 %v21851_v39  ;;  %v20047_v30 = vld [vmem:[%s27025_s3 + $0x6c] ss:$16 sps:$4 sm:$0xff]   ;;  %v20049_v31 = vld [vmem:[%s27025_s3 + $0x68] ss:$16 sps:$4 sm:$0xff]  }
 0x16e   :  { %v888_v50 = vpack.c.bf16 %v853_v48, %v852_v46  ;;  %v662_v51 = vadd.f32 %v21760_v13, %v18860_v49  ;;  %v653_v52 = vpop.f32.mrb[61].mxu0  ;;  %v21874_v62 = vld [vmem:[#allocation2 + $0xd8] sm:$0xff]  ;;  %v21275_v46 = vld [vmem:[#allocation2 + $0x48] sm:$0xff] }
 0x16f   :  { %v21862_v54 = vld [vmem:[#allocation2 + $0xd0] sm:$0xff]  ;;  %922 = vst.msk [vmem:[#allocation2 + $0xe8] sm:$0xff] %vm892_vm4, %v889_v47  ;;  %v654_v55 = vadd.f32 %v21760_v13, %v653_v52  ;;  %v18861_v56 = vpop.f32.mrb[62].mxu0  ;;  %v20050_v32 = vld [vmem:[%s27025_s3 + $0x8c] ss:$16 sps:$4 sm:$0xff]  }
 0x170   :  { %921 = vst.msk [vmem:[#allocation2 + $0xe0] sm:$0xff] %vm892_vm4, %v888_v50  ;;  %v794_v58 = vmul.f32 0.2, %v662_v51  ;;  %v665_v59 = vadd.f32 %v21760_v13, %v18861_v56  ;;  %v656_v60 = vpop.f32.mrb[63].mxu0  ;;  %1222 = vmatmul.mubr.bf16.gmra.mrb[20].mxu1 %v14406_v45  ;;  %16401 = vmatprep.subr.bf16.mxu1 %v21862_v54  ;;  %vm730_vm0 = vcmp.ge.f32.partialorder %v662_v51, 0.0  ;;  %v21274_v45 = vld [vmem:[#allocation2] sm:$0xff] }
 0x171   :  { %v792_v63 = vmul.f32 0.2, %v654_v55  ;;  %v657_v0 = vadd.f32 %v21760_v13, %v656_v60  ;;  %16402 = vmatpush3.bf16.msra.mxu1 %v21866_v57  ;;  %1229 = vmatprep.mubr.bf16.mxu1 %v20032_v42  ;;  %vm728_vm1 = vcmp.ge.f32.partialorder %v654_v55, 0.0  ;;  %v20035_v13 = vld [vmem:[%s27025_s3 + $0xe4] ss:$16 sps:$4 sm:$0xff]   ;;  %v21276_v48 = vld [vmem:[#allocation2 + $0x8] sm:$0xff] }
 0x172   :  { %vm731_vm2 = vcmp.ge.f32.partialorder %v665_v59, 0.0  ;;  %v795_v1 = vmul.f32 0.2, %v665_v59  ;;  %16403 = vmatprep.subr.bf16.mxu1 %v21874_v62  ;;  %1625 = vmatmul.mubr.bf16.gmra.mrb[84].mxu0 %v20094_v53  ;;  %v858_v5 = vsel %vm730_vm0, %v662_v51, %v794_v58  ;;  %v20052_v33 = vld [vmem:[%s27025_s3 + $0x88] ss:$16 sps:$4 sm:$0xff]   ;;  %v21277_v50 = vld [vmem:[#allocation2 + $0x50] sm:$0xff] }
 0x173   :  { %vm729_vm3 = vcmp.ge.f32.partialorder %v657_v0, 0.0  ;;  %v793_v4 = vmul.f32 0.2, %v657_v0  ;;  %1632 = vmatprep.mubr.bf16.mxu0 %v20098_v61  ;;  %v856_v7 = vsel %vm728_vm1, %v654_v55, %v792_v63  ;;  %v20055_v36 = vld [vmem:[%s27025_s3 + $0xa8] ss:$16 sps:$4 sm:$0xff]   ;;  %v21278_v51 = vld [vmem:[#allocation2 + $0x10] sm:$0xff] }
 0x174   :  { %v859_v6 = vsel %vm731_vm2, %v665_v59, %v795_v1  ;;  %v20058_v38 = vld [vmem:[%s27025_s3 + $0xc8] ss:$16 sps:$4 sm:$0xff]   ;;  %v20067_v42 = vld [vmem:[%s27025_s3 + $0x10c] ss:$16 sps:$4 sm:$0xff]   ;;  %v21281_v56 = vld [vmem:[#allocation2 + $0x60] sm:$0xff] }
 0x175   :  { %v891_v41 = vpack.c.bf16 %v859_v6, %v858_v5  ;;  %v857_v8 = vsel %vm729_vm3, %v657_v0, %v793_v4  ;;  %16404 = vmatpush3.bf16.msra.mxu1 %v976_v3  ;;  %v20061_v40 = vld [vmem:[%s27025_s3 + $0xe8] ss:$16 sps:$4 sm:$0xff]   ;;  %v20071_v44 = vld [vmem:[%s27025_s3 + $0x12c] ss:$16 sps:$4 sm:$0xff]   ;;  %v22001_v63 = vld [vmem:[#allocation2 + $0x30] sm:$0xff] }
 0x176   :  { %v890_v9 = vpack.c.bf16 %v857_v8, %v856_v7  ;;  %v986_v15 = vld [vmem:[#allocation2 + $0xe8] sm:$0xff]  ;;  %v21279_v52 = vld [vmem:[#allocation2 + $0x58] sm:$0xff]  ;;  %v20110_v8 = vld [vmem:[%s27025_s3 + $0x200] ss:$16 sps:$4 sm:$0xff]  }
 0x177   :  { %v985_v11 = vld [vmem:[#allocation2 + $0xe0] sm:$0xff]  ;;  %924 = vst.msk [vmem:[#allocation2 + $0xf8] sm:$0xff] %vm892_vm4, %v891_v41  ;;  %v20065_v43 = vld [vmem:[%s27025_s3 + $0x108] ss:$16 sps:$4 sm:$0xff]   ;;  %v20077_v49 = vld [vmem:[%s27025_s3 + $0x14c] ss:$16 sps:$4 sm:$0xff]  }
 0x178   :  { %923 = vst.msk [vmem:[#allocation2 + $0xf0] sm:$0xff] %vm892_vm4, %v890_v9  ;;  %1230 = vmatmul.mubr.bf16.gmra.mrb[24].mxu1 %v20034_v2  ;;  %16405 = vmatprep.subr.bf16.mxu1 %v985_v11  ;;  %v20073_v47 = vld [vmem:[%s27025_s3 + $0x128] ss:$16 sps:$4 sm:$0xff]   ;;  %v20083_v55 = vld [vmem:[%s27025_s3 + $0x16c] ss:$16 sps:$4 sm:$0xff]  }
 0x179   :  { %16406 = vmatpush3.bf16.msra.mxu1 %v977_v12  ;;  %1237 = vmatprep.mubr.bf16.mxu1 %v20035_v13  ;;  %v20079_v53 = vld [vmem:[%s27025_s3 + $0x148] ss:$16 sps:$4 sm:$0xff]   ;;  %v20089_v61 = vld [vmem:[%s27025_s3 + $0x18c] ss:$16 sps:$4 sm:$0xff]   ;;  %v20112_v41 = vld [vmem:[%s27025_s3 + $0x204] ss:$16 sps:$4 sm:$0xff]  }
 0x17a   :  { %16407 = vmatprep.subr.bf16.mxu1 %v986_v15  ;;  %1633 = vmatmul.mubr.bf16.gmra.mrb[88].mxu0 %v20100_v10  ;;  %v21283_v58 = vld [vmem:[#allocation2 + $0x68] sm:$0xff]  ;;  %v22004_v0 = vld [vmem:[#allocation2 + $0x78] sm:$0xff]  ;;  %v20113_v9 = vld [vmem:[%s27025_s3 + $0x224] ss:$16 sps:$4 sm:$0xff]  }
 0x17b   :  { %1640 = vmatprep.mubr.bf16.mxu0 %v20104_v14  ;;  %v20085_v59 = vld [vmem:[%s27025_s3 + $0x168] ss:$16 sps:$4 sm:$0xff]   ;;  %v20101_v13 = vld [vmem:[%s27025_s3 + $0x1cc] ss:$16 sps:$4 sm:$0xff]   ;;  %v20115_v10 = vld [vmem:[%s27025_s3 + $0x220] ss:$16 sps:$4 sm:$0xff]  }
 0x17c   :  { %v21284_v60 = vld [vmem:[#allocation2 + $0x28] sm:$0xff]  ;;  %v22010_v2 = vld [vmem:[#allocation2 + $0x38] sm:$0xff]  ;;  %v20119_v14 = vld [vmem:[%s27025_s3 + $0x264] ss:$16 sps:$4 sm:$0xff]  }
 0x17d   :  { %16408 = vmatpush3.bf16.msra.mxu1 %v978_v16  ;;  %v20091_v1 = vld [vmem:[%s27025_s3 + $0x188] ss:$16 sps:$4 sm:$0xff]   ;;  %v20107_v6 = vld [vmem:[%s27025_s3 + $0x1ec] ss:$16 sps:$4 sm:$0xff]  }
 0x17e   :  { %v21907_v22 = vld [vmem:[#allocation2 + $0xf8] sm:$0xff] }
 0x17f   :  { %v21903_v20 = vld [vmem:[#allocation2 + $0xf0] sm:$0xff]  ;;  %v20097_v4 = vld [vmem:[%s27025_s3 + $0x1a8] ss:$16 sps:$4 sm:$0xff]  }
 0x180   :  { %1238 = vmatmul.mubr.bf16.gmra.mrb[28].mxu1 %v20037_v17  ;;  %16409 = vmatprep.subr.bf16.mxu1 %v21903_v20  ;;  %v20103_v5 = vld [vmem:[%s27025_s3 + $0x1c8] ss:$16 sps:$4 sm:$0xff]   ;;  %v20122_v17 = vld [vmem:[%s27025_s3 + $0x284] ss:$16 sps:$4 sm:$0xff]  }
 0x181   :  { %16410 = vmatpush3.bf16.msra.mxu1 %v21905_v21  ;;  %1278 = vmatprep.mubr.bf16.mxu1 %v20040_v18  ;;  %v20109_v7 = vld [vmem:[%s27025_s3 + $0x1e8] ss:$16 sps:$4 sm:$0xff]  }
 0x182   :  { %16411 = vmatprep.subr.bf16.mxu1 %v21907_v22  ;;  %1641 = vmatmul.mubr.bf16.gmra.mrb[92].mxu0 %v20106_v19 }
 0x185   :  { %16412 = vmatpush3.bf16.msra.mxu1 %v21911_v23 }
 0x186   :  { %16525 = vmatprep.subr.bf16.mxu1 %v21828_v25 }
 0x188   :  { %1279 = vmatmul.mubr.bf16.vlgmr.msra.gmra.mrb[32].mxu1 %v20038_v24 }
 0x189   :  { %16526 = vmatpush3.bf16.msra.mxu1 %v21835_v29  ;;  %1286 = vmatprep.mubr.bf16.mxu1 %v20041_v26  ;;  %v20046_v29 = vld [vmem:[%s27025_s3 + $0x48] ss:$16 sps:$4 sm:$0xff]   ;;  %v20167_v26 = vld [vmem:[%s27027_s4 + $0x20] sm:$0xff]  }
 0x18a   :  { %16527 = vmatprep.subr.bf16.mxu1 %v21843_v34  ;;  %v20053_v34 = vld [vmem:[%s27025_s3 + $0xac] ss:$16 sps:$4 sm:$0xff]   ;;  %18862 = vmatprep.subr.bf16.mxu0 %v20167_v26 }
 0x18b   :  { %18863 = vmatpush3.bf16.msra.mxu0 %v20167_v26 }
 0x18d   :  { %16528 = vmatpush3.bf16.msra.mxu1 %v21851_v39  ;;  %v20059_v39 = vld [vmem:[%s27025_s3 + $0xec] ss:$16 sps:$4 sm:$0xff]  }
 0x18e   :  { %16529 = vmatprep.subr.bf16.mxu1 %v21862_v54  ;;  %v21280_v54 = vld [vmem:[#allocation2 + $0x18] sm:$0xff] }
 0x190   :  { %1287 = vmatmul.mubr.bf16.gmra.mrb[36].mxu1 %v20043_v27 }
 0x191   :  { %16530 = vmatpush3.bf16.msra.mxu1 %v21866_v57  ;;  %1294 = vmatprep.mubr.bf16.mxu1 %v20044_v28  ;;  %v21282_v57 = vld [vmem:[#allocation2 + $0x20] sm:$0xff] }
 0x192   :  { %16531 = vmatprep.subr.bf16.mxu1 %v21874_v62  ;;  %v21285_v62 = vld [vmem:[#allocation2 + $0x70] sm:$0xff] }
 0x195   :  { %16532 = vmatpush3.bf16.msra.mxu1 %v976_v3  ;;  %v20095_v3 = vld [vmem:[%s27025_s3 + $0x1ac] ss:$16 sps:$4 sm:$0xff]  }
 0x196   :  { %16533 = vmatprep.subr.bf16.mxu1 %v985_v11  ;;  %v20116_v11 = vld [vmem:[%s27025_s3 + $0x244] ss:$16 sps:$4 sm:$0xff]  }
 0x198   :  { %1295 = vmatmul.mubr.bf16.gmra.mrb[40].mxu1 %v20046_v29 }
 0x199   :  { %16534 = vmatpush3.bf16.msra.mxu1 %v977_v12  ;;  %1302 = vmatprep.mubr.bf16.mxu1 %v20047_v30  ;;  %v20118_v12 = vld [vmem:[%s27025_s3 + $0x240] ss:$16 sps:$4 sm:$0xff]  }
 0x19a   :  { %16535 = vmatprep.subr.bf16.mxu1 %v986_v15  ;;  %v20121_v15 = vld [vmem:[%s27025_s3 + $0x260] ss:$16 sps:$4 sm:$0xff]  }
 0x19d   :  { %16536 = vmatpush3.bf16.msra.mxu1 %v978_v16 }
 0x19e   :  { %16537 = vmatprep.subr.bf16.mxu1 %v21903_v20 }
 0x1a0   :  { %1303 = vmatmul.mubr.bf16.gmra.mrb[44].mxu1 %v20049_v31 }
 0x1a1   :  { %16538 = vmatpush3.bf16.msra.mxu1 %v21905_v21  ;;  %1310 = vmatprep.mubr.bf16.mxu1 %v20050_v32 }
 0x1a2   :  { %16539 = vmatprep.subr.bf16.mxu1 %v21907_v22 }
 0x1a5   :  { %16540 = vmatpush3.bf16.msra.mxu1 %v21911_v23 }
 0x1a6   :  { %16613 = vmatprep.subr.bf16.mxu1 %v21956_v35 }
 0x1a8   :  { %1311 = vmatmul.mubr.bf16.gmra.mrb[48].mxu1 %v20052_v33 }
 0x1a9   :  { %1318 = vmatprep.mubr.bf16.mxu1 %v20053_v34 }
 0x1b0   :  { %1319 = vmatmul.mubr.bf16.gmra.mrb[52].mxu1 %v20055_v36  ;;  %v20124_v36 = vld [vmem:[%s27025_s3 + $0x280] ss:$16 sps:$4 sm:$0xff]  }
 0x1b1   :  { %1326 = vmatprep.mubr.bf16.mxu1 %v20056_v37 }
 0x1b8   :  { %1327 = vmatmul.mubr.bf16.gmra.mrb[56].mxu1 %v20058_v38  ;;  %v20125_v38 = vld [vmem:[%s27025_s3 + $0x2a4] ss:$16 sps:$4 sm:$0xff]  }
 0x1b9   :  { %1334 = vmatprep.mubr.bf16.mxu1 %v20059_v39 }
 0x1c0   :  { %1335 = vmatmul.mubr.bf16.gmra.mrb[60].mxu1 %v20061_v40  ;;  %v20172_v40 = vld [vmem:[%s27027_s4 + $0x30] sm:$0xff]  }
 0x1c1   :  { %1681 = vmatprep.mubr.bf16.mxu1 %v20067_v42 }
 0x1c8   :  { %1682 = vmatmul.mubr.bf16.vlgmr.msra.gmra.mrb[64].mxu1 %v20065_v43 }
 0x1c9   :  { %16614 = vmatpush3.bf16.msra.mxu1 %v21274_v45  ;;  %1689 = vmatprep.mubr.bf16.mxu1 %v20071_v44 }
 0x1ca   :  { %16615 = vmatprep.subr.bf16.mxu1 %v21275_v46 }
 0x1cd   :  { %16616 = vmatpush3.bf16.msra.mxu1 %v21276_v48 }
 0x1ce   :  { %16617 = vmatprep.subr.bf16.mxu1 %v21277_v50 }
 0x1d0   :  { %1690 = vmatmul.mubr.bf16.gmra.mrb[68].mxu1 %v20073_v47 }
 0x1d1   :  { %16618 = vmatpush3.bf16.msra.mxu1 %v21278_v51  ;;  %1697 = vmatprep.mubr.bf16.mxu1 %v20077_v49 }
 0x1d2   :  { %16619 = vmatprep.subr.bf16.mxu1 %v21279_v52 }
 0x1d5   :  { %16620 = vmatpush3.bf16.msra.mxu1 %v21280_v54 }
 0x1d6   :  { %16621 = vmatprep.subr.bf16.mxu1 %v21281_v56 }
 0x1d8   :  { %1698 = vmatmul.mubr.bf16.gmra.mrb[72].mxu1 %v20079_v53  ;;  %v20127_v53 = vld [vmem:[%s27025_s3 + $0x2a0] ss:$16 sps:$4 sm:$0xff]  }
 0x1d9   :  { %16622 = vmatpush3.bf16.msra.mxu1 %v21282_v57  ;;  %1705 = vmatprep.mubr.bf16.mxu1 %v20083_v55 }
 0x1da   :  { %16623 = vmatprep.subr.bf16.mxu1 %v21283_v58 }
 0x1dd   :  { %16624 = vmatpush3.bf16.msra.mxu1 %v21284_v60 }
 0x1de   :  { %16625 = vmatprep.subr.bf16.mxu1 %v21285_v62 }
 0x1e0   :  { %1706 = vmatmul.mubr.bf16.gmra.mrb[76].mxu1 %v20085_v59 }
 0x1e1   :  { %16626 = vmatpush3.bf16.msra.mxu1 %v22001_v63  ;;  %1713 = vmatprep.mubr.bf16.mxu1 %v20089_v61 }
 0x1e2   :  { %16627 = vmatprep.subr.bf16.mxu1 %v22004_v0 }
 0x1e5   :  { %16628 = vmatpush3.bf16.msra.mxu1 %v22010_v2 }
 0x1e6   :  { %16753 = vmatprep.subr.bf16.mxu1 %v21956_v35  ;;  %v20170_v35 = vld [vmem:[%s27027_s4 + $0x28] sm:$0xff]  }
 0x1e7   :  { %18864 = vmatprep.subr.bf16.mxu0 %v20170_v35 }
 0x1e8   :  { %1714 = vmatmul.mubr.bf16.gmra.mrb[80].mxu1 %v20091_v1  ;;  %18865 = vmatpush3.bf16.msra.mxu0 %v20170_v35 }
 0x1e9   :  { %1721 = vmatprep.mubr.bf16.mxu1 %v20095_v3  ;;  %18866 = vmatprep.subr.bf16.mxu0 %v20172_v40  ;;  %v20130_v3 = vld [vmem:[%s27025_s3 + $0x2c0] ss:$16 sps:$4 sm:$0xff]  }
 0x1ec   :  { %18867 = vmatpush3.bf16.msra.mxu0 %v20172_v40 }
 0x1f0   :  { %1722 = vmatmul.mubr.bf16.gmra.mrb[84].mxu1 %v20097_v4 }
 0x1f1   :  { %1729 = vmatprep.mubr.bf16.mxu1 %v20101_v13  ;;  %v20131_v13 = vld [vmem:[%s27025_s3 + $0x2e4] ss:$16 sps:$4 sm:$0xff]  }
 0x1f8   :  { %1730 = vmatmul.mubr.bf16.gmra.mrb[88].mxu1 %v20103_v5 }
 0x1f9   :  { %1737 = vmatprep.mubr.bf16.mxu1 %v20107_v6 }
 0x200   :  { %1738 = vmatmul.mubr.bf16.gmra.mrb[92].mxu1 %v20109_v7 }
 0x201   :  { %2278 = vmatprep.mubr.bf16.mxu1 %v20112_v41 }
 0x208   :  { %2279 = vmatmul.mubr.bf16.vlgmr.msra.gmra.mrb[96].mxu1 %v20110_v8 }
 0x209   :  { %16754 = vmatpush3.bf16.msra.mxu1 %v21274_v45  ;;  %2286 = vmatprep.mubr.bf16.mxu1 %v20113_v9 }
 0x20a   :  { %16755 = vmatprep.subr.bf16.mxu1 %v21275_v46 }
 0x20d   :  { %16756 = vmatpush3.bf16.msra.mxu1 %v21276_v48 }
 0x20e   :  { %16757 = vmatprep.subr.bf16.mxu1 %v21277_v50 }
 0x210   :  { %2287 = vmatmul.mubr.bf16.gmra.mrb[100].mxu1 %v20115_v10 }
 0x211   :  { %16758 = vmatpush3.bf16.msra.mxu1 %v21278_v51  ;;  %2294 = vmatprep.mubr.bf16.mxu1 %v20116_v11 }
 0x212   :  { %16759 = vmatprep.subr.bf16.mxu1 %v21279_v52  ;;  %v20175_v52 = vld [vmem:[%s27027_s4 + $0x38] sm:$0xff]  }
 0x213   :  { %18868 = vmatprep.subr.bf16.mxu0 %v20175_v52 }
 0x214   :  { %18869 = vmatpush3.bf16.msra.mxu0 %v20175_v52 }
 0x215   :  { %16760 = vmatpush3.bf16.msra.mxu1 %v21280_v54 }
 0x216   :  { %16761 = vmatprep.subr.bf16.mxu1 %v21281_v56  ;;  %v22106_v56 = vld [vmem:[%s27027_s4] sm:$0xff]  }
 0x217   :  { %18886 = vmatprep.subr.bf16.mxu0 %v22106_v56 }
 0x218   :  { %2295 = vmatmul.mubr.bf16.gmra.mrb[104].mxu1 %v20118_v12 }
 0x219   :  { %16762 = vmatpush3.bf16.msra.mxu1 %v21282_v57  ;;  %2302 = vmatprep.mubr.bf16.mxu1 %v20119_v14 }
 0x21a   :  { %16763 = vmatprep.subr.bf16.mxu1 %v21283_v58 }
 0x21b   :  { %v16349_v16 = vpop.f32.mrb[0].mxu1  ;;  %v16477_v18 = vpop.f32.mrb[64].mxu0 }
 0x21c   :  { %v16350_v19 = vpop.f32.mrb[1].mxu1  ;;  %v16478_v24 = vpop.f32.mrb[65].mxu0 }
 0x21d   :  { %v22062_v27 = vadd.f32 %v16350_v19, %v16349_v16  ;;  %16764 = vmatpush3.bf16.msra.mxu1 %v21284_v60  ;;  %v16352_v28 = vpop.f32.mrb[2].mxu1  ;;  %v22064_v29 = vadd.f32 %v16478_v24, %v16477_v18  ;;  %v16480_v30 = vpop.f32.mrb[66].mxu0  ;;  %v20133_v16 = vld [vmem:[%s27025_s3 + $0x2e0] ss:$16 sps:$4 sm:$0xff]   ;;  %v20136_v18 = vld [vmem:[%s27025_s3 + $0x304] ss:$16 sps:$4 sm:$0xff]  }
 0x21e   :  { %16765 = vmatprep.subr.bf16.mxu1 %v21285_v62  ;;  %v16353_v31 = vpop.f32.mrb[3].mxu1  ;;  %v16481_v32 = vpop.f32.mrb[67].mxu0 }
 0x21f   :  { %v22066_v33 = vadd.f32 %v16353_v31, %v16352_v28  ;;  %v22068_v34 = vadd.f32 %v16481_v32, %v16480_v30 }
 0x220   :  { %2303 = vmatmul.mubr.bf16.gmra.mrb[108].mxu1 %v20121_v15 }
 0x221   :  { %16766 = vmatpush3.bf16.msra.mxu1 %v22001_v63  ;;  %2310 = vmatprep.mubr.bf16.mxu1 %v20122_v17 }
 0x222   :  { %16767 = vmatprep.subr.bf16.mxu1 %v22004_v0 }
 0x223   :  { %v16355_v37 = vpop.f32.mrb[4].mxu1  ;;  %v16483_v39 = vpop.f32.mrb[68].mxu0 }
 0x224   :  { %v16356_v42 = vpop.f32.mrb[5].mxu1  ;;  %v16484_v43 = vpop.f32.mrb[69].mxu0 }
 0x225   :  { %v22084_v44 = vadd.f32 %v16356_v42, %v16355_v37  ;;  %16768 = vmatpush3.bf16.msra.mxu1 %v22010_v2  ;;  %v16358_v45 = vpop.f32.mrb[6].mxu1  ;;  %v22087_v46 = vadd.f32 %v16484_v43, %v16483_v39  ;;  %v16486_v47 = vpop.f32.mrb[70].mxu0  ;;  %v20134_v39 = vld [vmem:[%s27025_s3 + $0x300] ss:$16 sps:$4 sm:$0xff]   ;;  %v20137_v42 = vld [vmem:[%s27025_s3 + $0x324] ss:$16 sps:$4 sm:$0xff]  }
 0x226   :  { %16817 = vmatprep.subr.bf16.mxu1 %v21828_v25  ;;  %v16359_v48 = vpop.f32.mrb[7].mxu1  ;;  %v16487_v49 = vpop.f32.mrb[71].mxu0  ;;  %v20128_v25 = vld [vmem:[%s27025_s3 + $0x2c4] ss:$16 sps:$4 sm:$0xff]  }
 0x227   :  { %v22090_v50 = vadd.f32 %v16359_v48, %v16358_v45  ;;  %v22092_v51 = vadd.f32 %v16487_v49, %v16486_v47 }
 0x228   :  { %2311 = vmatmul.mubr.bf16.gmra.mrb[112].mxu1 %v20124_v36 }
 0x229   :  { %2318 = vmatprep.mubr.bf16.mxu1 %v20125_v38 }
 0x22b   :  { %v16361_v54 = vpop.f32.mrb[8].mxu1  ;;  %v16489_v55 = vpop.f32.mrb[72].mxu0 }
 0x22c   :  { %v16362_v57 = vpop.f32.mrb[9].mxu1  ;;  %v16490_v58 = vpop.f32.mrb[73].mxu0 }
 0x22d   :  { %v22108_v59 = vadd.f32 %v16362_v57, %v16361_v54  ;;  %v16364_v60 = vpop.f32.mrb[10].mxu1  ;;  %v22110_v61 = vadd.f32 %v16490_v58, %v16489_v55  ;;  %v16492_v62 = vpop.f32.mrb[74].mxu0  ;;  %v22157_v57 = vld [vmem:[#allocation2 + $0x80] sm:$0xff] }
 0x22e   :  { %v16365_v63 = vpop.f32.mrb[11].mxu1  ;;  %v16493_v0 = vpop.f32.mrb[75].mxu0 }
 0x22f   :  { %v22113_v1 = vadd.f32 %v16365_v63, %v16364_v60  ;;  %v22115_v2 = vadd.f32 %v16493_v0, %v16492_v62  ;;  %v22162_v60 = vld [vmem:[#allocation2 + $0xc8] sm:$0xff]  ;;  %v20139_v62 = vld [vmem:[%s27025_s3 + $0x320] ss:$16 sps:$4 sm:$0xff]   ;;  %v20140_v0 = vld [vmem:[%s27025_s3 + $0x344] ss:$16 sps:$4 sm:$0xff]  }
 0x230   :  { %2319 = vmatmul.mubr.bf16.gmra.mrb[116].mxu1 %v20127_v53 }
 0x231   :  { %2326 = vmatprep.mubr.bf16.mxu1 %v20128_v25 }
 0x233   :  { %v16367_v4 = vpop.f32.mrb[12].mxu1  ;;  %v16495_v5 = vpop.f32.mrb[76].mxu0 }
 0x234   :  { %v16368_v6 = vpop.f32.mrb[13].mxu1  ;;  %v16496_v7 = vpop.f32.mrb[77].mxu0 }
 0x235   :  { %v22123_v41 = vadd.f32 %v16368_v6, %v16367_v4  ;;  %v16370_v8 = vpop.f32.mrb[14].mxu1  ;;  %v22125_v9 = vadd.f32 %v16496_v7, %v16495_v5  ;;  %v16498_v10 = vpop.f32.mrb[78].mxu0  ;;  %v22176_v7 = vld [vmem:[#allocation2 + $0xd0] sm:$0xff] }
 0x236   :  { %v16371_v11 = vpop.f32.mrb[15].mxu1  ;;  %v16499_v12 = vpop.f32.mrb[79].mxu0 }
 0x237   :  { %v22127_v14 = vadd.f32 %v16371_v11, %v16370_v8  ;;  %v22129_v15 = vadd.f32 %v16499_v12, %v16498_v10 }
 0x238   :  { %2327 = vmatmul.mubr.bf16.gmra.mrb[120].mxu1 %v20130_v3 }
 0x239   :  { %2334 = vmatprep.mubr.bf16.mxu1 %v20131_v13  ;;  %v22173_v13 = vld [vmem:[#allocation2 + $0x88] sm:$0xff] }
 0x23b   :  { %v16373_v17 = vpop.f32.mrb[16].mxu1 }
 0x23c   :  { %v16374_v19 = vpop.f32.mrb[17].mxu1 }
 0x23d   :  { %v22137_v24 = vadd.f32 %v16374_v19, %v16373_v17  ;;  %v16376_v26 = vpop.f32.mrb[18].mxu1  ;;  %v16501_v28 = vpop.f32.mrb[80].mxu0 }
 0x23e   :  { %v16377_v30 = vpop.f32.mrb[19].mxu1  ;;  %v16502_v31 = vpop.f32.mrb[81].mxu0 }
 0x23f   :  { %v22139_v32 = vadd.f32 %v16377_v30, %v16376_v26  ;;  %v22141_v35 = vadd.f32 %v16502_v31, %v16501_v28  ;;  %v16504_v36 = vpop.f32.mrb[82].mxu0  ;;  %v22188_v26 = vld [vmem:[#allocation2 + $0xd8] sm:$0xff]  ;;  %v20142_v28 = vld [vmem:[%s27025_s3 + $0x340] ss:$16 sps:$4 sm:$0xff]   ;;  %v20143_v31 = vld [vmem:[%s27025_s3 + $0x364] ss:$16 sps:$4 sm:$0xff]  }
 0x240   :  { %2335 = vmatmul.mubr.bf16.gmra.mrb[124].mxu1 %v20133_v16  ;;  %v16505_v37 = vpop.f32.mrb[83].mxu0 }
 0x241   :  { %2843 = vmatprep.mubr.bf16.mxu1 %v20136_v18  ;;  %v22143_v38 = vadd.f32 %v16505_v37, %v16504_v36  ;;  %v22183_v18 = vld [vmem:[#allocation2 + $0x90] sm:$0xff] }
 0x243   :  { %v16379_v40 = vpop.f32.mrb[20].mxu1 }
 0x244   :  { %v16380_v43 = vpop.f32.mrb[21].mxu1 }
 0x245   :  { %v22151_v45 = vadd.f32 %v16380_v43, %v16379_v40  ;;  %v16382_v47 = vpop.f32.mrb[22].mxu1  ;;  %v16507_v48 = vpop.f32.mrb[84].mxu0  ;;  %v22202_v43 = vld [vmem:[#allocation2 + $0xe0] sm:$0xff] }
 0x246   :  { %v16383_v49 = vpop.f32.mrb[23].mxu1  ;;  %v16508_v52 = vpop.f32.mrb[85].mxu0 }
 0x247   :  { %v22153_v53 = vadd.f32 %v16383_v49, %v16382_v47  ;;  %v22155_v54 = vadd.f32 %v16508_v52, %v16507_v48  ;;  %v16510_v25 = vpop.f32.mrb[86].mxu0 }
 0x248   :  { %2844 = vmatmul.mubr.bf16.vlgmr.msra.gmra.mrb[128].mxu1 %v20134_v39  ;;  %v16511_v55 = vpop.f32.mrb[87].mxu0  ;;  %v22199_v39 = vld [vmem:[#allocation2 + $0x98] sm:$0xff] }
 0x249   :  { %16818 = vmatpush3.bf16.msra.mxu1 %v22157_v57  ;;  %2851 = vmatprep.mubr.bf16.mxu1 %v20137_v42  ;;  %v22160_v58 = vadd.f32 %v16511_v55, %v16510_v25 }
 0x24a   :  { %16819 = vmatprep.subr.bf16.mxu1 %v22162_v60 }
 0x24b   :  { %v16385_v63 = vpop.f32.mrb[24].mxu1 }
 0x24c   :  { %v16386_v3 = vpop.f32.mrb[25].mxu1 }
 0x24d   :  { %v22171_v4 = vadd.f32 %v16386_v3, %v16385_v63  ;;  %16820 = vmatpush3.bf16.msra.mxu1 %v22173_v13  ;;  %v16388_v5 = vpop.f32.mrb[26].mxu1  ;;  %v16513_v6 = vpop.f32.mrb[88].mxu0 }
 0x24e   :  { %16821 = vmatprep.subr.bf16.mxu1 %v22176_v7  ;;  %v16389_v8 = vpop.f32.mrb[27].mxu1  ;;  %v16514_v10 = vpop.f32.mrb[89].mxu0 }
 0x24f   :  { %v22179_v11 = vadd.f32 %v16389_v8, %v16388_v5  ;;  %v22181_v12 = vadd.f32 %v16514_v10, %v16513_v6  ;;  %v16516_v16 = vpop.f32.mrb[90].mxu0  ;;  %v20145_v6 = vld [vmem:[%s27025_s3 + $0x360] ss:$16 sps:$4 sm:$0xff]   ;;  %v22220_v10 = vld [vmem:[#allocation2 + $0xa8] sm:$0xff] }
 0x250   :  { %2852 = vmatmul.mubr.bf16.gmra.mrb[132].mxu1 %v20139_v62  ;;  %v16517_v17 = vpop.f32.mrb[91].mxu0  ;;  %v22209_v62 = vld [vmem:[#allocation2 + $0xa0] sm:$0xff] }
 0x251   :  { %16822 = vmatpush3.bf16.msra.mxu1 %v22183_v18  ;;  %2859 = vmatprep.mubr.bf16.mxu1 %v20140_v0  ;;  %v22186_v19 = vadd.f32 %v16517_v17, %v16516_v16  ;;  %v22214_v0 = vld [vmem:[#allocation2 + $0xe8] sm:$0xff]  ;;  %v20146_v17 = vld [vmem:[%s27025_s3 + $0x384] ss:$16 sps:$4 sm:$0xff]  }
 0x252   :  { %16823 = vmatprep.subr.bf16.mxu1 %v22188_v26 }
 0x253   :  { %v16391_v30 = vpop.f32.mrb[28].mxu1 }
 0x254   :  { %v16392_v36 = vpop.f32.mrb[29].mxu1 }
 0x255   :  { %v22197_v37 = vadd.f32 %v16392_v36, %v16391_v30  ;;  %16824 = vmatpush3.bf16.msra.mxu1 %v22199_v39  ;;  %v16394_v40 = vpop.f32.mrb[30].mxu1  ;;  %v16519_v42 = vpop.f32.mrb[92].mxu0 }
 0x256   :  { %16825 = vmatprep.subr.bf16.mxu1 %v22202_v43  ;;  %v16395_v47 = vpop.f32.mrb[31].mxu1  ;;  %v16520_v48 = vpop.f32.mrb[93].mxu0 }
 0x257   :  { %v22205_v49 = vadd.f32 %v16395_v47, %v16394_v40  ;;  %v22207_v52 = vadd.f32 %v16520_v48, %v16519_v42  ;;  %v16522_v25 = vpop.f32.mrb[94].mxu0 }
 0x258   :  { %2860 = vmatmul.mubr.bf16.gmra.mrb[136].mxu1 %v20142_v28  ;;  %v16523_v55 = vpop.f32.mrb[95].mxu0 }
 0x259   :  { %16826 = vmatpush3.bf16.msra.mxu1 %v22209_v62  ;;  %2867 = vmatprep.mubr.bf16.mxu1 %v20143_v31  ;;  %v22212_v63 = vadd.f32 %v16523_v55, %v16522_v25 }
 0x25a   :  { %16827 = vmatprep.subr.bf16.mxu1 %v22214_v0 }
 0x25b   :  { %v16413_v3 = vpop.f32.mrb[32].mxu1 }
 0x25c   :  { %v16414_v5 = vpop.f32.mrb[33].mxu1 }
 0x25d   :  { %v16415_v8 = vadd.f32 %v16414_v5, %v16413_v3  ;;  %16828 = vmatpush3.bf16.msra.mxu1 %v22220_v10  ;;  %v16416_v16 = vpop.f32.mrb[34].mxu1 }
 0x25e   :  { %16829 = vmatprep.subr.bf16.mxu1 %v21903_v20  ;;  %v16417_v28 = vpop.f32.mrb[35].mxu1  ;;  %v20148_v20 = vld [vmem:[%s27025_s3 + $0x380] ss:$16 sps:$4 sm:$0xff]  }
 0x25f   :  { %v22228_v30 = vadd.f32 %v16415_v8, %v22062_v27  ;;  %v16418_v31 = vadd.f32 %v16417_v28, %v16416_v16  ;;  %v20151_v8 = vld [vmem:[%s27025_s3 + $0x3a0] ss:$16 sps:$4 sm:$0xff]  }
 0x260   :  { %2868 = vmatmul.mubr.bf16.gmra.mrb[140].mxu1 %v20145_v6 }
 0x261   :  { %v22231_v36 = vadd.f32 %v16418_v31, %v22066_v33  ;;  %16830 = vmatpush3.bf16.msra.mxu1 %v21905_v21  ;;  %2875 = vmatprep.mubr.bf16.mxu1 %v20146_v17  ;;  %v20149_v21 = vld [vmem:[%s27025_s3 + $0x3a4] ss:$16 sps:$4 sm:$0xff]  }
 0x262   :  { %16831 = vmatprep.subr.bf16.mxu1 %v21907_v22  ;;  %v22244_v33 = vld [vmem:[#allocation2 + $0xc0] sm:$0xff] }
 0x263   :  { %v16419_v40 = vpop.f32.mrb[36].mxu1  ;;  %v1343_v42 = vpack.c.bf16 %v22231_v36, %v22228_v30  ;;  %v20205_v36 = vld [vmem:[%s27025_s3 + $0x4ac] ss:$16 sps:$4 sm:$0xff]  }
 0x264   :  { %v16420_v47 = vpop.f32.mrb[37].mxu1 }
 0x265   :  { %v16421_v27 = vadd.f32 %v16420_v47, %v16419_v40  ;;  %16832 = vmatpush3.bf16.msra.mxu1 %v21911_v23  ;;  %v16422_v48 = vpop.f32.mrb[38].mxu1 }
 0x266   :  { %16957 = vmatprep.subr.bf16.mxu1 %v22244_v33  ;;  %v16423_v22 = vpop.f32.mrb[39].mxu1 }
 0x267   :  { %v22248_v25 = vadd.f32 %v16421_v27, %v22084_v44  ;;  %v16424_v55 = vadd.f32 %v16423_v22, %v16422_v48  ;;  %v20152_v44 = vld [vmem:[%s27025_s3 + $0x3c4] ss:$16 sps:$4 sm:$0xff]   ;;  %v20154_v48 = vld [vmem:[%s27025_s3 + $0x3c0] ss:$16 sps:$4 sm:$0xff]  }
 0x268   :  { %2876 = vmatmul.mubr.bf16.gmra.mrb[144].mxu1 %v20148_v20 }
 0x269   :  { %v22251_v3 = vadd.f32 %v16424_v55, %v22090_v50  ;;  %2883 = vmatprep.mubr.bf16.mxu1 %v20149_v21 }
 0x26b   :  { %v16425_v5 = vpop.f32.mrb[40].mxu1  ;;  %v27047_v30 = vpack.c.bf16 %v22251_v3, %v22248_v25  ;;  %v20207_v25 = vld [vmem:[%s27025_s3 + $0x4a8] ss:$16 sps:$4 sm:$0xff]   ;;  %v20208_v3 = vld [vmem:[%s27025_s3 + $0x4cc] ss:$16 sps:$4 sm:$0xff]  }
 0x26c   :  { %v16426_v6 = vpop.f32.mrb[41].mxu1 }
 0x26d   :  { %v16427_v16 = vadd.f32 %v16426_v6, %v16425_v5  ;;  %v16428_v17 = vpop.f32.mrb[42].mxu1 }
 0x26e   :  { %v16429_v28 = vpop.f32.mrb[43].mxu1 }
 0x26f   :  { %v22262_v50 = vadd.f32 %v16427_v16, %v22108_v59  ;;  %v16430_v31 = vadd.f32 %v16429_v28, %v16428_v17  ;;  %v20155_v59 = vld [vmem:[%s27025_s3 + $0x3e4] ss:$16 sps:$4 sm:$0xff]   ;;  %v20181_v16 = vld [vmem:[%s27025_s3 + $0x3a8] ss:$16 sps:$4 sm:$0xff]  }
 0x270   :  { %2884 = vmatmul.mubr.bf16.gmra.mrb[148].mxu1 %v20151_v8 }
 0x271   :  { %v22265_v40 = vadd.f32 %v16430_v31, %v22113_v1  ;;  %2891 = vmatprep.mubr.bf16.mxu1 %v20152_v44  ;;  %v20157_v44 = vld [vmem:[%s27025_s3 + $0x3e0] ss:$16 sps:$4 sm:$0xff]  }
 0x273   :  { %v16431_v47 = vpop.f32.mrb[44].mxu1 }
 0x274   :  { %v16432_v27 = vpop.f32.mrb[45].mxu1 }
 0x275   :  { %v16433_v21 = vadd.f32 %v16432_v27, %v16431_v47  ;;  %v16434_v22 = vpop.f32.mrb[46].mxu1 }
 0x276   :  { %v16435_v55 = vpop.f32.mrb[47].mxu1 }
 0x277   :  { %v22276_v1 = vadd.f32 %v16433_v21, %v22123_v41  ;;  %v16436_v5 = vadd.f32 %v16435_v55, %v16434_v22  ;;  %v20160_v41 = vld [vmem:[%s27025_s3 + $0x30c] ss:$16 sps:$4 sm:$0xff]   ;;  %v20158_v55 = vld [vmem:[%s27025_s3 + $0x308] ss:$16 sps:$4 sm:$0xff]  }
 0x278   :  { %2892 = vmatmul.mubr.bf16.gmra.mrb[152].mxu1 %v20154_v48 }
 0x279   :  { %v22279_v6 = vadd.f32 %v16436_v5, %v22127_v14  ;;  %2899 = vmatprep.mubr.bf16.mxu1 %v20155_v59 }
 0x27b   :  { %v16437_v8 = vpop.f32.mrb[48].mxu1 }
 0x27c   :  { %v16438_v17 = vpop.f32.mrb[49].mxu1 }
 0x27d   :  { %v16439_v28 = vadd.f32 %v16438_v17, %v16437_v8  ;;  %v16440_v31 = vpop.f32.mrb[50].mxu1 }
 0x27e   :  { %v16441_v47 = vpop.f32.mrb[51].mxu1 }
 0x27f   :  { %v22290_v14 = vadd.f32 %v16439_v28, %v22137_v24  ;;  %v16442_v27 = vadd.f32 %v16441_v47, %v16440_v31  ;;  %v20161_v24 = vld [vmem:[%s27025_s3 + $0x32c] ss:$16 sps:$4 sm:$0xff]  }
 0x280   :  { %2900 = vmatmul.mubr.bf16.gmra.mrb[156].mxu1 %v20157_v44 }
 0x281   :  { %v22293_v48 = vadd.f32 %v16442_v27, %v22139_v32  ;;  %2940 = vmatprep.mubr.bf16.mxu1 %v20160_v41 }
 0x283   :  { %v16443_v21 = vpop.f32.mrb[52].mxu1 }
 0x284   :  { %v16444_v59 = vpop.f32.mrb[53].mxu1 }
 0x285   :  { %v16445_v5 = vadd.f32 %v16444_v59, %v16443_v21  ;;  %v16446_v8 = vpop.f32.mrb[54].mxu1 }
 0x286   :  { %v16447_v17 = vpop.f32.mrb[55].mxu1 }
 0x287   :  { %v22304_v32 = vadd.f32 %v16445_v5, %v22151_v45  ;;  %v16448_v44 = vadd.f32 %v16447_v17, %v16446_v8  ;;  %v20163_v45 = vld [vmem:[%s27025_s3 + $0x328] ss:$16 sps:$4 sm:$0xff]  }
 0x288   :  { %2941 = vmatmul.mubr.bf16.vlgmr.msra.gmra.mrb[160].mxu1 %v20158_v55 }
 0x289   :  { %v22307_v28 = vadd.f32 %v16448_v44, %v22153_v53  ;;  %16958 = vmatpush3.bf16.msra.mxu1 %v22157_v57  ;;  %2948 = vmatprep.mubr.bf16.mxu1 %v20161_v24  ;;  %v20164_v53 = vld [vmem:[%s27025_s3 + $0x34c] ss:$16 sps:$4 sm:$0xff]  }
 0x28a   :  { %16959 = vmatprep.subr.bf16.mxu1 %v22162_v60 }
 0x28b   :  { %v16449_v31 = vpop.f32.mrb[56].mxu1 }
 0x28c   :  { %v16450_v47 = vpop.f32.mrb[57].mxu1 }
 0x28d   :  { %v16451_v27 = vadd.f32 %v16450_v47, %v16449_v31  ;;  %16960 = vmatpush3.bf16.msra.mxu1 %v22173_v13  ;;  %v16452_v21 = vpop.f32.mrb[58].mxu1 }
 0x28e   :  { %16961 = vmatprep.subr.bf16.mxu1 %v22176_v7  ;;  %v16453_v59 = vpop.f32.mrb[59].mxu1 }
 0x28f   :  { %v22322_v55 = vadd.f32 %v16451_v27, %v22171_v4  ;;  %v16454_v5 = vadd.f32 %v16453_v59, %v16452_v21  ;;  %v20166_v4 = vld [vmem:[%s27025_s3 + $0x348] ss:$16 sps:$4 sm:$0xff]  }
 0x290   :  { %2949 = vmatmul.mubr.bf16.gmra.mrb[164].mxu1 %v20163_v45 }
 0x291   :  { %v22325_v8 = vadd.f32 %v16454_v5, %v22179_v11  ;;  %16962 = vmatpush3.bf16.msra.mxu1 %v22183_v18  ;;  %2956 = vmatprep.mubr.bf16.mxu1 %v20164_v53  ;;  %v20168_v11 = vld [vmem:[%s27025_s3 + $0x36c] ss:$16 sps:$4 sm:$0xff]   ;;  %v22361_v5 = vld [vmem:[#allocation2 + $0xb0] sm:$0xff] }
 0x292   :  { %16963 = vmatprep.subr.bf16.mxu1 %v22188_v26 }
 0x293   :  { %v16455_v24 = vpop.f32.mrb[60].mxu1 }
 0x294   :  { %v16456_v44 = vpop.f32.mrb[61].mxu1 }
 0x295   :  { %v16457_v31 = vadd.f32 %v16456_v44, %v16455_v24  ;;  %16964 = vmatpush3.bf16.msra.mxu1 %v22199_v39  ;;  %v16458_v47 = vpop.f32.mrb[62].mxu1 }
 0x296   :  { %16965 = vmatprep.subr.bf16.mxu1 %v22202_v43  ;;  %v16459_v45 = vpop.f32.mrb[63].mxu1 }
 0x297   :  { %v22340_v27 = vadd.f32 %v16457_v31, %v22197_v37  ;;  %v16460_v21 = vadd.f32 %v16459_v45, %v16458_v47  ;;  %v20171_v37 = vld [vmem:[%s27025_s3 + $0x368] ss:$16 sps:$4 sm:$0xff]   ;;  %v22356_v31 = vld [vmem:[#allocation2 + $0xf0] sm:$0xff] }
 0x298   :  { %2957 = vmatmul.mubr.bf16.gmra.mrb[168].mxu1 %v20166_v4 }
 0x299   :  { %v22343_v53 = vadd.f32 %v16460_v21, %v22205_v49  ;;  %16966 = vmatpush3.bf16.msra.mxu1 %v22209_v62  ;;  %2964 = vmatprep.mubr.bf16.mxu1 %v20168_v11  ;;  %v20173_v49 = vld [vmem:[%s27025_s3 + $0x38c] ss:$16 sps:$4 sm:$0xff]  }
 0x29a   :  { %16967 = vmatprep.subr.bf16.mxu1 %v22214_v0 }
 0x29b   :  { %v16541_v59 = vpop.f32.mrb[64].mxu1 }
 0x29c   :  { %v16542_v24 = vpop.f32.mrb[65].mxu1 }
 0x29d   :  { %v16543_v44 = vadd.f32 %v16542_v24, %v16541_v59  ;;  %16968 = vmatpush3.bf16.msra.mxu1 %v22220_v10  ;;  %v16544_v4 = vpop.f32.mrb[66].mxu1  ;;  %v22364_v59 = vld [vmem:[#allocation2 + $0xf8] sm:$0xff] }
 0x29e   :  { %16969 = vmatprep.subr.bf16.mxu1 %v22356_v31  ;;  %v16545_v47 = vpop.f32.mrb[67].mxu1 }
 0x29f   :  { %v1684_v11 = vadd.f32 %v16543_v44, %v22064_v29  ;;  %v16546_v45 = vadd.f32 %v16545_v47, %v16544_v4  ;;  %v20176_v29 = vld [vmem:[%s27025_s3 + $0x388] ss:$16 sps:$4 sm:$0xff]   ;;  %v20178_v4 = vld [vmem:[%s27025_s3 + $0x3ac] ss:$16 sps:$4 sm:$0xff]  }
 0x2a0   :  { %2965 = vmatmul.mubr.bf16.gmra.mrb[172].mxu1 %v20171_v37  ;;  %v22370_v37 = vld [vmem:[#allocation2 + $0xb8] sm:$0xff] }
 0x2a1   :  { %v1687_v21 = vadd.f32 %v16546_v45, %v22068_v34  ;;  %16970 = vmatpush3.bf16.msra.mxu1 %v22361_v5  ;;  %2972 = vmatprep.mubr.bf16.mxu1 %v20173_v49  ;;  %v22377_v49 = vld [vmem:[#allocation2 + $0x40] sm:$0xff] }
 0x2a2   :  { %16971 = vmatprep.subr.bf16.mxu1 %v22364_v59 }
 0x2a3   :  { %v16547_v24 = vpop.f32.mrb[68].mxu1  ;;  %v1746_v17 = vpack.c.bf16 %v1687_v21, %v1684_v11 }
 0x2a4   :  { %v16548_v41 = vpop.f32.mrb[69].mxu1 }
 0x2a5   :  { %v16549_v44 = vadd.f32 %v16548_v41, %v16547_v24  ;;  %16972 = vmatpush3.bf16.msra.mxu1 %v22370_v37  ;;  %v16550_v34 = vpop.f32.mrb[70].mxu1  ;;  %18870 = vmatprep.mubr.msk.bf16.mxu0 %vm892_vm4, %v1746_v17  ;;  %v20180_v17 = vld [vmem:[%s27027_s4 + $0x8] sm:$0xff]  }
 0x2a6   :  { %17033 = vmatprep.subr.bf16.mxu1 %v22377_v49  ;;  %v16551_v47 = vpop.f32.mrb[71].mxu1 }
 0x2a7   :  { %v1692_v11 = vadd.f32 %v16549_v44, %v22087_v46  ;;  %v16552_v45 = vadd.f32 %v16551_v47, %v16550_v34  ;;  %v20183_v46 = vld [vmem:[%s27025_s3 + $0x3cc] ss:$16 sps:$4 sm:$0xff]   ;;  %v20182_v34 = vld [vmem:[%s27027_s4 + $0x10] sm:$0xff]  }
 0x2a8   :  { %2973 = vmatmul.mubr.bf16.gmra.mrb[176].mxu1 %v20176_v29 }
 0x2a9   :  { %v1695_v41 = vadd.f32 %v16552_v45, %v22092_v51  ;;  %2980 = vmatprep.mubr.bf16.mxu1 %v20178_v4 }
 0x2ab   :  { %v1747_v21 = vpack.c.bf16 %v1695_v41, %v1692_v11  ;;  %v16553_v24 = vpop.f32.mrb[72].mxu1 }
 0x2ac   :  { %v16554_v22 = vpop.f32.mrb[73].mxu1 }
 0x2ad   :  { %v16555_v20 = vadd.f32 %v16554_v22, %v16553_v24  ;;  %v16556_v23 = vpop.f32.mrb[74].mxu1  ;;  %18871 = vmatmul.mubr.msk.bf16.vlgmr.msra.gmra.mrb[96].mxu0 %vm892_vm4, %v1747_v21 }
 0x2ae   :  { %18887 = vmatpush3.bf16.msra.mxu0 %v22106_v56  ;;  %v16557_v51 = vpop.f32.mrb[75].mxu1  ;;  %v20185_v56 = vld [vmem:[%s27027_s4 + $0x18] sm:$0xff]  }
 0x2af   :  { %v1700_v29 = vadd.f32 %v16555_v20, %v22110_v61  ;;  %v16558_v44 = vadd.f32 %v16557_v51, %v16556_v23  ;;  %18888 = vmatprep.subr.bf16.mxu0 %v20180_v17  ;;  %v20186_v61 = vld [vmem:[%s27025_s3 + $0x3c8] ss:$16 sps:$4 sm:$0xff]  }
 0x2b0   :  { %2981 = vmatmul.mubr.bf16.gmra.mrb[180].mxu1 %v20181_v16  ;;  %v20189_v51 = vld [vmem:[%s27025_s3 + $0x3e8] ss:$16 sps:$4 sm:$0xff]  }
 0x2b1   :  { %v1703_v22 = vadd.f32 %v16558_v44, %v22115_v2  ;;  %2988 = vmatprep.mubr.bf16.mxu1 %v20183_v46  ;;  %v20187_v2 = vld [vmem:[%s27025_s3 + $0x3ec] ss:$16 sps:$4 sm:$0xff]  }
 0x2b2   :  { %18889 = vmatpush3.bf16.msra.mxu0 %v20180_v17 }
 0x2b3   :  { %v16559_v4 = vpop.f32.mrb[76].mxu1  ;;  %18890 = vmatprep.subr.bf16.mxu0 %v20182_v34  ;;  %v1748_v47 = vpack.c.bf16 %v1703_v22, %v1700_v29 }
 0x2b4   :  { %v16560_v11 = vpop.f32.mrb[77].mxu1 }
 0x2b5   :  { %v16561_v23 = vadd.f32 %v16560_v11, %v16559_v4  ;;  %v16562_v20 = vpop.f32.mrb[78].mxu1  ;;  %18874 = vmatprep.mubr.msk.bf16.mxu0 %vm892_vm4, %v1748_v47  ;;  %v20190_v11 = vld [vmem:[%s27025_s3 + $0x408] ss:$16 sps:$4 sm:$0xff]  }
 0x2b6   :  { %18891 = vmatpush3.bf16.msra.mxu0 %v20182_v34  ;;  %v16563_v16 = vpop.f32.mrb[79].mxu1 }
 0x2b7   :  { %v1708_v45 = vadd.f32 %v16561_v23, %v22125_v9  ;;  %v16564_v41 = vadd.f32 %v16563_v16, %v16562_v20  ;;  %18892 = vmatprep.subr.bf16.mxu0 %v20185_v56  ;;  %v20192_v9 = vld [vmem:[%s27025_s3 + $0x40c] ss:$16 sps:$4 sm:$0xff]  }
 0x2b8   :  { %2989 = vmatmul.mubr.bf16.gmra.mrb[184].mxu1 %v20186_v61 }
 0x2b9   :  { %v1711_v21 = vadd.f32 %v16564_v41, %v22129_v15  ;;  %2996 = vmatprep.mubr.bf16.mxu1 %v20187_v2  ;;  %v22432_v41 = vld [vmem:[#allocation2 + $0x48] sm:$0xff] }
 0x2ba   :  { %18893 = vmatpush3.bf16.msra.mxu0 %v20185_v56 }
 0x2bb   :  { %16677 = vmatprep.subr.bf16.mxu0 %v22244_v33  ;;  %v16565_v24 = vpop.f32.mrb[80].mxu1  ;;  %v1749_v17 = vpack.c.bf16 %v1711_v21, %v1708_v45  ;;  %v22429_v45 = vld [vmem:[#allocation2] sm:$0xff] }
 0x2bc   :  { %v16566_v46 = vpop.f32.mrb[81].mxu1 }
 0x2bd   :  { %v16567_v29 = vadd.f32 %v16566_v46, %v16565_v24  ;;  %v16568_v44 = vpop.f32.mrb[82].mxu1  ;;  %18875 = vmatmul.mubr.msk.bf16.gmra.mrb[100].mxu0 %vm892_vm4, %v1749_v17 }
 0x2be   :  { %v16569_v15 = vpop.f32.mrb[83].mxu1 }
 0x2bf   :  { %v1716_v34 = vadd.f32 %v16567_v29, %v22141_v35  ;;  %v16570_v22 = vadd.f32 %v16569_v15, %v16568_v44  ;;  %v20193_v35 = vld [vmem:[%s27025_s3 + $0x42c] ss:$16 sps:$4 sm:$0xff]   ;;  %v22445_v44 = vld [vmem:[#allocation2 + $0x50] sm:$0xff] }
 0x2c0   :  { %2997 = vmatmul.mubr.bf16.gmra.mrb[188].mxu1 %v20189_v51  ;;  %v22438_v51 = vld [vmem:[#allocation2 + $0x8] sm:$0xff] }
 0x2c1   :  { %v1719_v33 = vadd.f32 %v16570_v22, %v22143_v38  ;;  %3505 = vmatprep.mubr.bf16.mxu1 %v20192_v9  ;;  %v20196_v29 = vld [vmem:[%s27025_s3 + $0x44c] ss:$16 sps:$4 sm:$0xff]  }
 0x2c3   :  { %v16571_v4 = vpop.f32.mrb[84].mxu1  ;;  %v1750_v47 = vpack.c.bf16 %v1719_v33, %v1716_v34  ;;  %v22450_v33 = vld [vmem:[#allocation2 + $0x10] sm:$0xff] }
 0x2c4   :  { %v16572_v56 = vpop.f32.mrb[85].mxu1 }
 0x2c5   :  { %v16573_v61 = vadd.f32 %v16572_v56, %v16571_v4  ;;  %v16574_v23 = vpop.f32.mrb[86].mxu1  ;;  %18878 = vmatprep.mubr.msk.bf16.mxu0 %vm892_vm4, %v1750_v47  ;;  %v22453_v4 = vld [vmem:[#allocation2 + $0x58] sm:$0xff] }
 0x2c6   :  { %v16575_v20 = vpop.f32.mrb[87].mxu1 }
 0x2c7   :  { %v1724_v2 = vadd.f32 %v16573_v61, %v22155_v54  ;;  %v16576_v38 = vadd.f32 %v16575_v20, %v16574_v23  ;;  %v20195_v54 = vld [vmem:[%s27025_s3 + $0x428] ss:$16 sps:$4 sm:$0xff]   ;;  %v22466_v20 = vld [vmem:[#allocation2 + $0x60] sm:$0xff] }
 0x2c8   :  { %3506 = vmatmul.mubr.bf16.vlgmr.msra.gmra.mrb[192].mxu1 %v20190_v11  ;;  %v22459_v23 = vld [vmem:[#allocation2 + $0x18] sm:$0xff] }
 0x2c9   :  { %v1727_v16 = vadd.f32 %v16576_v38, %v22160_v58  ;;  %17034 = vmatpush3.bf16.msra.mxu1 %v22429_v45  ;;  %3513 = vmatprep.mubr.bf16.mxu1 %v20193_v35  ;;  %v20199_v35 = vld [vmem:[%s27025_s3 + $0x46c] ss:$16 sps:$4 sm:$0xff]  }
 0x2ca   :  { %17035 = vmatprep.subr.bf16.mxu1 %v22432_v41 }
 0x2cb   :  { %v16577_v21 = vpop.f32.mrb[88].mxu1  ;;  %v1751_v24 = vpack.c.bf16 %v1727_v16, %v1724_v2 }
 0x2cc   :  { %v16578_v17 = vpop.f32.mrb[89].mxu1 }
 0x2cd   :  { %v16579_v46 = vadd.f32 %v16578_v17, %v16577_v21  ;;  %17036 = vmatpush3.bf16.msra.mxu1 %v22438_v51  ;;  %v16580_v58 = vpop.f32.mrb[90].mxu1  ;;  %18879 = vmatmul.mubr.msk.bf16.gmra.mrb[104].mxu0 %vm892_vm4, %v1751_v24  ;;  %v22471_v24 = vld [vmem:[#allocation2 + $0x20] sm:$0xff]  ;;  %v22474_v17 = vld [vmem:[#allocation2 + $0x68] sm:$0xff] }
 0x2ce   :  { %17037 = vmatprep.subr.bf16.mxu1 %v22445_v44  ;;  %v16581_v9 = vpop.f32.mrb[91].mxu1 }
 0x2cf   :  { %v1732_v15 = vadd.f32 %v16579_v46, %v22181_v12  ;;  %v16582_v34 = vadd.f32 %v16581_v9, %v16580_v58  ;;  %v20198_v12 = vld [vmem:[%s27025_s3 + $0x448] ss:$16 sps:$4 sm:$0xff]  }
 0x2d0   :  { %3514 = vmatmul.mubr.bf16.gmra.mrb[196].mxu1 %v20195_v54  ;;  %v20201_v46 = vld [vmem:[%s27025_s3 + $0x468] ss:$16 sps:$4 sm:$0xff]  }
 0x2d1   :  { %v1735_v22 = vadd.f32 %v16582_v34, %v22186_v19  ;;  %17038 = vmatpush3.bf16.msra.mxu1 %v22450_v33  ;;  %3521 = vmatprep.mubr.bf16.mxu1 %v20196_v29  ;;  %v22480_v58 = vld [vmem:[#allocation2 + $0x28] sm:$0xff]  ;;  %v22494_v29 = vld [vmem:[#allocation2 + $0x30] sm:$0xff]  ;;  %v22497_v9 = vld [vmem:[#allocation2 + $0x78] sm:$0xff] }
 0x2d2   :  { %17039 = vmatprep.subr.bf16.mxu1 %v22453_v4  ;;  %v22503_v34 = vld [vmem:[#allocation2 + $0x38] sm:$0xff] }
 0x2d3   :  { %v16583_v47 = vpop.f32.mrb[92].mxu1  ;;  %v1752_v56 = vpack.c.bf16 %v1735_v22, %v1732_v15  ;;  %v20204_v15 = vld [vmem:[%s27025_s3 + $0x488] ss:$16 sps:$4 sm:$0xff]  }
 0x2d4   :  { %v16584_v11 = vpop.f32.mrb[93].mxu1 }
 0x2d5   :  { %v16585_v61 = vadd.f32 %v16584_v11, %v16583_v47  ;;  %17040 = vmatpush3.bf16.msra.mxu1 %v22459_v23  ;;  %v16586_v19 = vpop.f32.mrb[94].mxu1  ;;  %18882 = vmatprep.mubr.msk.bf16.mxu0 %vm892_vm4, %v1752_v56  ;;  %v20219_v47 = vld [vmem:[%s27025_s3 + $0x504] ss:$16 sps:$4 sm:$0xff]  }
 0x2d6   :  { %17041 = vmatprep.subr.bf16.mxu1 %v22466_v20  ;;  %v16587_v2 = vpop.f32.mrb[95].mxu1 }
 0x2d7   :  { %v1740_v38 = vadd.f32 %v16585_v61, %v22207_v52  ;;  %v16588_v16 = vadd.f32 %v16587_v2, %v16586_v19  ;;  %v20202_v52 = vld [vmem:[%s27025_s3 + $0x48c] ss:$16 sps:$4 sm:$0xff]  }
 0x2d8   :  { %3522 = vmatmul.mubr.bf16.gmra.mrb[200].mxu1 %v20198_v12 }
 0x2d9   :  { %v1743_v21 = vadd.f32 %v16588_v16, %v22212_v63  ;;  %17042 = vmatpush3.bf16.msra.mxu1 %v22471_v24  ;;  %3529 = vmatprep.mubr.bf16.mxu1 %v20199_v35  ;;  %v22487_v63 = vld [vmem:[#allocation2 + $0x70] sm:$0xff] }
 0x2da   :  { %17043 = vmatprep.subr.bf16.mxu1 %v22474_v17 }
 0x2db   :  { %v1753_v54 = vpack.c.bf16 %v1743_v21, %v1740_v38  ;;  %v20217_v38 = vld [vmem:[%s27025_s3 + $0x500] ss:$16 sps:$4 sm:$0xff]  }
 0x2dd   :  { %17044 = vmatpush3.bf16.msra.mxu1 %v22480_v58  ;;  %18883 = vmatmul.mubr.msk.bf16.gmra.mrb[108].mxu0 %vm892_vm4, %v1753_v54  ;;  %v20223_v54 = vld [vmem:[%s27025_s3 + $0x524] ss:$16 sps:$4 sm:$0xff]  }
 0x2de   :  { %17045 = vmatprep.subr.bf16.mxu1 %v22487_v63  ;;  %18894 = vmatprep.mubr.msk.bf16.mxu0 %vm892_vm4, %v1343_v42  ;;  %v27048_v42 = vpack.c.bf16 %v22265_v40, %v22262_v50 }
 0x2e0   :  { %3530 = vmatmul.mubr.bf16.gmra.mrb[204].mxu1 %v20201_v46 }
 0x2e1   :  { %17046 = vmatpush3.bf16.msra.mxu1 %v22494_v29  ;;  %3537 = vmatprep.mubr.bf16.mxu1 %v20202_v52 }
 0x2e2   :  { %17047 = vmatprep.subr.bf16.mxu1 %v22497_v9 }
 0x2e5   :  { %17048 = vmatpush3.bf16.msra.mxu1 %v22503_v34  ;;  %18895 = vmatmul.mubr.msk.bf16.vlgmr.msra.gmra.mrb[96].mxu0 %vm892_vm4, %v27047_v30 }
 0x2e6   :  { %16678 = vmatpush3.bf16.msra.mxu0 %v22157_v57  ;;  %17173 = vmatprep.subr.bf16.mxu1 %v22377_v49  ;;  %v27049_v57 = vpack.c.bf16 %v22279_v6, %v22276_v1 }
 0x2e7   :  { %18898 = vmatprep.mubr.msk.bf16.mxu0 %vm892_vm4, %v27048_v42  ;;  %16679 = vmatprep.subr.bf16.mxu0 %v22162_v60  ;;  %v27050_v60 = vpack.c.bf16 %v22293_v48, %v22290_v14  ;;  %v20222_v42 = vld [vmem:[%s27025_s3 + $0x228] ss:$16 sps:$4 sm:$0xff]  }
 0x2e8   :  { %3538 = vmatmul.mubr.bf16.gmra.mrb[208].mxu1 %v20204_v15 }
 0x2e9   :  { %3545 = vmatprep.mubr.bf16.mxu1 %v20205_v36 }
 0x2ea   :  { %16680 = vmatpush3.bf16.msra.mxu0 %v22173_v13  ;;  %v16629_v13 = vpop.f32.mrb[96].mxu1 }
 0x2eb   :  { %16681 = vmatprep.subr.bf16.mxu0 %v22176_v7  ;;  %v16630_v7 = vpop.f32.mrb[97].mxu1 }
 0x2ec   :  { %v22539_v50 = vadd.f32 %v16630_v7, %v16629_v13  ;;  %v16632_v40 = vpop.f32.mrb[98].mxu1  ;;  %v20225_v7 = vld [vmem:[%s27025_s3 + $0x520] ss:$16 sps:$4 sm:$0xff]  }
 0x2ed   :  { %18899 = vmatmul.mubr.msk.bf16.gmra.mrb[100].mxu0 %vm892_vm4, %v27049_v57  ;;  %v16633_v1 = vpop.f32.mrb[99].mxu1  ;;  %v20226_v57 = vld [vmem:[%s27025_s3 + $0x24c] ss:$16 sps:$4 sm:$0xff]  }
 0x2ee   :  { %16682 = vmatpush3.bf16.msra.mxu0 %v22183_v18  ;;  %18902 = vmatprep.mubr.msk.bf16.mxu0 %vm892_vm4, %v27050_v60  ;;  %v20210_v18 = vld [vmem:[%s27025_s3 + $0x4c8] ss:$16 sps:$4 sm:$0xff]   ;;  %v22545_v6 = vadd.f32 %v16633_v1, %v16632_v40  ;;  %v16635_v14 = vpop.f32.mrb[100].mxu1  ;;  %v20229_v1 = vld [vmem:[%s27025_s3 + $0x544] ss:$16 sps:$4 sm:$0xff]  }
 0x2ef   :  { %16683 = vmatprep.subr.bf16.mxu0 %v22188_v26  ;;  %v27051_v26 = vpack.c.bf16 %v22307_v28, %v22304_v32  ;;  %v16636_v48 = vpop.f32.mrb[101].mxu1  ;;  %v20216_v32 = vld [vmem:[%s27025_s3 + $0x20c] ss:$16 sps:$4 sm:$0xff]  }
 0x2f0   :  { %3546 = vmatmul.mubr.bf16.gmra.mrb[212].mxu1 %v20207_v25  ;;  %v22564_v28 = vadd.f32 %v16636_v48, %v16635_v14 }
 0x2f1   :  { %3553 = vmatprep.mubr.bf16.mxu1 %v20208_v3 }
 0x2f2   :  { %16684 = vmatpush3.bf16.msra.mxu0 %v22199_v39  ;;  %v20211_v39 = vld [vmem:[%s27025_s3 + $0x4ec] ss:$16 sps:$4 sm:$0xff]  }
 0x2f3   :  { %16685 = vmatprep.subr.bf16.mxu0 %v22202_v43  ;;  %v27052_v43 = vpack.c.bf16 %v22325_v8, %v22322_v55 }
 0x2f5   :  { %18903 = vmatmul.mubr.msk.bf16.gmra.mrb[104].mxu0 %vm892_vm4, %v27051_v26 }
 0x2f6   :  { %16686 = vmatpush3.bf16.msra.mxu0 %v22209_v62  ;;  %18906 = vmatprep.mubr.msk.bf16.mxu0 %vm892_vm4, %v27052_v43  ;;  %v16638_v62 = vpop.f32.mrb[102].mxu1 }
 0x2f7   :  { %16687 = vmatprep.subr.bf16.mxu0 %v22214_v0  ;;  %v16639_v55 = vpop.f32.mrb[103].mxu1  ;;  %v20213_v0 = vld [vmem:[%s27025_s3 + $0x4e8] ss:$16 sps:$4 sm:$0xff]  }
 0x2f8   :  { %3554 = vmatmul.mubr.bf16.gmra.mrb[216].mxu1 %v20210_v18  ;;  %v22570_v8 = vadd.f32 %v16639_v55, %v16638_v62  ;;  %v16641_v22 = vpop.f32.mrb[104].mxu1  ;;  %v20232_v55 = vld [vmem:[%s27025_s3 + $0x26c] ss:$16 sps:$4 sm:$0xff]  }
 0x2f9   :  { %3561 = vmatprep.mubr.bf16.mxu1 %v20211_v39  ;;  %v16642_v56 = vpop.f32.mrb[105].mxu1 }
 0x2fa   :  { %16688 = vmatpush3.bf16.msra.mxu0 %v22220_v10  ;;  %v27053_v10 = vpack.c.bf16 %v22343_v53, %v22340_v27  ;;  %v16644_v11 = vpop.f32.mrb[106].mxu1  ;;  %v20214_v53 = vld [vmem:[%s27025_s3 + $0x208] ss:$16 sps:$4 sm:$0xff]  }
 0x2fb   :  { %16689 = vmatprep.subr.bf16.mxu0 %v22356_v31  ;;  %v22580_v31 = vadd.f32 %v16642_v56, %v16641_v22  ;;  %v16645_v12 = vpop.f32.mrb[107].mxu1  ;;  %v20231_v22 = vld [vmem:[%s27025_s3 + $0x540] ss:$16 sps:$4 sm:$0xff]  }
 0x2fc   :  { %v22583_v61 = vadd.f32 %v16645_v12, %v16644_v11  ;;  %v16647_v27 = vpop.f32.mrb[108].mxu1 }
 0x2fd   :  { %18907 = vmatmul.mubr.msk.bf16.gmra.mrb[108].mxu0 %vm892_vm4, %v27053_v10  ;;  %v16648_v19 = vpop.f32.mrb[109].mxu1 }
 0x2fe   :  { %16690 = vmatpush3.bf16.msra.mxu0 %v22361_v5  ;;  %2375 = vmatprep.mubr.bf16.mxu0 %v20216_v32  ;;  %v20220_v5 = vld [vmem:[%s27025_s3 + $0x22c] ss:$16 sps:$4 sm:$0xff]   ;;  %v22592_v35 = vadd.f32 %v16648_v19, %v16647_v27  ;;  %v20228_v32 = vld [vmem:[%s27025_s3 + $0x248] ss:$16 sps:$4 sm:$0xff]  }
 0x2ff   :  { %16691 = vmatprep.subr.bf16.mxu0 %v22364_v59  ;;  %v16650_v59 = vpop.f32.mrb[110].mxu1  ;;  %v20238_v19 = vld [vmem:[%s27025_s3 + $0x28c] ss:$16 sps:$4 sm:$0xff]  }
 0x300   :  { %3562 = vmatmul.mubr.bf16.gmra.mrb[220].mxu1 %v20213_v0  ;;  %v16651_v2 = vpop.f32.mrb[111].mxu1 }
 0x301   :  { %3973 = vmatprep.mubr.bf16.mxu1 %v20219_v47  ;;  %v22597_v16 = vadd.f32 %v16651_v2, %v16650_v59  ;;  %v16653_v21 = vpop.f32.mrb[112].mxu1  ;;  %v20235_v47 = vld [vmem:[%s27025_s3 + $0x564] ss:$16 sps:$4 sm:$0xff]   ;;  %v20237_v59 = vld [vmem:[%s27025_s3 + $0x560] ss:$16 sps:$4 sm:$0xff]  }
 0x302   :  { %16692 = vmatpush3.bf16.msra.mxu0 %v22370_v37  ;;  %v16654_v46 = vpop.f32.mrb[113].mxu1 }
 0x303   :  { %v22602_v52 = vadd.f32 %v16654_v46, %v16653_v21  ;;  %v16656_v15 = vpop.f32.mrb[114].mxu1 }
 0x304   :  { %v16657_v30 = vpop.f32.mrb[115].mxu1 }
 0x305   :  { %2376 = vmatmul.mubr.bf16.vlgmr.msra.gmra.mrb[112].mxu0 %v20214_v53  ;;  %v22604_v36 = vadd.f32 %v16657_v30, %v16656_v15  ;;  %v16659_v25 = vpop.f32.mrb[116].mxu1  ;;  %v20234_v53 = vld [vmem:[%s27025_s3 + $0x268] ss:$16 sps:$4 sm:$0xff]  }
 0x306   :  { %2383 = vmatprep.mubr.bf16.mxu0 %v20220_v5  ;;  %v16660_v3 = vpop.f32.mrb[117].mxu1  ;;  %v20240_v30 = vld [vmem:[%s27025_s3 + $0x288] ss:$16 sps:$4 sm:$0xff]  }
 0x307   :  { %v22614_v60 = vadd.f32 %v16660_v3, %v16659_v25  ;;  %v16662_v13 = vpop.f32.mrb[118].mxu1 }
 0x308   :  { %3974 = vmatmul.mubr.bf16.vlgmr.msra.gmra.mrb[224].mxu1 %v20217_v38  ;;  %v16663_v40 = vpop.f32.mrb[119].mxu1  ;;  %v20241_v38 = vld [vmem:[%s27025_s3 + $0x584] ss:$16 sps:$4 sm:$0xff]  }
 0x309   :  { %17174 = vmatpush3.bf16.msra.mxu1 %v22429_v45  ;;  %3981 = vmatprep.mubr.bf16.mxu1 %v20223_v54  ;;  %v22623_v18 = vadd.f32 %v16663_v40, %v16662_v13  ;;  %v20247_v13 = vld [vmem:[%s27025_s3 + $0x5a4] ss:$16 sps:$4 sm:$0xff]  }
 0x30a   :  { %17175 = vmatprep.subr.bf16.mxu1 %v22432_v41 }
 0x30b   :  { %v16665_v26 = vpop.f32.mrb[120].mxu1 }
 0x30c   :  { %v16666_v39 = vpop.f32.mrb[121].mxu1 }
 0x30d   :  { %17176 = vmatpush3.bf16.msra.mxu1 %v22438_v51  ;;  %2384 = vmatmul.mubr.bf16.gmra.mrb[116].mxu0 %v20222_v42  ;;  %v22626_v43 = vadd.f32 %v16666_v39, %v16665_v26  ;;  %v16668_v14 = vpop.f32.mrb[122].mxu1  ;;  %v20244_v42 = vld [vmem:[%s27025_s3 + $0x2ac] ss:$16 sps:$4 sm:$0xff]   ;;  %v20246_v39 = vld [vmem:[%s27025_s3 + $0x2a8] ss:$16 sps:$4 sm:$0xff]  }
 0x30e   :  { %17177 = vmatprep.subr.bf16.mxu1 %v22445_v44  ;;  %2391 = vmatprep.mubr.bf16.mxu0 %v20226_v57  ;;  %v16669_v48 = vpop.f32.mrb[123].mxu1  ;;  %v20243_v57 = vld [vmem:[%s27025_s3 + $0x580] ss:$16 sps:$4 sm:$0xff]  }
 0x30f   :  { %v22632_v62 = vadd.f32 %v16669_v48, %v16668_v14  ;;  %v20250_v14 = vld [vmem:[%s27025_s3 + $0x2cc] ss:$16 sps:$4 sm:$0xff]  }
 0x310   :  { %3982 = vmatmul.mubr.bf16.gmra.mrb[228].mxu1 %v20225_v7 }
 0x311   :  { %17178 = vmatpush3.bf16.msra.mxu1 %v22450_v33  ;;  %3989 = vmatprep.mubr.bf16.mxu1 %v20229_v1 }
 0x312   :  { %17179 = vmatprep.subr.bf16.mxu1 %v22453_v4 }
 0x313   :  { %v16671_v0 = vpop.f32.mrb[124].mxu1 }
 0x314   :  { %v16672_v10 = vpop.f32.mrb[125].mxu1 }
 0x315   :  { %17180 = vmatpush3.bf16.msra.mxu1 %v22459_v23  ;;  %2392 = vmatmul.mubr.bf16.gmra.mrb[120].mxu0 %v20228_v32  ;;  %v22645_v56 = vadd.f32 %v16672_v10, %v16671_v0  ;;  %v16674_v11 = vpop.f32.mrb[126].mxu1  ;;  %v20249_v32 = vld [vmem:[%s27025_s3 + $0x5a0] ss:$16 sps:$4 sm:$0xff]  }
 0x316   :  { %17181 = vmatprep.subr.bf16.mxu1 %v22466_v20  ;;  %2399 = vmatprep.mubr.bf16.mxu0 %v20232_v55  ;;  %v16675_v12 = vpop.f32.mrb[127].mxu1  ;;  %v20253_v55 = vld [vmem:[%s27025_s3 + $0x5c4] ss:$16 sps:$4 sm:$0xff]  }
 0x317   :  { %v22648_v27 = vadd.f32 %v16675_v12, %v16674_v11  ;;  %v20252_v11 = vld [vmem:[%s27025_s3 + $0x2c8] ss:$16 sps:$4 sm:$0xff]   ;;  %v20256_v12 = vld [vmem:[%s27025_s3 + $0x2ec] ss:$16 sps:$4 sm:$0xff]  }
 0x318   :  { %3990 = vmatmul.mubr.bf16.gmra.mrb[232].mxu1 %v20231_v22 }
 0x319   :  { %17182 = vmatpush3.bf16.msra.mxu1 %v22471_v24  ;;  %3997 = vmatprep.mubr.bf16.mxu1 %v20235_v47 }
 0x31a   :  { %17183 = vmatprep.subr.bf16.mxu1 %v22474_v17 }
 0x31b   :  { %v16769_v5 = vpop.f32.mrb[128].mxu1 }
 0x31c   :  { %v16770_v2 = vpop.f32.mrb[129].mxu1 }
 0x31d   :  { %17184 = vmatpush3.bf16.msra.mxu1 %v22480_v58  ;;  %2400 = vmatmul.mubr.bf16.gmra.mrb[124].mxu0 %v20234_v53  ;;  %v22665_v21 = vadd.f32 %v16770_v2, %v16769_v5  ;;  %v16772_v54 = vpop.f32.mrb[130].mxu1 }
 0x31e   :  { %17185 = vmatprep.subr.bf16.mxu1 %v22487_v63  ;;  %2407 = vmatprep.mubr.bf16.mxu0 %v20238_v19  ;;  %v16773_v46 = vpop.f32.mrb[131].mxu1  ;;  %v20255_v19 = vld [vmem:[%s27025_s3 + $0x5c0] ss:$16 sps:$4 sm:$0xff]  }
 0x31f   :  { %v22668_v15 = vadd.f32 %v16773_v46, %v16772_v54 }
 0x320   :  { %3998 = vmatmul.mubr.bf16.gmra.mrb[236].mxu1 %v20237_v59  ;;  %v20259_v59 = vld [vmem:[%s27025_s3 + $0x5e4] ss:$16 sps:$4 sm:$0xff]  }
 0x321   :  { %17186 = vmatpush3.bf16.msra.mxu1 %v22494_v29  ;;  %4005 = vmatprep.mubr.bf16.mxu1 %v20241_v38 }
 0x322   :  { %17187 = vmatprep.subr.bf16.mxu1 %v22497_v9 }
 0x323   :  { %v16775_v25 = vpop.f32.mrb[132].mxu1 }
 0x324   :  { %v16776_v3 = vpop.f32.mrb[133].mxu1 }
 0x325   :  { %17188 = vmatpush3.bf16.msra.mxu1 %v22503_v34  ;;  %2408 = vmatmul.mubr.bf16.gmra.mrb[128].mxu0 %v20240_v30  ;;  %v22685_v7 = vadd.f32 %v16776_v3, %v16775_v25  ;;  %v16778_v40 = vpop.f32.mrb[134].mxu1  ;;  %v20258_v30 = vld [vmem:[%s27025_s3 + $0x2e8] ss:$16 sps:$4 sm:$0xff]   ;;  %v20261_v25 = vld [vmem:[%s27025_s3 + $0x5e0] ss:$16 sps:$4 sm:$0xff]  }
 0x326   :  { %17313 = vmatprep.subr.bf16.mxu1 %v22377_v49  ;;  %2415 = vmatprep.mubr.bf16.mxu0 %v20244_v42  ;;  %v16779_v1 = vpop.f32.mrb[135].mxu1  ;;  %v20264_v3 = vld [vmem:[%s27025_s3 + $0x604] ss:$16 sps:$4 sm:$0xff]  }
 0x327   :  { %v22688_v26 = vadd.f32 %v16779_v1, %v16778_v40 }
 0x328   :  { %4006 = vmatmul.mubr.bf16.gmra.mrb[240].mxu1 %v20243_v57 }
 0x329   :  { %4013 = vmatprep.mubr.bf16.mxu1 %v20247_v13 }
 0x32b   :  { %v16781_v48 = vpop.f32.mrb[136].mxu1 }
 0x32c   :  { %v16782_v49 = vpop.f32.mrb[137].mxu1 }
 0x32d   :  { %2416 = vmatmul.mubr.bf16.gmra.mrb[132].mxu0 %v20246_v39  ;;  %v22702_v0 = vadd.f32 %v16782_v49, %v16781_v48  ;;  %v16784_v22 = vpop.f32.mrb[138].mxu1  ;;  %v20262_v48 = vld [vmem:[%s27025_s3 + $0x600] ss:$16 sps:$4 sm:$0xff]   ;;  %v20267_v49 = vld [vmem:[%s27025_s3 + $0x624] ss:$16 sps:$4 sm:$0xff]  }
 0x32e   :  { %2423 = vmatprep.mubr.bf16.mxu0 %v20250_v14  ;;  %v16785_v10 = vpop.f32.mrb[139].mxu1 }
 0x32f   :  { %v22704_v47 = vadd.f32 %v16785_v10, %v16784_v22 }
 0x330   :  { %4014 = vmatmul.mubr.bf16.gmra.mrb[244].mxu1 %v20249_v32 }
 0x331   :  { %4021 = vmatprep.mubr.bf16.mxu1 %v20253_v55 }
 0x333   :  { %v16787_v53 = vpop.f32.mrb[140].mxu1 }
 0x334   :  { %v16788_v5 = vpop.f32.mrb[141].mxu1 }
 0x335   :  { %2424 = vmatmul.mubr.bf16.gmra.mrb[136].mxu0 %v20252_v11  ;;  %v22718_v2 = vadd.f32 %v16788_v5, %v16787_v53  ;;  %v16790_v38 = vpop.f32.mrb[142].mxu1  ;;  %v20265_v53 = vld [vmem:[%s27025_s3 + $0x620] ss:$16 sps:$4 sm:$0xff]   ;;  %v20270_v5 = vld [vmem:[%s27025_s3 + $0x644] ss:$16 sps:$4 sm:$0xff]  }
 0x336   :  { %2431 = vmatprep.mubr.bf16.mxu0 %v20256_v12  ;;  %v16791_v54 = vpop.f32.mrb[143].mxu1 }
 0x337   :  { %v22720_v46 = vadd.f32 %v16791_v54, %v16790_v38 }
 0x338   :  { %4022 = vmatmul.mubr.bf16.gmra.mrb[248].mxu1 %v20255_v19 }
 0x339   :  { %4029 = vmatprep.mubr.bf16.mxu1 %v20259_v59 }
 0x33b   :  { %v16793_v42 = vpop.f32.mrb[144].mxu1 }
 0x33c   :  { %v16794_v57 = vpop.f32.mrb[145].mxu1 }
 0x33d   :  { %2432 = vmatmul.mubr.bf16.gmra.mrb[140].mxu0 %v20258_v30  ;;  %v22731_v13 = vadd.f32 %v16794_v57, %v16793_v42  ;;  %v16796_v40 = vpop.f32.mrb[146].mxu1 }
 0x33e   :  { %v16797_v1 = vpop.f32.mrb[147].mxu1 }
 0x33f   :  { %v22733_v39 = vadd.f32 %v16797_v1, %v16796_v40  ;;  %v20320_v40 = vld [vmem:[%s27027_s4 + $0x48] sm:$0xff]  }
 0x340   :  { %4030 = vmatmul.mubr.bf16.gmra.mrb[252].mxu1 %v20261_v25 }
 0x341   :  { %4538 = vmatprep.mubr.bf16.mxu1 %v20264_v3 }
 0x343   :  { %v16799_v14 = vpop.f32.mrb[148].mxu1 }
 0x344   :  { %v16800_v32 = vpop.f32.mrb[149].mxu1 }
 0x345   :  { %v22741_v55 = vadd.f32 %v16800_v32, %v16799_v14  ;;  %v16802_v22 = vpop.f32.mrb[150].mxu1 }
 0x346   :  { %v16803_v10 = vpop.f32.mrb[151].mxu1 }
 0x347   :  { %v22743_v11 = vadd.f32 %v16803_v10, %v16802_v22  ;;  %v20274_v22 = vld [vmem:[%s27025_s3 + $0x680] ss:$16 sps:$4 sm:$0xff]  }
 0x348   :  { %4539 = vmatmul.mubr.bf16.vlgmr.msra.gmra.mrb[0].mxu1 %v20262_v48 }
 0x349   :  { %17314 = vmatpush3.bf16.msra.mxu1 %v22429_v45  ;;  %4546 = vmatprep.mubr.bf16.mxu1 %v20267_v49 }
 0x34a   :  { %17315 = vmatprep.subr.bf16.mxu1 %v22432_v41 }
 0x34b   :  { %v16805_v12 = vpop.f32.mrb[152].mxu1 }
 0x34c   :  { %v16806_v19 = vpop.f32.mrb[153].mxu1 }
 0x34d   :  { %17316 = vmatpush3.bf16.msra.mxu1 %v22438_v51  ;;  %v22754_v59 = vadd.f32 %v16806_v19, %v16805_v12  ;;  %v16808_v38 = vpop.f32.mrb[154].mxu1  ;;  %v20268_v51 = vld [vmem:[%s27025_s3 + $0x640] ss:$16 sps:$4 sm:$0xff]  }
 0x34e   :  { %17317 = vmatprep.subr.bf16.mxu1 %v22445_v44  ;;  %v16809_v45 = vpop.f32.mrb[155].mxu1  ;;  %v20273_v44 = vld [vmem:[%s27025_s3 + $0x664] ss:$16 sps:$4 sm:$0xff]  }
 0x34f   :  { %v22757_v54 = vadd.f32 %v16809_v45, %v16808_v38 }
 0x350   :  { %4547 = vmatmul.mubr.bf16.gmra.mrb[4].mxu1 %v20265_v53  ;;  %v22812_v53 = vld [vmem:[#allocation2 + $0xc0] sm:$0xff] }
 0x351   :  { %17318 = vmatpush3.bf16.msra.mxu1 %v22450_v33  ;;  %4554 = vmatprep.mubr.bf16.mxu1 %v20270_v5 }
 0x352   :  { %17319 = vmatprep.subr.bf16.mxu1 %v22453_v4  ;;  %v20319_v4 = vld [vmem:[%s27027_s4 + $0x40] sm:$0xff]  }
 0x353   :  { %v16811_v41 = vpop.f32.mrb[156].mxu1  ;;  %18910 = vmatprep.subr.bf16.mxu0 %v20319_v4 }
 0x354   :  { %v16812_v30 = vpop.f32.mrb[157].mxu1  ;;  %18911 = vmatpush3.bf16.msra.mxu0 %v20319_v4 }
 0x355   :  { %17320 = vmatpush3.bf16.msra.mxu1 %v22459_v23  ;;  %v22768_v42 = vadd.f32 %v16812_v30, %v16811_v41  ;;  %v16814_v25 = vpop.f32.mrb[158].mxu1  ;;  %18912 = vmatprep.subr.bf16.mxu0 %v20320_v40 }
 0x356   :  { %17321 = vmatprep.subr.bf16.mxu1 %v22466_v20  ;;  %v16815_v33 = vpop.f32.mrb[159].mxu1  ;;  %v20271_v20 = vld [vmem:[%s27025_s3 + $0x660] ss:$16 sps:$4 sm:$0xff]  }
 0x357   :  { %v22771_v57 = vadd.f32 %v16815_v33, %v16814_v25 }
 0x358   :  { %4555 = vmatmul.mubr.bf16.gmra.mrb[8].mxu1 %v20268_v51  ;;  %18913 = vmatpush3.bf16.msra.mxu0 %v20320_v40 }
 0x359   :  { %17322 = vmatpush3.bf16.msra.mxu1 %v22471_v24  ;;  %4562 = vmatprep.mubr.bf16.mxu1 %v20273_v44  ;;  %v20276_v24 = vld [vmem:[%s27025_s3 + $0x684] ss:$16 sps:$4 sm:$0xff]  }
 0x35a   :  { %17323 = vmatprep.subr.bf16.mxu1 %v22474_v17  ;;  %v20282_v44 = vld [vmem:[%s27025_s3 + $0x6c4] ss:$16 sps:$4 sm:$0xff]  }
 0x35b   :  { %v16833_v23 = vpop.f32.mrb[160].mxu1 }
 0x35c   :  { %v16834_v3 = vpop.f32.mrb[161].mxu1 }
 0x35d   :  { %17324 = vmatpush3.bf16.msra.mxu1 %v22480_v58  ;;  %v16835_v1 = vadd.f32 %v16834_v3, %v16833_v23  ;;  %v16836_v17 = vpop.f32.mrb[162].mxu1  ;;  %v20324_v58 = vld [vmem:[%s27027_s4 + $0x50] sm:$0xff]  }
 0x35e   :  { %17325 = vmatprep.subr.bf16.mxu1 %v22487_v63  ;;  %v16837_v14 = vpop.f32.mrb[163].mxu1  ;;  %18914 = vmatprep.subr.bf16.mxu0 %v20324_v58 }
 0x35f   :  { %v22790_v48 = vadd.f32 %v16835_v1, %v22665_v21  ;;  %v16838_v32 = vadd.f32 %v16837_v14, %v16836_v17  ;;  %18915 = vmatpush3.bf16.msra.mxu0 %v20324_v58 }
 0x360   :  { %4563 = vmatmul.mubr.bf16.gmra.mrb[12].mxu1 %v20271_v20 }
 0x361   :  { %17326 = vmatpush3.bf16.msra.mxu1 %v22494_v29  ;;  %4570 = vmatprep.mubr.bf16.mxu1 %v20276_v24  ;;  %v22797_v49 = vadd.f32 %v16838_v32, %v22668_v15  ;;  %v20325_v29 = vld [vmem:[%s27027_s4 + $0x58] sm:$0xff]   ;;  %v20280_v24 = vld [vmem:[%s27025_s3 + $0x6c0] ss:$16 sps:$4 sm:$0xff]  }
 0x362   :  { %17327 = vmatprep.subr.bf16.mxu1 %v22497_v9  ;;  %v20279_v9 = vld [vmem:[%s27025_s3 + $0x6a4] ss:$16 sps:$4 sm:$0xff]   ;;  %18916 = vmatprep.subr.bf16.mxu0 %v20325_v29 }
 0x363   :  { %v16839_v63 = vpop.f32.mrb[164].mxu1  ;;  %v3005_v21 = vpack.c.bf16 %v22797_v49, %v22790_v48  ;;  %18917 = vmatpush3.bf16.msra.mxu0 %v20325_v29  ;;  %v20283_v29 = vld [vmem:[%s27025_s3 + $0x6e0] ss:$16 sps:$4 sm:$0xff]   ;;  %v23125_v49 = vld [vmem:[#allocation2 + $0x78] sm:$0xff] }
 0x364   :  { %v16840_v10 = vpop.f32.mrb[165].mxu1  ;;  %v23122_v48 = vld [vmem:[#allocation2 + $0x30] sm:$0xff] }
 0x365   :  { %17328 = vmatpush3.bf16.msra.mxu1 %v22503_v34  ;;  %v16841_v15 = vadd.f32 %v16840_v10, %v16839_v63  ;;  %v16842_v12 = vpop.f32.mrb[166].mxu1  ;;  %v22821_v34 = vld [vmem:[%s27027_s4 + $0x60] sm:$0xff]  }
 0x366   :  { %17377 = vmatprep.subr.bf16.mxu1 %v22812_v53  ;;  %v16843_v19 = vpop.f32.mrb[167].mxu1  ;;  %18934 = vmatprep.subr.bf16.mxu0 %v22821_v34 }
 0x367   :  { %v22816_v5 = vadd.f32 %v16841_v15, %v22685_v7  ;;  %v16844_v38 = vadd.f32 %v16843_v19, %v16842_v12  ;;  %v20277_v7 = vld [vmem:[%s27025_s3 + $0x6a0] ss:$16 sps:$4 sm:$0xff]  }
 0x368   :  { %4571 = vmatmul.mubr.bf16.gmra.mrb[16].mxu1 %v20274_v22 }
 0x369   :  { %4578 = vmatprep.mubr.bf16.mxu1 %v20279_v9  ;;  %v22824_v45 = vadd.f32 %v16844_v38, %v22688_v26 }
 0x36b   :  { %v3006_v41 = vpack.c.bf16 %v22824_v45, %v22816_v5  ;;  %v16845_v51 = vpop.f32.mrb[168].mxu1  ;;  %v20359_v5 = vld [vmem:[%s27025_s3 + $0x8ac] ss:$16 sps:$4 sm:$0xff]   ;;  %v20357_v45 = vld [vmem:[%s27025_s3 + $0x8a8] ss:$16 sps:$4 sm:$0xff]  }
 0x36c   :  { %v16846_v30 = vpop.f32.mrb[169].mxu1 }
 0x36d   :  { %v16847_v25 = vadd.f32 %v16846_v30, %v16845_v51  ;;  %v16848_v33 = vpop.f32.mrb[170].mxu1 }
 0x36e   :  { %v16849_v4 = vpop.f32.mrb[171].mxu1 }
 0x36f   :  { %v22836_v26 = vadd.f32 %v16847_v25, %v22702_v0  ;;  %v16850_v23 = vadd.f32 %v16849_v4, %v16848_v33  ;;  %v20285_v0 = vld [vmem:[%s27025_s3 + $0x6e4] ss:$16 sps:$4 sm:$0xff]  }
 0x370   :  { %4579 = vmatmul.mubr.bf16.gmra.mrb[20].mxu1 %v20277_v7 }
 0x371   :  { %4586 = vmatprep.mubr.bf16.mxu1 %v20282_v44  ;;  %v22839_v20 = vadd.f32 %v16850_v23, %v22704_v47  ;;  %v20286_v44 = vld [vmem:[%s27025_s3 + $0x700] ss:$16 sps:$4 sm:$0xff]  }
 0x373   :  { %v16851_v3 = vpop.f32.mrb[172].mxu1  ;;  %v3007_v40 = vpack.c.bf16 %v22839_v20, %v22836_v26  ;;  %v20360_v26 = vld [vmem:[%s27025_s3 + $0x8c8] ss:$16 sps:$4 sm:$0xff]   ;;  %v20365_v20 = vld [vmem:[%s27025_s3 + $0x8ec] ss:$16 sps:$4 sm:$0xff]  }
 0x374   :  { %v16852_v1 = vpop.f32.mrb[173].mxu1 }
 0x375   :  { %v16853_v17 = vadd.f32 %v16852_v1, %v16851_v3  ;;  %v16854_v14 = vpop.f32.mrb[174].mxu1 }
 0x376   :  { %v16855_v32 = vpop.f32.mrb[175].mxu1 }
 0x377   :  { %v22850_v58 = vadd.f32 %v16853_v17, %v22718_v2  ;;  %v16856_v47 = vadd.f32 %v16855_v32, %v16854_v14  ;;  %v20288_v2 = vld [vmem:[%s27025_s3 + $0x704] ss:$16 sps:$4 sm:$0xff]  }
 0x378   :  { %4587 = vmatmul.mubr.bf16.gmra.mrb[24].mxu1 %v20280_v24  ;;  %v22880_v24 = vld [vmem:[#allocation2 + $0x80] sm:$0xff] }
 0x379   :  { %4594 = vmatprep.mubr.bf16.mxu1 %v20285_v0  ;;  %v22853_v63 = vadd.f32 %v16856_v47, %v22720_v46  ;;  %v22886_v0 = vld [vmem:[#allocation2 + $0xc8] sm:$0xff] }
 0x37a   :  { %v22894_v47 = vld [vmem:[#allocation2 + $0x88] sm:$0xff] }
 0x37b   :  { %v16857_v22 = vpop.f32.mrb[176].mxu1  ;;  %v3008_v10 = vpack.c.bf16 %v22853_v63, %v22850_v58  ;;  %v20363_v58 = vld [vmem:[%s27025_s3 + $0x8e8] ss:$16 sps:$4 sm:$0xff]   ;;  %v20369_v63 = vld [vmem:[%s27027_s4 + $0x80] sm:$0xff]  }
 0x37c   :  { %v16858_v9 = vpop.f32.mrb[177].mxu1 }
 0x37d   :  { %v16859_v15 = vadd.f32 %v16858_v9, %v16857_v22  ;;  %v16860_v12 = vpop.f32.mrb[178].mxu1  ;;  %v22900_v9 = vld [vmem:[#allocation2 + $0xd0] sm:$0xff] }
 0x37e   :  { %v16861_v19 = vpop.f32.mrb[179].mxu1 }
 0x37f   :  { %v22864_v38 = vadd.f32 %v16859_v15, %v22731_v13  ;;  %v16862_v46 = vadd.f32 %v16861_v19, %v16860_v12  ;;  %v20291_v13 = vld [vmem:[%s27025_s3 + $0x724] ss:$16 sps:$4 sm:$0xff]  }
 0x380   :  { %4595 = vmatmul.mubr.bf16.gmra.mrb[28].mxu1 %v20283_v29  ;;  %v22906_v19 = vld [vmem:[#allocation2 + $0x90] sm:$0xff] }
 0x381   :  { %5103 = vmatprep.mubr.bf16.mxu1 %v20288_v2  ;;  %v22867_v51 = vadd.f32 %v16862_v46, %v22733_v39 }
 0x383   :  { %v16863_v7 = vpop.f32.mrb[180].mxu1  ;;  %v3009_v30 = vpack.c.bf16 %v22867_v51, %v22864_v38  ;;  %v20366_v38 = vld [vmem:[%s27025_s3 + $0x400] ss:$16 sps:$4 sm:$0xff]   ;;  %v20374_v51 = vld [vmem:[%s27025_s3 + $0x424] ss:$16 sps:$4 sm:$0xff]  }
 0x384   :  { %v16864_v25 = vpop.f32.mrb[181].mxu1 }
 0x385   :  { %v16865_v33 = vadd.f32 %v16864_v25, %v16863_v7  ;;  %v16866_v4 = vpop.f32.mrb[182].mxu1  ;;  %v22912_v7 = vld [vmem:[#allocation2 + $0xd8] sm:$0xff] }
 0x386   :  { %v16867_v23 = vpop.f32.mrb[183].mxu1 }
 0x387   :  { %v22878_v3 = vadd.f32 %v16865_v33, %v22741_v55  ;;  %v16868_v39 = vadd.f32 %v16867_v23, %v16866_v4  ;;  %v20289_v55 = vld [vmem:[%s27025_s3 + $0x720] ss:$16 sps:$4 sm:$0xff]   ;;  %v21328_v33 = vld [vmem:[#allocation2 + $0x98] sm:$0xff] }
 0x388   :  { %5104 = vmatmul.mubr.bf16.vlgmr.msra.gmra.mrb[32].mxu1 %v20286_v44 }
 0x389   :  { %17378 = vmatpush3.bf16.msra.mxu1 %v22880_v24  ;;  %5111 = vmatprep.mubr.bf16.mxu1 %v20291_v13  ;;  %v22884_v1 = vadd.f32 %v16868_v39, %v22743_v11  ;;  %v20294_v11 = vld [vmem:[%s27025_s3 + $0x744] ss:$16 sps:$4 sm:$0xff]  }
 0x38a   :  { %17379 = vmatprep.subr.bf16.mxu1 %v22886_v0  ;;  %v21329_v39 = vld [vmem:[#allocation2 + $0xe0] sm:$0xff] }
 0x38b   :  { %v16869_v17 = vpop.f32.mrb[184].mxu1  ;;  %v3010_v14 = vpack.c.bf16 %v22884_v1, %v22878_v3 }
 0x38c   :  { %v16870_v32 = vpop.f32.mrb[185].mxu1 }
 0x38d   :  { %17380 = vmatpush3.bf16.msra.mxu1 %v22894_v47  ;;  %v16871_v22 = vadd.f32 %v16870_v32, %v16869_v17  ;;  %v16872_v29 = vpop.f32.mrb[186].mxu1 }
 0x38e   :  { %17381 = vmatprep.subr.bf16.mxu1 %v22900_v9  ;;  %v16873_v2 = vpop.f32.mrb[187].mxu1 }
 0x38f   :  { %v22904_v15 = vadd.f32 %v16871_v22, %v22754_v59  ;;  %v16874_v12 = vadd.f32 %v16873_v2, %v16872_v29  ;;  %v20292_v59 = vld [vmem:[%s27025_s3 + $0x740] ss:$16 sps:$4 sm:$0xff]   ;;  %v21331_v29 = vld [vmem:[#allocation2 + $0xe8] sm:$0xff] }
 0x390   :  { %5112 = vmatmul.mubr.bf16.gmra.mrb[36].mxu1 %v20289_v55 }
 0x391   :  { %17382 = vmatpush3.bf16.msra.mxu1 %v22906_v19  ;;  %5119 = vmatprep.mubr.bf16.mxu1 %v20294_v11  ;;  %v22910_v46 = vadd.f32 %v16874_v12, %v22757_v54  ;;  %v20297_v54 = vld [vmem:[%s27025_s3 + $0x764] ss:$16 sps:$4 sm:$0xff]   ;;  %v20295_v12 = vld [vmem:[%s27025_s3 + $0x760] ss:$16 sps:$4 sm:$0xff]  }
 0x392   :  { %17383 = vmatprep.subr.bf16.mxu1 %v22912_v7  ;;  %v21330_v11 = vld [vmem:[#allocation2 + $0xa0] sm:$0xff] }
 0x393   :  { %v16875_v44 = vpop.f32.mrb[188].mxu1  ;;  %v3011_v25 = vpack.c.bf16 %v22910_v46, %v22904_v15 }
 0x394   :  { %v16876_v13 = vpop.f32.mrb[189].mxu1 }
 0x395   :  { %17384 = vmatpush3.bf16.msra.mxu1 %v21328_v33  ;;  %v16877_v4 = vadd.f32 %v16876_v13, %v16875_v44  ;;  %v16878_v23 = vpop.f32.mrb[190].mxu1  ;;  %v21332_v44 = vld [vmem:[#allocation2 + $0xa8] sm:$0xff]  ;;  %v21335_v13 = vld [vmem:[#allocation2 + $0xf8] sm:$0xff] }
 0x396   :  { %17385 = vmatprep.subr.bf16.mxu1 %v21329_v39  ;;  %v16879_v17 = vpop.f32.mrb[191].mxu1 }
 0x397   :  { %v22924_v55 = vadd.f32 %v16877_v4, %v22768_v42  ;;  %v16880_v32 = vadd.f32 %v16879_v17, %v16878_v23  ;;  %v20300_v42 = vld [vmem:[%s27025_s3 + $0x784] ss:$16 sps:$4 sm:$0xff]   ;;  %v20301_v23 = vld [vmem:[%s27025_s3 + $0x7a0] ss:$16 sps:$4 sm:$0xff]  }
 0x398   :  { %5120 = vmatmul.mubr.bf16.gmra.mrb[40].mxu1 %v20292_v59  ;;  %v21333_v59 = vld [vmem:[#allocation2 + $0xf0] sm:$0xff] }
 0x399   :  { %17386 = vmatpush3.bf16.msra.mxu1 %v21330_v11  ;;  %5127 = vmatprep.mubr.bf16.mxu1 %v20297_v54  ;;  %v22927_v22 = vadd.f32 %v16880_v32, %v22771_v57  ;;  %v21334_v57 = vld [vmem:[#allocation2 + $0xb0] sm:$0xff] }
 0x39a   :  { %17387 = vmatprep.subr.bf16.mxu1 %v21331_v29  ;;  %v20298_v54 = vld [vmem:[%s27025_s3 + $0x780] ss:$16 sps:$4 sm:$0xff]   ;;  %v20303_v4 = vld [vmem:[%s27025_s3 + $0x7a4] ss:$16 sps:$4 sm:$0xff]  }
 0x39b   :  { %v3012_v2 = vpack.c.bf16 %v22927_v22, %v22924_v55  ;;  %v20306_v17 = vld [vmem:[%s27025_s3 + $0x7c4] ss:$16 sps:$4 sm:$0xff]   ;;  %v16973_v3 = vpop.f32.mrb[192].mxu1 }
 0x39c   :  { %v20309_v32 = vld [vmem:[%s27025_s3 + $0x7e4] ss:$16 sps:$4 sm:$0xff]   ;;  %v16974_v1 = vpop.f32.mrb[193].mxu1 }
 0x39d   :  { %17388 = vmatpush3.bf16.msra.mxu1 %v21332_v44  ;;  %v16976_v15 = vpop.f32.mrb[194].mxu1  ;;  %v20376_v55 = vld [vmem:[%s27027_s4 + $0x90] sm:$0xff]  }
 0x39e   :  { %17389 = vmatprep.subr.bf16.mxu1 %v21333_v59  ;;  %v16977_v46 = vpop.f32.mrb[195].mxu1 }
 0x39f   :  { %v23222_v22 = vadd.f32 %v16977_v46, %v16976_v15 }
 0x3a0   :  { %5128 = vmatmul.mubr.bf16.gmra.mrb[44].mxu1 %v20295_v12  ;;  %v20307_v12 = vld [vmem:[%s27025_s3 + $0x7e0] ss:$16 sps:$4 sm:$0xff]  }
 0x3a1   :  { %17390 = vmatpush3.bf16.msra.mxu1 %v21334_v57  ;;  %5135 = vmatprep.mubr.bf16.mxu1 %v20300_v42  ;;  %v20312_v42 = vld [vmem:[%s27025_s3 + $0x70c] ss:$16 sps:$4 sm:$0xff]  }
 0x3a2   :  { %17391 = vmatprep.subr.bf16.mxu1 %v21335_v13 }
 0x3a5   :  { %17392 = vmatpush3.bf16.msra.mxu1 %v22370_v37  ;;  %v20304_v37 = vld [vmem:[%s27025_s3 + $0x7c0] ss:$16 sps:$4 sm:$0xff]  }
 0x3a6   :  { %17517 = vmatprep.subr.bf16.mxu1 %v22812_v53 }
 0x3a8   :  { %5136 = vmatmul.mubr.bf16.gmra.mrb[48].mxu1 %v20298_v54  ;;  %v20310_v54 = vld [vmem:[%s27025_s3 + $0x708] ss:$16 sps:$4 sm:$0xff]  }
 0x3a9   :  { %5143 = vmatprep.mubr.bf16.mxu1 %v20303_v4  ;;  %v20315_v4 = vld [vmem:[%s27025_s3 + $0x72c] ss:$16 sps:$4 sm:$0xff]  }
 0x3b0   :  { %5144 = vmatmul.mubr.bf16.gmra.mrb[52].mxu1 %v20301_v23  ;;  %v20313_v23 = vld [vmem:[%s27025_s3 + $0x728] ss:$16 sps:$4 sm:$0xff]  }
 0x3b1   :  { %5151 = vmatprep.mubr.bf16.mxu1 %v20306_v17  ;;  %v20318_v17 = vld [vmem:[%s27025_s3 + $0x74c] ss:$16 sps:$4 sm:$0xff]  }
 0x3b8   :  { %5152 = vmatmul.mubr.bf16.gmra.mrb[56].mxu1 %v20304_v37 }
 0x3b9   :  { %5159 = vmatprep.mubr.bf16.mxu1 %v20309_v32 }
 0x3c0   :  { %5160 = vmatmul.mubr.bf16.gmra.mrb[60].mxu1 %v20307_v12 }
 0x3c1   :  { %5200 = vmatprep.mubr.bf16.mxu1 %v20312_v42 }
 0x3c8   :  { %5201 = vmatmul.mubr.bf16.vlgmr.msra.gmra.mrb[64].mxu1 %v20310_v54 }
 0x3c9   :  { %17518 = vmatpush3.bf16.msra.mxu1 %v22880_v24  ;;  %5208 = vmatprep.mubr.bf16.mxu1 %v20315_v4  ;;  %v20316_v24 = vld [vmem:[%s27025_s3 + $0x748] ss:$16 sps:$4 sm:$0xff]  }
 0x3ca   :  { %17519 = vmatprep.subr.bf16.mxu1 %v22886_v0  ;;  %v20323_v0 = vld [vmem:[%s27025_s3 + $0x76c] ss:$16 sps:$4 sm:$0xff]  }
 0x3cd   :  { %17520 = vmatpush3.bf16.msra.mxu1 %v22894_v47 }
 0x3ce   :  { %17521 = vmatprep.subr.bf16.mxu1 %v22900_v9 }
 0x3d0   :  { %5209 = vmatmul.mubr.bf16.gmra.mrb[68].mxu1 %v20313_v23 }
 0x3d1   :  { %17522 = vmatpush3.bf16.msra.mxu1 %v22906_v19  ;;  %5216 = vmatprep.mubr.bf16.mxu1 %v20318_v17 }
 0x3d2   :  { %17523 = vmatprep.subr.bf16.mxu1 %v22912_v7 }
 0x3d5   :  { %17524 = vmatpush3.bf16.msra.mxu1 %v21328_v33  ;;  %v20321_v33 = vld [vmem:[%s27025_s3 + $0x768] ss:$16 sps:$4 sm:$0xff]  }
 0x3d6   :  { %17525 = vmatprep.subr.bf16.mxu1 %v21329_v39  ;;  %v20328_v39 = vld [vmem:[%s27025_s3 + $0x78c] ss:$16 sps:$4 sm:$0xff]  }
 0x3d8   :  { %v16693_v47 = vpop.f32.mrb[112].mxu0  ;;  %5217 = vmatmul.mubr.bf16.gmra.mrb[72].mxu1 %v20316_v24  ;;  %v23007_v24 = vld [vmem:[#allocation2 + $0x40] sm:$0xff] }
 0x3d9   :  { %17526 = vmatpush3.bf16.msra.mxu1 %v21330_v11  ;;  %v16694_v9 = vpop.f32.mrb[113].mxu0  ;;  %5224 = vmatprep.mubr.bf16.mxu1 %v20323_v0 }
 0x3da   :  { %v16695_v37 = vadd.f32 %v16694_v9, %v16693_v47  ;;  %17527 = vmatprep.subr.bf16.mxu1 %v21331_v29  ;;  %v16696_v19 = vpop.f32.mrb[114].mxu0  ;;  %v20330_v47 = vld [vmem:[%s27027_s4 + $0x68] sm:$0xff]  }
 0x3db   :  { %v16697_v32 = vpop.f32.mrb[115].mxu0 }
 0x3dc   :  { %v2378_v7 = vadd.f32 %v16695_v37, %v22539_v50  ;;  %v16698_v12 = vadd.f32 %v16697_v32, %v16696_v19 }
 0x3dd   :  { %17528 = vmatpush3.bf16.msra.mxu1 %v21332_v44 }
 0x3de   :  { %v2381_v11 = vadd.f32 %v16698_v12, %v22545_v6  ;;  %17529 = vmatprep.subr.bf16.mxu1 %v21333_v59  ;;  %v20326_v6 = vld [vmem:[%s27025_s3 + $0x788] ss:$16 sps:$4 sm:$0xff]  }
 0x3df   :  { %v23000_v59 = vld [vmem:[#allocation2 + $0xb8] sm:$0xff] }
 0x3e0   :  { %v16699_v42 = vpop.f32.mrb[116].mxu0  ;;  %5225 = vmatmul.mubr.bf16.gmra.mrb[76].mxu1 %v20321_v33  ;;  %v2440_v29 = vpack.c.bf16 %v2381_v11, %v2378_v7  ;;  %v20331_v12 = vld [vmem:[%s27025_s3 + $0x7a8] ss:$16 sps:$4 sm:$0xff]   ;;  %v20334_v33 = vld [vmem:[%s27027_s4 + $0x70] sm:$0xff]  }
 0x3e1   :  { %17530 = vmatpush3.bf16.msra.mxu1 %v21334_v57  ;;  %v16700_v54 = vpop.f32.mrb[117].mxu0  ;;  %5232 = vmatprep.mubr.bf16.mxu1 %v20328_v39  ;;  %v20333_v57 = vld [vmem:[%s27025_s3 + $0x7ac] ss:$16 sps:$4 sm:$0xff]  }
 0x3e2   :  { %v16701_v50 = vadd.f32 %v16700_v54, %v16699_v42  ;;  %17531 = vmatprep.subr.bf16.mxu1 %v21335_v13  ;;  %v16702_v4 = vpop.f32.mrb[118].mxu0  ;;  %18918 = vmatprep.mubr.msk.bf16.mxu0 %vm892_vm4, %v2440_v29  ;;  %v20338_v39 = vld [vmem:[%s27025_s3 + $0x7cc] ss:$16 sps:$4 sm:$0xff]  }
 0x3e3   :  { %v16703_v23 = vpop.f32.mrb[119].mxu0  ;;  %v20335_v42 = vld [vmem:[%s27027_s4 + $0x78] sm:$0xff]  }
 0x3e4   :  { %v2386_v44 = vadd.f32 %v16701_v50, %v22564_v28  ;;  %v16704_v17 = vadd.f32 %v16703_v23, %v16702_v4 }
 0x3e5   :  { %17532 = vmatpush3.bf16.msra.mxu1 %v23000_v59 }
 0x3e6   :  { %v2389_v13 = vadd.f32 %v16704_v17, %v22570_v8  ;;  %17593 = vmatprep.subr.bf16.mxu1 %v23007_v24  ;;  %v20341_v17 = vld [vmem:[%s27025_s3 + $0x7ec] ss:$16 sps:$4 sm:$0xff]  }
 0x3e8   :  { %v2441_v28 = vpack.c.bf16 %v2389_v13, %v2386_v44  ;;  %v16705_v0 = vpop.f32.mrb[120].mxu0  ;;  %5233 = vmatmul.mubr.bf16.gmra.mrb[80].mxu1 %v20326_v6  ;;  %v20336_v44 = vld [vmem:[%s27025_s3 + $0x7c8] ss:$16 sps:$4 sm:$0xff]  }
 0x3e9   :  { %v16706_v9 = vpop.f32.mrb[121].mxu0  ;;  %5240 = vmatprep.mubr.bf16.mxu1 %v20333_v57 }
 0x3ea   :  { %v16707_v37 = vadd.f32 %v16706_v9, %v16705_v0  ;;  %v16708_v19 = vpop.f32.mrb[122].mxu0  ;;  %18919 = vmatmul.mubr.msk.bf16.vlgmr.msra.gmra.mrb[96].mxu0 %vm892_vm4, %v2441_v28 }
 0x3eb   :  { %18935 = vmatpush3.bf16.msra.mxu0 %v22821_v34  ;;  %v16709_v8 = vpop.f32.mrb[123].mxu0 }
 0x3ec   :  { %v2394_v32 = vadd.f32 %v16707_v37, %v22580_v31  ;;  %v16710_v7 = vadd.f32 %v16709_v8, %v16708_v19  ;;  %18936 = vmatprep.subr.bf16.mxu0 %v20330_v47  ;;  %v20344_v19 = vld [vmem:[%s27025_s3 + $0x80c] ss:$16 sps:$4 sm:$0xff]  }
 0x3ee   :  { %v2397_v11 = vadd.f32 %v16710_v7, %v22583_v61 }
 0x3ef   :  { %18937 = vmatpush3.bf16.msra.mxu0 %v20330_v47 }
 0x3f0   :  { %v16711_v34 = vpop.f32.mrb[124].mxu0  ;;  %5241 = vmatmul.mubr.bf16.gmra.mrb[84].mxu1 %v20331_v12  ;;  %18938 = vmatprep.subr.bf16.mxu0 %v20334_v33  ;;  %v2442_v31 = vpack.c.bf16 %v2397_v11, %v2394_v32 }
 0x3f1   :  { %v16712_v29 = vpop.f32.mrb[125].mxu0  ;;  %5248 = vmatprep.mubr.bf16.mxu1 %v20338_v39 }
 0x3f2   :  { %v16713_v54 = vadd.f32 %v16712_v29, %v16711_v34  ;;  %v16714_v50 = vpop.f32.mrb[126].mxu0  ;;  %18922 = vmatprep.mubr.msk.bf16.mxu0 %vm892_vm4, %v2442_v31  ;;  %v20342_v31 = vld [vmem:[%s27025_s3 + $0x808] ss:$16 sps:$4 sm:$0xff]  }
 0x3f3   :  { %18939 = vmatpush3.bf16.msra.mxu0 %v20334_v33  ;;  %v16715_v4 = vpop.f32.mrb[127].mxu0 }
 0x3f4   :  { %v2402_v23 = vadd.f32 %v16713_v54, %v22592_v35  ;;  %v16716_v61 = vadd.f32 %v16715_v4, %v16714_v50  ;;  %18940 = vmatprep.subr.bf16.mxu0 %v20335_v42  ;;  %v23057_v50 = vld [vmem:[#allocation2] sm:$0xff] }
 0x3f6   :  { %v2405_v6 = vadd.f32 %v16716_v61, %v22597_v16  ;;  %v20339_v16 = vld [vmem:[%s27025_s3 + $0x7e8] ss:$16 sps:$4 sm:$0xff]  }
 0x3f7   :  { %18941 = vmatpush3.bf16.msra.mxu0 %v20335_v42 }
 0x3f8   :  { %16893 = vmatprep.subr.bf16.mxu0 %v23007_v24  ;;  %v16717_v57 = vpop.f32.mrb[128].mxu0  ;;  %5249 = vmatmul.mubr.bf16.gmra.mrb[88].mxu1 %v20336_v44  ;;  %v2443_v13 = vpack.c.bf16 %v2405_v6, %v2402_v23  ;;  %v23060_v23 = vld [vmem:[#allocation2 + $0x48] sm:$0xff] }
 0x3f9   :  { %v16718_v28 = vpop.f32.mrb[129].mxu0  ;;  %5256 = vmatprep.mubr.bf16.mxu1 %v20341_v17  ;;  %v20345_v6 = vld [vmem:[%s27025_s3 + $0x828] ss:$16 sps:$4 sm:$0xff]  }
 0x3fa   :  { %v16719_v35 = vadd.f32 %v16718_v28, %v16717_v57  ;;  %v16720_v0 = vpop.f32.mrb[130].mxu0  ;;  %18923 = vmatmul.mubr.msk.bf16.gmra.mrb[100].mxu0 %vm892_vm4, %v2443_v13  ;;  %v23068_v57 = vld [vmem:[#allocation2 + $0x8] sm:$0xff] }
 0x3fb   :  { %v16721_v47 = vpop.f32.mrb[131].mxu0  ;;  %v20350_v13 = vld [vmem:[%s27025_s3 + $0x84c] ss:$16 sps:$4 sm:$0xff]  }
 0x3fc   :  { %v2410_v9 = vadd.f32 %v16719_v35, %v22602_v52  ;;  %v16722_v37 = vadd.f32 %v16721_v47, %v16720_v0  ;;  %v23075_v35 = vld [vmem:[#allocation2 + $0x50] sm:$0xff] }
 0x3fd   :  { %v23078_v47 = vld [vmem:[#allocation2 + $0x10] sm:$0xff] }
 0x3fe   :  { %v2413_v8 = vadd.f32 %v16722_v37, %v22604_v36  ;;  %v20347_v36 = vld [vmem:[%s27025_s3 + $0x82c] ss:$16 sps:$4 sm:$0xff]  }
 0x400   :  { %v16723_v32 = vpop.f32.mrb[132].mxu0  ;;  %5257 = vmatmul.mubr.bf16.gmra.mrb[92].mxu1 %v20339_v16  ;;  %v2444_v7 = vpack.c.bf16 %v2413_v8, %v2410_v9  ;;  %v23081_v16 = vld [vmem:[#allocation2 + $0x58] sm:$0xff] }
 0x401   :  { %v16724_v12 = vpop.f32.mrb[133].mxu0  ;;  %5765 = vmatprep.mubr.bf16.mxu1 %v20344_v19 }
 0x402   :  { %v16725_v33 = vadd.f32 %v16724_v12, %v16723_v32  ;;  %v16726_v39 = vpop.f32.mrb[134].mxu0  ;;  %18926 = vmatprep.mubr.msk.bf16.mxu0 %vm892_vm4, %v2444_v7  ;;  %v20348_v7 = vld [vmem:[%s27025_s3 + $0x848] ss:$16 sps:$4 sm:$0xff]  }
 0x403   :  { %v16727_v52 = vpop.f32.mrb[135].mxu0  ;;  %v23089_v12 = vld [vmem:[#allocation2 + $0x18] sm:$0xff] }
 0x404   :  { %v2418_v11 = vadd.f32 %v16725_v33, %v22614_v60  ;;  %v16728_v34 = vadd.f32 %v16727_v52, %v16726_v39  ;;  %v20353_v33 = vld [vmem:[%s27025_s3 + $0x86c] ss:$16 sps:$4 sm:$0xff]   ;;  %v23096_v52 = vld [vmem:[#allocation2 + $0x60] sm:$0xff] }
 0x406   :  { %v2421_v42 = vadd.f32 %v16728_v34, %v22623_v18  ;;  %v23102_v34 = vld [vmem:[#allocation2 + $0x68] sm:$0xff] }
 0x408   :  { %v16729_v29 = vpop.f32.mrb[136].mxu0  ;;  %5766 = vmatmul.mubr.bf16.vlgmr.msra.gmra.mrb[96].mxu1 %v20342_v31  ;;  %v2445_v54 = vpack.c.bf16 %v2421_v42, %v2418_v11  ;;  %v23099_v11 = vld [vmem:[#allocation2 + $0x20] sm:$0xff]  ;;  %v23113_v31 = vld [vmem:[#allocation2 + $0x28] sm:$0xff]  ;;  %v23119_v42 = vld [vmem:[#allocation2 + $0x70] sm:$0xff] }
 0x409   :  { %17594 = vmatpush3.bf16.msra.mxu1 %v23057_v50  ;;  %v16730_v4 = vpop.f32.mrb[137].mxu0  ;;  %5773 = vmatprep.mubr.bf16.mxu1 %v20347_v36  ;;  %v20356_v36 = vld [vmem:[%s27025_s3 + $0x88c] ss:$16 sps:$4 sm:$0xff]  }
 0x40a   :  { %v16731_v60 = vadd.f32 %v16730_v4, %v16729_v29  ;;  %17595 = vmatprep.subr.bf16.mxu1 %v23060_v23  ;;  %v16732_v61 = vpop.f32.mrb[138].mxu0  ;;  %18927 = vmatmul.mubr.msk.bf16.gmra.mrb[104].mxu0 %vm892_vm4, %v2445_v54  ;;  %v23141_v29 = vld [vmem:[#allocation2 + $0x38] sm:$0xff]  ;;  %v20377_v54 = vld [vmem:[%s27025_s3 + $0x420] ss:$16 sps:$4 sm:$0xff]   ;;  %v20382_v4 = vld [vmem:[%s27025_s3 + $0x444] ss:$16 sps:$4 sm:$0xff]  }
 0x40b   :  { %v16733_v44 = vpop.f32.mrb[139].mxu0 }
 0x40c   :  { %v2426_v18 = vadd.f32 %v16731_v60, %v22626_v43  ;;  %v16734_v17 = vadd.f32 %v16733_v44, %v16732_v61  ;;  %v20378_v60 = vld [vmem:[%s27027_s4 + $0x98] sm:$0xff]   ;;  %v20379_v61 = vld [vmem:[%s27025_s3 + $0x920] ss:$16 sps:$4 sm:$0xff]   ;;  %v20387_v44 = vld [vmem:[%s27025_s3 + $0x944] ss:$16 sps:$4 sm:$0xff]  }
 0x40d   :  { %17596 = vmatpush3.bf16.msra.mxu1 %v23068_v57 }
 0x40e   :  { %v2429_v28 = vadd.f32 %v16734_v17, %v22632_v62  ;;  %17597 = vmatprep.subr.bf16.mxu1 %v23075_v35  ;;  %v20384_v17 = vld [vmem:[%s27025_s3 + $0x440] ss:$16 sps:$4 sm:$0xff]  }
 0x410   :  { %v16735_v43 = vpop.f32.mrb[140].mxu0  ;;  %5774 = vmatmul.mubr.bf16.gmra.mrb[100].mxu1 %v20345_v6  ;;  %v2446_v0 = vpack.c.bf16 %v2429_v28, %v2426_v18  ;;  %v16979_v18 = vpop.f32.mrb[196].mxu1 }
 0x411   :  { %17598 = vmatpush3.bf16.msra.mxu1 %v23078_v47  ;;  %v16736_v9 = vpop.f32.mrb[141].mxu0  ;;  %5781 = vmatprep.mubr.bf16.mxu1 %v20350_v13  ;;  %v16980_v6 = vpop.f32.mrb[197].mxu1  ;;  %v20388_v13 = vld [vmem:[%s27025_s3 + $0x464] ss:$16 sps:$4 sm:$0xff]  }
 0x412   :  { %v16737_v37 = vadd.f32 %v16736_v9, %v16735_v43  ;;  %17599 = vmatprep.subr.bf16.mxu1 %v23081_v16  ;;  %v16738_v19 = vpop.f32.mrb[142].mxu0  ;;  %18930 = vmatprep.mubr.msk.bf16.mxu0 %vm892_vm4, %v2446_v0  ;;  %v23252_v28 = vadd.f32 %v16980_v6, %v16979_v18  ;;  %v16982_v43 = vpop.f32.mrb[198].mxu1  ;;  %v20408_v18 = vld [vmem:[%s27025_s3 + $0x4c0] ss:$16 sps:$4 sm:$0xff]  }
 0x413   :  { %v16739_v62 = vpop.f32.mrb[143].mxu0  ;;  %v16983_v0 = vpop.f32.mrb[199].mxu1 }
 0x414   :  { %v2434_v8 = vadd.f32 %v16737_v37, %v22645_v56  ;;  %v16740_v32 = vadd.f32 %v16739_v62, %v16738_v19  ;;  %v23256_v9 = vadd.f32 %v16983_v0, %v16982_v43  ;;  %v20385_v37 = vld [vmem:[%s27025_s3 + $0x940] ss:$16 sps:$4 sm:$0xff]   ;;  %v16985_v19 = vpop.f32.mrb[200].mxu1 }
 0x415   :  { %17600 = vmatpush3.bf16.msra.mxu1 %v23089_v12  ;;  %v20390_v62 = vld [vmem:[%s27025_s3 + $0x460] ss:$16 sps:$4 sm:$0xff]  }
 0x416   :  { %v2437_v39 = vadd.f32 %v16740_v32, %v22648_v27  ;;  %17601 = vmatprep.subr.bf16.mxu1 %v23096_v52  ;;  %v20351_v27 = vld [vmem:[%s27025_s3 + $0x868] ss:$16 sps:$4 sm:$0xff]   ;;  %v20394_v32 = vld [vmem:[%s27025_s3 + $0x484] ss:$16 sps:$4 sm:$0xff]  }
 0x418   :  { %5782 = vmatmul.mubr.bf16.gmra.mrb[104].mxu1 %v20348_v7  ;;  %v2447_v56 = vpack.c.bf16 %v2437_v39, %v2434_v8  ;;  %v16986_v8 = vpop.f32.mrb[201].mxu1 }
 0x419   :  { %17602 = vmatpush3.bf16.msra.mxu1 %v23099_v11  ;;  %5789 = vmatprep.mubr.bf16.mxu1 %v20353_v33  ;;  %v23273_v7 = vadd.f32 %v16986_v8, %v16985_v19  ;;  %v16988_v33 = vpop.f32.mrb[202].mxu1  ;;  %v20414_v8 = vld [vmem:[%s27025_s3 + $0x4e0] ss:$16 sps:$4 sm:$0xff]  }
 0x41a   :  { %17603 = vmatprep.subr.bf16.mxu1 %v23102_v34  ;;  %18931 = vmatmul.mubr.msk.bf16.gmra.mrb[108].mxu0 %vm892_vm4, %v2447_v56  ;;  %v16989_v39 = vpop.f32.mrb[203].mxu1 }
 0x41b   :  { %18942 = vmatprep.mubr.msk.bf16.mxu0 %vm892_vm4, %v3005_v21  ;;  %v20354_v21 = vld [vmem:[%s27025_s3 + $0x888] ss:$16 sps:$4 sm:$0xff]   ;;  %v23276_v56 = vadd.f32 %v16989_v39, %v16988_v33 }
 0x41d   :  { %17604 = vmatpush3.bf16.msra.mxu1 %v23113_v31 }
 0x41e   :  { %17605 = vmatprep.subr.bf16.mxu1 %v23119_v42 }
 0x420   :  { %5790 = vmatmul.mubr.bf16.gmra.mrb[108].mxu1 %v20351_v27  ;;  %v20391_v27 = vld [vmem:[%s27025_s3 + $0x960] ss:$16 sps:$4 sm:$0xff]  }
 0x421   :  { %17606 = vmatpush3.bf16.msra.mxu1 %v23122_v48  ;;  %5797 = vmatprep.mubr.bf16.mxu1 %v20356_v36  ;;  %v20399_v36 = vld [vmem:[%s27025_s3 + $0x984] ss:$16 sps:$4 sm:$0xff]  }
 0x422   :  { %17607 = vmatprep.subr.bf16.mxu1 %v23125_v49  ;;  %18943 = vmatmul.mubr.msk.bf16.vlgmr.msra.gmra.mrb[96].mxu0 %vm892_vm4, %v3006_v41  ;;  %v20362_v41 = vld [vmem:[%s27025_s3 + $0x8cc] ss:$16 sps:$4 sm:$0xff]  }
 0x423   :  { %16894 = vmatpush3.bf16.msra.mxu0 %v23057_v50  ;;  %18946 = vmatprep.mubr.msk.bf16.mxu0 %vm892_vm4, %v3007_v40  ;;  %v20368_v40 = vld [vmem:[%s27025_s3 + $0x404] ss:$16 sps:$4 sm:$0xff]  }
 0x424   :  { %16895 = vmatprep.subr.bf16.mxu0 %v23060_v23 }
 0x425   :  { %17608 = vmatpush3.bf16.msra.mxu1 %v23141_v29 }
 0x426   :  { %17733 = vmatprep.subr.bf16.mxu1 %v23007_v24 }
 0x427   :  { %16896 = vmatpush3.bf16.msra.mxu0 %v23068_v57 }
 0x428   :  { %16897 = vmatprep.subr.bf16.mxu0 %v23075_v35  ;;  %5798 = vmatmul.mubr.bf16.gmra.mrb[112].mxu1 %v20354_v21  ;;  %v16991_v21 = vpop.f32.mrb[204].mxu1 }
 0x429   :  { %5805 = vmatprep.mubr.bf16.mxu1 %v20359_v5  ;;  %v20396_v5 = vld [vmem:[%s27025_s3 + $0x480] ss:$16 sps:$4 sm:$0xff]  }
 0x42a   :  { %18947 = vmatmul.mubr.msk.bf16.gmra.mrb[100].mxu0 %vm892_vm4, %v3008_v10  ;;  %v20373_v10 = vld [vmem:[%s27025_s3 + $0x904] ss:$16 sps:$4 sm:$0xff]  }
 0x42b   :  { %16898 = vmatpush3.bf16.msra.mxu0 %v23078_v47  ;;  %18950 = vmatprep.mubr.msk.bf16.mxu0 %vm892_vm4, %v3009_v30  ;;  %v20370_v30 = vld [vmem:[%s27027_s4 + $0x88] sm:$0xff]  }
 0x42c   :  { %16899 = vmatprep.subr.bf16.mxu0 %v23081_v16 }
 0x42f   :  { %16900 = vmatpush3.bf16.msra.mxu0 %v23089_v12 }
 0x430   :  { %16901 = vmatprep.subr.bf16.mxu0 %v23096_v52  ;;  %5806 = vmatmul.mubr.bf16.gmra.mrb[116].mxu1 %v20357_v45  ;;  %v16992_v45 = vpop.f32.mrb[205].mxu1 }
 0x431   :  { %5813 = vmatprep.mubr.bf16.mxu1 %v20362_v41  ;;  %v20400_v41 = vld [vmem:[%s27025_s3 + $0x4a4] ss:$16 sps:$4 sm:$0xff]  }
 0x432   :  { %18951 = vmatmul.mubr.msk.bf16.gmra.mrb[104].mxu0 %vm892_vm4, %v3010_v14  ;;  %v23214_v14 = vadd.f32 %v16974_v1, %v16973_v3  ;;  %v20406_v3 = vld [vmem:[%s27025_s3 + $0x4c4] ss:$16 sps:$4 sm:$0xff]  }
 0x433   :  { %16902 = vmatpush3.bf16.msra.mxu0 %v23099_v11  ;;  %18954 = vmatprep.mubr.msk.bf16.mxu0 %vm892_vm4, %v3011_v25  ;;  %v20371_v25 = vld [vmem:[%s27025_s3 + $0x900] ss:$16 sps:$4 sm:$0xff]  }
 0x434   :  { %16903 = vmatprep.subr.bf16.mxu0 %v23102_v34 }
 0x437   :  { %16904 = vmatpush3.bf16.msra.mxu0 %v23113_v31 }
 0x438   :  { %16905 = vmatprep.subr.bf16.mxu0 %v23119_v42  ;;  %5814 = vmatmul.mubr.bf16.gmra.mrb[120].mxu1 %v20360_v26  ;;  %v23293_v26 = vadd.f32 %v16992_v45, %v16991_v21  ;;  %v20415_v21 = vld [vmem:[%s27025_s3 + $0x9e0] ss:$16 sps:$4 sm:$0xff]   ;;  %v20420_v45 = vld [vmem:[%s27025_s3 + $0xa04] ss:$16 sps:$4 sm:$0xff]  }
 0x439   :  { %5821 = vmatprep.mubr.bf16.mxu1 %v20365_v20  ;;  %v16994_v20 = vpop.f32.mrb[206].mxu1 }
 0x43a   :  { %18955 = vmatmul.mubr.msk.bf16.gmra.mrb[108].mxu0 %vm892_vm4, %v3012_v2  ;;  %v20381_v2 = vld [vmem:[%s27025_s3 + $0x924] ss:$16 sps:$4 sm:$0xff]  }
 0x43b   :  { %16906 = vmatpush3.bf16.msra.mxu0 %v23122_v48  ;;  %3408 = vmatprep.mubr.bf16.mxu0 %v20368_v40  ;;  %v16995_v40 = vpop.f32.mrb[207].mxu1 }
 0x43c   :  { %16907 = vmatprep.subr.bf16.mxu0 %v23125_v49 }
 0x43f   :  { %16908 = vmatpush3.bf16.msra.mxu0 %v23141_v29 }
 0x440   :  { %5822 = vmatmul.mubr.bf16.gmra.mrb[124].mxu1 %v20363_v58  ;;  %18958 = vmatprep.subr.bf16.mxu0 %v20369_v63  ;;  %v23296_v58 = vadd.f32 %v16995_v40, %v16994_v20 }
 0x441   :  { %6233 = vmatprep.mubr.bf16.mxu1 %v20373_v10  ;;  %v20405_v10 = vld [vmem:[%s27025_s3 + $0x9a4] ss:$16 sps:$4 sm:$0xff]  }
 0x442   :  { %3409 = vmatmul.mubr.bf16.vlgmr.msra.gmra.mrb[144].mxu0 %v20366_v38  ;;  %v16997_v38 = vpop.f32.mrb[208].mxu1 }
 0x443   :  { %18959 = vmatpush3.bf16.msra.mxu0 %v20369_v63  ;;  %3416 = vmatprep.mubr.bf16.mxu0 %v20374_v51  ;;  %v20397_v63 = vld [vmem:[%s27025_s3 + $0x980] ss:$16 sps:$4 sm:$0xff]  }
 0x444   :  { %18960 = vmatprep.subr.bf16.mxu0 %v20370_v30  ;;  %v20402_v51 = vld [vmem:[%s27025_s3 + $0x4a0] ss:$16 sps:$4 sm:$0xff]  }
 0x447   :  { %18961 = vmatpush3.bf16.msra.mxu0 %v20370_v30  ;;  %v16998_v30 = vpop.f32.mrb[209].mxu1 }
 0x448   :  { %6234 = vmatmul.mubr.bf16.vlgmr.msra.gmra.mrb[128].mxu1 %v20371_v25  ;;  %18962 = vmatprep.subr.bf16.mxu0 %v20376_v55  ;;  %v23313_v1 = vadd.f32 %v16998_v30, %v16997_v38  ;;  %v17000_v15 = vpop.f32.mrb[210].mxu1  ;;  %v20418_v38 = vld [vmem:[%s27025_s3 + $0xa00] ss:$16 sps:$4 sm:$0xff]   ;;  %v20423_v30 = vld [vmem:[%s27025_s3 + $0xa24] ss:$16 sps:$4 sm:$0xff]  }
 0x449   :  { %17734 = vmatpush3.bf16.msra.mxu1 %v23057_v50  ;;  %6241 = vmatprep.mubr.bf16.mxu1 %v20381_v2  ;;  %v17001_v46 = vpop.f32.mrb[211].mxu1 }
 0x44a   :  { %17735 = vmatprep.subr.bf16.mxu1 %v23060_v23  ;;  %3417 = vmatmul.mubr.bf16.gmra.mrb[148].mxu0 %v20377_v54  ;;  %v23315_v25 = vadd.f32 %v17001_v46, %v17000_v15  ;;  %v20426_v15 = vld [vmem:[%s27025_s3 + $0xa44] ss:$16 sps:$4 sm:$0xff]  }
 0x44b   :  { %18963 = vmatpush3.bf16.msra.mxu0 %v20376_v55  ;;  %3424 = vmatprep.mubr.bf16.mxu0 %v20382_v4  ;;  %v17003_v55 = vpop.f32.mrb[212].mxu1  ;;  %v20403_v4 = vld [vmem:[%s27025_s3 + $0x9a0] ss:$16 sps:$4 sm:$0xff]  }
 0x44c   :  { %18964 = vmatprep.subr.bf16.mxu0 %v20378_v60 }
 0x44d   :  { %17736 = vmatpush3.bf16.msra.mxu1 %v23068_v57 }
 0x44e   :  { %17737 = vmatprep.subr.bf16.mxu1 %v23075_v35 }
 0x44f   :  { %18965 = vmatpush3.bf16.msra.mxu0 %v20378_v60 }
 0x450   :  { %17097 = vmatprep.subr.bf16.mxu0 %v22812_v53  ;;  %6242 = vmatmul.mubr.bf16.gmra.mrb[132].mxu1 %v20379_v61  ;;  %v20393_v53 = vld [vmem:[%s27025_s3 + $0x964] ss:$16 sps:$4 sm:$0xff]  }
 0x451   :  { %17738 = vmatpush3.bf16.msra.mxu1 %v23078_v47  ;;  %6249 = vmatprep.mubr.bf16.mxu1 %v20387_v44  ;;  %v20411_v61 = vld [vmem:[%s27025_s3 + $0x9c4] ss:$16 sps:$4 sm:$0xff]  }
 0x452   :  { %17739 = vmatprep.subr.bf16.mxu1 %v23081_v16  ;;  %3425 = vmatmul.mubr.bf16.gmra.mrb[152].mxu0 %v20384_v17  ;;  %v20412_v17 = vld [vmem:[%s27025_s3 + $0x4e4] ss:$16 sps:$4 sm:$0xff]  }
 0x453   :  { %3432 = vmatprep.mubr.bf16.mxu0 %v20388_v13 }
 0x455   :  { %17740 = vmatpush3.bf16.msra.mxu1 %v23089_v12 }
 0x456   :  { %17741 = vmatprep.subr.bf16.mxu1 %v23096_v52 }
 0x458   :  { %6250 = vmatmul.mubr.bf16.gmra.mrb[136].mxu1 %v20385_v37 }
 0x459   :  { %17742 = vmatpush3.bf16.msra.mxu1 %v23099_v11  ;;  %6257 = vmatprep.mubr.bf16.mxu1 %v20393_v53  ;;  %v20409_v53 = vld [vmem:[%s27025_s3 + $0x9c0] ss:$16 sps:$4 sm:$0xff]  }
 0x45a   :  { %17743 = vmatprep.subr.bf16.mxu1 %v23102_v34  ;;  %3433 = vmatmul.mubr.bf16.gmra.mrb[156].mxu0 %v20390_v62  ;;  %v20417_v62 = vld [vmem:[%s27025_s3 + $0x9e4] ss:$16 sps:$4 sm:$0xff]  }
 0x45b   :  { %3440 = vmatprep.mubr.bf16.mxu0 %v20394_v32 }
 0x45d   :  { %17744 = vmatpush3.bf16.msra.mxu1 %v23113_v31 }
 0x45e   :  { %17745 = vmatprep.subr.bf16.mxu1 %v23119_v42 }
 0x460   :  { %6258 = vmatmul.mubr.bf16.gmra.mrb[140].mxu1 %v20391_v27 }
 0x461   :  { %17746 = vmatpush3.bf16.msra.mxu1 %v23122_v48  ;;  %6265 = vmatprep.mubr.bf16.mxu1 %v20399_v36 }
 0x462   :  { %17747 = vmatprep.subr.bf16.mxu1 %v23125_v49  ;;  %3441 = vmatmul.mubr.bf16.gmra.mrb[160].mxu0 %v20396_v5 }
 0x463   :  { %3448 = vmatprep.mubr.bf16.mxu0 %v20400_v41 }
 0x465   :  { %17748 = vmatpush3.bf16.msra.mxu1 %v23141_v29 }
 0x466   :  { %17873 = vmatprep.subr.bf16.mxu1 %v23007_v24  ;;  %v17004_v24 = vpop.f32.mrb[213].mxu1 }
 0x467   :  { %v23317_v2 = vadd.f32 %v17004_v24, %v17003_v55  ;;  %v17006_v54 = vpop.f32.mrb[214].mxu1 }
 0x468   :  { %6266 = vmatmul.mubr.bf16.gmra.mrb[144].mxu1 %v20397_v63  ;;  %v17007_v60 = vpop.f32.mrb[215].mxu1 }
 0x469   :  { %6273 = vmatprep.mubr.bf16.mxu1 %v20405_v10  ;;  %v23325_v44 = vadd.f32 %v17007_v60, %v17006_v54  ;;  %v17009_v6 = vpop.f32.mrb[216].mxu1 }
 0x46a   :  { %3449 = vmatmul.mubr.bf16.gmra.mrb[164].mxu0 %v20402_v51  ;;  %v17010_v13 = vpop.f32.mrb[217].mxu1 }
 0x46b   :  { %3456 = vmatprep.mubr.bf16.mxu0 %v20406_v3  ;;  %v23333_v43 = vadd.f32 %v17010_v13, %v17009_v6  ;;  %v17012_v0 = vpop.f32.mrb[218].mxu1  ;;  %v20421_v3 = vld [vmem:[%s27025_s3 + $0xa20] ss:$16 sps:$4 sm:$0xff]  }
 0x46c   :  { %v17013_v37 = vpop.f32.mrb[219].mxu1 }
 0x46d   :  { %v23338_v19 = vadd.f32 %v17013_v37, %v17012_v0  ;;  %v17015_v32 = vpop.f32.mrb[220].mxu1 }
 0x46e   :  { %v17016_v33 = vpop.f32.mrb[221].mxu1 }
 0x46f   :  { %v23346_v39 = vadd.f32 %v17016_v33, %v17015_v32  ;;  %v17018_v27 = vpop.f32.mrb[222].mxu1  ;;  %v20438_v33 = vld [vmem:[%s27025_s3 + $0xac4] ss:$16 sps:$4 sm:$0xff]  }
 0x470   :  { %6274 = vmatmul.mubr.bf16.gmra.mrb[148].mxu1 %v20403_v4  ;;  %v17019_v36 = vpop.f32.mrb[223].mxu1 }
 0x471   :  { %6281 = vmatprep.mubr.bf16.mxu1 %v20411_v61  ;;  %v23351_v5 = vadd.f32 %v17019_v36, %v17018_v27  ;;  %v17049_v41 = vpop.f32.mrb[224].mxu1 }
 0x472   :  { %3457 = vmatmul.mubr.bf16.gmra.mrb[168].mxu0 %v20408_v18  ;;  %v17050_v20 = vpop.f32.mrb[225].mxu1 }
 0x473   :  { %3464 = vmatprep.mubr.bf16.mxu0 %v20412_v17  ;;  %v23356_v40 = vadd.f32 %v17050_v20, %v17049_v41  ;;  %v17052_v63 = vpop.f32.mrb[226].mxu1 }
 0x474   :  { %v17053_v10 = vpop.f32.mrb[227].mxu1 }
 0x475   :  { %v23361_v51 = vadd.f32 %v17053_v10, %v17052_v63  ;;  %v17055_v46 = vpop.f32.mrb[228].mxu1  ;;  %v20436_v63 = vld [vmem:[%s27025_s3 + $0xac0] ss:$16 sps:$4 sm:$0xff]   ;;  %v20441_v10 = vld [vmem:[%s27025_s3 + $0xae4] ss:$16 sps:$4 sm:$0xff]  }
 0x476   :  { %v17056_v55 = vpop.f32.mrb[229].mxu1 }
 0x477   :  { %v23376_v24 = vadd.f32 %v17056_v55, %v17055_v46 }
 0x478   :  { %6282 = vmatmul.mubr.bf16.gmra.mrb[152].mxu1 %v20409_v53 }
 0x479   :  { %6289 = vmatprep.mubr.bf16.mxu1 %v20417_v62 }
 0x47a   :  { %3465 = vmatmul.mubr.bf16.gmra.mrb[172].mxu0 %v20414_v8 }
 0x480   :  { %6290 = vmatmul.mubr.bf16.gmra.mrb[156].mxu1 %v20415_v21 }
 0x481   :  { %6798 = vmatprep.mubr.bf16.mxu1 %v20420_v45 }
 0x488   :  { %6799 = vmatmul.mubr.bf16.vlgmr.msra.gmra.mrb[160].mxu1 %v20418_v38 }
 0x489   :  { %17874 = vmatpush3.bf16.msra.mxu1 %v23057_v50  ;;  %6806 = vmatprep.mubr.bf16.mxu1 %v20423_v30  ;;  %v17058_v50 = vpop.f32.mrb[230].mxu1 }
 0x48a   :  { %17875 = vmatprep.subr.bf16.mxu1 %v23060_v23  ;;  %v17059_v54 = vpop.f32.mrb[231].mxu1 }
 0x48b   :  { %v23379_v23 = vadd.f32 %v17059_v54, %v17058_v50  ;;  %v17061_v4 = vpop.f32.mrb[232].mxu1  ;;  %v20439_v50 = vld [vmem:[%s27025_s3 + $0xae0] ss:$16 sps:$4 sm:$0xff]   ;;  %v20444_v54 = vld [vmem:[%s27025_s3 + $0xb04] ss:$16 sps:$4 sm:$0xff]  }
 0x48c   :  { %v17062_v60 = vpop.f32.mrb[233].mxu1 }
 0x48d   :  { %17876 = vmatpush3.bf16.msra.mxu1 %v23068_v57  ;;  %v20424_v57 = vld [vmem:[%s27025_s3 + $0xa40] ss:$16 sps:$4 sm:$0xff]  }
 0x48e   :  { %17877 = vmatprep.subr.bf16.mxu1 %v23075_v35  ;;  %v20429_v35 = vld [vmem:[%s27025_s3 + $0xa64] ss:$16 sps:$4 sm:$0xff]  }
 0x490   :  { %6807 = vmatmul.mubr.bf16.gmra.mrb[164].mxu1 %v20421_v3 }
 0x491   :  { %17878 = vmatpush3.bf16.msra.mxu1 %v23078_v47  ;;  %6814 = vmatprep.mubr.bf16.mxu1 %v20426_v15  ;;  %v17064_v47 = vpop.f32.mrb[234].mxu1 }
 0x492   :  { %17879 = vmatprep.subr.bf16.mxu1 %v23081_v16  ;;  %v23391_v16 = vadd.f32 %v17062_v60, %v17061_v4  ;;  %v17065_v61 = vpop.f32.mrb[235].mxu1 }
 0x493   :  { %v23394_v18 = vadd.f32 %v17065_v61, %v17064_v47  ;;  %v17067_v17 = vpop.f32.mrb[236].mxu1 }
 0x495   :  { %17880 = vmatpush3.bf16.msra.mxu1 %v23089_v12  ;;  %v20427_v12 = vld [vmem:[%s27025_s3 + $0xa60] ss:$16 sps:$4 sm:$0xff]  }
 0x496   :  { %17881 = vmatprep.subr.bf16.mxu1 %v23096_v52  ;;  %v20432_v52 = vld [vmem:[%s27025_s3 + $0xa84] ss:$16 sps:$4 sm:$0xff]  }
 0x498   :  { %6815 = vmatmul.mubr.bf16.gmra.mrb[168].mxu1 %v20424_v57 }
 0x499   :  { %17882 = vmatpush3.bf16.msra.mxu1 %v23099_v11  ;;  %6822 = vmatprep.mubr.bf16.mxu1 %v20429_v35  ;;  %v17068_v11 = vpop.f32.mrb[237].mxu1 }
 0x49a   :  { %17883 = vmatprep.subr.bf16.mxu1 %v23102_v34  ;;  %v17070_v6 = vpop.f32.mrb[238].mxu1  ;;  %v23405_v34 = vadd.f32 %v17068_v11, %v17067_v17 }
 0x49b   :  { %v17071_v13 = vpop.f32.mrb[239].mxu1 }
 0x49c   :  { %v23415_v0 = vadd.f32 %v17071_v13, %v17070_v6  ;;  %v17073_v37 = vpop.f32.mrb[240].mxu1  ;;  %v23460_v13 = vld [vmem:[#allocation2 + $0x80] sm:$0xff] }
 0x49d   :  { %17884 = vmatpush3.bf16.msra.mxu1 %v23113_v31  ;;  %v20430_v31 = vld [vmem:[%s27025_s3 + $0xa80] ss:$16 sps:$4 sm:$0xff]   ;;  %v17074_v53 = vpop.f32.mrb[241].mxu1 }
 0x49e   :  { %17885 = vmatprep.subr.bf16.mxu1 %v23119_v42  ;;  %v20435_v42 = vld [vmem:[%s27025_s3 + $0xaa4] ss:$16 sps:$4 sm:$0xff]   ;;  %v23420_v62 = vadd.f32 %v17074_v53, %v17073_v37  ;;  %v23465_v37 = vld [vmem:[#allocation2 + $0xc8] sm:$0xff] }
 0x4a0   :  { %6823 = vmatmul.mubr.bf16.gmra.mrb[172].mxu1 %v20427_v12  ;;  %v20442_v12 = vld [vmem:[%s27025_s3 + $0xb00] ss:$16 sps:$4 sm:$0xff]  }
 0x4a1   :  { %17886 = vmatpush3.bf16.msra.mxu1 %v23122_v48  ;;  %6830 = vmatprep.mubr.bf16.mxu1 %v20432_v52  ;;  %v23417_v48 = vld [vmem:[#allocation2 + $0xc0] sm:$0xff] }
 0x4a2   :  { %17887 = vmatprep.subr.bf16.mxu1 %v23125_v49  ;;  %v17076_v49 = vpop.f32.mrb[242].mxu1  ;;  %v20447_v52 = vld [vmem:[%s27025_s3 + $0xb24] ss:$16 sps:$4 sm:$0xff]  }
 0x4a3   :  { %v17077_v8 = vpop.f32.mrb[243].mxu1 }
 0x4a4   :  { %v23422_v32 = vadd.f32 %v17077_v8, %v17076_v49  ;;  %v17079_v27 = vpop.f32.mrb[244].mxu1  ;;  %v20445_v49 = vld [vmem:[%s27025_s3 + $0xb20] ss:$16 sps:$4 sm:$0xff]   ;;  %v23473_v8 = vld [vmem:[#allocation2 + $0x88] sm:$0xff] }
 0x4a5   :  { %17888 = vmatpush3.bf16.msra.mxu1 %v23141_v29  ;;  %v20433_v29 = vld [vmem:[%s27025_s3 + $0xaa0] ss:$16 sps:$4 sm:$0xff]   ;;  %v17080_v36 = vpop.f32.mrb[245].mxu1 }
 0x4a6   :  { %17937 = vmatprep.subr.bf16.mxu1 %v23417_v48  ;;  %v17082_v21 = vpop.f32.mrb[246].mxu1  ;;  %v23430_v45 = vadd.f32 %v17080_v36, %v17079_v27  ;;  %v23479_v27 = vld [vmem:[#allocation2 + $0xd0] sm:$0xff] }
 0x4a7   :  { %v17083_v41 = vpop.f32.mrb[247].mxu1 }
 0x4a8   :  { %6831 = vmatmul.mubr.bf16.gmra.mrb[176].mxu1 %v20430_v31  ;;  %v23432_v20 = vadd.f32 %v17083_v41, %v17082_v21  ;;  %v17085_v38 = vpop.f32.mrb[248].mxu1  ;;  %v23482_v41 = vld [vmem:[#allocation2 + $0x90] sm:$0xff] }
 0x4a9   :  { %6838 = vmatprep.mubr.bf16.mxu1 %v20435_v42  ;;  %v17086_v30 = vpop.f32.mrb[249].mxu1 }
 0x4aa   :  { %27054 = vst [vmem:[#allocation5_spill] sm:$0xff] %v23432_v20  ;;  %v17088_v3 = vpop.f32.mrb[250].mxu1  ;;  %v23440_v15 = vadd.f32 %v17086_v30, %v17085_v38  ;;  %v23487_v38 = vld [vmem:[#allocation2 + $0xd8] sm:$0xff] }
 0x4ab   :  { %v17089_v46 = vpop.f32.mrb[251].mxu1 }
 0x4ac   :  { %27055 = vst [vmem:[#allocation6_spill] sm:$0xff] %v23440_v15  ;;  %v23442_v55 = vadd.f32 %v17089_v46, %v17088_v3  ;;  %v17091_v57 = vpop.f32.mrb[252].mxu1  ;;  %v20448_v3 = vld [vmem:[%s27025_s3 + $0xb40] ss:$16 sps:$4 sm:$0xff]   ;;  %v23495_v46 = vld [vmem:[#allocation2 + $0x98] sm:$0xff] }
 0x4ad   :  { %v17092_v35 = vpop.f32.mrb[253].mxu1 }
 0x4ae   :  { %27056 = vst [vmem:[#allocation7_spill] sm:$0xff] %v23442_v55  ;;  %v17094_v4 = vpop.f32.mrb[254].mxu1  ;;  %v23450_v60 = vadd.f32 %v17092_v35, %v17091_v57  ;;  %v23501_v57 = vld [vmem:[#allocation2 + $0xe0] sm:$0xff] }
 0x4af   :  { %v17095_v47 = vpop.f32.mrb[255].mxu1 }
 0x4b0   :  { %6839 = vmatmul.mubr.bf16.gmra.mrb[180].mxu1 %v20433_v29  ;;  %27057 = vst [vmem:[#allocation8_spill] sm:$0xff] %v23450_v60  ;;  %v23452_v61 = vadd.f32 %v17095_v47, %v17094_v4  ;;  %v17189_v17 = vpop.f32.mrb[0].mxu1  ;;  %v20450_v29 = vld [vmem:[%s27025_s3 + $0xb44] ss:$16 sps:$4 sm:$0xff]  }
 0x4b1   :  { %6846 = vmatprep.mubr.bf16.mxu1 %v20438_v33  ;;  %v17190_v11 = vpop.f32.mrb[1].mxu1 }
 0x4b2   :  { %27058 = vst [vmem:[#allocation9_spill] sm:$0xff] %v23452_v61  ;;  %v17192_v6 = vpop.f32.mrb[2].mxu1  ;;  %v23463_v31 = vadd.f32 %v17190_v11, %v17189_v17  ;;  %v23511_v11 = vld [vmem:[#allocation2 + $0xe8] sm:$0xff] }
 0x4b3   :  { %v17193_v42 = vpop.f32.mrb[3].mxu1 }
 0x4b4   :  { %27059 = vst [vmem:[#allocation10_spill] sm:$0xff] %v23463_v31  ;;  %v23468_v53 = vadd.f32 %v17193_v42, %v17192_v6  ;;  %v17195_v33 = vpop.f32.mrb[4].mxu1  ;;  %v20451_v6 = vld [vmem:[%s27025_s3 + $0xb60] ss:$16 sps:$4 sm:$0xff]   ;;  %v23517_v42 = vld [vmem:[#allocation2 + $0xa8] sm:$0xff] }
 0x4b5   :  { %v17196_v36 = vpop.f32.mrb[5].mxu1 }
 0x4b6   :  { %27060 = vst [vmem:[#allocation11_spill] sm:$0xff] %v23468_v53  ;;  %v17198_v21 = vpop.f32.mrb[6].mxu1 }
 0x4b8   :  { %6847 = vmatmul.mubr.bf16.gmra.mrb[184].mxu1 %v20436_v63  ;;  %v23485_v63 = vadd.f32 %v17196_v36, %v17195_v33  ;;  %v23523_v33 = vld [vmem:[#allocation2 + $0xf0] sm:$0xff] }
 0x4b9   :  { %6854 = vmatprep.mubr.bf16.mxu1 %v20441_v10  ;;  %v17199_v10 = vpop.f32.mrb[7].mxu1 }
 0x4ba   :  { %27061 = vst [vmem:[#allocation12_spill] sm:$0xff] %v23485_v63  ;;  %v23490_v30 = vadd.f32 %v17199_v10, %v17198_v21 }
 0x4bc   :  { %27062 = vst [vmem:[#allocation13_spill] sm:$0xff] %v23490_v30 }
 0x4c0   :  { %6855 = vmatmul.mubr.bf16.gmra.mrb[188].mxu1 %v20439_v50  ;;  %v20453_v50 = vld [vmem:[%s27025_s3 + $0xb64] ss:$16 sps:$4 sm:$0xff]  }
 0x4c1   :  { %7363 = vmatprep.mubr.bf16.mxu1 %v20444_v54  ;;  %v17201_v54 = vpop.f32.mrb[8].mxu1 }
 0x4c2   :  { %v17202_v35 = vpop.f32.mrb[9].mxu1 }
 0x4c3   :  { %v23504_v4 = vadd.f32 %v17202_v35, %v17201_v54  ;;  %v17204_v47 = vpop.f32.mrb[10].mxu1  ;;  %v23531_v54 = vld [vmem:[#allocation2 + $0xf8] sm:$0xff] }
 0x4c5   :  { %27063 = vst [vmem:[#allocation14_spill] sm:$0xff] %v23504_v4 }
 0x4c8   :  { %7364 = vmatmul.mubr.bf16.vlgmr.msra.gmra.mrb[192].mxu1 %v20442_v12  ;;  %v17205_v12 = vpop.f32.mrb[11].mxu1 }
 0x4c9   :  { %17938 = vmatpush3.bf16.msra.mxu1 %v23460_v13  ;;  %7371 = vmatprep.mubr.bf16.mxu1 %v20447_v52  ;;  %v23506_v52 = vld [vmem:[#allocation2 + $0xa0] sm:$0xff]  ;;  %v23509_v17 = vadd.f32 %v17205_v12, %v17204_v47 }
 0x4ca   :  { %17939 = vmatprep.subr.bf16.mxu1 %v23465_v37  ;;  %v20454_v47 = vld [vmem:[%s27025_s3 + $0xb80] ss:$16 sps:$4 sm:$0xff]   ;;  %v20459_v12 = vld [vmem:[%s27025_s3 + $0xba4] ss:$16 sps:$4 sm:$0xff]  }
 0x4cb   :  { %27064 = vst [vmem:[#allocation15_spill] sm:$0xff] %v23509_v17 }
 0x4cd   :  { %17940 = vmatpush3.bf16.msra.mxu1 %v23473_v8 }
 0x4ce   :  { %17941 = vmatprep.subr.bf16.mxu1 %v23479_v27 }
 0x4d0   :  { %7372 = vmatmul.mubr.bf16.gmra.mrb[196].mxu1 %v20445_v49  ;;  %v20456_v49 = vld [vmem:[%s27025_s3 + $0xb84] ss:$16 sps:$4 sm:$0xff]  }
 0x4d1   :  { %17942 = vmatpush3.bf16.msra.mxu1 %v23482_v41  ;;  %7379 = vmatprep.mubr.bf16.mxu1 %v20450_v29  ;;  %v17207_v29 = vpop.f32.mrb[12].mxu1 }
 0x4d2   :  { %17943 = vmatprep.subr.bf16.mxu1 %v23487_v38  ;;  %v17208_v36 = vpop.f32.mrb[13].mxu1 }
 0x4d3   :  { %v23526_v21 = vadd.f32 %v17208_v36, %v17207_v29  ;;  %v17210_v10 = vpop.f32.mrb[14].mxu1 }
 0x4d5   :  { %17944 = vmatpush3.bf16.msra.mxu1 %v23495_v46  ;;  %27065 = vst [vmem:[#allocation16_spill] sm:$0xff] %v23526_v21 }
 0x4d6   :  { %17945 = vmatprep.subr.bf16.mxu1 %v23501_v57 }
 0x4d8   :  { %7380 = vmatmul.mubr.bf16.gmra.mrb[200].mxu1 %v20448_v3  ;;  %v23528_v3 = vld [vmem:[#allocation2 + $0xb0] sm:$0xff] }
 0x4d9   :  { %17946 = vmatpush3.bf16.msra.mxu1 %v23506_v52  ;;  %7387 = vmatprep.mubr.bf16.mxu1 %v20453_v50  ;;  %v17211_v50 = vpop.f32.mrb[15].mxu1 }
 0x4da   :  { %17947 = vmatprep.subr.bf16.mxu1 %v23511_v11  ;;  %v23534_v35 = vadd.f32 %v17211_v50, %v17210_v10 }
 0x4dc   :  { %27066 = vst [vmem:[#allocation17_spill] sm:$0xff] %v23534_v35  ;;  %v20462_v35 = vld [vmem:[%s27025_s3 + $0xbc4] ss:$16 sps:$4 sm:$0xff]  }
 0x4dd   :  { %17948 = vmatpush3.bf16.msra.mxu1 %v23517_v42 }
 0x4de   :  { %17949 = vmatprep.subr.bf16.mxu1 %v23523_v33 }
 0x4e0   :  { %7388 = vmatmul.mubr.bf16.gmra.mrb[204].mxu1 %v20451_v6  ;;  %v17213_v6 = vpop.f32.mrb[16].mxu1 }
 0x4e1   :  { %17950 = vmatpush3.bf16.msra.mxu1 %v23528_v3  ;;  %7395 = vmatprep.mubr.bf16.mxu1 %v20456_v49  ;;  %v17214_v49 = vpop.f32.mrb[17].mxu1 }
 0x4e2   :  { %17951 = vmatprep.subr.bf16.mxu1 %v23531_v54  ;;  %v23544_v29 = vadd.f32 %v17214_v49, %v17213_v6  ;;  %v17216_v36 = vpop.f32.mrb[18].mxu1 }
 0x4e3   :  { %v17217_v10 = vpop.f32.mrb[19].mxu1 }
 0x4e4   :  { %27067 = vst [vmem:[#allocation18_spill] sm:$0xff] %v23544_v29  ;;  %v23546_v50 = vadd.f32 %v17217_v10, %v17216_v36  ;;  %v17219_v21 = vpop.f32.mrb[20].mxu1  ;;  %v20465_v29 = vld [vmem:[%s27025_s3 + $0xbe4] ss:$16 sps:$4 sm:$0xff]  }
 0x4e5   :  { %17952 = vmatpush3.bf16.msra.mxu1 %v23000_v59  ;;  %v20457_v59 = vld [vmem:[%s27025_s3 + $0xba0] ss:$16 sps:$4 sm:$0xff]   ;;  %v17220_v17 = vpop.f32.mrb[21].mxu1 }
 0x4e6   :  { %18077 = vmatprep.subr.bf16.mxu1 %v23417_v48  ;;  %27068 = vst [vmem:[#allocation19_spill] sm:$0xff] %v23546_v50  ;;  %v23554_v4 = vadd.f32 %v17220_v17, %v17219_v21  ;;  %v17222_v6 = vpop.f32.mrb[22].mxu1  ;;  %v20460_v50 = vld [vmem:[%s27025_s3 + $0xbc0] ss:$16 sps:$4 sm:$0xff]  }
 0x4e8   :  { %7396 = vmatmul.mubr.bf16.gmra.mrb[208].mxu1 %v20454_v47  ;;  %27069 = vst [vmem:[#allocation20_spill] sm:$0xff] %v23554_v4  ;;  %v17223_v47 = vpop.f32.mrb[23].mxu1 }
 0x4e9   :  { %7403 = vmatprep.mubr.bf16.mxu1 %v20459_v12  ;;  %v23556_v12 = vadd.f32 %v17223_v47, %v17222_v6  ;;  %v17225_v49 = vpop.f32.mrb[24].mxu1 }
 0x4ea   :  { %v17226_v36 = vpop.f32.mrb[25].mxu1 }
 0x4eb   :  { %27070 = vst [vmem:[#allocation21_spill] sm:$0xff] %v23556_v12  ;;  %v23558_v10 = vadd.f32 %v17226_v36, %v17225_v49  ;;  %v17228_v17 = vpop.f32.mrb[26].mxu1  ;;  %v20463_v49 = vld [vmem:[%s27025_s3 + $0xbe0] ss:$16 sps:$4 sm:$0xff]   ;;  %v20468_v36 = vld [vmem:[%s27025_s3 + $0xb0c] ss:$16 sps:$4 sm:$0xff]  }
 0x4ec   :  { %v17229_v21 = vpop.f32.mrb[27].mxu1 }
 0x4ed   :  { %27071 = vst [vmem:[#allocation22_spill] sm:$0xff] %v23558_v10 }
 0x4f0   :  { %7404 = vmatmul.mubr.bf16.gmra.mrb[212].mxu1 %v20457_v59  ;;  %v23566_v59 = vadd.f32 %v17229_v21, %v17228_v17 }
 0x4f1   :  { %7411 = vmatprep.mubr.bf16.mxu1 %v20462_v35  ;;  %v17231_v35 = vpop.f32.mrb[28].mxu1 }
 0x4f2   :  { %27072 = vst [vmem:[#allocation23_spill] sm:$0xff] %v23566_v59  ;;  %v17232_v6 = vpop.f32.mrb[29].mxu1 }
 0x4f3   :  { %v23568_v47 = vadd.f32 %v17232_v6, %v17231_v35  ;;  %v17234_v10 = vpop.f32.mrb[30].mxu1  ;;  %v20466_v35 = vld [vmem:[%s27025_s3 + $0xb08] ss:$16 sps:$4 sm:$0xff]   ;;  %v20471_v6 = vld [vmem:[%s27025_s3 + $0xb2c] ss:$16 sps:$4 sm:$0xff]  }
 0x4f4   :  { %v17235_v12 = vpop.f32.mrb[31].mxu1 }
 0x4f5   :  { %27073 = vst [vmem:[#allocation24_spill] sm:$0xff] %v23568_v47 }
 0x4f8   :  { %7412 = vmatmul.mubr.bf16.gmra.mrb[216].mxu1 %v20460_v50  ;;  %v23576_v50 = vadd.f32 %v17235_v12, %v17234_v10  ;;  %v20469_v10 = vld [vmem:[%s27025_s3 + $0xb28] ss:$16 sps:$4 sm:$0xff]  }
 0x4f9   :  { %7419 = vmatprep.mubr.bf16.mxu1 %v20465_v29  ;;  %v17329_v29 = vpop.f32.mrb[32].mxu1 }
 0x4fa   :  { %27074 = vst [vmem:[#allocation25_spill] sm:$0xff] %v23576_v50  ;;  %v17330_v17 = vpop.f32.mrb[33].mxu1 }
 0x4fb   :  { %v23578_v21 = vadd.f32 %v17330_v17, %v17329_v29  ;;  %v17332_v47 = vpop.f32.mrb[34].mxu1 }
 0x4fc   :  { %v17333_v59 = vpop.f32.mrb[35].mxu1 }
 0x4fd   :  { %v23587_v12 = vadd.f32 %v17333_v59, %v17332_v47 }
 0x500   :  { %7420 = vmatmul.mubr.bf16.gmra.mrb[220].mxu1 %v20463_v49  ;;  %v20474_v49 = vld [vmem:[%s27025_s3 + $0xb4c] ss:$16 sps:$4 sm:$0xff]  }
 0x501   :  { %7460 = vmatprep.mubr.bf16.mxu1 %v20468_v36  ;;  %v17335_v36 = vpop.f32.mrb[36].mxu1 }
 0x502   :  { %v17336_v29 = vpop.f32.mrb[37].mxu1 }
 0x503   :  { %v23598_v17 = vadd.f32 %v17336_v29, %v17335_v36  ;;  %v17338_v59 = vpop.f32.mrb[38].mxu1  ;;  %v20477_v36 = vld [vmem:[%s27025_s3 + $0xb6c] ss:$16 sps:$4 sm:$0xff]  }
 0x504   :  { %v17339_v47 = vpop.f32.mrb[39].mxu1 }
 0x508   :  { %7461 = vmatmul.mubr.bf16.vlgmr.msra.gmra.mrb[224].mxu1 %v20466_v35  ;;  %v23601_v35 = vadd.f32 %v17339_v47, %v17338_v59 }
 0x509   :  { %18078 = vmatpush3.bf16.msra.mxu1 %v23460_v13  ;;  %7468 = vmatprep.mubr.bf16.mxu1 %v20471_v6  ;;  %v20472_v6 = vld [vmem:[%s27025_s3 + $0xb48] ss:$16 sps:$4 sm:$0xff]  }
 0x50a   :  { %18079 = vmatprep.subr.bf16.mxu1 %v23465_v37 }
 0x50d   :  { %18080 = vmatpush3.bf16.msra.mxu1 %v23473_v8 }
 0x50e   :  { %18081 = vmatprep.subr.bf16.mxu1 %v23479_v27 }
 0x510   :  { %7469 = vmatmul.mubr.bf16.gmra.mrb[228].mxu1 %v20469_v10  ;;  %v17341_v10 = vpop.f32.mrb[40].mxu1 }
 0x511   :  { %18082 = vmatpush3.bf16.msra.mxu1 %v23482_v41  ;;  %7476 = vmatprep.mubr.bf16.mxu1 %v20474_v49  ;;  %v17342_v49 = vpop.f32.mrb[41].mxu1 }
 0x512   :  { %18083 = vmatprep.subr.bf16.mxu1 %v23487_v38  ;;  %v23612_v4 = vadd.f32 %v17342_v49, %v17341_v10  ;;  %v17344_v30 = vpop.f32.mrb[42].mxu1 }
 0x513   :  { %v17345_v53 = vpop.f32.mrb[43].mxu1 }
 0x514   :  { %v23616_v60 = vadd.f32 %v17345_v53, %v17344_v30 }
 0x515   :  { %18084 = vmatpush3.bf16.msra.mxu1 %v23495_v46  ;;  %v16909_v50 = vpop.f32.mrb[144].mxu0 }
 0x516   :  { %18085 = vmatprep.subr.bf16.mxu1 %v23501_v57  ;;  %v16910_v29 = vpop.f32.mrb[145].mxu0 }
 0x517   :  { %v16911_v59 = vadd.f32 %v16910_v29, %v16909_v50  ;;  %v16912_v47 = vpop.f32.mrb[146].mxu0  ;;  %v20475_v50 = vld [vmem:[%s27025_s3 + $0xb68] ss:$16 sps:$4 sm:$0xff]  }
 0x518   :  { %v16913_v63 = vpop.f32.mrb[147].mxu0  ;;  %7477 = vmatmul.mubr.bf16.gmra.mrb[232].mxu1 %v20472_v6 }
 0x519   :  { %v3508_v31 = vadd.f32 %v23214_v14, %v16911_v59  ;;  %v16914_v61 = vadd.f32 %v16913_v63, %v16912_v47  ;;  %18086 = vmatpush3.bf16.msra.mxu1 %v23506_v52  ;;  %7484 = vmatprep.mubr.bf16.mxu1 %v20477_v36  ;;  %v20480_v14 = vld [vmem:[%s27025_s3 + $0xb8c] ss:$16 sps:$4 sm:$0xff]   ;;  %v17347_v63 = vpop.f32.mrb[44].mxu1 }
 0x51a   :  { %18087 = vmatprep.subr.bf16.mxu1 %v23511_v11  ;;  %v17348_v30 = vpop.f32.mrb[45].mxu1 }
 0x51b   :  { %v3511_v55 = vadd.f32 %v23222_v22, %v16914_v61  ;;  %v23629_v22 = vadd.f32 %v17348_v30, %v17347_v63  ;;  %v17350_v61 = vpop.f32.mrb[46].mxu1  ;;  %v23646_v30 = vld [vmem:[#allocation2 + $0x40] sm:$0xff] }
 0x51c   :  { %v17351_v59 = vpop.f32.mrb[47].mxu1 }
 0x51d   :  { %18088 = vmatpush3.bf16.msra.mxu1 %v23517_v42  ;;  %v16915_v6 = vpop.f32.mrb[148].mxu0  ;;  %v3570_v10 = vpack.c.bf16 %v3511_v55, %v3508_v31  ;;  %v23633_v47 = vadd.f32 %v17351_v59, %v17350_v61 }
 0x51e   :  { %18089 = vmatprep.subr.bf16.mxu1 %v23523_v33  ;;  %v16916_v53 = vpop.f32.mrb[149].mxu0 }
 0x51f   :  { %v16917_v36 = vadd.f32 %v16916_v53, %v16915_v6  ;;  %v16918_v29 = vpop.f32.mrb[150].mxu0  ;;  %18966 = vmatprep.mubr.msk.bf16.mxu0 %vm892_vm4, %v3570_v10  ;;  %v20478_v10 = vld [vmem:[%s27025_s3 + $0xb88] ss:$16 sps:$4 sm:$0xff]  }
 0x520   :  { %v16919_v49 = vpop.f32.mrb[151].mxu0  ;;  %7485 = vmatmul.mubr.bf16.gmra.mrb[236].mxu1 %v20475_v50  ;;  %v23640_v53 = vld [vmem:[#allocation2 + $0xb8] sm:$0xff] }
 0x521   :  { %v3516_v55 = vadd.f32 %v23252_v28, %v16917_v36  ;;  %v16920_v31 = vadd.f32 %v16919_v49, %v16918_v29  ;;  %18090 = vmatpush3.bf16.msra.mxu1 %v23528_v3  ;;  %7492 = vmatprep.mubr.bf16.mxu1 %v20480_v14  ;;  %v20483_v50 = vld [vmem:[%s27025_s3 + $0xbac] ss:$16 sps:$4 sm:$0xff]   ;;  %v17353_v14 = vpop.f32.mrb[48].mxu1 }
 0x522   :  { %18091 = vmatprep.subr.bf16.mxu1 %v23531_v54  ;;  %v17354_v36 = vpop.f32.mrb[49].mxu1 }
 0x523   :  { %v3519_v6 = vadd.f32 %v23256_v9, %v16920_v31  ;;  %v23650_v49 = vadd.f32 %v17354_v36, %v17353_v14  ;;  %v17356_v59 = vpop.f32.mrb[50].mxu1 }
 0x524   :  { %v17357_v31 = vpop.f32.mrb[51].mxu1 }
 0x525   :  { %v3571_v63 = vpack.c.bf16 %v3519_v6, %v3516_v55  ;;  %18092 = vmatpush3.bf16.msra.mxu1 %v23640_v53  ;;  %v16921_v28 = vpop.f32.mrb[152].mxu0  ;;  %v23655_v20 = vadd.f32 %v17357_v31, %v17356_v59 }
 0x526   :  { %18153 = vmatprep.subr.bf16.mxu1 %v23646_v30  ;;  %v16922_v9 = vpop.f32.mrb[153].mxu0 }
 0x527   :  { %v16923_v29 = vadd.f32 %v16922_v9, %v16921_v28  ;;  %v16924_v61 = vpop.f32.mrb[154].mxu0  ;;  %18967 = vmatmul.mubr.msk.bf16.vlgmr.msra.gmra.mrb[96].mxu0 %vm892_vm4, %v3571_v63  ;;  %v17359_v28 = vpop.f32.mrb[52].mxu1 }
 0x528   :  { %17098 = vmatpush3.bf16.msra.mxu0 %v23460_v13  ;;  %v16925_v55 = vpop.f32.mrb[155].mxu0  ;;  %7493 = vmatmul.mubr.bf16.gmra.mrb[240].mxu1 %v20478_v10  ;;  %v17360_v9 = vpop.f32.mrb[53].mxu1  ;;  %v20481_v13 = vld [vmem:[%s27025_s3 + $0xba8] ss:$16 sps:$4 sm:$0xff]  }
 0x529   :  { %v3524_v6 = vadd.f32 %v23273_v7, %v16923_v29  ;;  %v16926_v15 = vadd.f32 %v16925_v55, %v16924_v61  ;;  %17099 = vmatprep.subr.bf16.mxu0 %v23465_v37  ;;  %7500 = vmatprep.mubr.bf16.mxu1 %v20483_v50  ;;  %v23658_v14 = vadd.f32 %v17360_v9, %v17359_v28  ;;  %v17362_v36 = vpop.f32.mrb[54].mxu1  ;;  %v20486_v50 = vld [vmem:[%s27025_s3 + $0xbcc] ss:$16 sps:$4 sm:$0xff]  }
 0x52a   :  { %v17363_v7 = vpop.f32.mrb[55].mxu1 }
 0x52b   :  { %v3527_v63 = vadd.f32 %v23276_v56, %v16926_v15  ;;  %v23668_v29 = vadd.f32 %v17363_v7, %v17362_v36  ;;  %v17365_v59 = vpop.f32.mrb[56].mxu1 }
 0x52c   :  { %17100 = vmatpush3.bf16.msra.mxu0 %v23473_v8  ;;  %v17366_v31 = vpop.f32.mrb[57].mxu1 }
 0x52d   :  { %17101 = vmatprep.subr.bf16.mxu0 %v23479_v27  ;;  %v16927_v37 = vpop.f32.mrb[156].mxu0  ;;  %v3572_v10 = vpack.c.bf16 %v3527_v63, %v3524_v6  ;;  %v23674_v6 = vadd.f32 %v17366_v31, %v17365_v59  ;;  %v17368_v28 = vpop.f32.mrb[58].mxu1 }
 0x52e   :  { %v16928_v56 = vpop.f32.mrb[157].mxu0  ;;  %v17369_v63 = vpop.f32.mrb[59].mxu1 }
 0x52f   :  { %v16929_v15 = vadd.f32 %v16928_v56, %v16927_v37  ;;  %v16930_v61 = vpop.f32.mrb[158].mxu0  ;;  %18970 = vmatprep.mubr.msk.bf16.mxu0 %vm892_vm4, %v3572_v10  ;;  %v23681_v36 = vadd.f32 %v17369_v63, %v17368_v28  ;;  %v17371_v10 = vpop.f32.mrb[60].mxu1 }
 0x530   :  { %17102 = vmatpush3.bf16.msra.mxu0 %v23482_v41  ;;  %v16931_v8 = vpop.f32.mrb[159].mxu0  ;;  %7501 = vmatmul.mubr.bf16.gmra.mrb[244].mxu1 %v20481_v13  ;;  %v20484_v41 = vld [vmem:[%s27025_s3 + $0xbc8] ss:$16 sps:$4 sm:$0xff]   ;;  %v20489_v13 = vld [vmem:[%s27025_s3 + $0xbec] ss:$16 sps:$4 sm:$0xff]  }
 0x531   :  { %v3532_v27 = vadd.f32 %v23293_v26, %v16929_v15  ;;  %v16932_v55 = vadd.f32 %v16931_v8, %v16930_v61  ;;  %17103 = vmatprep.subr.bf16.mxu0 %v23487_v38  ;;  %7508 = vmatprep.mubr.bf16.mxu1 %v20486_v50 }
 0x533   :  { %v3535_v9 = vadd.f32 %v23296_v58, %v16932_v55  ;;  %v20492_v55 = vld [vmem:[%s27025_s3 + $0xc0c] ss:$16 sps:$4 sm:$0xff]  }
 0x534   :  { %17104 = vmatpush3.bf16.msra.mxu0 %v23495_v46 }
 0x535   :  { %17105 = vmatprep.subr.bf16.mxu0 %v23501_v57  ;;  %v16933_v26 = vpop.f32.mrb[160].mxu0  ;;  %v3573_v38 = vpack.c.bf16 %v3535_v9, %v3532_v27  ;;  %v17372_v57 = vpop.f32.mrb[61].mxu1 }
 0x536   :  { %v16934_v7 = vpop.f32.mrb[161].mxu0  ;;  %v23691_v15 = vadd.f32 %v17372_v57, %v17371_v10  ;;  %v17374_v61 = vpop.f32.mrb[62].mxu1 }
 0x537   :  { %v16935_v37 = vadd.f32 %v16934_v7, %v16933_v26  ;;  %v16936_v58 = vpop.f32.mrb[162].mxu0  ;;  %18971 = vmatmul.mubr.msk.bf16.gmra.mrb[100].mxu0 %vm892_vm4, %v3573_v38  ;;  %v17375_v59 = vpop.f32.mrb[63].mxu1 }
 0x538   :  { %17106 = vmatpush3.bf16.msra.mxu0 %v23506_v52  ;;  %v16937_v46 = vpop.f32.mrb[163].mxu0  ;;  %7509 = vmatmul.mubr.bf16.gmra.mrb[248].mxu1 %v20484_v41  ;;  %v20487_v52 = vld [vmem:[%s27025_s3 + $0xbe8] ss:$16 sps:$4 sm:$0xff]   ;;  %v23698_v27 = vadd.f32 %v17375_v59, %v17374_v61  ;;  %v17393_v9 = vpop.f32.mrb[64].mxu1 }
 0x539   :  { %v3540_v50 = vadd.f32 %v23313_v1, %v16935_v37  ;;  %v16938_v56 = vadd.f32 %v16937_v46, %v16936_v58  ;;  %17107 = vmatprep.subr.bf16.mxu0 %v23511_v11  ;;  %7516 = vmatprep.mubr.bf16.mxu1 %v20489_v13  ;;  %v17394_v26 = vpop.f32.mrb[65].mxu1 }
 0x53a   :  { %v17395_v38 = vadd.f32 %v17394_v26, %v17393_v9  ;;  %v17396_v13 = vpop.f32.mrb[66].mxu1 }
 0x53b   :  { %v3543_v8 = vadd.f32 %v23315_v25, %v16938_v56 }
 0x53c   :  { %17108 = vmatpush3.bf16.msra.mxu0 %v23517_v42  ;;  %v23719_v37 = vadd.f32 %v17395_v38, %v23578_v21 }
 0x53d   :  { %17109 = vmatprep.subr.bf16.mxu0 %v23523_v33  ;;  %v16939_v1 = vpop.f32.mrb[164].mxu0  ;;  %v3574_v11 = vpack.c.bf16 %v3543_v8, %v3540_v50  ;;  %v23711_v33 = vld [vmem:[%s27027_s4 + $0xa0] sm:$0xff]   ;;  %v20495_v50 = vld [vmem:[%s27025_s3 + $0xc2c] ss:$16 sps:$4 sm:$0xff]  }
 0x53e   :  { %v16940_v31 = vpop.f32.mrb[165].mxu0 }
 0x53f   :  { %v16941_v28 = vadd.f32 %v16940_v31, %v16939_v1  ;;  %v16942_v25 = vpop.f32.mrb[166].mxu0  ;;  %18974 = vmatprep.mubr.msk.bf16.mxu0 %vm892_vm4, %v3574_v11  ;;  %v23733_v1 = vld [vmem:[#allocation2 + $0x48] sm:$0xff] }
 0x540   :  { %17110 = vmatpush3.bf16.msra.mxu0 %v23528_v3  ;;  %v16943_v42 = vpop.f32.mrb[167].mxu0  ;;  %7517 = vmatmul.mubr.bf16.gmra.mrb[252].mxu1 %v20487_v52  ;;  %v17397_v3 = vpop.f32.mrb[67].mxu1  ;;  %v23730_v52 = vld [vmem:[#allocation2] sm:$0xff]  ;;  %v20493_v11 = vld [vmem:[%s27025_s3 + $0xc28] ss:$16 sps:$4 sm:$0xff]  }
 0x541   :  { %v3548_v63 = vadd.f32 %v23317_v2, %v16941_v28  ;;  %v16944_v41 = vadd.f32 %v16943_v42, %v16942_v25  ;;  %17111 = vmatprep.subr.bf16.mxu0 %v23531_v54  ;;  %8025 = vmatprep.mubr.bf16.mxu1 %v20492_v55  ;;  %v20490_v2 = vld [vmem:[%s27025_s3 + $0xc08] ss:$16 sps:$4 sm:$0xff]   ;;  %v17398_v58 = vadd.f32 %v17397_v3, %v17396_v13  ;;  %v20498_v28 = vld [vmem:[%s27025_s3 + $0xc4c] ss:$16 sps:$4 sm:$0xff]   ;;  %v17399_v25 = vpop.f32.mrb[68].mxu1  ;;  %v23746_v42 = vld [vmem:[#allocation2 + $0x50] sm:$0xff] }
 0x542   :  { %v23740_v55 = vld [vmem:[#allocation2 + $0x8] sm:$0xff]  ;;  %v17400_v9 = vpop.f32.mrb[69].mxu1 }
 0x543   :  { %v3551_v7 = vadd.f32 %v23325_v44, %v16944_v41  ;;  %v23726_v56 = vadd.f32 %v17398_v58, %v23587_v12  ;;  %v17401_v26 = vadd.f32 %v17400_v9, %v17399_v25  ;;  %v17402_v38 = vpop.f32.mrb[70].mxu1  ;;  %v23751_v58 = vld [vmem:[#allocation2 + $0x10] sm:$0xff]  ;;  %v23788_v9 = vld [vmem:[#allocation2 + $0x68] sm:$0xff] }
 0x544   :  { %17112 = vmatpush3.bf16.msra.mxu0 %v23640_v53  ;;  %27075 = vst [vmem:[#allocation26_spill] sm:$0xff] %v23788_v9 }
 0x545   :  { %v16945_v46 = vpop.f32.mrb[168].mxu0  ;;  %v3575_v10 = vpack.c.bf16 %v3551_v7, %v3548_v63  ;;  %18982 = vmatprep.subr.bf16.mxu0 %v23711_v33  ;;  %v17403_v7 = vpop.f32.mrb[71].mxu1 }
 0x546   :  { %v16946_v44 = vpop.f32.mrb[169].mxu0 }
 0x547   :  { %v16947_v57 = vadd.f32 %v16946_v44, %v16945_v46  ;;  %v16948_v61 = vpop.f32.mrb[170].mxu0  ;;  %18975 = vmatmul.mubr.msk.bf16.gmra.mrb[104].mxu0 %vm892_vm4, %v3575_v10  ;;  %v23755_v46 = vadd.f32 %v17401_v26, %v23598_v17  ;;  %v23757_v10 = vld [vmem:[#allocation2 + $0x58] sm:$0xff] }
 0x548   :  { %v16949_v8 = vpop.f32.mrb[171].mxu0  ;;  %8026 = vmatmul.mubr.bf16.vlgmr.msra.gmra.mrb[0].mxu1 %v20490_v2  ;;  %v23770_v17 = vld [vmem:[#allocation2 + $0x18] sm:$0xff] }
 0x549   :  { %v3556_v21 = vadd.f32 %v23333_v43, %v16947_v57  ;;  %v16950_v59 = vadd.f32 %v16949_v8, %v16948_v61  ;;  %18154 = vmatpush3.bf16.msra.mxu1 %v23730_v52  ;;  %8033 = vmatprep.mubr.bf16.mxu1 %v20495_v50  ;;  %v17404_v50 = vadd.f32 %v17403_v7, %v17402_v38  ;;  %v20501_v57 = vld [vmem:[%s27025_s3 + $0x50c] ss:$16 sps:$4 sm:$0xff]   ;;  %v20503_v26 = vld [vmem:[%s27025_s3 + $0xc68] ss:$16 sps:$4 sm:$0xff]   ;;  %v23806_v7 = vld [vmem:[#allocation2 + $0x70] sm:$0xff] }
 0x54a   :  { %18155 = vmatprep.subr.bf16.mxu1 %v23733_v1  ;;  %v23800_v38 = vld [vmem:[#allocation2 + $0x28] sm:$0xff]  ;;  %27077 = vst [vmem:[#allocation28_spill] sm:$0xff] %v23806_v7 }
 0x54b   :  { %v3559_v12 = vadd.f32 %v23338_v19, %v16950_v59  ;;  %v23768_v61 = vadd.f32 %v17404_v50, %v23601_v35  ;;  %v23776_v59 = vld [vmem:[#allocation2 + $0x60] sm:$0xff]  ;;  %27076 = vst [vmem:[#allocation27_spill] sm:$0xff] %v23800_v38 }
 0x54d   :  { %18156 = vmatpush3.bf16.msra.mxu1 %v23740_v55  ;;  %v16951_v43 = vpop.f32.mrb[172].mxu0  ;;  %v3576_v31 = vpack.c.bf16 %v3559_v12, %v3556_v21  ;;  %v17405_v21 = vpop.f32.mrb[72].mxu1 }
 0x54e   :  { %18157 = vmatprep.subr.bf16.mxu1 %v23746_v42  ;;  %v16952_v19 = vpop.f32.mrb[173].mxu0 }
 0x54f   :  { %v16953_v63 = vadd.f32 %v16952_v19, %v16951_v43  ;;  %v16954_v41 = vpop.f32.mrb[174].mxu0  ;;  %18978 = vmatprep.mubr.msk.bf16.mxu0 %vm892_vm4, %v3576_v31 }
 0x550   :  { %v16955_v13 = vpop.f32.mrb[175].mxu0  ;;  %8034 = vmatmul.mubr.bf16.gmra.mrb[4].mxu1 %v20493_v11  ;;  %v17406_v11 = vpop.f32.mrb[73].mxu1 }
 0x551   :  { %v3564_v3 = vadd.f32 %v23346_v39, %v16953_v63  ;;  %v16956_v2 = vadd.f32 %v16955_v13, %v16954_v41  ;;  %18158 = vmatpush3.bf16.msra.mxu1 %v23751_v58  ;;  %8041 = vmatprep.mubr.bf16.mxu1 %v20498_v28  ;;  %v20496_v39 = vld [vmem:[%s27025_s3 + $0xc48] ss:$16 sps:$4 sm:$0xff]   ;;  %v17407_v35 = vadd.f32 %v17406_v11, %v17405_v21  ;;  %v17408_v43 = vpop.f32.mrb[74].mxu1  ;;  %v23782_v28 = vld [vmem:[#allocation2 + $0x20] sm:$0xff] }
 0x552   :  { %18159 = vmatprep.subr.bf16.mxu1 %v23757_v10  ;;  %v17409_v31 = vpop.f32.mrb[75].mxu1  ;;  %v20499_v63 = vld [vmem:[%s27025_s3 + $0x508] ss:$16 sps:$4 sm:$0xff]  }
 0x553   :  { %v3567_v44 = vadd.f32 %v23351_v5, %v16956_v2  ;;  %v20505_v5 = vld [vmem:[%s27025_s3 + $0xc6c] ss:$16 sps:$4 sm:$0xff]   ;;  %v23786_v25 = vadd.f32 %v17407_v35, %v23612_v4  ;;  %v17410_v19 = vadd.f32 %v17409_v31, %v17408_v43  ;;  %v17411_v13 = vpop.f32.mrb[76].mxu1 }
 0x554   :  { %v20506_v4 = vld [vmem:[%s27027_s4 + $0xa8] sm:$0xff]   ;;  %v23825_v11 = vld [vmem:[#allocation2 + $0x78] sm:$0xff] }
 0x555   :  { %18160 = vmatpush3.bf16.msra.mxu1 %v23770_v17  ;;  %v3577_v8 = vpack.c.bf16 %v3567_v44, %v3564_v3  ;;  %v23795_v41 = vadd.f32 %v17410_v19, %v23616_v60  ;;  %v20507_v60 = vld [vmem:[%s27025_s3 + $0x52c] ss:$16 sps:$4 sm:$0xff]   ;;  %v17412_v3 = vpop.f32.mrb[77].mxu1  ;;  %27079 = vst [vmem:[#allocation30_spill] sm:$0xff] %v23825_v11 }
 0x556   :  { %18161 = vmatprep.subr.bf16.mxu1 %v23776_v59  ;;  %v20513_v2 = vld [vmem:[%s27025_s3 + $0xc8c] ss:$16 sps:$4 sm:$0xff]   ;;  %v17413_v50 = vadd.f32 %v17412_v3, %v17411_v13  ;;  %v17414_v44 = vpop.f32.mrb[78].mxu1 }
 0x557   :  { %18979 = vmatmul.mubr.msk.bf16.gmra.mrb[108].mxu0 %vm892_vm4, %v3577_v8  ;;  %v20509_v8 = vld [vmem:[%s27027_s4 + $0xb0] sm:$0xff]   ;;  %v23837_v43 = vld [vmem:[#allocation2 + $0x38] sm:$0xff] }
 0x558   :  { %8042 = vmatmul.mubr.bf16.gmra.mrb[8].mxu1 %v20496_v39  ;;  %4070 = vmatprep.mubr.bf16.mxu0 %v20501_v57  ;;  %v17415_v39 = vpop.f32.mrb[79].mxu1  ;;  %v23816_v57 = vld [vmem:[#allocation2 + $0x30] sm:$0xff]  ;;  %27080 = vst [vmem:[#allocation31_spill] sm:$0xff] %v23837_v43  ;;  %v20514_v31 = vld [vmem:[%s27027_s4 + $0xb8] sm:$0xff]  }
 0x559   :  { %18162 = vmatpush3.bf16.msra.mxu1 %v23782_v28  ;;  %8049 = vmatprep.mubr.bf16.mxu1 %v20505_v5  ;;  %27078 = vst [vmem:[#allocation29_spill] sm:$0xff] %v23816_v57  ;;  %v23823_v5 = vadd.f32 %v17413_v50, %v23629_v22  ;;  %v17416_v21 = vadd.f32 %v17415_v39, %v17414_v44  ;;  %v20511_v22 = vld [vmem:[%s27025_s3 + $0xc88] ss:$16 sps:$4 sm:$0xff]   ;;  %v20515_v19 = vld [vmem:[%s27025_s3 + $0x54c] ss:$16 sps:$4 sm:$0xff]  }
 0x55a   :  { %18163 = vmatprep.subr.bf16.mxu1 %v23788_v9  ;;  %v20517_v39 = vld [vmem:[%s27025_s3 + $0x548] ss:$16 sps:$4 sm:$0xff]  }
 0x55b   :  { %v23832_v35 = vadd.f32 %v17416_v21, %v23633_v47  ;;  %v17417_v47 = vpop.f32.mrb[80].mxu1 }
 0x55d   :  { %18164 = vmatpush3.bf16.msra.mxu1 %v23800_v38 }
 0x55e   :  { %18165 = vmatprep.subr.bf16.mxu1 %v23806_v7 }
 0x55f   :  { %4071 = vmatmul.mubr.bf16.vlgmr.msra.gmra.mrb[176].mxu0 %v20499_v63  ;;  %v20520_v63 = vld [vmem:[%s27025_s3 + $0xcac] ss:$16 sps:$4 sm:$0xff]  }
 0x560   :  { %18983 = vmatpush3.bf16.msra.mxu0 %v23711_v33  ;;  %8050 = vmatmul.mubr.bf16.gmra.mrb[12].mxu1 %v20503_v26  ;;  %v20510_v33 = vld [vmem:[%s27025_s3 + $0x528] ss:$16 sps:$4 sm:$0xff]   ;;  %v17418_v26 = vpop.f32.mrb[81].mxu1 }
 0x561   :  { %18166 = vmatpush3.bf16.msra.mxu1 %v23816_v57  ;;  %18984 = vmatprep.subr.bf16.mxu0 %v20506_v4  ;;  %v17420_v13 = vpop.f32.mrb[82].mxu1 }
 0x562   :  { %18167 = vmatprep.subr.bf16.mxu1 %v23825_v11  ;;  %4078 = vmatprep.mubr.bf16.mxu0 %v20507_v60  ;;  %v17421_v60 = vpop.f32.mrb[83].mxu1 }
 0x563   :  { %8057 = vmatprep.mubr.bf16.mxu1 %v20513_v2  ;;  %v17422_v2 = vadd.f32 %v17421_v60, %v17420_v13  ;;  %v17423_v50 = vpop.f32.mrb[84].mxu1 }
 0x564   :  { %18985 = vmatpush3.bf16.msra.mxu0 %v20506_v4  ;;  %v17419_v4 = vadd.f32 %v17418_v26, %v17417_v47  ;;  %v17424_v44 = vpop.f32.mrb[85].mxu1  ;;  %v20526_v47 = vld [vmem:[%s27025_s3 + $0xccc] ss:$16 sps:$4 sm:$0xff]  }
 0x565   :  { %18168 = vmatpush3.bf16.msra.mxu1 %v23837_v43  ;;  %18986 = vmatprep.subr.bf16.mxu0 %v20509_v8  ;;  %v23857_v21 = vadd.f32 %v17422_v2, %v23655_v20 }
 0x566   :  { %18293 = vmatprep.subr.bf16.mxu1 %v23646_v30  ;;  %v23851_v3 = vadd.f32 %v17419_v4, %v23650_v49  ;;  %v20521_v49 = vld [vmem:[%s27025_s3 + $0x56c] ss:$16 sps:$4 sm:$0xff]  }
 0x567   :  { %4079 = vmatmul.mubr.bf16.gmra.mrb[180].mxu0 %v20510_v33  ;;  %v17425_v33 = vadd.f32 %v17424_v44, %v17423_v50 }
 0x568   :  { %18987 = vmatpush3.bf16.msra.mxu0 %v20509_v8  ;;  %8058 = vmatmul.mubr.bf16.gmra.mrb[16].mxu1 %v20511_v22  ;;  %v17426_v8 = vpop.f32.mrb[86].mxu1  ;;  %v20518_v22 = vld [vmem:[%s27025_s3 + $0xca8] ss:$16 sps:$4 sm:$0xff]  }
 0x569   :  { %18988 = vmatprep.subr.bf16.mxu0 %v20514_v31  ;;  %4086 = vmatprep.mubr.bf16.mxu0 %v20515_v19  ;;  %v17427_v19 = vpop.f32.mrb[87].mxu1  ;;  %v23870_v20 = vadd.f32 %v17425_v33, %v23658_v14  ;;  %v20524_v14 = vld [vmem:[%s27025_s3 + $0xcc8] ss:$16 sps:$4 sm:$0xff]  }
 0x56a   :  { %8065 = vmatprep.mubr.bf16.mxu1 %v20520_v63  ;;  %v17428_v63 = vadd.f32 %v17427_v19, %v17426_v8  ;;  %v17429_v26 = vpop.f32.mrb[88].mxu1 }
 0x56b   :  { %v17430_v4 = vpop.f32.mrb[89].mxu1 }
 0x56c   :  { %18989 = vmatpush3.bf16.msra.mxu0 %v20514_v31  ;;  %v23873_v31 = vadd.f32 %v17428_v63, %v23668_v29  ;;  %v17431_v13 = vadd.f32 %v17430_v4, %v17429_v26  ;;  %v17432_v60 = vpop.f32.mrb[90].mxu1  ;;  %v20527_v29 = vld [vmem:[%s27025_s3 + $0x58c] ss:$16 sps:$4 sm:$0xff]   ;;  %v20530_v63 = vld [vmem:[%s27025_s3 + $0xce8] ss:$16 sps:$4 sm:$0xff]  }
 0x56d   :  { %17237 = vmatprep.subr.bf16.mxu0 %v23417_v48  ;;  %v20523_v48 = vld [vmem:[%s27025_s3 + $0x568] ss:$16 sps:$4 sm:$0xff]   ;;  %v17433_v2 = vpop.f32.mrb[91].mxu1 }
 0x56e   :  { %v23885_v50 = vadd.f32 %v17431_v13, %v23674_v6  ;;  %v17434_v44 = vadd.f32 %v17433_v2, %v17432_v60  ;;  %v17435_v8 = vpop.f32.mrb[92].mxu1  ;;  %v20529_v6 = vld [vmem:[%s27025_s3 + $0x588] ss:$16 sps:$4 sm:$0xff]   ;;  %v20538_v13 = vld [vmem:[%s27025_s3 + $0xd04] ss:$16 sps:$4 sm:$0xff]  }
 0x56f   :  { %4087 = vmatmul.mubr.bf16.gmra.mrb[184].mxu0 %v20517_v39  ;;  %v20532_v39 = vld [vmem:[%s27025_s3 + $0xcec] ss:$16 sps:$4 sm:$0xff]  }
 0x570   :  { %8066 = vmatmul.mubr.bf16.gmra.mrb[20].mxu1 %v20518_v22  ;;  %4094 = vmatprep.mubr.bf16.mxu0 %v20521_v49  ;;  %v23891_v33 = vadd.f32 %v17434_v44, %v23681_v36  ;;  %v17436_v22 = vpop.f32.mrb[93].mxu1  ;;  %v20533_v36 = vld [vmem:[%s27025_s3 + $0x5ac] ss:$16 sps:$4 sm:$0xff]  }
 0x571   :  { %8073 = vmatprep.mubr.bf16.mxu1 %v20526_v47  ;;  %v17437_v49 = vadd.f32 %v17436_v22, %v17435_v8  ;;  %v17438_v19 = vpop.f32.mrb[94].mxu1  ;;  %v20544_v22 = vld [vmem:[%s27025_s3 + $0xd24] ss:$16 sps:$4 sm:$0xff]  }
 0x572   :  { %v17439_v47 = vpop.f32.mrb[95].mxu1 }
 0x573   :  { %v23903_v26 = vadd.f32 %v17437_v49, %v23691_v15  ;;  %v17440_v4 = vadd.f32 %v17439_v47, %v17438_v19  ;;  %v20535_v15 = vld [vmem:[%s27025_s3 + $0x5a8] ss:$16 sps:$4 sm:$0xff]   ;;  %v20542_v19 = vld [vmem:[%s27025_s3 + $0xd20] ss:$16 sps:$4 sm:$0xff]   ;;  %v20550_v47 = vld [vmem:[%s27025_s3 + $0xd44] ss:$16 sps:$4 sm:$0xff]  }
 0x574   :  { %v20541_v49 = vld [vmem:[%s27025_s3 + $0x5c8] ss:$16 sps:$4 sm:$0xff]  }
 0x575   :  { %v23909_v60 = vadd.f32 %v17440_v4, %v23698_v27  ;;  %v20539_v27 = vld [vmem:[%s27025_s3 + $0x5cc] ss:$16 sps:$4 sm:$0xff]   ;;  %v20553_v4 = vld [vmem:[%s27025_s3 + $0xd64] ss:$16 sps:$4 sm:$0xff]  }
 0x577   :  { %4095 = vmatmul.mubr.bf16.gmra.mrb[188].mxu0 %v20523_v48  ;;  %v17533_v48 = vpop.f32.mrb[96].mxu1 }
 0x578   :  { %8074 = vmatmul.mubr.bf16.gmra.mrb[24].mxu1 %v20524_v14  ;;  %4102 = vmatprep.mubr.bf16.mxu0 %v20527_v29  ;;  %v17534_v2 = vpop.f32.mrb[97].mxu1 }
 0x579   :  { %8081 = vmatprep.mubr.bf16.mxu1 %v20532_v39  ;;  %v23911_v14 = vadd.f32 %v17534_v2, %v17533_v48  ;;  %v17536_v29 = vpop.f32.mrb[98].mxu1  ;;  %v20536_v39 = vld [vmem:[%s27025_s3 + $0xd00] ss:$16 sps:$4 sm:$0xff]   ;;  %v20556_v48 = vld [vmem:[%s27025_s3 + $0xd84] ss:$16 sps:$4 sm:$0xff]  }
 0x57a   :  { %v17537_v44 = vpop.f32.mrb[99].mxu1  ;;  %v20554_v2 = vld [vmem:[%s27025_s3 + $0xd80] ss:$16 sps:$4 sm:$0xff]  }
 0x57b   :  { %27081 = vst [vmem:[#allocation32_spill] sm:$0xff] %v23911_v14  ;;  %v23922_v8 = vadd.f32 %v17537_v44, %v17536_v29  ;;  %v20559_v29 = vld [vmem:[%s27025_s3 + $0xda4] ss:$16 sps:$4 sm:$0xff]  }
 0x57c   :  { %v20562_v44 = vld [vmem:[%s27025_s3 + $0xdc4] ss:$16 sps:$4 sm:$0xff]  }
 0x57d   :  { %27082 = vst [vmem:[#allocation33_spill] sm:$0xff] %v23922_v8 }
 0x57f   :  { %4103 = vmatmul.mubr.bf16.gmra.mrb[192].mxu0 %v20529_v6  ;;  %v20545_v6 = vld [vmem:[%s27025_s3 + $0x5ec] ss:$16 sps:$4 sm:$0xff]  }
 0x580   :  { %8082 = vmatmul.mubr.bf16.gmra.mrb[28].mxu1 %v20530_v63  ;;  %4110 = vmatprep.mubr.bf16.mxu0 %v20533_v36  ;;  %v20547_v63 = vld [vmem:[%s27025_s3 + $0x5e8] ss:$16 sps:$4 sm:$0xff]   ;;  %v20548_v36 = vld [vmem:[%s27025_s3 + $0xd40] ss:$16 sps:$4 sm:$0xff]  }
 0x581   :  { %8493 = vmatprep.mubr.bf16.mxu1 %v20538_v13  ;;  %v20551_v13 = vld [vmem:[%s27025_s3 + $0xd60] ss:$16 sps:$4 sm:$0xff]  }
 0x587   :  { %4111 = vmatmul.mubr.bf16.gmra.mrb[196].mxu0 %v20535_v15  ;;  %v20557_v15 = vld [vmem:[%s27025_s3 + $0xda0] ss:$16 sps:$4 sm:$0xff]  }
 0x588   :  { %8494 = vmatmul.mubr.bf16.vlgmr.msra.gmra.mrb[32].mxu1 %v20536_v39  ;;  %4118 = vmatprep.mubr.bf16.mxu0 %v20539_v27  ;;  %v20560_v39 = vld [vmem:[%s27025_s3 + $0xdc0] ss:$16 sps:$4 sm:$0xff]  }
 0x589   :  { %18294 = vmatpush3.bf16.msra.mxu1 %v23730_v52  ;;  %8501 = vmatprep.mubr.bf16.mxu1 %v20544_v22  ;;  %v20563_v27 = vld [vmem:[%s27025_s3 + $0xde0] ss:$16 sps:$4 sm:$0xff]   ;;  %v20568_v22 = vld [vmem:[%s27025_s3 + $0xe04] ss:$16 sps:$4 sm:$0xff]  }
 0x58a   :  { %18295 = vmatprep.subr.bf16.mxu1 %v23733_v1 }
 0x58d   :  { %18296 = vmatpush3.bf16.msra.mxu1 %v23740_v55 }
 0x58e   :  { %18297 = vmatprep.subr.bf16.mxu1 %v23746_v42 }
 0x58f   :  { %4119 = vmatmul.mubr.bf16.gmra.mrb[200].mxu0 %v20541_v49  ;;  %v20566_v49 = vld [vmem:[%s27025_s3 + $0xe00] ss:$16 sps:$4 sm:$0xff]  }
 0x590   :  { %8502 = vmatmul.mubr.bf16.gmra.mrb[36].mxu1 %v20542_v19  ;;  %4126 = vmatprep.mubr.bf16.mxu0 %v20545_v6  ;;  %v20571_v19 = vld [vmem:[%s27025_s3 + $0xe24] ss:$16 sps:$4 sm:$0xff]   ;;  %v20569_v6 = vld [vmem:[%s27025_s3 + $0xe20] ss:$16 sps:$4 sm:$0xff]  }
 0x591   :  { %18298 = vmatpush3.bf16.msra.mxu1 %v23751_v58  ;;  %8509 = vmatprep.mubr.bf16.mxu1 %v20550_v47  ;;  %v20574_v47 = vld [vmem:[%s27025_s3 + $0xe44] ss:$16 sps:$4 sm:$0xff]  }
 0x592   :  { %18299 = vmatprep.subr.bf16.mxu1 %v23757_v10 }
 0x595   :  { %18300 = vmatpush3.bf16.msra.mxu1 %v23770_v17 }
 0x596   :  { %18301 = vmatprep.subr.bf16.mxu1 %v23776_v59 }
 0x597   :  { %4127 = vmatmul.mubr.bf16.gmra.mrb[204].mxu0 %v20547_v63  ;;  %v20578_v63 = vld [vmem:[%s27025_s3 + $0xe80] ss:$16 sps:$4 sm:$0xff]  }
 0x598   :  { %8510 = vmatmul.mubr.bf16.gmra.mrb[40].mxu1 %v20548_v36  ;;  %v20583_v36 = vld [vmem:[%s27025_s3 + $0xea4] ss:$16 sps:$4 sm:$0xff]  }
 0x599   :  { %18302 = vmatpush3.bf16.msra.mxu1 %v23782_v28  ;;  %8517 = vmatprep.mubr.bf16.mxu1 %v20553_v4  ;;  %v24039_v4 = vld [vmem:[#allocation2 + $0xc0] sm:$0xff] }
 0x59a   :  { %18303 = vmatprep.subr.bf16.mxu1 %v23788_v9  ;;  %27083 = vst [vmem:[#allocation34_spill] sm:$0xff] %v24039_v4 }
 0x59d   :  { %18304 = vmatpush3.bf16.msra.mxu1 %v23800_v38 }
 0x59e   :  { %18305 = vmatprep.subr.bf16.mxu1 %v23806_v7 }
 0x5a0   :  { %8518 = vmatmul.mubr.bf16.gmra.mrb[44].mxu1 %v20551_v13  ;;  %v20581_v13 = vld [vmem:[%s27025_s3 + $0xea0] ss:$16 sps:$4 sm:$0xff]  }
 0x5a1   :  { %18306 = vmatpush3.bf16.msra.mxu1 %v23816_v57  ;;  %8525 = vmatprep.mubr.bf16.mxu1 %v20556_v48  ;;  %v20586_v48 = vld [vmem:[%s27025_s3 + $0xec4] ss:$16 sps:$4 sm:$0xff]  }
 0x5a2   :  { %18307 = vmatprep.subr.bf16.mxu1 %v23825_v11 }
 0x5a5   :  { %18308 = vmatpush3.bf16.msra.mxu1 %v23837_v43 }
 0x5a6   :  { %18433 = vmatprep.subr.bf16.mxu1 %v23646_v30  ;;  %v20565_v30 = vld [vmem:[%s27025_s3 + $0xde4] ss:$16 sps:$4 sm:$0xff]  }
 0x5a8   :  { %8526 = vmatmul.mubr.bf16.gmra.mrb[48].mxu1 %v20554_v2  ;;  %v20584_v2 = vld [vmem:[%s27025_s3 + $0xec0] ss:$16 sps:$4 sm:$0xff]  }
 0x5a9   :  { %8533 = vmatprep.mubr.bf16.mxu1 %v20559_v29  ;;  %v20589_v29 = vld [vmem:[%s27025_s3 + $0xee4] ss:$16 sps:$4 sm:$0xff]  }
 0x5b0   :  { %8534 = vmatmul.mubr.bf16.gmra.mrb[52].mxu1 %v20557_v15  ;;  %v20587_v15 = vld [vmem:[%s27025_s3 + $0xee0] ss:$16 sps:$4 sm:$0xff]  }
 0x5b1   :  { %8541 = vmatprep.mubr.bf16.mxu1 %v20562_v44  ;;  %v20592_v44 = vld [vmem:[%s27025_s3 + $0xf04] ss:$16 sps:$4 sm:$0xff]  }
 0x5b8   :  { %8542 = vmatmul.mubr.bf16.gmra.mrb[56].mxu1 %v20560_v39  ;;  %v20590_v39 = vld [vmem:[%s27025_s3 + $0xf00] ss:$16 sps:$4 sm:$0xff]  }
 0x5b9   :  { %8549 = vmatprep.mubr.bf16.mxu1 %v20565_v30  ;;  %v24063_v30 = vld [vmem:[#allocation2 + $0x80] sm:$0xff] }
 0x5c0   :  { %8550 = vmatmul.mubr.bf16.gmra.mrb[60].mxu1 %v20563_v27  ;;  %v24066_v27 = vld [vmem:[#allocation2 + $0xc8] sm:$0xff] }
 0x5c1   :  { %9058 = vmatprep.mubr.bf16.mxu1 %v20568_v22  ;;  %v24069_v22 = vld [vmem:[#allocation2 + $0x88] sm:$0xff] }
 0x5c8   :  { %9059 = vmatmul.mubr.bf16.vlgmr.msra.gmra.mrb[64].mxu1 %v20566_v49  ;;  %v24072_v49 = vld [vmem:[#allocation2 + $0xd0] sm:$0xff] }
 0x5c9   :  { %18434 = vmatpush3.bf16.msra.mxu1 %v23730_v52  ;;  %9066 = vmatprep.mubr.bf16.mxu1 %v20571_v19  ;;  %v20572_v52 = vld [vmem:[%s27025_s3 + $0xe40] ss:$16 sps:$4 sm:$0xff]  }
 0x5ca   :  { %18435 = vmatprep.subr.bf16.mxu1 %v23733_v1  ;;  %v20577_v1 = vld [vmem:[%s27025_s3 + $0xe64] ss:$16 sps:$4 sm:$0xff]  }
 0x5cb   :  { %v24075_v19 = vld [vmem:[#allocation2 + $0x90] sm:$0xff] }
 0x5cd   :  { %18436 = vmatpush3.bf16.msra.mxu1 %v23740_v55  ;;  %v20575_v55 = vld [vmem:[%s27025_s3 + $0xe60] ss:$16 sps:$4 sm:$0xff]  }
 0x5ce   :  { %18437 = vmatprep.subr.bf16.mxu1 %v23746_v42  ;;  %v20580_v42 = vld [vmem:[%s27025_s3 + $0xe84] ss:$16 sps:$4 sm:$0xff]  }
 0x5d0   :  { %9067 = vmatmul.mubr.bf16.gmra.mrb[68].mxu1 %v20569_v6  ;;  %v24078_v6 = vld [vmem:[#allocation2 + $0xd8] sm:$0xff] }
 0x5d1   :  { %18438 = vmatpush3.bf16.msra.mxu1 %v23751_v58  ;;  %9074 = vmatprep.mubr.bf16.mxu1 %v20574_v47  ;;  %v24081_v47 = vld [vmem:[#allocation2 + $0x98] sm:$0xff] }
 0x5d2   :  { %18439 = vmatprep.subr.bf16.mxu1 %v23757_v10 }
 0x5d5   :  { %18440 = vmatpush3.bf16.msra.mxu1 %v23770_v17 }
 0x5d6   :  { %18441 = vmatprep.subr.bf16.mxu1 %v23776_v59 }
 0x5d8   :  { %9075 = vmatmul.mubr.bf16.gmra.mrb[72].mxu1 %v20572_v52  ;;  %v24084_v52 = vld [vmem:[#allocation2 + $0xe0] sm:$0xff] }
 0x5d9   :  { %18442 = vmatpush3.bf16.msra.mxu1 %v23782_v28  ;;  %9082 = vmatprep.mubr.bf16.mxu1 %v20577_v1  ;;  %v24087_v1 = vld [vmem:[#allocation2 + $0xa0] sm:$0xff] }
 0x5da   :  { %18443 = vmatprep.subr.bf16.mxu1 %v23788_v9 }
 0x5dd   :  { %18444 = vmatpush3.bf16.msra.mxu1 %v23800_v38 }
 0x5de   :  { %18445 = vmatprep.subr.bf16.mxu1 %v23806_v7 }
 0x5e0   :  { %9083 = vmatmul.mubr.bf16.gmra.mrb[76].mxu1 %v20575_v55  ;;  %v24090_v55 = vld [vmem:[#allocation2 + $0xe8] sm:$0xff] }
 0x5e1   :  { %18446 = vmatpush3.bf16.msra.mxu1 %v23816_v57  ;;  %9090 = vmatprep.mubr.bf16.mxu1 %v20580_v42  ;;  %v24093_v42 = vld [vmem:[#allocation2 + $0xa8] sm:$0xff] }
 0x5e2   :  { %18447 = vmatprep.subr.bf16.mxu1 %v23825_v11 }
 0x5e5   :  { %18448 = vmatpush3.bf16.msra.mxu1 %v23837_v43 }
 0x5e6   :  { %18497 = vmatprep.subr.bf16.mxu1 %v24039_v4 }
 0x5e8   :  { %9091 = vmatmul.mubr.bf16.gmra.mrb[80].mxu1 %v20578_v63  ;;  %v24096_v63 = vld [vmem:[#allocation2 + $0xf0] sm:$0xff] }
 0x5e9   :  { %9098 = vmatprep.mubr.bf16.mxu1 %v20583_v36  ;;  %v24099_v36 = vld [vmem:[#allocation2 + $0xb0] sm:$0xff] }
 0x5f0   :  { %9099 = vmatmul.mubr.bf16.gmra.mrb[84].mxu1 %v20581_v13 }
 0x5f1   :  { %9106 = vmatprep.mubr.bf16.mxu1 %v20586_v48 }
 0x5f8   :  { %9107 = vmatmul.mubr.bf16.gmra.mrb[88].mxu1 %v20584_v2 }
 0x5f9   :  { %9114 = vmatprep.mubr.bf16.mxu1 %v20589_v29 }
 0x600   :  { %9115 = vmatmul.mubr.bf16.gmra.mrb[92].mxu1 %v20587_v15 }
 0x601   :  { %9623 = vmatprep.mubr.bf16.mxu1 %v20592_v44 }
 0x608   :  { %9624 = vmatmul.mubr.bf16.vlgmr.msra.gmra.mrb[96].mxu1 %v20590_v39 }
 0x609   :  { %18498 = vmatpush3.bf16.msra.mxu1 %v24063_v30 }
 0x60a   :  { %18499 = vmatprep.subr.bf16.mxu1 %v24066_v27 }
 0x60d   :  { %18500 = vmatpush3.bf16.msra.mxu1 %v24069_v22 }
 0x60e   :  { %18501 = vmatprep.subr.bf16.mxu1 %v24072_v49 }
 0x611   :  { %18502 = vmatpush3.bf16.msra.mxu1 %v24075_v19 }
 0x612   :  { %18503 = vmatprep.subr.bf16.mxu1 %v24078_v6 }
 0x615   :  { %18504 = vmatpush3.bf16.msra.mxu1 %v24081_v47 }
 0x616   :  { %18505 = vmatprep.subr.bf16.mxu1 %v24084_v52 }
 0x619   :  { %18506 = vmatpush3.bf16.msra.mxu1 %v24087_v1 }
 0x61a   :  { %18507 = vmatprep.subr.bf16.mxu1 %v24090_v55 }
 0x61d   :  { %18508 = vmatpush3.bf16.msra.mxu1 %v24093_v42 }
 0x61e   :  { %18509 = vmatprep.subr.bf16.mxu1 %v24096_v63 }
 0x621   :  { %18510 = vmatpush3.bf16.msra.mxu1 %v24099_v36 }
 0x622   :  { %18511 = vmatprep.subr.bf16.mxu1 %v23531_v54 }
 0x625   :  { %18512 = vmatpush3.bf16.msra.mxu1 %v23640_v53 }
 0x632   :  { %v17113_v13 = vpop.f32.mrb[176].mxu0 }
 0x633   :  { %v17114_v48 = vpop.f32.mrb[177].mxu0 }
 0x634   :  { %v17115_v2 = vadd.f32 %v17114_v48, %v17113_v13  ;;  %v17116_v29 = vpop.f32.mrb[178].mxu0 }
 0x635   :  { %v17117_v15 = vpop.f32.mrb[179].mxu0 }
 0x636   :  { %v4073_v44 = vadd.f32 %v17115_v2, %v23356_v40  ;;  %v17118_v39 = vadd.f32 %v17117_v15, %v17116_v29 }
 0x638   :  { %v4076_v12 = vadd.f32 %v17118_v39, %v23361_v51 }
 0x63a   :  { %v17119_v8 = vpop.f32.mrb[180].mxu0  ;;  %v4135_v14 = vpack.c.bf16 %v4076_v12, %v4073_v44 }
 0x63b   :  { %v17120_v4 = vpop.f32.mrb[181].mxu0 }
 0x63c   :  { %v17121_v43 = vadd.f32 %v17120_v4, %v17119_v8  ;;  %v17122_v11 = vpop.f32.mrb[182].mxu0  ;;  %18990 = vmatprep.mubr.msk.bf16.mxu0 %vm892_vm4, %v4135_v14 }
 0x63d   :  { %v17123_v54 = vpop.f32.mrb[183].mxu0 }
 0x63e   :  { %v4081_v57 = vadd.f32 %v17121_v43, %v23376_v24  ;;  %v17124_v7 = vadd.f32 %v17123_v54, %v17122_v11 }
 0x640   :  { %v4084_v13 = vadd.f32 %v17124_v7, %v23379_v23 }
 0x642   :  { %v4136_v48 = vpack.c.bf16 %v4084_v13, %v4081_v57  ;;  %v17125_v38 = vpop.f32.mrb[184].mxu0 }
 0x643   :  { %v17126_v9 = vpop.f32.mrb[185].mxu0 }
 0x644   :  { %v17127_v40 = vadd.f32 %v17126_v9, %v17125_v38  ;;  %v17128_v2 = vpop.f32.mrb[186].mxu0  ;;  %18991 = vmatmul.mubr.msk.bf16.vlgmr.msra.gmra.mrb[96].mxu0 %vm892_vm4, %v4136_v48 }
 0x645   :  { %17238 = vmatpush3.bf16.msra.mxu0 %v24063_v30  ;;  %v17129_v51 = vpop.f32.mrb[187].mxu0 }
 0x646   :  { %v4089_v12 = vadd.f32 %v17127_v40, %v23391_v16  ;;  %v17130_v8 = vadd.f32 %v17129_v51, %v17128_v2  ;;  %17239 = vmatprep.subr.bf16.mxu0 %v24066_v27 }
 0x648   :  { %v4092_v24 = vadd.f32 %v17130_v8, %v23394_v18 }
 0x649   :  { %17240 = vmatpush3.bf16.msra.mxu0 %v24069_v22 }
 0x64a   :  { %17241 = vmatprep.subr.bf16.mxu0 %v24072_v49  ;;  %v17131_v23 = vpop.f32.mrb[188].mxu0  ;;  %v4137_v7 = vpack.c.bf16 %v4092_v24, %v4089_v12  ;;  %v27084_v24 = vld [vmem:[#allocation5_spill] sm:$0xff] }
 0x64b   :  { %v17132_v9 = vpop.f32.mrb[189].mxu0 }
 0x64c   :  { %v17133_v38 = vadd.f32 %v17132_v9, %v17131_v23  ;;  %v17134_v57 = vpop.f32.mrb[190].mxu0  ;;  %18994 = vmatprep.mubr.msk.bf16.mxu0 %vm892_vm4, %v4137_v7 }
 0x64d   :  { %17242 = vmatpush3.bf16.msra.mxu0 %v24075_v19  ;;  %v17135_v11 = vpop.f32.mrb[191].mxu0 }
 0x64e   :  { %v4097_v16 = vadd.f32 %v17133_v38, %v23405_v34  ;;  %v17136_v43 = vadd.f32 %v17135_v11, %v17134_v57  ;;  %17243 = vmatprep.subr.bf16.mxu0 %v24078_v6 }
 0x650   :  { %v4100_v18 = vadd.f32 %v17136_v43, %v23415_v0  ;;  %v27085_v43 = vld [vmem:[#allocation6_spill] sm:$0xff] }
 0x651   :  { %17244 = vmatpush3.bf16.msra.mxu0 %v24081_v47 }
 0x652   :  { %17245 = vmatprep.subr.bf16.mxu0 %v24084_v52  ;;  %v17137_v14 = vpop.f32.mrb[192].mxu0  ;;  %v4138_v4 = vpack.c.bf16 %v4100_v18, %v4097_v16 }
 0x653   :  { %v17138_v29 = vpop.f32.mrb[193].mxu0 }
 0x654   :  { %v17139_v15 = vadd.f32 %v17138_v29, %v17137_v14  ;;  %v17140_v44 = vpop.f32.mrb[194].mxu0  ;;  %18995 = vmatmul.mubr.msk.bf16.gmra.mrb[100].mxu0 %vm892_vm4, %v4138_v4  ;;  %v27086_v4 = vld [vmem:[#allocation7_spill] sm:$0xff] }
 0x655   :  { %17246 = vmatpush3.bf16.msra.mxu0 %v24087_v1  ;;  %v17141_v39 = vpop.f32.mrb[195].mxu0 }
 0x656   :  { %v4105_v34 = vadd.f32 %v17139_v15, %v23420_v62  ;;  %v17142_v54 = vadd.f32 %v17141_v39, %v17140_v44  ;;  %17247 = vmatprep.subr.bf16.mxu0 %v24090_v55  ;;  %v24132_v62 = vld [vmem:[#allocation2 + $0xf8] sm:$0xff] }
 0x658   :  { %v4108_v0 = vadd.f32 %v17142_v54, %v23422_v32  ;;  %v27087_v54 = vld [vmem:[#allocation8_spill] sm:$0xff] }
 0x659   :  { %17248 = vmatpush3.bf16.msra.mxu0 %v24093_v42 }
 0x65a   :  { %17249 = vmatprep.subr.bf16.mxu0 %v24096_v63  ;;  %v17143_v13 = vpop.f32.mrb[196].mxu0  ;;  %v4139_v48 = vpack.c.bf16 %v4108_v0, %v4105_v34 }
 0x65b   :  { %v17144_v40 = vpop.f32.mrb[197].mxu0 }
 0x65c   :  { %v17146_v2 = vpop.f32.mrb[198].mxu0  ;;  %18998 = vmatprep.mubr.msk.bf16.mxu0 %vm892_vm4, %v4139_v48  ;;  %v17145_v51 = vadd.f32 %v17144_v40, %v17143_v13  ;;  %v27088_v48 = vld [vmem:[#allocation9_spill] sm:$0xff] }
 0x65d   :  { %17250 = vmatpush3.bf16.msra.mxu0 %v24099_v36  ;;  %v17147_v12 = vpop.f32.mrb[199].mxu0 }
 0x65e   :  { %17251 = vmatprep.subr.bf16.mxu0 %v24132_v62  ;;  %v4113_v32 = vadd.f32 %v17145_v51, %v23430_v45  ;;  %v17148_v8 = vadd.f32 %v17147_v12, %v17146_v2  ;;  %v20595_v2 = vld [vmem:[%s27025_s3 + $0x60c] ss:$16 sps:$4 sm:$0xff]   ;;  %v20593_v12 = vld [vmem:[%s27025_s3 + $0x608] ss:$16 sps:$4 sm:$0xff]  }
 0x660   :  { %v4116_v23 = vadd.f32 %v17148_v8, %v27084_v24  ;;  %v20598_v8 = vld [vmem:[%s27025_s3 + $0x628] ss:$16 sps:$4 sm:$0xff]   ;;  %v20599_v24 = vld [vmem:[%s27025_s3 + $0x64c] ss:$16 sps:$4 sm:$0xff]  }
 0x661   :  { %17252 = vmatpush3.bf16.msra.mxu0 %v23640_v53 }
 0x662   :  { %v17149_v7 = vpop.f32.mrb[200].mxu0  ;;  %v4140_v9 = vpack.c.bf16 %v4116_v23, %v4113_v32  ;;  %v20596_v32 = vld [vmem:[%s27025_s3 + $0x62c] ss:$16 sps:$4 sm:$0xff]   ;;  %v20601_v23 = vld [vmem:[%s27025_s3 + $0x648] ss:$16 sps:$4 sm:$0xff]  }
 0x663   :  { %v17150_v38 = vpop.f32.mrb[201].mxu0 }
 0x664   :  { %v17152_v57 = vpop.f32.mrb[202].mxu0  ;;  %18999 = vmatmul.mubr.msk.bf16.gmra.mrb[104].mxu0 %vm892_vm4, %v4140_v9  ;;  %v17151_v11 = vadd.f32 %v17150_v38, %v17149_v7  ;;  %v20602_v7 = vld [vmem:[%s27025_s3 + $0x66c] ss:$16 sps:$4 sm:$0xff]   ;;  %v20604_v9 = vld [vmem:[%s27025_s3 + $0x668] ss:$16 sps:$4 sm:$0xff]  }
 0x665   :  { %v17153_v16 = vpop.f32.mrb[203].mxu0  ;;  %v20605_v38 = vld [vmem:[%s27025_s3 + $0x68c] ss:$16 sps:$4 sm:$0xff]  }
 0x666   :  { %v4121_v18 = vadd.f32 %v17151_v11, %v27085_v43  ;;  %v17154_v14 = vadd.f32 %v17153_v16, %v17152_v57  ;;  %v20607_v57 = vld [vmem:[%s27025_s3 + $0x688] ss:$16 sps:$4 sm:$0xff]   ;;  %v20608_v11 = vld [vmem:[%s27025_s3 + $0x6ac] ss:$16 sps:$4 sm:$0xff]  }
 0x667   :  { %v20610_v16 = vld [vmem:[%s27025_s3 + $0x6a8] ss:$16 sps:$4 sm:$0xff]   ;;  %v20611_v43 = vld [vmem:[%s27025_s3 + $0x6cc] ss:$16 sps:$4 sm:$0xff]  }
 0x668   :  { %v4124_v29 = vadd.f32 %v17154_v14, %v27086_v4  ;;  %v20614_v14 = vld [vmem:[%s27025_s3 + $0x6ec] ss:$16 sps:$4 sm:$0xff]   ;;  %v20616_v4 = vld [vmem:[%s27025_s3 + $0x6e8] ss:$16 sps:$4 sm:$0xff]  }
 0x66a   :  { %v17155_v15 = vpop.f32.mrb[204].mxu0  ;;  %v4141_v45 = vpack.c.bf16 %v4124_v29, %v4121_v18  ;;  %v20613_v18 = vld [vmem:[%s27025_s3 + $0x6c8] ss:$16 sps:$4 sm:$0xff]   ;;  %v5265_v29 = vpack.c.bf16 %v23726_v56, %v23719_v37  ;;  %v27107_v56 = vld [vmem:[#allocation27_spill] sm:$0xff] }
 0x66b   :  { %v17156_v44 = vpop.f32.mrb[205].mxu0  ;;  %v27106_v37 = vld [vmem:[#allocation26_spill] sm:$0xff] }
 0x66c   :  { %v17157_v39 = vadd.f32 %v17156_v44, %v17155_v15  ;;  %v17158_v34 = vpop.f32.mrb[206].mxu0  ;;  %19002 = vmatprep.mubr.msk.bf16.mxu0 %vm892_vm4, %v4141_v45  ;;  %v5267_v15 = vpack.c.bf16 %v23795_v41, %v23786_v25  ;;  %v5268_v45 = vpack.c.bf16 %v23832_v35, %v23823_v5  ;;  %v20617_v44 = vld [vmem:[%s27027_s4 + $0xc0] sm:$0xff]   ;;  %v20629_v41 = vld [vmem:[%s27027_s4 + $0x108] sm:$0xff]   ;;  %v20632_v5 = vld [vmem:[%s27027_s4 + $0x110] sm:$0xff]  }
 0x66d   :  { %v17159_v53 = vpop.f32.mrb[207].mxu0  ;;  %19006 = vmatprep.subr.bf16.mxu0 %v20617_v44  ;;  %v20630_v25 = vld [vmem:[%s27025_s3 + $0x824] ss:$16 sps:$4 sm:$0xff]   ;;  %v20633_v35 = vld [vmem:[%s27025_s3 + $0x820] ss:$16 sps:$4 sm:$0xff]  }
 0x66e   :  { %v4129_v0 = vadd.f32 %v17157_v39, %v27087_v54  ;;  %v17160_v13 = vadd.f32 %v17159_v53, %v17158_v34  ;;  %v20618_v39 = vld [vmem:[%s27027_s4 + $0xc8] sm:$0xff]   ;;  %v5269_v34 = vpack.c.bf16 %v23857_v21, %v23851_v3  ;;  %v20619_v53 = vld [vmem:[%s27027_s4 + $0xd0] sm:$0xff]   ;;  %v20620_v54 = vld [vmem:[%s27027_s4 + $0xd8] sm:$0xff]  }
 0x66f   :  { %v20635_v3 = vld [vmem:[%s27025_s3 + $0x844] ss:$16 sps:$4 sm:$0xff]   ;;  %v20634_v21 = vld [vmem:[%s27027_s4 + $0x118] sm:$0xff]  }
 0x670   :  { %v4132_v40 = vadd.f32 %v17160_v13, %v27088_v48  ;;  %v20621_v13 = vld [vmem:[%s27027_s4 + $0xe0] sm:$0xff]   ;;  %v5271_v48 = vpack.c.bf16 %v23891_v33, %v23885_v50  ;;  %v27112_v50 = vld [vmem:[#allocation34_spill] sm:$0xff] }
 0x671   :  { %v20640_v33 = vld [vmem:[%s27025_s3 + $0x860] ss:$16 sps:$4 sm:$0xff]  }
 0x672   :  { %v4142_v51 = vpack.c.bf16 %v4132_v40, %v4129_v0  ;;  %v5270_v0 = vpack.c.bf16 %v23873_v31, %v23870_v20  ;;  %v5272_v40 = vpack.c.bf16 %v23909_v60, %v23903_v26  ;;  %v20637_v20 = vld [vmem:[%s27025_s3 + $0x840] ss:$16 sps:$4 sm:$0xff]   ;;  %v20638_v31 = vld [vmem:[%s27025_s3 + $0x864] ss:$16 sps:$4 sm:$0xff]  }
 0x673   :  { %v20643_v26 = vld [vmem:[%s27025_s3 + $0x884] ss:$16 sps:$4 sm:$0xff]   ;;  %v20641_v60 = vld [vmem:[%s27025_s3 + $0x880] ss:$16 sps:$4 sm:$0xff]  }
 0x674   :  { %19003 = vmatmul.mubr.msk.bf16.gmra.mrb[108].mxu0 %vm892_vm4, %v4142_v51 }
 0x675   :  { %4635 = vmatprep.mubr.bf16.mxu0 %v20595_v2 }
 0x67c   :  { %4636 = vmatmul.mubr.bf16.vlgmr.msra.gmra.mrb[208].mxu0 %v20593_v12 }
 0x67d   :  { %4643 = vmatprep.mubr.bf16.mxu0 %v20596_v32  ;;  %19007 = vmatpush3.bf16.msra.mxu0 %v20617_v44 }
 0x67e   :  { %19008 = vmatprep.subr.bf16.mxu0 %v20618_v39 }
 0x681   :  { %19009 = vmatpush3.bf16.msra.mxu0 %v20618_v39 }
 0x682   :  { %19010 = vmatprep.subr.bf16.mxu0 %v20619_v53 }
 0x684   :  { %4644 = vmatmul.mubr.bf16.gmra.mrb[212].mxu0 %v20598_v8 }
 0x685   :  { %4651 = vmatprep.mubr.bf16.mxu0 %v20599_v24  ;;  %19011 = vmatpush3.bf16.msra.mxu0 %v20619_v53  ;;  %v27089_v24 = vld [vmem:[#allocation10_spill] sm:$0xff]  ;;  %v27092_v53 = vld [vmem:[#allocation13_spill] sm:$0xff] }
 0x686   :  { %19012 = vmatprep.subr.bf16.mxu0 %v20620_v54 }
 0x689   :  { %19013 = vmatpush3.bf16.msra.mxu0 %v20620_v54 }
 0x68a   :  { %19030 = vmatprep.subr.bf16.mxu0 %v20621_v13 }
 0x68c   :  { %4652 = vmatmul.mubr.bf16.gmra.mrb[216].mxu0 %v20601_v23 }
 0x68d   :  { %4659 = vmatprep.mubr.bf16.mxu0 %v20602_v7 }
 0x694   :  { %4660 = vmatmul.mubr.bf16.gmra.mrb[220].mxu0 %v20604_v9  ;;  %v27090_v9 = vld [vmem:[#allocation11_spill] sm:$0xff] }
 0x695   :  { %4667 = vmatprep.mubr.bf16.mxu0 %v20605_v38 }
 0x69c   :  { %4668 = vmatmul.mubr.bf16.gmra.mrb[224].mxu0 %v20607_v57 }
 0x69d   :  { %4675 = vmatprep.mubr.bf16.mxu0 %v20608_v11 }
 0x6a4   :  { %4676 = vmatmul.mubr.bf16.gmra.mrb[228].mxu0 %v20610_v16 }
 0x6a5   :  { %4683 = vmatprep.mubr.bf16.mxu0 %v20611_v43 }
 0x6ac   :  { %4684 = vmatmul.mubr.bf16.gmra.mrb[232].mxu0 %v20613_v18 }
 0x6ad   :  { %4691 = vmatprep.mubr.bf16.mxu0 %v20614_v14 }
 0x6b4   :  { %4692 = vmatmul.mubr.bf16.gmra.mrb[236].mxu0 %v20616_v4  ;;  %v27091_v4 = vld [vmem:[#allocation12_spill] sm:$0xff] }
 0x74f   :  { %v17253_v2 = vpop.f32.mrb[208].mxu0 }
 0x750   :  { %v17254_v51 = vpop.f32.mrb[209].mxu0 }
 0x751   :  { %v17255_v12 = vadd.f32 %v17254_v51, %v17253_v2  ;;  %v17256_v32 = vpop.f32.mrb[210].mxu0 }
 0x752   :  { %v17257_v8 = vpop.f32.mrb[211].mxu0 }
 0x753   :  { %v4638_v23 = vadd.f32 %v17255_v12, %v27089_v24  ;;  %v17258_v7 = vadd.f32 %v17257_v8, %v17256_v32  ;;  %v20622_v12 = vld [vmem:[%s27027_s4 + $0xe8] sm:$0xff]  }
 0x755   :  { %v4641_v38 = vadd.f32 %v17258_v7, %v27090_v9  ;;  %v27093_v7 = vld [vmem:[#allocation14_spill] sm:$0xff] }
 0x757   :  { %v4700_v57 = vpack.c.bf16 %v4641_v38, %v4638_v23  ;;  %v17259_v11 = vpop.f32.mrb[212].mxu0 }
 0x758   :  { %v17260_v16 = vpop.f32.mrb[213].mxu0 }
 0x759   :  { %v17261_v43 = vadd.f32 %v17260_v16, %v17259_v11  ;;  %v17262_v18 = vpop.f32.mrb[214].mxu0  ;;  %19014 = vmatprep.mubr.msk.bf16.mxu0 %vm892_vm4, %v4700_v57  ;;  %v20623_v57 = vld [vmem:[%s27027_s4 + $0xf0] sm:$0xff]  }
 0x75a   :  { %v17263_v14 = vpop.f32.mrb[215].mxu0  ;;  %v27094_v11 = vld [vmem:[#allocation15_spill] sm:$0xff] }
 0x75b   :  { %v4646_v44 = vadd.f32 %v17261_v43, %v27091_v4  ;;  %v17264_v39 = vadd.f32 %v17263_v14, %v17262_v18  ;;  %v20624_v14 = vld [vmem:[%s27027_s4 + $0xf8] sm:$0xff]  }
 0x75d   :  { %v4649_v54 = vadd.f32 %v17264_v39, %v27092_v53  ;;  %v27095_v53 = vld [vmem:[#allocation16_spill] sm:$0xff] }
 0x75f   :  { %v4701_v2 = vpack.c.bf16 %v4649_v54, %v4646_v44  ;;  %v17265_v51 = vpop.f32.mrb[216].mxu0 }
 0x760   :  { %v17266_v32 = vpop.f32.mrb[217].mxu0 }
 0x761   :  { %v17267_v8 = vadd.f32 %v17266_v32, %v17265_v51  ;;  %v17268_v24 = vpop.f32.mrb[218].mxu0  ;;  %19015 = vmatmul.mubr.msk.bf16.vlgmr.msra.gmra.mrb[96].mxu0 %vm892_vm4, %v4701_v2  ;;  %v27096_v51 = vld [vmem:[#allocation17_spill] sm:$0xff] }
 0x762   :  { %19031 = vmatpush3.bf16.msra.mxu0 %v20621_v13  ;;  %v17269_v23 = vpop.f32.mrb[219].mxu0 }
 0x763   :  { %v4654_v9 = vadd.f32 %v17267_v8, %v27093_v7  ;;  %v17270_v38 = vadd.f32 %v17269_v23, %v17268_v24  ;;  %19032 = vmatprep.subr.bf16.mxu0 %v20622_v12  ;;  %v21400_v8 = vld [vmem:[#allocation2 + $0x40] sm:$0xff] }
 0x765   :  { %v4657_v16 = vadd.f32 %v17270_v38, %v27094_v11  ;;  %v27097_v11 = vld [vmem:[#allocation18_spill] sm:$0xff] }
 0x766   :  { %19033 = vmatpush3.bf16.msra.mxu0 %v20622_v12 }
 0x767   :  { %v4702_v43 = vpack.c.bf16 %v4657_v16, %v4654_v9  ;;  %v17271_v18 = vpop.f32.mrb[220].mxu0  ;;  %19034 = vmatprep.subr.bf16.mxu0 %v20623_v57 }
 0x768   :  { %v17272_v13 = vpop.f32.mrb[221].mxu0 }
 0x769   :  { %v17273_v4 = vadd.f32 %v17272_v13, %v17271_v18  ;;  %v17274_v44 = vpop.f32.mrb[222].mxu0  ;;  %19018 = vmatprep.mubr.msk.bf16.mxu0 %vm892_vm4, %v4702_v43  ;;  %v27098_v43 = vld [vmem:[#allocation19_spill] sm:$0xff] }
 0x76a   :  { %19035 = vmatpush3.bf16.msra.mxu0 %v20623_v57  ;;  %v17275_v39 = vpop.f32.mrb[223].mxu0 }
 0x76b   :  { %v4662_v54 = vadd.f32 %v17273_v4, %v27095_v53  ;;  %v17276_v2 = vadd.f32 %v17275_v39, %v17274_v44  ;;  %19036 = vmatprep.subr.bf16.mxu0 %v20624_v14 }
 0x76d   :  { %v4665_v12 = vadd.f32 %v17276_v2, %v27096_v51 }
 0x76e   :  { %19037 = vmatpush3.bf16.msra.mxu0 %v20624_v14 }
 0x76f   :  { %v4703_v32 = vpack.c.bf16 %v4665_v12, %v4662_v54  ;;  %17453 = vmatprep.subr.bf16.mxu0 %v21400_v8  ;;  %v17277_v24 = vpop.f32.mrb[224].mxu0  ;;  %v27099_v54 = vld [vmem:[#allocation20_spill] sm:$0xff]  ;;  %v27100_v12 = vld [vmem:[#allocation21_spill] sm:$0xff] }
 0x770   :  { %v17278_v23 = vpop.f32.mrb[225].mxu0 }
 0x771   :  { %v17279_v7 = vadd.f32 %v17278_v23, %v17277_v24  ;;  %v17280_v9 = vpop.f32.mrb[226].mxu0  ;;  %19019 = vmatmul.mubr.msk.bf16.gmra.mrb[100].mxu0 %vm892_vm4, %v4703_v32 }
 0x772   :  { %v17281_v38 = vpop.f32.mrb[227].mxu0 }
 0x773   :  { %v4670_v57 = vadd.f32 %v17279_v7, %v27097_v11  ;;  %v17282_v16 = vadd.f32 %v17281_v38, %v17280_v9  ;;  %v27101_v11 = vld [vmem:[#allocation22_spill] sm:$0xff] }
 0x775   :  { %v4673_v18 = vadd.f32 %v17282_v16, %v27098_v43  ;;  %v27102_v43 = vld [vmem:[#allocation23_spill] sm:$0xff] }
 0x777   :  { %v4704_v13 = vpack.c.bf16 %v4673_v18, %v4670_v57  ;;  %v17283_v4 = vpop.f32.mrb[228].mxu0 }
 0x778   :  { %v17284_v44 = vpop.f32.mrb[229].mxu0 }
 0x779   :  { %v17285_v39 = vadd.f32 %v17284_v44, %v17283_v4  ;;  %v17286_v14 = vpop.f32.mrb[230].mxu0  ;;  %19022 = vmatprep.mubr.msk.bf16.mxu0 %vm892_vm4, %v4704_v13 }
 0x77a   :  { %v17287_v53 = vpop.f32.mrb[231].mxu0 }
 0x77b   :  { %v4678_v2 = vadd.f32 %v17285_v39, %v27099_v54  ;;  %v17288_v51 = vadd.f32 %v17287_v53, %v17286_v14  ;;  %v27103_v54 = vld [vmem:[#allocation24_spill] sm:$0xff] }
 0x77d   :  { %v4681_v8 = vadd.f32 %v17288_v51, %v27100_v12  ;;  %v27104_v12 = vld [vmem:[#allocation25_spill] sm:$0xff] }
 0x77f   :  { %v4705_v32 = vpack.c.bf16 %v4681_v8, %v4678_v2  ;;  %v17289_v24 = vpop.f32.mrb[232].mxu0 }
 0x780   :  { %v17290_v23 = vpop.f32.mrb[233].mxu0 }
 0x781   :  { %v17291_v7 = vadd.f32 %v17290_v23, %v17289_v24  ;;  %v17292_v9 = vpop.f32.mrb[234].mxu0  ;;  %19023 = vmatmul.mubr.msk.bf16.gmra.mrb[104].mxu0 %vm892_vm4, %v4705_v32  ;;  %v27105_v24 = vpack.c.bf16 %v23768_v61, %v23755_v46  ;;  %v21401_v23 = vld [vmem:[#allocation2] sm:$0xff]  ;;  %v27108_v46 = vld [vmem:[#allocation28_spill] sm:$0xff]  ;;  %v27110_v61 = vld [vmem:[#allocation30_spill] sm:$0xff] }
 0x782   :  { %v17293_v38 = vpop.f32.mrb[235].mxu0 }
 0x783   :  { %v4686_v57 = vadd.f32 %v17291_v7, %v27101_v11  ;;  %v17294_v16 = vadd.f32 %v17293_v38, %v17292_v9  ;;  %v21402_v7 = vld [vmem:[#allocation2 + $0x48] sm:$0xff]  ;;  %v21404_v38 = vld [vmem:[#allocation2 + $0x50] sm:$0xff] }
 0x784   :  { %v21403_v9 = vld [vmem:[#allocation2 + $0x8] sm:$0xff] }
 0x785   :  { %v4689_v18 = vadd.f32 %v17294_v16, %v27102_v43 }
 0x787   :  { %v4706_v13 = vpack.c.bf16 %v4689_v18, %v4686_v57  ;;  %v17295_v4 = vpop.f32.mrb[236].mxu0 }
 0x788   :  { %v17296_v44 = vpop.f32.mrb[237].mxu0 }
 0x789   :  { %v17297_v39 = vadd.f32 %v17296_v44, %v17295_v4  ;;  %v17298_v14 = vpop.f32.mrb[238].mxu0  ;;  %19026 = vmatprep.mubr.msk.bf16.mxu0 %vm892_vm4, %v4706_v13 }
 0x78a   :  { %v17299_v53 = vpop.f32.mrb[239].mxu0 }
 0x78b   :  { %v4694_v2 = vadd.f32 %v17297_v39, %v27103_v54  ;;  %v17300_v51 = vadd.f32 %v17299_v53, %v17298_v14 }
 0x78d   :  { %v4697_v8 = vadd.f32 %v17300_v51, %v27104_v12 }
 0x78f   :  { %v4707_v32 = vpack.c.bf16 %v4697_v8, %v4694_v2 }
 0x791   :  { %19027 = vmatmul.mubr.msk.bf16.gmra.mrb[108].mxu0 %vm892_vm4, %v4707_v32 }
 0x792   :  { %19038 = vmatprep.mubr.msk.bf16.mxu0 %vm892_vm4, %v5265_v29  ;;  %v20646_v29 = vld [vmem:[%s27025_s3 + $0x8a4] ss:$16 sps:$4 sm:$0xff]  }
 0x799   :  { %19039 = vmatmul.mubr.msk.bf16.vlgmr.msra.gmra.mrb[96].mxu0 %vm892_vm4, %v27105_v24 }
 0x79a   :  { %17454 = vmatpush3.bf16.msra.mxu0 %v21401_v23  ;;  %19042 = vmatprep.mubr.msk.bf16.mxu0 %vm892_vm4, %v5267_v15  ;;  %v20644_v15 = vld [vmem:[%s27025_s3 + $0x8a0] ss:$16 sps:$4 sm:$0xff]  }
 0x79b   :  { %17455 = vmatprep.subr.bf16.mxu0 %v21402_v7 }
 0x79e   :  { %17456 = vmatpush3.bf16.msra.mxu0 %v21403_v9 }
 0x79f   :  { %17457 = vmatprep.subr.bf16.mxu0 %v21404_v38 }
 0x7a1   :  { %19043 = vmatmul.mubr.msk.bf16.gmra.mrb[100].mxu0 %vm892_vm4, %v5268_v45  ;;  %v20649_v45 = vld [vmem:[%s27025_s3 + $0x8c4] ss:$16 sps:$4 sm:$0xff]  }
 0x7a2   :  { %17458 = vmatpush3.bf16.msra.mxu0 %v23751_v58  ;;  %19046 = vmatprep.mubr.msk.bf16.mxu0 %vm892_vm4, %v5269_v34  ;;  %v20627_v58 = vld [vmem:[%s27025_s3 + $0x804] ss:$16 sps:$4 sm:$0xff]   ;;  %v20647_v34 = vld [vmem:[%s27025_s3 + $0x8c0] ss:$16 sps:$4 sm:$0xff]  }
 0x7a3   :  { %17459 = vmatprep.subr.bf16.mxu0 %v23757_v10  ;;  %v27109_v10 = vld [vmem:[#allocation29_spill] sm:$0xff] }
 0x7a6   :  { %17460 = vmatpush3.bf16.msra.mxu0 %v23770_v17  ;;  %v20628_v17 = vld [vmem:[%s27027_s4 + $0x100] sm:$0xff]  }
 0x7a7   :  { %17461 = vmatprep.subr.bf16.mxu0 %v23776_v59  ;;  %v20625_v59 = vld [vmem:[%s27025_s3 + $0x800] ss:$16 sps:$4 sm:$0xff]  }
 0x7a9   :  { %19047 = vmatmul.mubr.msk.bf16.gmra.mrb[104].mxu0 %vm892_vm4, %v5270_v0  ;;  %v20652_v0 = vld [vmem:[%s27025_s3 + $0x8e4] ss:$16 sps:$4 sm:$0xff]  }
 0x7aa   :  { %17462 = vmatpush3.bf16.msra.mxu0 %v23782_v28  ;;  %19050 = vmatprep.mubr.msk.bf16.mxu0 %vm892_vm4, %v5271_v48  ;;  %v27111_v28 = vld [vmem:[#allocation31_spill] sm:$0xff] }
 0x7ab   :  { %17463 = vmatprep.subr.bf16.mxu0 %v27106_v37  ;;  %v20650_v48 = vld [vmem:[%s27025_s3 + $0x8e0] ss:$16 sps:$4 sm:$0xff]  }
 0x7ae   :  { %17464 = vmatpush3.bf16.msra.mxu0 %v27107_v56 }
 0x7af   :  { %17465 = vmatprep.subr.bf16.mxu0 %v27108_v46 }
 0x7b1   :  { %19051 = vmatmul.mubr.msk.bf16.gmra.mrb[108].mxu0 %vm892_vm4, %v5272_v40  ;;  %v17539_v40 = vpop.f32.mrb[100].mxu1 }
 0x7b2   :  { %17466 = vmatpush3.bf16.msra.mxu0 %v27109_v10  ;;  %5668 = vmatprep.mubr.bf16.mxu0 %v20627_v58  ;;  %v17540_v11 = vpop.f32.mrb[101].mxu1 }
 0x7b3   :  { %17467 = vmatprep.subr.bf16.mxu0 %v27110_v61  ;;  %v17541_v57 = vadd.f32 %v17540_v11, %v17539_v40  ;;  %v17542_v16 = vpop.f32.mrb[102].mxu1  ;;  %v27113_v40 = vld [vmem:[#allocation32_spill] sm:$0xff] }
 0x7b4   :  { %v17543_v43 = vpop.f32.mrb[103].mxu1 }
 0x7b5   :  { %v17544_v18 = vadd.f32 %v17543_v43, %v17542_v16  ;;  %v17545_v13 = vpop.f32.mrb[104].mxu1 }
 0x7b6   :  { %17468 = vmatpush3.bf16.msra.mxu0 %v27111_v28  ;;  %v17546_v4 = vpop.f32.mrb[105].mxu1 }
 0x7b7   :  { %19054 = vmatprep.subr.bf16.mxu0 %v20628_v17  ;;  %v24359_v44 = vadd.f32 %v17546_v4, %v17545_v13  ;;  %v17548_v39 = vpop.f32.mrb[106].mxu1 }
 0x7b8   :  { %v17549_v14 = vpop.f32.mrb[107].mxu1 }
 0x7b9   :  { %5669 = vmatmul.mubr.bf16.vlgmr.msra.gmra.mrb[240].mxu0 %v20625_v59  ;;  %v24361_v53 = vadd.f32 %v17549_v14, %v17548_v39  ;;  %v17551_v54 = vpop.f32.mrb[108].mxu1  ;;  %v27114_v39 = vld [vmem:[#allocation33_spill] sm:$0xff] }
 0x7ba   :  { %19055 = vmatpush3.bf16.msra.mxu0 %v20628_v17  ;;  %5676 = vmatprep.mubr.bf16.mxu0 %v20630_v25  ;;  %v17552_v2 = vpop.f32.mrb[109].mxu1 }
 0x7bb   :  { %19056 = vmatprep.subr.bf16.mxu0 %v20629_v41  ;;  %v24363_v51 = vadd.f32 %v17552_v2, %v17551_v54  ;;  %v17554_v12 = vpop.f32.mrb[110].mxu1 }
 0x7bc   :  { %v17555_v8 = vpop.f32.mrb[111].mxu1 }
 0x7bd   :  { %v24365_v32 = vadd.f32 %v17555_v8, %v17554_v12  ;;  %v17557_v24 = vpop.f32.mrb[112].mxu1 }
 0x7be   :  { %19057 = vmatpush3.bf16.msra.mxu0 %v20629_v41  ;;  %v17558_v23 = vpop.f32.mrb[113].mxu1 }
 0x7bf   :  { %19058 = vmatprep.subr.bf16.mxu0 %v20632_v5  ;;  %v24367_v7 = vadd.f32 %v17558_v23, %v17557_v24  ;;  %v17560_v9 = vpop.f32.mrb[114].mxu1 }
 0x7c0   :  { %v17561_v38 = vpop.f32.mrb[115].mxu1 }
 0x7c1   :  { %5677 = vmatmul.mubr.bf16.gmra.mrb[244].mxu0 %v20633_v35  ;;  %v24369_v37 = vadd.f32 %v17561_v38, %v17560_v9  ;;  %v17563_v56 = vpop.f32.mrb[116].mxu1 }
 0x7c2   :  { %19059 = vmatpush3.bf16.msra.mxu0 %v20632_v5  ;;  %5684 = vmatprep.mubr.bf16.mxu0 %v20635_v3  ;;  %v17564_v58 = vpop.f32.mrb[117].mxu1 }
 0x7c3   :  { %19060 = vmatprep.subr.bf16.mxu0 %v20634_v21  ;;  %v24371_v46 = vadd.f32 %v17564_v58, %v17563_v56  ;;  %v17566_v10 = vpop.f32.mrb[118].mxu1 }
 0x7c4   :  { %v17567_v61 = vpop.f32.mrb[119].mxu1 }
 0x7c5   :  { %v24373_v17 = vadd.f32 %v17567_v61, %v17566_v10  ;;  %v17569_v59 = vpop.f32.mrb[120].mxu1 }
 0x7c6   :  { %19061 = vmatpush3.bf16.msra.mxu0 %v20634_v21  ;;  %v17570_v28 = vpop.f32.mrb[121].mxu1 }
 0x7c7   :  { %17657 = vmatprep.subr.bf16.mxu0 %v27112_v50  ;;  %v24375_v25 = vadd.f32 %v17570_v28, %v17569_v59  ;;  %v17572_v41 = vpop.f32.mrb[122].mxu1 }
 0x7c8   :  { %v17573_v5 = vpop.f32.mrb[123].mxu1 }
 0x7c9   :  { %5685 = vmatmul.mubr.bf16.gmra.mrb[248].mxu0 %v20637_v20  ;;  %v24377_v35 = vadd.f32 %v17573_v5, %v17572_v41  ;;  %v17575_v3 = vpop.f32.mrb[124].mxu1 }
 0x7ca   :  { %5692 = vmatprep.mubr.bf16.mxu0 %v20638_v31  ;;  %v17576_v21 = vpop.f32.mrb[125].mxu1 }
 0x7cb   :  { %v24379_v20 = vadd.f32 %v17576_v21, %v17575_v3  ;;  %v17578_v31 = vpop.f32.mrb[126].mxu1 }
 0x7d1   :  { %5693 = vmatmul.mubr.bf16.gmra.mrb[252].mxu0 %v20640_v33  ;;  %v17579_v33 = vpop.f32.mrb[127].mxu1 }
 0x7d2   :  { %5700 = vmatprep.mubr.bf16.mxu0 %v20643_v26  ;;  %v24381_v26 = vadd.f32 %v17579_v33, %v17578_v31 }
 0x7d9   :  { %5701 = vmatmul.mubr.bf16.gmra.mrb[0].mxu0 %v20641_v60 }
 0x7da   :  { %5708 = vmatprep.mubr.bf16.mxu0 %v20646_v29 }
 0x7e1   :  { %5709 = vmatmul.mubr.bf16.gmra.mrb[4].mxu0 %v20644_v15 }
 0x7e2   :  { %5716 = vmatprep.mubr.bf16.mxu0 %v20649_v45 }
 0x7e9   :  { %5717 = vmatmul.mubr.bf16.gmra.mrb[8].mxu0 %v20647_v34  ;;  %v17609_v34 = vpop.f32.mrb[128].mxu1 }
 0x7ea   :  { %5724 = vmatprep.mubr.bf16.mxu0 %v20652_v0 }
 0x7f1   :  { %5725 = vmatmul.mubr.bf16.gmra.mrb[12].mxu0 %v20650_v48  ;;  %v17610_v48 = vpop.f32.mrb[129].mxu1 }
 0x7f2   :  { %v24384_v43 = vadd.f32 %v17610_v48, %v17609_v34  ;;  %v17612_v13 = vpop.f32.mrb[130].mxu1 }
 0x7f3   :  { %v17613_v4 = vpop.f32.mrb[131].mxu1 }
 0x7f4   :  { %v24387_v54 = vadd.f32 %v17613_v4, %v17612_v13 }
 0x88c   :  { %v17469_v60 = vpop.f32.mrb[240].mxu0 }
 0x88d   :  { %v17470_v29 = vpop.f32.mrb[241].mxu0 }
 0x88e   :  { %v17471_v15 = vadd.f32 %v17470_v29, %v17469_v60  ;;  %v17472_v45 = vpop.f32.mrb[242].mxu0 }
 0x88f   :  { %v17473_v0 = vpop.f32.mrb[243].mxu0 }
 0x890   :  { %v5768_v11 = vadd.f32 %v27113_v40, %v17471_v15  ;;  %v17474_v16 = vadd.f32 %v17473_v0, %v17472_v45 }
 0x892   :  { %v5771_v14 = vadd.f32 %v27114_v39, %v17474_v16 }
 0x894   :  { %v5830_v2 = vpack.c.bf16 %v5771_v14, %v5768_v11  ;;  %v17475_v12 = vpop.f32.mrb[244].mxu0 }
 0x895   :  { %v17476_v8 = vpop.f32.mrb[245].mxu0 }
 0x896   :  { %v17477_v24 = vadd.f32 %v17476_v8, %v17475_v12  ;;  %v17478_v23 = vpop.f32.mrb[246].mxu0  ;;  %19062 = vmatprep.mubr.msk.bf16.mxu0 %vm892_vm4, %v5830_v2 }
 0x897   :  { %v17479_v9 = vpop.f32.mrb[247].mxu0 }
 0x898   :  { %v5776_v38 = vadd.f32 %v17541_v57, %v17477_v24  ;;  %v17480_v56 = vadd.f32 %v17479_v9, %v17478_v23 }
 0x89a   :  { %v5779_v58 = vadd.f32 %v17544_v18, %v17480_v56 }
 0x89c   :  { %v5831_v10 = vpack.c.bf16 %v5779_v58, %v5776_v38  ;;  %v17481_v61 = vpop.f32.mrb[248].mxu0 }
 0x89d   :  { %v17482_v59 = vpop.f32.mrb[249].mxu0 }
 0x89e   :  { %v17483_v28 = vadd.f32 %v17482_v59, %v17481_v61  ;;  %v17484_v41 = vpop.f32.mrb[250].mxu0  ;;  %19063 = vmatmul.mubr.msk.bf16.vlgmr.msra.gmra.mrb[96].mxu0 %vm892_vm4, %v5831_v10  ;;  %v20660_v10 = vld [vmem:[%s27025_s3 + $0x92c] ss:$16 sps:$4 sm:$0xff]   ;;  %v20658_v61 = vld [vmem:[%s27025_s3 + $0x928] ss:$16 sps:$4 sm:$0xff]  }
 0x89f   :  { %17658 = vmatpush3.bf16.msra.mxu0 %v24063_v30  ;;  %v17485_v5 = vpop.f32.mrb[251].mxu0  ;;  %v20665_v59 = vld [vmem:[%s27025_s3 + $0x94c] ss:$16 sps:$4 sm:$0xff]  }
 0x8a0   :  { %v5784_v3 = vadd.f32 %v24359_v44, %v17483_v28  ;;  %v17486_v21 = vadd.f32 %v17485_v5, %v17484_v41  ;;  %17659 = vmatprep.subr.bf16.mxu0 %v24066_v27  ;;  %v20662_v28 = vld [vmem:[%s27027_s4 + $0x138] sm:$0xff]  }
 0x8a1   :  { %v20663_v41 = vld [vmem:[%s27025_s3 + $0x948] ss:$16 sps:$4 sm:$0xff]   ;;  %v20668_v5 = vld [vmem:[%s27025_s3 + $0x96c] ss:$16 sps:$4 sm:$0xff]  }
 0x8a2   :  { %v5787_v31 = vadd.f32 %v24361_v53, %v17486_v21  ;;  %v20671_v21 = vld [vmem:[%s27025_s3 + $0x98c] ss:$16 sps:$4 sm:$0xff]  }
 0x8a3   :  { %17660 = vmatpush3.bf16.msra.mxu0 %v24069_v22 }
 0x8a4   :  { %v5832_v57 = vpack.c.bf16 %v5787_v31, %v5784_v3  ;;  %17661 = vmatprep.subr.bf16.mxu0 %v24072_v49  ;;  %v17487_v18 = vpop.f32.mrb[252].mxu0  ;;  %v20666_v3 = vld [vmem:[%s27025_s3 + $0x968] ss:$16 sps:$4 sm:$0xff]  }
 0x8a5   :  { %v17488_v33 = vpop.f32.mrb[253].mxu0  ;;  %v20669_v31 = vld [vmem:[%s27025_s3 + $0x988] ss:$16 sps:$4 sm:$0xff]  }
 0x8a6   :  { %v17489_v60 = vadd.f32 %v17488_v33, %v17487_v18  ;;  %v17490_v29 = vpop.f32.mrb[254].mxu0  ;;  %19066 = vmatprep.mubr.msk.bf16.mxu0 %vm892_vm4, %v5832_v57  ;;  %v20672_v57 = vld [vmem:[%s27025_s3 + $0x9a8] ss:$16 sps:$4 sm:$0xff]   ;;  %v20677_v18 = vld [vmem:[%s27025_s3 + $0x9cc] ss:$16 sps:$4 sm:$0xff]  }
 0x8a7   :  { %17662 = vmatpush3.bf16.msra.mxu0 %v24075_v19  ;;  %v17491_v30 = vpop.f32.mrb[255].mxu0  ;;  %v20675_v33 = vld [vmem:[%s27025_s3 + $0x9c8] ss:$16 sps:$4 sm:$0xff]  }
 0x8a8   :  { %v5792_v44 = vadd.f32 %v24363_v51, %v17489_v60  ;;  %v17492_v15 = vadd.f32 %v17491_v30, %v17490_v29  ;;  %17663 = vmatprep.subr.bf16.mxu0 %v24078_v6  ;;  %v20680_v60 = vld [vmem:[%s27025_s3 + $0x9ec] ss:$16 sps:$4 sm:$0xff]   ;;  %v20678_v29 = vld [vmem:[%s27025_s3 + $0x9e8] ss:$16 sps:$4 sm:$0xff]   ;;  %v17615_v30 = vpop.f32.mrb[132].mxu1 }
 0x8aa   :  { %v5795_v27 = vadd.f32 %v24365_v32, %v17492_v15 }
 0x8ab   :  { %17664 = vmatpush3.bf16.msra.mxu0 %v24081_v47 }
 0x8ac   :  { %v5833_v22 = vpack.c.bf16 %v5795_v27, %v5792_v44  ;;  %17665 = vmatprep.subr.bf16.mxu0 %v24084_v52  ;;  %v17493_v49 = vpop.f32.mrb[0].mxu0  ;;  %v17616_v44 = vpop.f32.mrb[133].mxu1 }
 0x8ad   :  { %v17494_v53 = vpop.f32.mrb[1].mxu0  ;;  %v24487_v15 = vadd.f32 %v17616_v44, %v17615_v30  ;;  %v17618_v27 = vpop.f32.mrb[134].mxu1 }
 0x8ae   :  { %v17495_v45 = vadd.f32 %v17494_v53, %v17493_v49  ;;  %v17496_v34 = vpop.f32.mrb[2].mxu0  ;;  %19067 = vmatmul.mubr.msk.bf16.gmra.mrb[100].mxu0 %vm892_vm4, %v5833_v22  ;;  %v17619_v22 = vpop.f32.mrb[135].mxu1 }
 0x8af   :  { %17666 = vmatpush3.bf16.msra.mxu0 %v24087_v1  ;;  %v17497_v19 = vpop.f32.mrb[3].mxu0  ;;  %v24489_v49 = vadd.f32 %v17619_v22, %v17618_v27  ;;  %v17621_v53 = vpop.f32.mrb[136].mxu1 }
 0x8b0   :  { %v5800_v51 = vadd.f32 %v24367_v7, %v17495_v45  ;;  %v17498_v0 = vadd.f32 %v17497_v19, %v17496_v34  ;;  %17667 = vmatprep.subr.bf16.mxu0 %v24090_v55  ;;  %v20656_v55 = vld [vmem:[%s27027_s4 + $0x120] sm:$0xff]   ;;  %v17622_v45 = vpop.f32.mrb[137].mxu1 }
 0x8b1   :  { %v24491_v34 = vadd.f32 %v17622_v45, %v17621_v53  ;;  %v17624_v19 = vpop.f32.mrb[138].mxu1 }
 0x8b2   :  { %v5803_v6 = vadd.f32 %v24369_v37, %v17498_v0 }
 0x8b3   :  { %17668 = vmatpush3.bf16.msra.mxu0 %v24093_v42 }
 0x8b4   :  { %v5834_v47 = vpack.c.bf16 %v5803_v6, %v5800_v51  ;;  %17669 = vmatprep.subr.bf16.mxu0 %v24096_v63  ;;  %v17499_v52 = vpop.f32.mrb[4].mxu0  ;;  %v24419_v63 = vld [vmem:[#allocation2 + $0xb8] sm:$0xff]  ;;  %v17625_v51 = vpop.f32.mrb[139].mxu1 }
 0x8b5   :  { %v17500_v32 = vpop.f32.mrb[5].mxu0  ;;  %v24493_v0 = vadd.f32 %v17625_v51, %v17624_v19  ;;  %v17627_v6 = vpop.f32.mrb[140].mxu1 }
 0x8b6   :  { %v17501_v48 = vadd.f32 %v17500_v32, %v17499_v52  ;;  %v17502_v40 = vpop.f32.mrb[6].mxu0  ;;  %19070 = vmatprep.mubr.msk.bf16.mxu0 %vm892_vm4, %v5834_v47  ;;  %v17628_v47 = vpop.f32.mrb[141].mxu1 }
 0x8b7   :  { %17670 = vmatpush3.bf16.msra.mxu0 %v24099_v36  ;;  %v17503_v1 = vpop.f32.mrb[7].mxu0  ;;  %v24495_v52 = vadd.f32 %v17628_v47, %v17627_v6  ;;  %v17630_v32 = vpop.f32.mrb[142].mxu1 }
 0x8b8   :  { %v5808_v7 = vadd.f32 %v24371_v46, %v17501_v48  ;;  %v17504_v11 = vadd.f32 %v17503_v1, %v17502_v40  ;;  %17671 = vmatprep.subr.bf16.mxu0 %v24132_v62  ;;  %v17631_v48 = vpop.f32.mrb[143].mxu1 }
 0x8b9   :  { %v24497_v40 = vadd.f32 %v17631_v48, %v17630_v32  ;;  %v17633_v1 = vpop.f32.mrb[144].mxu1 }
 0x8ba   :  { %v5811_v42 = vadd.f32 %v24373_v17, %v17504_v11 }
 0x8bb   :  { %17672 = vmatpush3.bf16.msra.mxu0 %v24419_v63 }
 0x8bc   :  { %v5835_v37 = vpack.c.bf16 %v5811_v42, %v5808_v7  ;;  %v17505_v16 = vpop.f32.mrb[8].mxu0  ;;  %19078 = vmatprep.subr.bf16.mxu0 %v20656_v55  ;;  %v17634_v7 = vpop.f32.mrb[145].mxu1 }
 0x8bd   :  { %v17506_v36 = vpop.f32.mrb[9].mxu0  ;;  %v24499_v11 = vadd.f32 %v17634_v7, %v17633_v1 }
 0x8be   :  { %v17507_v13 = vadd.f32 %v17506_v36, %v17505_v16  ;;  %v17508_v4 = vpop.f32.mrb[10].mxu0  ;;  %19071 = vmatmul.mubr.msk.bf16.gmra.mrb[104].mxu0 %vm892_vm4, %v5835_v37 }
 0x8bf   :  { %v17509_v46 = vpop.f32.mrb[11].mxu0 }
 0x8c0   :  { %v5816_v62 = vadd.f32 %v24375_v25, %v17507_v13  ;;  %v17510_v39 = vadd.f32 %v17509_v46, %v17508_v4  ;;  %v20655_v25 = vld [vmem:[%s27025_s3 + $0x90c] ss:$16 sps:$4 sm:$0xff]  }
 0x8c2   :  { %v5819_v14 = vadd.f32 %v24377_v35, %v17510_v39  ;;  %v20653_v35 = vld [vmem:[%s27025_s3 + $0x908] ss:$16 sps:$4 sm:$0xff]  }
 0x8c4   :  { %v5836_v2 = vpack.c.bf16 %v5819_v14, %v5816_v62  ;;  %v17511_v17 = vpop.f32.mrb[12].mxu0 }
 0x8c5   :  { %v17512_v12 = vpop.f32.mrb[13].mxu0 }
 0x8c6   :  { %v17513_v8 = vadd.f32 %v17512_v12, %v17511_v17  ;;  %v17514_v24 = vpop.f32.mrb[14].mxu0  ;;  %19074 = vmatprep.mubr.msk.bf16.mxu0 %vm892_vm4, %v5836_v2 }
 0x8c7   :  { %v17515_v23 = vpop.f32.mrb[15].mxu0 }
 0x8c8   :  { %v5824_v9 = vadd.f32 %v24379_v20, %v17513_v8  ;;  %v17516_v38 = vadd.f32 %v17515_v23, %v17514_v24  ;;  %v20657_v20 = vld [vmem:[%s27027_s4 + $0x128] sm:$0xff]  }
 0x8ca   :  { %v5827_v56 = vadd.f32 %v24381_v26, %v17516_v38  ;;  %v20661_v26 = vld [vmem:[%s27027_s4 + $0x130] sm:$0xff]  }
 0x8cc   :  { %v5837_v58 = vpack.c.bf16 %v5827_v56, %v5824_v9 }
 0x8ce   :  { %19075 = vmatmul.mubr.msk.bf16.gmra.mrb[108].mxu0 %vm892_vm4, %v5837_v58 }
 0x8cf   :  { %6330 = vmatprep.mubr.bf16.mxu0 %v20655_v25 }
 0x8d6   :  { %6331 = vmatmul.mubr.bf16.vlgmr.msra.gmra.mrb[16].mxu0 %v20653_v35 }
 0x8d7   :  { %19079 = vmatpush3.bf16.msra.mxu0 %v20656_v55  ;;  %6338 = vmatprep.mubr.bf16.mxu0 %v20660_v10  ;;  %v17636_v55 = vpop.f32.mrb[146].mxu1 }
 0x8d8   :  { %19080 = vmatprep.subr.bf16.mxu0 %v20657_v20  ;;  %v17637_v42 = vpop.f32.mrb[147].mxu1 }
 0x8d9   :  { %v24501_v37 = vadd.f32 %v17637_v42, %v17636_v55  ;;  %v17639_v16 = vpop.f32.mrb[148].mxu1 }
 0x8da   :  { %v17640_v36 = vpop.f32.mrb[149].mxu1 }
 0x8db   :  { %19081 = vmatpush3.bf16.msra.mxu0 %v20657_v20  ;;  %v24503_v13 = vadd.f32 %v17640_v36, %v17639_v16  ;;  %v17642_v4 = vpop.f32.mrb[150].mxu1 }
 0x8dc   :  { %19082 = vmatprep.subr.bf16.mxu0 %v20661_v26  ;;  %v17643_v46 = vpop.f32.mrb[151].mxu1 }
 0x8dd   :  { %v24505_v62 = vadd.f32 %v17643_v46, %v17642_v4  ;;  %v17645_v39 = vpop.f32.mrb[152].mxu1 }
 0x8de   :  { %6339 = vmatmul.mubr.bf16.gmra.mrb[20].mxu0 %v20658_v61  ;;  %v17646_v14 = vpop.f32.mrb[153].mxu1 }
 0x8df   :  { %19083 = vmatpush3.bf16.msra.mxu0 %v20661_v26  ;;  %6346 = vmatprep.mubr.bf16.mxu0 %v20665_v59  ;;  %v24507_v2 = vadd.f32 %v17646_v14, %v17645_v39  ;;  %v17648_v17 = vpop.f32.mrb[154].mxu1 }
 0x8e0   :  { %19084 = vmatprep.subr.bf16.mxu0 %v20662_v28  ;;  %v17649_v12 = vpop.f32.mrb[155].mxu1 }
 0x8e1   :  { %v24509_v8 = vadd.f32 %v17649_v12, %v17648_v17  ;;  %v17651_v24 = vpop.f32.mrb[156].mxu1 }
 0x8e2   :  { %v17652_v23 = vpop.f32.mrb[157].mxu1 }
 0x8e3   :  { %19085 = vmatpush3.bf16.msra.mxu0 %v20662_v28  ;;  %v24511_v9 = vadd.f32 %v17652_v23, %v17651_v24  ;;  %v17654_v38 = vpop.f32.mrb[158].mxu1  ;;  %v24537_v23 = vld [vmem:[#allocation2 + $0x80] sm:$0xff] }
 0x8e4   :  { %17797 = vmatprep.subr.bf16.mxu0 %v27112_v50  ;;  %v20674_v50 = vld [vmem:[%s27025_s3 + $0x9ac] ss:$16 sps:$4 sm:$0xff]   ;;  %v17655_v56 = vpop.f32.mrb[159].mxu1 }
 0x8e5   :  { %v24513_v25 = vadd.f32 %v17655_v56, %v17654_v38  ;;  %v17749_v26 = vpop.f32.mrb[160].mxu1 }
 0x8e6   :  { %6347 = vmatmul.mubr.bf16.gmra.mrb[24].mxu0 %v20663_v41  ;;  %v17750_v59 = vpop.f32.mrb[161].mxu1 }
 0x8e7   :  { %6354 = vmatprep.mubr.bf16.mxu0 %v20668_v5  ;;  %v24516_v5 = vadd.f32 %v17750_v59, %v17749_v26 }
 0x8ee   :  { %6355 = vmatmul.mubr.bf16.gmra.mrb[28].mxu0 %v20666_v3  ;;  %v17752_v3 = vpop.f32.mrb[162].mxu1 }
 0x8ef   :  { %6362 = vmatprep.mubr.bf16.mxu0 %v20671_v21  ;;  %v17753_v21 = vpop.f32.mrb[163].mxu1 }
 0x8f6   :  { %6363 = vmatmul.mubr.bf16.gmra.mrb[32].mxu0 %v20669_v31 }
 0x8f7   :  { %6370 = vmatprep.mubr.bf16.mxu0 %v20674_v50  ;;  %v24519_v50 = vadd.f32 %v17753_v21, %v17752_v3  ;;  %v24552_v21 = vld [vmem:[#allocation2 + $0xd0] sm:$0xff] }
 0x8fe   :  { %6371 = vmatmul.mubr.bf16.gmra.mrb[36].mxu0 %v20672_v57  ;;  %v17755_v57 = vpop.f32.mrb[164].mxu1 }
 0x8ff   :  { %6378 = vmatprep.mubr.bf16.mxu0 %v20677_v18  ;;  %v17756_v18 = vpop.f32.mrb[165].mxu1 }
 0x900   :  { %v17758_v30 = vpop.f32.mrb[166].mxu1 }
 0x901   :  { %v17759_v27 = vpop.f32.mrb[167].mxu1 }
 0x902   :  { %v24524_v53 = vadd.f32 %v17759_v27, %v17758_v30  ;;  %v17761_v45 = vpop.f32.mrb[168].mxu1 }
 0x906   :  { %6379 = vmatmul.mubr.bf16.gmra.mrb[40].mxu0 %v20675_v33 }
 0x907   :  { %6386 = vmatprep.mubr.bf16.mxu0 %v20680_v60 }
 0x90e   :  { %6387 = vmatmul.mubr.bf16.gmra.mrb[44].mxu0 %v20678_v29  ;;  %v24521_v29 = vadd.f32 %v17756_v18, %v17755_v57 }
 0x9a9   :  { %v17673_v58 = vpop.f32.mrb[16].mxu0 }
 0x9aa   :  { %v17674_v35 = vpop.f32.mrb[17].mxu0 }
 0x9ab   :  { %v17675_v10 = vadd.f32 %v17674_v35, %v17673_v58  ;;  %v17676_v20 = vpop.f32.mrb[18].mxu0  ;;  %v24541_v35 = vld [vmem:[#allocation2 + $0xc8] sm:$0xff] }
 0x9ac   :  { %v17677_v61 = vpop.f32.mrb[19].mxu0 }
 0x9ad   :  { %v6333_v28 = vadd.f32 %v17675_v10, %v24384_v43  ;;  %v17678_v41 = vadd.f32 %v17677_v61, %v17676_v20 }
 0x9af   :  { %v6336_v31 = vadd.f32 %v17678_v41, %v24387_v54  ;;  %v17762_v54 = vpop.f32.mrb[169].mxu1  ;;  %v24549_v41 = vld [vmem:[#allocation2 + $0x88] sm:$0xff] }
 0x9b0   :  { %v24527_v47 = vadd.f32 %v17762_v54, %v17761_v45  ;;  %v17764_v32 = vpop.f32.mrb[170].mxu1 }
 0x9b1   :  { %v6395_v33 = vpack.c.bf16 %v6336_v31, %v6333_v28  ;;  %v17679_v60 = vpop.f32.mrb[20].mxu0  ;;  %v17765_v48 = vpop.f32.mrb[171].mxu1 }
 0x9b2   :  { %v17680_v44 = vpop.f32.mrb[21].mxu0  ;;  %v24530_v7 = vadd.f32 %v17765_v48, %v17764_v32  ;;  %v17767_v55 = vpop.f32.mrb[172].mxu1 }
 0x9b3   :  { %v17681_v22 = vadd.f32 %v17680_v44, %v17679_v60  ;;  %v17682_v43 = vpop.f32.mrb[22].mxu0  ;;  %19086 = vmatprep.mubr.msk.bf16.mxu0 %vm892_vm4, %v6395_v33  ;;  %v17768_v42 = vpop.f32.mrb[173].mxu1 }
 0x9b4   :  { %v17683_v19 = vpop.f32.mrb[23].mxu0  ;;  %v24532_v4 = vadd.f32 %v17768_v42, %v17767_v55  ;;  %v17770_v46 = vpop.f32.mrb[174].mxu1 }
 0x9b5   :  { %v6341_v51 = vadd.f32 %v17681_v22, %v24487_v15  ;;  %v17684_v6 = vadd.f32 %v17683_v19, %v17682_v43  ;;  %v17771_v14 = vpop.f32.mrb[175].mxu1  ;;  %v24560_v22 = vld [vmem:[#allocation2 + $0x90] sm:$0xff] }
 0x9b6   :  { %v24535_v12 = vadd.f32 %v17771_v14, %v17770_v46  ;;  %v17773_v24 = vpop.f32.mrb[176].mxu1  ;;  %v24575_v46 = vld [vmem:[#allocation2 + $0xe0] sm:$0xff] }
 0x9b7   :  { %v6344_v1 = vadd.f32 %v17684_v6, %v24489_v49  ;;  %v17774_v38 = vpop.f32.mrb[177].mxu1 }
 0x9b8   :  { %v24544_v10 = vadd.f32 %v17774_v38, %v17773_v24  ;;  %v17776_v20 = vpop.f32.mrb[178].mxu1 }
 0x9b9   :  { %v6396_v16 = vpack.c.bf16 %v6344_v1, %v6341_v51  ;;  %v17685_v36 = vpop.f32.mrb[24].mxu0  ;;  %v17777_v26 = vpop.f32.mrb[179].mxu1  ;;  %v24564_v51 = vld [vmem:[#allocation2 + $0xd8] sm:$0xff] }
 0x9ba   :  { %v17686_v39 = vpop.f32.mrb[25].mxu0  ;;  %v24547_v59 = vadd.f32 %v17777_v26, %v17776_v20  ;;  %v17779_v28 = vpop.f32.mrb[180].mxu1 }
 0x9bb   :  { %v17687_v17 = vadd.f32 %v17686_v39, %v17685_v36  ;;  %v17688_v15 = vpop.f32.mrb[26].mxu0  ;;  %19087 = vmatmul.mubr.msk.bf16.vlgmr.msra.gmra.mrb[96].mxu0 %vm892_vm4, %v6396_v16  ;;  %v17780_v3 = vpop.f32.mrb[181].mxu1  ;;  %v24572_v16 = vld [vmem:[#allocation2 + $0x98] sm:$0xff] }
 0x9bc   :  { %17798 = vmatpush3.bf16.msra.mxu0 %v24537_v23  ;;  %v17689_v49 = vpop.f32.mrb[27].mxu0  ;;  %v24555_v57 = vadd.f32 %v17780_v3, %v17779_v28  ;;  %v17782_v18 = vpop.f32.mrb[182].mxu1  ;;  %v24587_v3 = vld [vmem:[#allocation2 + $0xe8] sm:$0xff] }
 0x9bd   :  { %v6349_v56 = vadd.f32 %v17687_v17, %v24491_v34  ;;  %v17690_v58 = vadd.f32 %v17689_v49, %v17688_v15  ;;  %17799 = vmatprep.subr.bf16.mxu0 %v24541_v35  ;;  %v17783_v60 = vpop.f32.mrb[183].mxu1 }
 0x9be   :  { %v24558_v44 = vadd.f32 %v17783_v60, %v17782_v18  ;;  %v17785_v27 = vpop.f32.mrb[184].mxu1 }
 0x9bf   :  { %v6352_v61 = vadd.f32 %v17690_v58, %v24493_v0  ;;  %v17786_v45 = vpop.f32.mrb[185].mxu1  ;;  %v24583_v58 = vld [vmem:[#allocation2 + $0xa0] sm:$0xff] }
 0x9c0   :  { %17800 = vmatpush3.bf16.msra.mxu0 %v24549_v41  ;;  %v24567_v6 = vadd.f32 %v17786_v45, %v17785_v27  ;;  %v17788_v32 = vpop.f32.mrb[186].mxu1 }
 0x9c1   :  { %v6397_v34 = vpack.c.bf16 %v6352_v61, %v6349_v56  ;;  %17801 = vmatprep.subr.bf16.mxu0 %v24552_v21  ;;  %v17691_v31 = vpop.f32.mrb[28].mxu0  ;;  %v17789_v48 = vpop.f32.mrb[187].mxu1 }
 0x9c2   :  { %v17692_v33 = vpop.f32.mrb[29].mxu0  ;;  %v24570_v55 = vadd.f32 %v17789_v48, %v17788_v32  ;;  %v17791_v42 = vpop.f32.mrb[188].mxu1 }
 0x9c3   :  { %v17693_v0 = vadd.f32 %v17692_v33, %v17691_v31  ;;  %v17694_v30 = vpop.f32.mrb[30].mxu0  ;;  %19090 = vmatprep.mubr.msk.bf16.mxu0 %vm892_vm4, %v6397_v34  ;;  %v17792_v36 = vpop.f32.mrb[189].mxu1 }
 0x9c4   :  { %17802 = vmatpush3.bf16.msra.mxu0 %v24560_v22  ;;  %v17695_v43 = vpop.f32.mrb[31].mxu0  ;;  %v24578_v14 = vadd.f32 %v17792_v36, %v17791_v42  ;;  %v17794_v17 = vpop.f32.mrb[190].mxu1 }
 0x9c5   :  { %v6357_v19 = vadd.f32 %v17693_v0, %v24495_v52  ;;  %v17696_v54 = vadd.f32 %v17695_v43, %v17694_v30  ;;  %17803 = vmatprep.subr.bf16.mxu0 %v24564_v51  ;;  %v17795_v24 = vpop.f32.mrb[191].mxu1  ;;  %v24595_v30 = vld [vmem:[#allocation2 + $0xa8] sm:$0xff]  ;;  %v24598_v43 = vld [vmem:[#allocation2 + $0xf0] sm:$0xff] }
 0x9c6   :  { %v24581_v38 = vadd.f32 %v17795_v24, %v17794_v17  ;;  %v17889_v56 = vpop.f32.mrb[192].mxu1 }
 0x9c7   :  { %v6360_v1 = vadd.f32 %v17696_v54, %v24497_v40  ;;  %v17890_v26 = vpop.f32.mrb[193].mxu1 }
 0x9c8   :  { %17804 = vmatpush3.bf16.msra.mxu0 %v24572_v16  ;;  %v24590_v34 = vadd.f32 %v17890_v26, %v17889_v56  ;;  %v17892_v31 = vpop.f32.mrb[194].mxu1 }
 0x9c9   :  { %v6398_v52 = vpack.c.bf16 %v6360_v1, %v6357_v19  ;;  %17805 = vmatprep.subr.bf16.mxu0 %v24575_v46  ;;  %v17697_v39 = vpop.f32.mrb[32].mxu0  ;;  %v17893_v18 = vpop.f32.mrb[195].mxu1 }
 0x9ca   :  { %v17698_v15 = vpop.f32.mrb[33].mxu0  ;;  %v24593_v60 = vadd.f32 %v17893_v18, %v17892_v31  ;;  %v17895_v0 = vpop.f32.mrb[196].mxu1 }
 0x9cb   :  { %v17699_v40 = vadd.f32 %v17698_v15, %v17697_v39  ;;  %v17700_v49 = vpop.f32.mrb[34].mxu0  ;;  %19091 = vmatmul.mubr.msk.bf16.gmra.mrb[100].mxu0 %vm892_vm4, %v6398_v52  ;;  %v17896_v27 = vpop.f32.mrb[197].mxu1  ;;  %v24606_v52 = vld [vmem:[#allocation2 + $0xb0] sm:$0xff] }
 0x9cc   :  { %17806 = vmatpush3.bf16.msra.mxu0 %v24583_v58  ;;  %v17701_v20 = vpop.f32.mrb[35].mxu0  ;;  %v24601_v19 = vadd.f32 %v17896_v27, %v17895_v0  ;;  %v17898_v54 = vpop.f32.mrb[198].mxu1 }
 0x9cd   :  { %v6365_v61 = vadd.f32 %v17699_v40, %v24499_v11  ;;  %v17702_v28 = vadd.f32 %v17701_v20, %v17700_v49  ;;  %17807 = vmatprep.subr.bf16.mxu0 %v24587_v3  ;;  %v17899_v48 = vpop.f32.mrb[199].mxu1  ;;  %v24610_v40 = vld [vmem:[#allocation2 + $0xf8] sm:$0xff] }
 0x9ce   :  { %v24604_v42 = vadd.f32 %v17899_v48, %v17898_v54  ;;  %v17901_v36 = vpop.f32.mrb[200].mxu1 }
 0x9cf   :  { %v6368_v33 = vadd.f32 %v17702_v28, %v24501_v37  ;;  %v17902_v17 = vpop.f32.mrb[201].mxu1 }
 0x9d0   :  { %17808 = vmatpush3.bf16.msra.mxu0 %v24595_v30  ;;  %v24613_v49 = vadd.f32 %v17902_v17, %v17901_v36  ;;  %v17904_v56 = vpop.f32.mrb[202].mxu1 }
 0x9d1   :  { %v6399_v11 = vpack.c.bf16 %v6368_v33, %v6365_v61  ;;  %17809 = vmatprep.subr.bf16.mxu0 %v24598_v43  ;;  %v17703_v45 = vpop.f32.mrb[36].mxu0  ;;  %v17905_v20 = vpop.f32.mrb[203].mxu1 }
 0x9d2   :  { %v17704_v32 = vpop.f32.mrb[37].mxu0  ;;  %v24616_v61 = vadd.f32 %v17905_v20, %v17904_v56  ;;  %v17907_v28 = vpop.f32.mrb[204].mxu1 }
 0x9d3   :  { %v17705_v37 = vadd.f32 %v17704_v32, %v17703_v45  ;;  %v17706_v1 = vpop.f32.mrb[38].mxu0  ;;  %19094 = vmatprep.mubr.msk.bf16.mxu0 %vm892_vm4, %v6399_v11  ;;  %v17908_v31 = vpop.f32.mrb[205].mxu1 }
 0x9d4   :  { %17810 = vmatpush3.bf16.msra.mxu0 %v24606_v52  ;;  %v17707_v39 = vpop.f32.mrb[39].mxu0  ;;  %v17910_v0 = vpop.f32.mrb[206].mxu1 }
 0x9d5   :  { %v6373_v15 = vadd.f32 %v17705_v37, %v24503_v13  ;;  %v17708_v24 = vadd.f32 %v17707_v39, %v17706_v1  ;;  %17811 = vmatprep.subr.bf16.mxu0 %v24610_v40  ;;  %v24619_v13 = vadd.f32 %v17908_v31, %v17907_v28  ;;  %v17911_v11 = vpop.f32.mrb[207].mxu1 }
 0x9d6   :  { %v24622_v32 = vadd.f32 %v17911_v11, %v17910_v0 }
 0x9d7   :  { %v6376_v26 = vadd.f32 %v17708_v24, %v24505_v62  ;;  %v17913_v62 = vpop.f32.mrb[208].mxu1 }
 0x9d8   :  { %17812 = vmatpush3.bf16.msra.mxu0 %v24419_v63  ;;  %v17914_v37 = vpop.f32.mrb[209].mxu1 }
 0x9d9   :  { %v6400_v18 = vpack.c.bf16 %v6376_v26, %v6373_v15  ;;  %v17709_v33 = vpop.f32.mrb[40].mxu0  ;;  %v24625_v36 = vadd.f32 %v17914_v37, %v17913_v62  ;;  %v17916_v39 = vpop.f32.mrb[210].mxu1 }
 0x9da   :  { %v17710_v27 = vpop.f32.mrb[41].mxu0  ;;  %v17917_v17 = vpop.f32.mrb[211].mxu1 }
 0x9db   :  { %v17711_v45 = vadd.f32 %v17710_v27, %v17709_v33  ;;  %v17712_v54 = vpop.f32.mrb[42].mxu0  ;;  %19095 = vmatmul.mubr.msk.bf16.gmra.mrb[104].mxu0 %vm892_vm4, %v6400_v18  ;;  %v24628_v24 = vadd.f32 %v17917_v17, %v17916_v39  ;;  %v17919_v56 = vpop.f32.mrb[212].mxu1 }
 0x9dc   :  { %v17713_v48 = vpop.f32.mrb[43].mxu0  ;;  %v17920_v20 = vpop.f32.mrb[213].mxu1 }
 0x9dd   :  { %v6381_v1 = vadd.f32 %v17711_v45, %v24507_v2  ;;  %v17714_v63 = vadd.f32 %v17713_v48, %v17712_v54  ;;  %v24630_v31 = vadd.f32 %v17920_v20, %v17919_v56  ;;  %v17922_v18 = vpop.f32.mrb[214].mxu1  ;;  %v20683_v56 = vld [vmem:[%s27025_s3 + $0xa0c] ss:$16 sps:$4 sm:$0xff]  }
 0x9de   :  { %v17923_v0 = vpop.f32.mrb[215].mxu1 }
 0x9df   :  { %v6384_v15 = vadd.f32 %v17714_v63, %v24509_v8  ;;  %v24633_v11 = vadd.f32 %v17923_v0, %v17922_v18  ;;  %v17925_v45 = vpop.f32.mrb[216].mxu1 }
 0x9e0   :  { %v17926_v8 = vpop.f32.mrb[217].mxu1 }
 0x9e1   :  { %v6401_v26 = vpack.c.bf16 %v6384_v15, %v6381_v1  ;;  %v17715_v28 = vpop.f32.mrb[44].mxu0  ;;  %v24636_v37 = vadd.f32 %v17926_v8, %v17925_v45  ;;  %v17928_v1 = vpop.f32.mrb[218].mxu1 }
 0x9e2   :  { %v17716_v33 = vpop.f32.mrb[45].mxu0  ;;  %v17929_v63 = vpop.f32.mrb[219].mxu1 }
 0x9e3   :  { %v17717_v27 = vadd.f32 %v17716_v33, %v17715_v28  ;;  %v17718_v2 = vpop.f32.mrb[46].mxu0  ;;  %19098 = vmatprep.mubr.msk.bf16.mxu0 %vm892_vm4, %v6401_v26  ;;  %v24639_v17 = vadd.f32 %v17929_v63, %v17928_v1  ;;  %v17931_v15 = vpop.f32.mrb[220].mxu1  ;;  %v20686_v1 = vld [vmem:[%s27025_s3 + $0xa2c] ss:$16 sps:$4 sm:$0xff]  }
 0x9e4   :  { %v17719_v54 = vpop.f32.mrb[47].mxu0  ;;  %v17932_v20 = vpop.f32.mrb[221].mxu1 }
 0x9e5   :  { %v6389_v62 = vadd.f32 %v17717_v27, %v24511_v9  ;;  %v17720_v48 = vadd.f32 %v17719_v54, %v17718_v2  ;;  %v24644_v28 = vadd.f32 %v17932_v20, %v17931_v15  ;;  %v17934_v18 = vpop.f32.mrb[222].mxu1  ;;  %v20681_v54 = vld [vmem:[%s27025_s3 + $0xa08] ss:$16 sps:$4 sm:$0xff]  }
 0x9e6   :  { %v17935_v9 = vpop.f32.mrb[223].mxu1 }
 0x9e7   :  { %v6392_v39 = vadd.f32 %v17720_v48, %v24513_v25  ;;  %v24647_v33 = vadd.f32 %v17935_v9, %v17934_v18  ;;  %v17953_v0 = vpop.f32.mrb[224].mxu1 }
 0x9e8   :  { %v17954_v25 = vpop.f32.mrb[225].mxu1 }
 0x9e9   :  { %v6402_v26 = vpack.c.bf16 %v6392_v39, %v6389_v62  ;;  %v17955_v27 = vadd.f32 %v17954_v25, %v17953_v0  ;;  %v17956_v2 = vpop.f32.mrb[226].mxu1 }
 0x9ea   :  { %v17957_v45 = vpop.f32.mrb[227].mxu1 }
 0x9eb   :  { %19099 = vmatmul.mubr.msk.bf16.gmra.mrb[108].mxu0 %vm892_vm4, %v6402_v26  ;;  %v24653_v8 = vadd.f32 %v17955_v27, %v24590_v34  ;;  %v17958_v62 = vadd.f32 %v17957_v45, %v17956_v2  ;;  %v17959_v48 = vpop.f32.mrb[228].mxu1 }
 0x9ec   :  { %6895 = vmatprep.mubr.bf16.mxu0 %v20683_v56  ;;  %v17960_v63 = vpop.f32.mrb[229].mxu1 }
 0x9ed   :  { %v24659_v39 = vadd.f32 %v17958_v62, %v24593_v60  ;;  %v17961_v15 = vadd.f32 %v17960_v63, %v17959_v48  ;;  %v17962_v56 = vpop.f32.mrb[230].mxu1  ;;  %v20684_v60 = vld [vmem:[%s27025_s3 + $0xa28] ss:$16 sps:$4 sm:$0xff]  }
 0x9ee   :  { %v17963_v20 = vpop.f32.mrb[231].mxu1 }
 0x9ef   :  { %v24662_v26 = vadd.f32 %v17961_v15, %v24601_v19  ;;  %v17964_v18 = vadd.f32 %v17963_v20, %v17962_v56  ;;  %v17965_v34 = vpop.f32.mrb[232].mxu1 }
 0x9f0   :  { %v17966_v9 = vpop.f32.mrb[233].mxu1 }
 0x9f1   :  { %v24665_v0 = vadd.f32 %v17964_v18, %v24604_v42  ;;  %v17967_v25 = vadd.f32 %v17966_v9, %v17965_v34  ;;  %v17968_v27 = vpop.f32.mrb[234].mxu1  ;;  %v20689_v42 = vld [vmem:[%s27025_s3 + $0xa4c] ss:$16 sps:$4 sm:$0xff]  }
 0x9f2   :  { %v17969_v2 = vpop.f32.mrb[235].mxu1 }
 0x9f3   :  { %6896 = vmatmul.mubr.bf16.vlgmr.msra.gmra.mrb[48].mxu0 %v20681_v54  ;;  %v24673_v19 = vadd.f32 %v17967_v25, %v24613_v49  ;;  %v17970_v54 = vadd.f32 %v17969_v2, %v17968_v27  ;;  %v17971_v62 = vpop.f32.mrb[236].mxu1  ;;  %v20687_v2 = vld [vmem:[%s27025_s3 + $0xa48] ss:$16 sps:$4 sm:$0xff]  }
 0x9f4   :  { %6903 = vmatprep.mubr.bf16.mxu0 %v20686_v1  ;;  %v17972_v48 = vpop.f32.mrb[237].mxu1 }
 0x9f5   :  { %v24679_v1 = vadd.f32 %v17970_v54, %v24616_v61  ;;  %v17973_v63 = vadd.f32 %v17972_v48, %v17971_v62  ;;  %v17974_v15 = vpop.f32.mrb[238].mxu1  ;;  %v20695_v62 = vld [vmem:[%s27025_s3 + $0xa8c] ss:$16 sps:$4 sm:$0xff]   ;;  %v20696_v48 = vld [vmem:[%s27025_s3 + $0xaa8] ss:$16 sps:$4 sm:$0xff]  }
 0x9f6   :  { %v17975_v56 = vpop.f32.mrb[239].mxu1 }
 0x9f7   :  { %v24684_v49 = vadd.f32 %v17973_v63, %v24619_v13  ;;  %v17976_v18 = vadd.f32 %v17975_v56, %v17974_v15  ;;  %v17977_v34 = vpop.f32.mrb[240].mxu1  ;;  %v20692_v13 = vld [vmem:[%s27025_s3 + $0xa6c] ss:$16 sps:$4 sm:$0xff]   ;;  %v20699_v15 = vld [vmem:[%s27025_s3 + $0xac8] ss:$16 sps:$4 sm:$0xff]  }
 0x9f8   :  { %v17978_v9 = vpop.f32.mrb[241].mxu1  ;;  %v20701_v63 = vld [vmem:[%s27025_s3 + $0xacc] ss:$16 sps:$4 sm:$0xff]  }
 0x9f9   :  { %v24687_v25 = vadd.f32 %v17976_v18, %v24622_v32  ;;  %v17979_v27 = vadd.f32 %v17978_v9, %v17977_v34  ;;  %v17980_v61 = vpop.f32.mrb[242].mxu1  ;;  %v20690_v32 = vld [vmem:[%s27025_s3 + $0xa68] ss:$16 sps:$4 sm:$0xff]   ;;  %v20704_v56 = vld [vmem:[%s27025_s3 + $0xaec] ss:$16 sps:$4 sm:$0xff]  }
 0x9fa   :  { %v20702_v18 = vld [vmem:[%s27025_s3 + $0xae8] ss:$16 sps:$4 sm:$0xff]   ;;  %v17981_v9 = vpop.f32.mrb[243].mxu1 }
 0x9fb   :  { %6904 = vmatmul.mubr.bf16.gmra.mrb[52].mxu0 %v20684_v60  ;;  %v24695_v54 = vadd.f32 %v17979_v27, %v24625_v36  ;;  %v20693_v36 = vld [vmem:[%s27025_s3 + $0xa88] ss:$16 sps:$4 sm:$0xff]   ;;  %v20705_v27 = vld [vmem:[%s27027_s4 + $0x140] sm:$0xff]  }
 0x9fc   :  { %6911 = vmatprep.mubr.bf16.mxu0 %v20689_v42  ;;  %v20698_v42 = vld [vmem:[%s27025_s3 + $0xaac] ss:$16 sps:$4 sm:$0xff]   ;;  %19102 = vmatprep.subr.bf16.mxu0 %v20705_v27 }
 0x9fd   :  { %19103 = vmatpush3.bf16.msra.mxu0 %v20705_v27 }
 0xa03   :  { %6912 = vmatmul.mubr.bf16.gmra.mrb[56].mxu0 %v20687_v2  ;;  %v17982_v2 = vadd.f32 %v17981_v9, %v17980_v61  ;;  %v20707_v61 = vld [vmem:[%s27027_s4 + $0x150] sm:$0xff]   ;;  %v20708_v9 = vld [vmem:[%s27027_s4 + $0x158] sm:$0xff]  }
 0xa04   :  { %6919 = vmatprep.mubr.bf16.mxu0 %v20692_v13 }
 0xa05   :  { %v24733_v13 = vadd.f32 %v17982_v2, %v24628_v24 }
 0xa0b   :  { %6920 = vmatmul.mubr.bf16.gmra.mrb[60].mxu0 %v20690_v32  ;;  %v20706_v32 = vld [vmem:[%s27027_s4 + $0x148] sm:$0xff]  }
 0xa0c   :  { %6927 = vmatprep.mubr.bf16.mxu0 %v20695_v62  ;;  %19104 = vmatprep.subr.bf16.mxu0 %v20706_v32 }
 0xa0d   :  { %19105 = vmatpush3.bf16.msra.mxu0 %v20706_v32 }
 0xa0e   :  { %19106 = vmatprep.subr.bf16.mxu0 %v20707_v61 }
 0xa11   :  { %19107 = vmatpush3.bf16.msra.mxu0 %v20707_v61 }
 0xa12   :  { %19108 = vmatprep.subr.bf16.mxu0 %v20708_v9 }
 0xa13   :  { %6928 = vmatmul.mubr.bf16.gmra.mrb[64].mxu0 %v20693_v36  ;;  %v17983_v36 = vpop.f32.mrb[244].mxu1 }
 0xa14   :  { %6935 = vmatprep.mubr.bf16.mxu0 %v20698_v42  ;;  %v17984_v42 = vpop.f32.mrb[245].mxu1 }
 0xa15   :  { %19109 = vmatpush3.bf16.msra.mxu0 %v20708_v9 }
 0xa1b   :  { %6936 = vmatmul.mubr.bf16.gmra.mrb[68].mxu0 %v20696_v48  ;;  %v17985_v48 = vadd.f32 %v17984_v42, %v17983_v36  ;;  %v20709_v42 = vld [vmem:[%s27027_s4 + $0x160] sm:$0xff]  }
 0xa1c   :  { %6943 = vmatprep.mubr.bf16.mxu0 %v20701_v63  ;;  %v17986_v63 = vpop.f32.mrb[246].mxu1  ;;  %19126 = vmatprep.subr.bf16.mxu0 %v20709_v42 }
 0xa1d   :  { %v17987_v24 = vpop.f32.mrb[247].mxu1 }
 0xa1e   :  { %v17989_v2 = vpop.f32.mrb[248].mxu1 }
 0xa1f   :  { %v17990_v32 = vpop.f32.mrb[249].mxu1 }
 0xa20   :  { %v17991_v36 = vadd.f32 %v17990_v32, %v17989_v2 }
 0xa23   :  { %6944 = vmatmul.mubr.bf16.gmra.mrb[72].mxu0 %v20699_v15  ;;  %v24744_v15 = vadd.f32 %v17985_v48, %v24630_v31  ;;  %v17992_v31 = vpop.f32.mrb[250].mxu1 }
 0xa24   :  { %6951 = vmatprep.mubr.bf16.mxu0 %v20704_v56  ;;  %v17988_v56 = vadd.f32 %v17987_v24, %v17986_v63  ;;  %v17993_v48 = vpop.f32.mrb[251].mxu1 }
 0xa25   :  { %v17994_v63 = vadd.f32 %v17993_v48, %v17992_v31 }
 0xa27   :  { %v24761_v61 = vadd.f32 %v17994_v63, %v24639_v17 }
 0xa2b   :  { %6952 = vmatmul.mubr.bf16.gmra.mrb[76].mxu0 %v20702_v18  ;;  %v24747_v18 = vadd.f32 %v17988_v56, %v24633_v11  ;;  %v24758_v11 = vadd.f32 %v17991_v36, %v24636_v37  ;;  %v17995_v56 = vpop.f32.mrb[252].mxu1 }
 0xa2c   :  { %v17996_v9 = vpop.f32.mrb[253].mxu1 }
 0xa2d   :  { %v17997_v2 = vadd.f32 %v17996_v9, %v17995_v56  ;;  %v17998_v32 = vpop.f32.mrb[254].mxu1 }
 0xa2e   :  { %v17999_v27 = vpop.f32.mrb[255].mxu1 }
 0xa2f   :  { %v24766_v62 = vadd.f32 %v17997_v2, %v24644_v28  ;;  %v18000_v60 = vadd.f32 %v17999_v27, %v17998_v32 }
 0xa31   :  { %v24769_v37 = vadd.f32 %v18000_v60, %v24647_v33 }
 0xac6   :  { %v17813_v17 = vpop.f32.mrb[48].mxu0 }
 0xac7   :  { %v17814_v31 = vpop.f32.mrb[49].mxu0 }
 0xac8   :  { %v17815_v48 = vadd.f32 %v17814_v31, %v17813_v17  ;;  %v17816_v63 = vpop.f32.mrb[50].mxu0 }
 0xac9   :  { %v17817_v24 = vpop.f32.mrb[51].mxu0 }
 0xaca   :  { %v6898_v20 = vadd.f32 %v17815_v48, %v24516_v5  ;;  %v17818_v56 = vadd.f32 %v17817_v24, %v17816_v63  ;;  %v20710_v5 = vld [vmem:[%s27027_s4 + $0x168] sm:$0xff]  }
 0xacc   :  { %v6901_v9 = vadd.f32 %v17818_v56, %v24519_v50 }
 0xace   :  { %v6960_v45 = vpack.c.bf16 %v6901_v9, %v6898_v20  ;;  %v17819_v28 = vpop.f32.mrb[52].mxu0 }
 0xacf   :  { %v17820_v2 = vpop.f32.mrb[53].mxu0 }
 0xad0   :  { %v17821_v27 = vadd.f32 %v17820_v2, %v17819_v28  ;;  %v17822_v32 = vpop.f32.mrb[54].mxu0  ;;  %19110 = vmatprep.mubr.msk.bf16.mxu0 %vm892_vm4, %v6960_v45 }
 0xad1   :  { %v17823_v33 = vpop.f32.mrb[55].mxu0 }
 0xad2   :  { %v6906_v60 = vadd.f32 %v17821_v27, %v24521_v29  ;;  %v17824_v36 = vadd.f32 %v17823_v33, %v17822_v32  ;;  %v20711_v29 = vld [vmem:[%s27027_s4 + $0x170] sm:$0xff]   ;;  %v21420_v33 = vld [vmem:[#allocation2 + $0x40] sm:$0xff] }
 0xad4   :  { %v6909_v17 = vadd.f32 %v17824_v36, %v24524_v53 }
 0xad6   :  { %v6961_v31 = vpack.c.bf16 %v6909_v17, %v6906_v60  ;;  %v17825_v34 = vpop.f32.mrb[56].mxu0 }
 0xad7   :  { %v17826_v50 = vpop.f32.mrb[57].mxu0 }
 0xad8   :  { %v17827_v20 = vadd.f32 %v17826_v50, %v17825_v34  ;;  %v17828_v24 = vpop.f32.mrb[58].mxu0  ;;  %19111 = vmatmul.mubr.msk.bf16.vlgmr.msra.gmra.mrb[96].mxu0 %vm892_vm4, %v6961_v31  ;;  %v20712_v34 = vld [vmem:[%s27027_s4 + $0x178] sm:$0xff]   ;;  %v18093_v50 = vpop.f32.mrb[0].mxu1 }
 0xad9   :  { %19127 = vmatpush3.bf16.msra.mxu0 %v20709_v42  ;;  %v17829_v48 = vpop.f32.mrb[59].mxu0 }
 0xada   :  { %v6914_v45 = vadd.f32 %v17827_v20, %v24527_v47  ;;  %v17830_v63 = vadd.f32 %v17829_v48, %v17828_v24  ;;  %19128 = vmatprep.subr.bf16.mxu0 %v20710_v5  ;;  %v18094_v24 = vpop.f32.mrb[1].mxu1 }
 0xadc   :  { %v6917_v53 = vadd.f32 %v17830_v63, %v24530_v7  ;;  %v24797_v63 = vpop.f32.mrb[2].mxu1 }
 0xadd   :  { %19129 = vmatpush3.bf16.msra.mxu0 %v20710_v5 }
 0xade   :  { %v6962_v36 = vpack.c.bf16 %v6917_v53, %v6914_v45  ;;  %v17831_v56 = vpop.f32.mrb[60].mxu0  ;;  %19130 = vmatprep.subr.bf16.mxu0 %v20711_v29  ;;  %v24795_v45 = vadd.f32 %v18094_v24, %v18093_v50 }
 0xadf   :  { %v17832_v42 = vpop.f32.mrb[61].mxu0 }
 0xae0   :  { %v17833_v9 = vadd.f32 %v17832_v42, %v17831_v56  ;;  %v17834_v28 = vpop.f32.mrb[62].mxu0  ;;  %19114 = vmatprep.mubr.msk.bf16.mxu0 %vm892_vm4, %v6962_v36 }
 0xae1   :  { %19131 = vmatpush3.bf16.msra.mxu0 %v20711_v29  ;;  %v17835_v47 = vpop.f32.mrb[63].mxu0 }
 0xae2   :  { %v6922_v2 = vadd.f32 %v17833_v9, %v24532_v4  ;;  %v17836_v27 = vadd.f32 %v17835_v47, %v17834_v28  ;;  %19132 = vmatprep.subr.bf16.mxu0 %v20712_v34 }
 0xae4   :  { %v6925_v7 = vadd.f32 %v17836_v27, %v24535_v12 }
 0xae5   :  { %19133 = vmatpush3.bf16.msra.mxu0 %v20712_v34 }
 0xae6   :  { %v6963_v32 = vpack.c.bf16 %v6925_v7, %v6922_v2  ;;  %18013 = vmatprep.subr.bf16.mxu0 %v21420_v33  ;;  %v17837_v60 = vpop.f32.mrb[64].mxu0 }
 0xae7   :  { %v17838_v17 = vpop.f32.mrb[65].mxu0 }
 0xae8   :  { %v17839_v31 = vadd.f32 %v17838_v17, %v17837_v60  ;;  %v17840_v5 = vpop.f32.mrb[66].mxu0  ;;  %19115 = vmatmul.mubr.msk.bf16.gmra.mrb[100].mxu0 %vm892_vm4, %v6963_v32 }
 0xae9   :  { %v17841_v20 = vpop.f32.mrb[67].mxu0 }
 0xaea   :  { %v6930_v48 = vadd.f32 %v17839_v31, %v24544_v10  ;;  %v17842_v4 = vadd.f32 %v17841_v20, %v17840_v5 }
 0xaec   :  { %v6933_v12 = vadd.f32 %v17842_v4, %v24547_v59 }
 0xaee   :  { %v6964_v29 = vpack.c.bf16 %v6933_v12, %v6930_v48  ;;  %v17843_v53 = vpop.f32.mrb[68].mxu0 }
 0xaef   :  { %v17844_v36 = vpop.f32.mrb[69].mxu0 }
 0xaf0   :  { %v17845_v56 = vadd.f32 %v17844_v36, %v17843_v53  ;;  %v17846_v34 = vpop.f32.mrb[70].mxu0  ;;  %19118 = vmatprep.mubr.msk.bf16.mxu0 %vm892_vm4, %v6964_v29  ;;  %v21421_v29 = vld [vmem:[#allocation2] sm:$0xff]  ;;  %v21423_v53 = vld [vmem:[#allocation2 + $0x8] sm:$0xff]  ;;  %v21424_v36 = vld [vmem:[#allocation2 + $0x50] sm:$0xff] }
 0xaf1   :  { %v17847_v42 = vpop.f32.mrb[71].mxu0 }
 0xaf2   :  { %v6938_v9 = vadd.f32 %v17845_v56, %v24555_v57  ;;  %v17848_v28 = vadd.f32 %v17847_v42, %v17846_v34  ;;  %v27120_v56 = vpack.c.bf16 %v24747_v18, %v24744_v15  ;;  %v20715_v34 = vld [vmem:[%s27025_s3 + $0xc04] ss:$16 sps:$4 sm:$0xff]   ;;  %v27122_v15 = vpack.c.bf16 %v24769_v37, %v24766_v62  ;;  %v20717_v37 = vld [vmem:[%s27027_s4 + $0x188] sm:$0xff]  }
 0xaf3   :  { %v21432_v42 = vld [vmem:[#allocation2 + $0x70] sm:$0xff] }
 0xaf4   :  { %v6941_v10 = vadd.f32 %v17848_v28, %v24558_v44  ;;  %v21433_v18 = vld [vmem:[#allocation2 + $0x30] sm:$0xff]  ;;  %v21435_v28 = vld [vmem:[#allocation2 + $0x38] sm:$0xff] }
 0xaf5   :  { %v20720_v62 = vld [vmem:[%s27025_s3 + $0xc24] ss:$16 sps:$4 sm:$0xff]  }
 0xaf6   :  { %v6965_v47 = vpack.c.bf16 %v6941_v10, %v6938_v9  ;;  %v17849_v2 = vpop.f32.mrb[72].mxu0  ;;  %v20713_v9 = vld [vmem:[%s27025_s3 + $0xc00] ss:$16 sps:$4 sm:$0xff]  }
 0xaf7   :  { %v17850_v27 = vpop.f32.mrb[73].mxu0  ;;  %v20721_v10 = vld [vmem:[%s27027_s4 + $0x190] sm:$0xff]  }
 0xaf8   :  { %v17851_v7 = vadd.f32 %v17850_v27, %v17849_v2  ;;  %v17852_v32 = vpop.f32.mrb[74].mxu0  ;;  %19119 = vmatmul.mubr.msk.bf16.gmra.mrb[104].mxu0 %vm892_vm4, %v6965_v47  ;;  %v20718_v47 = vld [vmem:[%s27025_s3 + $0xc20] ss:$16 sps:$4 sm:$0xff]   ;;  %v20725_v2 = vld [vmem:[%s27025_s3 + $0xc44] ss:$16 sps:$4 sm:$0xff]   ;;  %v20722_v27 = vld [vmem:[%s27027_s4 + $0x198] sm:$0xff]  }
 0xaf9   :  { %v17853_v59 = vpop.f32.mrb[75].mxu0 }
 0xafa   :  { %v6946_v33 = vadd.f32 %v17851_v7, %v24567_v6  ;;  %v17854_v60 = vadd.f32 %v17853_v59, %v17852_v32  ;;  %v27115_v6 = vpack.c.bf16 %v24659_v39, %v24653_v8  ;;  %v27118_v8 = vpack.c.bf16 %v24687_v25, %v24684_v49  ;;  %v21425_v39 = vld [vmem:[#allocation2 + $0x10] sm:$0xff]  ;;  %v21429_v49 = vld [vmem:[#allocation2 + $0x20] sm:$0xff] }
 0xafb   :  { %v27121_v25 = vpack.c.bf16 %v24761_v61, %v24758_v11  ;;  %v21434_v11 = vld [vmem:[#allocation2 + $0x78] sm:$0xff]  ;;  %v20716_v61 = vld [vmem:[%s27027_s4 + $0x180] sm:$0xff]  }
 0xafc   :  { %v6949_v17 = vadd.f32 %v17854_v60, %v24570_v55  ;;  %v27116_v55 = vpack.c.bf16 %v24665_v0, %v24662_v26  ;;  %v27119_v26 = vpack.c.bf16 %v24733_v13, %v24695_v54  ;;  %v21426_v0 = vld [vmem:[#allocation2 + $0x58] sm:$0xff]  ;;  %v21430_v54 = vld [vmem:[#allocation2 + $0x68] sm:$0xff]  ;;  %v20723_v7 = vld [vmem:[%s27025_s3 + $0xc40] ss:$16 sps:$4 sm:$0xff]  }
 0xafd   :  { %v21431_v13 = vld [vmem:[#allocation2 + $0x28] sm:$0xff]  ;;  %v20728_v32 = vld [vmem:[%s27025_s3 + $0xc64] ss:$16 sps:$4 sm:$0xff]  }
 0xafe   :  { %v6966_v31 = vpack.c.bf16 %v6949_v17, %v6946_v33  ;;  %v17855_v5 = vpop.f32.mrb[76].mxu0  ;;  %v24875_v59 = vld [vmem:[#allocation2 + $0xc0] sm:$0xff] }
 0xaff   :  { %v17856_v50 = vpop.f32.mrb[77].mxu0  ;;  %v20726_v33 = vld [vmem:[%s27025_s3 + $0xc60] ss:$16 sps:$4 sm:$0xff]   ;;  %v20731_v60 = vld [vmem:[%s27025_s3 + $0xc84] ss:$16 sps:$4 sm:$0xff]  }
 0xb00   :  { %v17857_v57 = vadd.f32 %v17856_v50, %v17855_v5  ;;  %v17858_v20 = vpop.f32.mrb[78].mxu0  ;;  %19122 = vmatprep.mubr.msk.bf16.mxu0 %vm892_vm4, %v6966_v31  ;;  %v20729_v17 = vld [vmem:[%s27025_s3 + $0xc80] ss:$16 sps:$4 sm:$0xff]   ;;  %v20734_v31 = vld [vmem:[%s27025_s3 + $0xca4] ss:$16 sps:$4 sm:$0xff]  }
 0xb01   :  { %v17859_v44 = vpop.f32.mrb[79].mxu0  ;;  %v20732_v5 = vld [vmem:[%s27025_s3 + $0xca0] ss:$16 sps:$4 sm:$0xff]   ;;  %v20737_v50 = vld [vmem:[%s27025_s3 + $0xcc4] ss:$16 sps:$4 sm:$0xff]  }
 0xb02   :  { %v6954_v24 = vadd.f32 %v17857_v57, %v24578_v14  ;;  %v17860_v48 = vadd.f32 %v17859_v44, %v17858_v20  ;;  %v27117_v14 = vpack.c.bf16 %v24679_v1, %v24673_v19  ;;  %v21427_v19 = vld [vmem:[#allocation2 + $0x18] sm:$0xff]  ;;  %v21428_v1 = vld [vmem:[#allocation2 + $0x60] sm:$0xff] }
 0xb03   :  { %v20735_v57 = vld [vmem:[%s27025_s3 + $0xcc0] ss:$16 sps:$4 sm:$0xff]   ;;  %v20740_v20 = vld [vmem:[%s27025_s3 + $0xce4] ss:$16 sps:$4 sm:$0xff]  }
 0xb04   :  { %v6957_v4 = vadd.f32 %v17860_v48, %v24581_v38  ;;  %v21422_v38 = vld [vmem:[#allocation2 + $0x48] sm:$0xff]  ;;  %v20738_v44 = vld [vmem:[%s27025_s3 + $0xce0] ss:$16 sps:$4 sm:$0xff]  }
 0xb06   :  { %v6967_v12 = vpack.c.bf16 %v6957_v4, %v6954_v24  ;;  %v18097_v24 = vpop.f32.mrb[3].mxu1 }
 0xb07   :  { %v18098_v48 = vadd.f32 %v18097_v24, %v24797_v63  ;;  %v18099_v4 = vpop.f32.mrb[4].mxu1  ;;  %v20769_v24 = vld [vmem:[%s27025_s3 + $0xf20] ss:$16 sps:$4 sm:$0xff]  }
 0xb08   :  { %19123 = vmatmul.mubr.msk.bf16.gmra.mrb[108].mxu0 %vm892_vm4, %v6967_v12  ;;  %v18100_v12 = vpop.f32.mrb[5].mxu1 }
 0xb09   :  { %19134 = vmatprep.mubr.msk.bf16.mxu0 %vm892_vm4, %v27115_v6  ;;  %v24906_v6 = vadd.f32 %v18100_v12, %v18099_v4  ;;  %v20771_v4 = vld [vmem:[%s27025_s3 + $0xf24] ss:$16 sps:$4 sm:$0xff]  }
 0xb0a   :  { %9631 = vmatprep.mubr.bf16.mxu1 %v20771_v4 }
 0xb0b   :  { %9632 = vmatmul.mubr.bf16.gmra.mrb[100].mxu1 %v20769_v24 }
 0xb10   :  { %19135 = vmatmul.mubr.msk.bf16.vlgmr.msra.gmra.mrb[96].mxu0 %vm892_vm4, %v27116_v55  ;;  %v18102_v55 = vpop.f32.mrb[6].mxu1 }
 0xb11   :  { %18014 = vmatpush3.bf16.msra.mxu0 %v21421_v29  ;;  %19138 = vmatprep.mubr.msk.bf16.mxu0 %vm892_vm4, %v27117_v14  ;;  %v18103_v29 = vpop.f32.mrb[7].mxu1 }
 0xb12   :  { %18015 = vmatprep.subr.bf16.mxu0 %v21422_v38  ;;  %v24908_v14 = vadd.f32 %v18103_v29, %v18102_v55  ;;  %v18105_v38 = vpop.f32.mrb[8].mxu1  ;;  %v20774_v29 = vld [vmem:[%s27025_s3 + $0xf44] ss:$16 sps:$4 sm:$0xff]  }
 0xb13   :  { %9639 = vmatprep.mubr.bf16.mxu1 %v20774_v29 }
 0xb15   :  { %18016 = vmatpush3.bf16.msra.mxu0 %v21423_v53  ;;  %v18106_v53 = vpop.f32.mrb[9].mxu1 }
 0xb16   :  { %18017 = vmatprep.subr.bf16.mxu0 %v21424_v36  ;;  %v24910_v36 = vadd.f32 %v18106_v53, %v18105_v38 }
 0xb18   :  { %19139 = vmatmul.mubr.msk.bf16.gmra.mrb[100].mxu0 %vm892_vm4, %v27118_v8  ;;  %v18108_v8 = vpop.f32.mrb[10].mxu1 }
 0xb19   :  { %18018 = vmatpush3.bf16.msra.mxu0 %v21425_v39  ;;  %19142 = vmatprep.mubr.msk.bf16.mxu0 %vm892_vm4, %v27119_v26  ;;  %v18109_v39 = vpop.f32.mrb[11].mxu1 }
 0xb1a   :  { %18019 = vmatprep.subr.bf16.mxu0 %v21426_v0  ;;  %v24912_v26 = vadd.f32 %v18109_v39, %v18108_v8  ;;  %v18111_v0 = vpop.f32.mrb[12].mxu1 }
 0xb1d   :  { %18020 = vmatpush3.bf16.msra.mxu0 %v21427_v19  ;;  %v18112_v19 = vpop.f32.mrb[13].mxu1 }
 0xb1e   :  { %18021 = vmatprep.subr.bf16.mxu0 %v21428_v1  ;;  %v24914_v1 = vadd.f32 %v18112_v19, %v18111_v0  ;;  %v18114_v63 = vpop.f32.mrb[14].mxu1 }
 0xb20   :  { %19143 = vmatmul.mubr.msk.bf16.gmra.mrb[104].mxu0 %vm892_vm4, %v27120_v56  ;;  %v18115_v56 = vpop.f32.mrb[15].mxu1 }
 0xb21   :  { %18022 = vmatpush3.bf16.msra.mxu0 %v21429_v49  ;;  %19146 = vmatprep.mubr.msk.bf16.mxu0 %vm892_vm4, %v27121_v25  ;;  %v24916_v49 = vadd.f32 %v18115_v56, %v18114_v63  ;;  %v18117_v25 = vpop.f32.mrb[16].mxu1 }
 0xb22   :  { %18023 = vmatprep.subr.bf16.mxu0 %v21430_v54  ;;  %v18118_v54 = vpop.f32.mrb[17].mxu1 }
 0xb25   :  { %18024 = vmatpush3.bf16.msra.mxu0 %v21431_v13  ;;  %v24918_v13 = vadd.f32 %v18118_v54, %v18117_v25 }
 0xb26   :  { %18025 = vmatprep.subr.bf16.mxu0 %v21432_v42 }
 0xb28   :  { %19147 = vmatmul.mubr.msk.bf16.gmra.mrb[108].mxu0 %vm892_vm4, %v27122_v15 }
 0xb29   :  { %18026 = vmatpush3.bf16.msra.mxu0 %v21433_v18  ;;  %7928 = vmatprep.mubr.bf16.mxu0 %v20715_v34  ;;  %v18120_v34 = vpop.f32.mrb[18].mxu1 }
 0xb2a   :  { %18027 = vmatprep.subr.bf16.mxu0 %v21434_v11  ;;  %v18121_v42 = vpop.f32.mrb[19].mxu1 }
 0xb2b   :  { %v24920_v15 = vadd.f32 %v18121_v42, %v18120_v34  ;;  %v18123_v18 = vpop.f32.mrb[20].mxu1  ;;  %v20772_v42 = vld [vmem:[%s27025_s3 + $0xf40] ss:$16 sps:$4 sm:$0xff]  }
 0xb2c   :  { %v18124_v11 = vpop.f32.mrb[21].mxu1  ;;  %9640 = vmatmul.mubr.bf16.gmra.mrb[104].mxu1 %v20772_v42 }
 0xb2d   :  { %18028 = vmatpush3.bf16.msra.mxu0 %v21435_v28 }
 0xb2e   :  { %19150 = vmatprep.subr.bf16.mxu0 %v20716_v61 }
 0xb30   :  { %7929 = vmatmul.mubr.bf16.vlgmr.msra.gmra.mrb[80].mxu0 %v20713_v9  ;;  %v18126_v9 = vpop.f32.mrb[22].mxu1 }
 0xb31   :  { %19151 = vmatpush3.bf16.msra.mxu0 %v20716_v61  ;;  %7936 = vmatprep.mubr.bf16.mxu0 %v20720_v62  ;;  %v24922_v61 = vadd.f32 %v18124_v11, %v18123_v18  ;;  %v18127_v28 = vpop.f32.mrb[23].mxu1  ;;  %v20777_v11 = vld [vmem:[%s27025_s3 + $0xf64] ss:$16 sps:$4 sm:$0xff]  }
 0xb32   :  { %19152 = vmatprep.subr.bf16.mxu0 %v20717_v37  ;;  %v24924_v62 = vadd.f32 %v18127_v28, %v18126_v9  ;;  %9647 = vmatprep.mubr.bf16.mxu1 %v20777_v11 }
 0xb35   :  { %19153 = vmatpush3.bf16.msra.mxu0 %v20717_v37  ;;  %v18129_v37 = vpop.f32.mrb[24].mxu1 }
 0xb36   :  { %19154 = vmatprep.subr.bf16.mxu0 %v20721_v10 }
 0xb38   :  { %7937 = vmatmul.mubr.bf16.gmra.mrb[84].mxu0 %v20718_v47 }
 0xb39   :  { %19155 = vmatpush3.bf16.msra.mxu0 %v20721_v10  ;;  %7944 = vmatprep.mubr.bf16.mxu0 %v20725_v2  ;;  %v18130_v10 = vpop.f32.mrb[25].mxu1 }
 0xb3a   :  { %19156 = vmatprep.subr.bf16.mxu0 %v20722_v27  ;;  %v24926_v47 = vadd.f32 %v18130_v10, %v18129_v37  ;;  %v18132_v2 = vpop.f32.mrb[26].mxu1 }
 0xb3d   :  { %19157 = vmatpush3.bf16.msra.mxu0 %v20722_v27  ;;  %v18133_v27 = vpop.f32.mrb[27].mxu1 }
 0xb3e   :  { %18217 = vmatprep.subr.bf16.mxu0 %v24875_v59 }
 0xb40   :  { %7945 = vmatmul.mubr.bf16.gmra.mrb[88].mxu0 %v20723_v7  ;;  %v24928_v7 = vadd.f32 %v18133_v27, %v18132_v2 }
 0xb41   :  { %7952 = vmatprep.mubr.bf16.mxu0 %v20728_v32  ;;  %v18135_v32 = vpop.f32.mrb[28].mxu1 }
 0xb48   :  { %7953 = vmatmul.mubr.bf16.gmra.mrb[92].mxu0 %v20726_v33  ;;  %v18136_v33 = vpop.f32.mrb[29].mxu1 }
 0xb49   :  { %7960 = vmatprep.mubr.bf16.mxu0 %v20731_v60  ;;  %v24930_v60 = vadd.f32 %v18136_v33, %v18135_v32  ;;  %v20775_v32 = vld [vmem:[%s27025_s3 + $0xf60] ss:$16 sps:$4 sm:$0xff]  }
 0xb4a   :  { %9648 = vmatmul.mubr.bf16.gmra.mrb[108].mxu1 %v20775_v32  ;;  %v20753_v32 = vld [vmem:[%s27025_s3 + $0xd4c] ss:$16 sps:$4 sm:$0xff]  }
 0xb50   :  { %7961 = vmatmul.mubr.bf16.gmra.mrb[112].mxu0 %v20729_v17  ;;  %v18138_v17 = vpop.f32.mrb[30].mxu1 }
 0xb51   :  { %7968 = vmatprep.mubr.bf16.mxu0 %v20734_v31  ;;  %v18139_v31 = vpop.f32.mrb[31].mxu1 }
 0xb52   :  { %v18169_v12 = vpop.f32.mrb[32].mxu1 }
 0xb53   :  { %v18170_v38 = vpop.f32.mrb[33].mxu1 }
 0xb54   :  { %v24944_v39 = vadd.f32 %v18170_v38, %v18169_v12  ;;  %v18172_v0 = vpop.f32.mrb[34].mxu1 }
 0xb55   :  { %v18173_v19 = vpop.f32.mrb[35].mxu1 }
 0xb56   :  { %v24946_v56 = vadd.f32 %v18173_v19, %v18172_v0 }
 0xb58   :  { %7969 = vmatmul.mubr.bf16.gmra.mrb[116].mxu0 %v20732_v5  ;;  %v24932_v5 = vadd.f32 %v18139_v31, %v18138_v17 }
 0xb59   :  { %7976 = vmatprep.mubr.bf16.mxu0 %v20737_v50 }
 0xb60   :  { %7977 = vmatmul.mubr.bf16.gmra.mrb[120].mxu0 %v20735_v57 }
 0xb61   :  { %7984 = vmatprep.mubr.bf16.mxu0 %v20740_v20 }
 0xb68   :  { %7985 = vmatmul.mubr.bf16.gmra.mrb[124].mxu0 %v20738_v44 }
 0xc03   :  { %v18029_v50 = vpop.f32.mrb[80].mxu0 }
 0xc04   :  { %v18030_v57 = vpop.f32.mrb[81].mxu0 }
 0xc05   :  { %v18031_v20 = vadd.f32 %v18030_v57, %v18029_v50  ;;  %v18032_v44 = vpop.f32.mrb[82].mxu0 }
 0xc06   :  { %v18033_v55 = vpop.f32.mrb[83].mxu0 }
 0xc07   :  { %v8028_v53 = vadd.f32 %v24795_v45, %v18031_v20  ;;  %v18034_v8 = vadd.f32 %v18033_v55, %v18032_v44 }
 0xc09   :  { %v8031_v63 = vadd.f32 %v18098_v48, %v18034_v8 }
 0xc0b   :  { %v8090_v25 = vpack.c.bf16 %v8031_v63, %v8028_v53  ;;  %v18035_v54 = vpop.f32.mrb[84].mxu0 }
 0xc0c   :  { %v18036_v34 = vpop.f32.mrb[85].mxu0 }
 0xc0d   :  { %v18037_v18 = vadd.f32 %v18036_v34, %v18035_v54  ;;  %v18038_v45 = vpop.f32.mrb[86].mxu0  ;;  %19158 = vmatprep.mubr.msk.bf16.mxu0 %vm892_vm4, %v8090_v25 }
 0xc0e   :  { %v18039_v9 = vpop.f32.mrb[87].mxu0 }
 0xc0f   :  { %v8036_v48 = vadd.f32 %v24906_v6, %v18037_v18  ;;  %v18040_v28 = vadd.f32 %v18039_v9, %v18038_v45 }
 0xc11   :  { %v8039_v37 = vadd.f32 %v24908_v14, %v18040_v28 }
 0xc13   :  { %v8091_v10 = vpack.c.bf16 %v8039_v37, %v8036_v48  ;;  %v18041_v2 = vpop.f32.mrb[88].mxu0 }
 0xc14   :  { %v18042_v27 = vpop.f32.mrb[89].mxu0 }
 0xc15   :  { %v18043_v33 = vadd.f32 %v18042_v27, %v18041_v2  ;;  %v18044_v17 = vpop.f32.mrb[90].mxu0  ;;  %19159 = vmatmul.mubr.msk.bf16.vlgmr.msra.gmra.mrb[96].mxu0 %vm892_vm4, %v8091_v10  ;;  %v20748_v2 = vld [vmem:[%s27025_s3 + $0xd2c] ss:$16 sps:$4 sm:$0xff]   ;;  %v20746_v27 = vld [vmem:[%s27025_s3 + $0xd28] ss:$16 sps:$4 sm:$0xff]  }
 0xc16   :  { %18218 = vmatpush3.bf16.msra.mxu0 %v24537_v23  ;;  %v18045_v31 = vpop.f32.mrb[91].mxu0 }
 0xc17   :  { %v8044_v6 = vadd.f32 %v24910_v36, %v18043_v33  ;;  %v18046_v50 = vadd.f32 %v18045_v31, %v18044_v17  ;;  %18219 = vmatprep.subr.bf16.mxu0 %v24541_v35  ;;  %v20750_v33 = vld [vmem:[%s27027_s4 + $0x1b8] sm:$0xff]  }
 0xc18   :  { %v20751_v17 = vld [vmem:[%s27025_s3 + $0xd48] ss:$16 sps:$4 sm:$0xff]   ;;  %v20756_v31 = vld [vmem:[%s27025_s3 + $0xd6c] ss:$16 sps:$4 sm:$0xff]  }
 0xc19   :  { %v8047_v14 = vadd.f32 %v24912_v26, %v18046_v50  ;;  %v20759_v50 = vld [vmem:[%s27025_s3 + $0xd8c] ss:$16 sps:$4 sm:$0xff]  }
 0xc1a   :  { %18220 = vmatpush3.bf16.msra.mxu0 %v24549_v41 }
 0xc1b   :  { %v8092_v57 = vpack.c.bf16 %v8047_v14, %v8044_v6  ;;  %18221 = vmatprep.subr.bf16.mxu0 %v24552_v21  ;;  %v18047_v20 = vpop.f32.mrb[92].mxu0  ;;  %v20754_v6 = vld [vmem:[%s27025_s3 + $0xd68] ss:$16 sps:$4 sm:$0xff]  }
 0xc1c   :  { %v18048_v44 = vpop.f32.mrb[93].mxu0  ;;  %v20757_v14 = vld [vmem:[%s27025_s3 + $0xd88] ss:$16 sps:$4 sm:$0xff]  }
 0xc1d   :  { %v18049_v24 = vadd.f32 %v18048_v44, %v18047_v20  ;;  %v18050_v4 = vpop.f32.mrb[94].mxu0  ;;  %19162 = vmatprep.mubr.msk.bf16.mxu0 %vm892_vm4, %v8092_v57  ;;  %v20760_v57 = vld [vmem:[%s27025_s3 + $0xda8] ss:$16 sps:$4 sm:$0xff]   ;;  %v20765_v20 = vld [vmem:[%s27025_s3 + $0xdcc] ss:$16 sps:$4 sm:$0xff]  }
 0xc1e   :  { %18222 = vmatpush3.bf16.msra.mxu0 %v24560_v22  ;;  %v18051_v23 = vpop.f32.mrb[95].mxu0  ;;  %v20763_v44 = vld [vmem:[%s27025_s3 + $0xdc8] ss:$16 sps:$4 sm:$0xff]  }
 0xc1f   :  { %v8052_v36 = vadd.f32 %v24914_v1, %v18049_v24  ;;  %v18052_v35 = vadd.f32 %v18051_v23, %v18050_v4  ;;  %18223 = vmatprep.subr.bf16.mxu0 %v24564_v51  ;;  %v20768_v24 = vld [vmem:[%s27025_s3 + $0xdec] ss:$16 sps:$4 sm:$0xff]   ;;  %v20766_v4 = vld [vmem:[%s27025_s3 + $0xde8] ss:$16 sps:$4 sm:$0xff]   ;;  %v20780_v23 = vld [vmem:[%s27025_s3 + $0xf84] ss:$16 sps:$4 sm:$0xff]  }
 0xc20   :  { %9655 = vmatprep.mubr.bf16.mxu1 %v20780_v23  ;;  %v20808_v23 = vld [vmem:[%s27025_s3 + $0xfa8] ss:$16 sps:$4 sm:$0xff]  }
 0xc21   :  { %v8055_v26 = vadd.f32 %v24916_v49, %v18052_v35  ;;  %v20778_v35 = vld [vmem:[%s27025_s3 + $0xf80] ss:$16 sps:$4 sm:$0xff]  }
 0xc22   :  { %18224 = vmatpush3.bf16.msra.mxu0 %v24572_v16  ;;  %9656 = vmatmul.mubr.bf16.gmra.mrb[112].mxu1 %v20778_v35  ;;  %v20814_v35 = vld [vmem:[%s27025_s3 + $0xfc8] ss:$16 sps:$4 sm:$0xff]  }
 0xc23   :  { %v8093_v41 = vpack.c.bf16 %v8055_v26, %v8052_v36  ;;  %18225 = vmatprep.subr.bf16.mxu0 %v24575_v46  ;;  %v18053_v21 = vpop.f32.mrb[112].mxu0  ;;  %v18175_v36 = vpop.f32.mrb[36].mxu1 }
 0xc24   :  { %v18054_v12 = vpop.f32.mrb[113].mxu0  ;;  %v18176_v26 = vpop.f32.mrb[37].mxu1 }
 0xc25   :  { %v18055_v55 = vadd.f32 %v18054_v12, %v18053_v21  ;;  %v18056_v29 = vpop.f32.mrb[114].mxu0  ;;  %19163 = vmatmul.mubr.msk.bf16.gmra.mrb[100].mxu0 %vm892_vm4, %v8093_v41  ;;  %v25063_v41 = vadd.f32 %v18176_v26, %v18175_v36  ;;  %v18178_v21 = vpop.f32.mrb[38].mxu1  ;;  %v20816_v36 = vld [vmem:[%s27025_s3 + $0xfcc] ss:$16 sps:$4 sm:$0xff]  }
 0xc26   :  { %18226 = vmatpush3.bf16.msra.mxu0 %v24583_v58  ;;  %v18057_v22 = vpop.f32.mrb[115].mxu0  ;;  %v18179_v12 = vpop.f32.mrb[39].mxu1  ;;  %v20822_v26 = vld [vmem:[%s27025_s3 + $0xfec] ss:$16 sps:$4 sm:$0xff]  }
 0xc27   :  { %v8060_v1 = vadd.f32 %v24918_v13, %v18055_v55  ;;  %v18058_v38 = vadd.f32 %v18057_v22, %v18056_v29  ;;  %18227 = vmatprep.subr.bf16.mxu0 %v24587_v3  ;;  %v20744_v3 = vld [vmem:[%s27027_s4 + $0x1a0] sm:$0xff]   ;;  %v25065_v55 = vadd.f32 %v18179_v12, %v18178_v21  ;;  %v18181_v22 = vpop.f32.mrb[40].mxu1  ;;  %v20820_v21 = vld [vmem:[%s27025_s3 + $0xfe8] ss:$16 sps:$4 sm:$0xff]  }
 0xc28   :  { %v20783_v29 = vld [vmem:[%s27025_s3 + $0xfa4] ss:$16 sps:$4 sm:$0xff]  }
 0xc29   :  { %v8063_v51 = vadd.f32 %v24920_v15, %v18058_v38  ;;  %v18182_v38 = vpop.f32.mrb[41].mxu1  ;;  %9663 = vmatprep.mubr.bf16.mxu1 %v20783_v29 }
 0xc2a   :  { %18228 = vmatpush3.bf16.msra.mxu0 %v24595_v30 }
 0xc2b   :  { %v8094_v16 = vpack.c.bf16 %v8063_v51, %v8060_v1  ;;  %18229 = vmatprep.subr.bf16.mxu0 %v24598_v43  ;;  %v18059_v46 = vpop.f32.mrb[116].mxu0  ;;  %v24989_v43 = vld [vmem:[#allocation2 + $0xb8] sm:$0xff]  ;;  %v20781_v1 = vld [vmem:[%s27025_s3 + $0xfa0] ss:$16 sps:$4 sm:$0xff]   ;;  %v25073_v51 = vadd.f32 %v18182_v38, %v18181_v22 }
 0xc2c   :  { %v18060_v49 = vpop.f32.mrb[117].mxu0  ;;  %9664 = vmatmul.mubr.bf16.gmra.mrb[116].mxu1 %v20781_v1 }
 0xc2d   :  { %v18061_v53 = vadd.f32 %v18060_v49, %v18059_v46  ;;  %v18062_v8 = vpop.f32.mrb[118].mxu0  ;;  %19166 = vmatprep.mubr.msk.bf16.mxu0 %vm892_vm4, %v8094_v16  ;;  %v18184_v16 = vpop.f32.mrb[42].mxu1 }
 0xc2e   :  { %18230 = vmatpush3.bf16.msra.mxu0 %v24606_v52  ;;  %v18063_v58 = vpop.f32.mrb[119].mxu0  ;;  %v18185_v46 = vpop.f32.mrb[43].mxu1 }
 0xc2f   :  { %v8068_v13 = vadd.f32 %v24922_v61, %v18061_v53  ;;  %v18064_v0 = vadd.f32 %v18063_v58, %v18062_v8  ;;  %18231 = vmatprep.subr.bf16.mxu0 %v24610_v40  ;;  %v25075_v49 = vadd.f32 %v18185_v46, %v18184_v16  ;;  %v20786_v53 = vld [vmem:[%s27025_s3 + $0xfc4] ss:$16 sps:$4 sm:$0xff]   ;;  %v18187_v8 = vpop.f32.mrb[44].mxu1  ;;  %v20784_v58 = vld [vmem:[%s27025_s3 + $0xfc0] ss:$16 sps:$4 sm:$0xff]  }
 0xc30   :  { %9671 = vmatprep.mubr.bf16.mxu1 %v20786_v53 }
 0xc31   :  { %v8071_v30 = vadd.f32 %v24924_v62, %v18064_v0 }
 0xc32   :  { %18232 = vmatpush3.bf16.msra.mxu0 %v24989_v43 }
 0xc33   :  { %v8095_v15 = vpack.c.bf16 %v8071_v30, %v8068_v13  ;;  %v18065_v19 = vpop.f32.mrb[120].mxu0  ;;  %19174 = vmatprep.subr.bf16.mxu0 %v20744_v3  ;;  %v18188_v13 = vpop.f32.mrb[45].mxu1 }
 0xc34   :  { %v18066_v52 = vpop.f32.mrb[121].mxu0  ;;  %v25083_v0 = vadd.f32 %v18188_v13, %v18187_v8  ;;  %9672 = vmatmul.mubr.bf16.gmra.mrb[120].mxu1 %v20784_v58 }
 0xc35   :  { %v18067_v63 = vadd.f32 %v18066_v52, %v18065_v19  ;;  %v18068_v25 = vpop.f32.mrb[122].mxu0  ;;  %19167 = vmatmul.mubr.msk.bf16.gmra.mrb[104].mxu0 %vm892_vm4, %v8095_v15  ;;  %v20789_v19 = vld [vmem:[%s27025_s3 + $0xfe4] ss:$16 sps:$4 sm:$0xff]  }
 0xc36   :  { %v18069_v61 = vpop.f32.mrb[123].mxu0  ;;  %9679 = vmatprep.mubr.bf16.mxu1 %v20789_v19 }
 0xc37   :  { %v8076_v40 = vadd.f32 %v24926_v47, %v18067_v63  ;;  %v18070_v54 = vadd.f32 %v18069_v61, %v18068_v25  ;;  %v20743_v47 = vld [vmem:[%s27025_s3 + $0xd0c] ss:$16 sps:$4 sm:$0xff]   ;;  %v20787_v63 = vld [vmem:[%s27025_s3 + $0xfe0] ss:$16 sps:$4 sm:$0xff]  }
 0xc39   :  { %v8079_v34 = vadd.f32 %v24928_v7, %v18070_v54  ;;  %v20741_v7 = vld [vmem:[%s27025_s3 + $0xd08] ss:$16 sps:$4 sm:$0xff]  }
 0xc3b   :  { %v8096_v42 = vpack.c.bf16 %v8079_v34, %v8076_v40  ;;  %v18071_v62 = vpop.f32.mrb[124].mxu0 }
 0xc3c   :  { %v18072_v18 = vpop.f32.mrb[125].mxu0  ;;  %9680 = vmatmul.mubr.bf16.gmra.mrb[124].mxu1 %v20787_v63 }
 0xc3d   :  { %v18073_v45 = vadd.f32 %v18072_v18, %v18071_v62  ;;  %v18074_v11 = vpop.f32.mrb[126].mxu0  ;;  %19170 = vmatprep.mubr.msk.bf16.mxu0 %vm892_vm4, %v8096_v42  ;;  %v20792_v42 = vld [vmem:[%s27025_s3 + $0xf0c] ss:$16 sps:$4 sm:$0xff]   ;;  %v20790_v18 = vld [vmem:[%s27025_s3 + $0xf08] ss:$16 sps:$4 sm:$0xff]  }
 0xc3e   :  { %v18075_v9 = vpop.f32.mrb[127].mxu0  ;;  %9720 = vmatprep.mubr.bf16.mxu1 %v20792_v42 }
 0xc3f   :  { %v8084_v48 = vadd.f32 %v24930_v60, %v18073_v45  ;;  %v18076_v28 = vadd.f32 %v18075_v9, %v18074_v11  ;;  %v20745_v60 = vld [vmem:[%s27027_s4 + $0x1a8] sm:$0xff]  }
 0xc41   :  { %v8087_v37 = vadd.f32 %v24932_v5, %v18076_v28  ;;  %v20749_v5 = vld [vmem:[%s27027_s4 + $0x1b0] sm:$0xff]  }
 0xc43   :  { %v8097_v10 = vpack.c.bf16 %v8087_v37, %v8084_v48  ;;  %v20795_v37 = vld [vmem:[%s27025_s3 + $0xf2c] ss:$16 sps:$4 sm:$0xff]  }
 0xc44   :  { %9721 = vmatmul.mubr.bf16.vlgmr.msra.gmra.mrb[128].mxu1 %v20790_v18 }
 0xc45   :  { %19171 = vmatmul.mubr.msk.bf16.gmra.mrb[108].mxu0 %vm892_vm4, %v8097_v10  ;;  %v20793_v10 = vld [vmem:[%s27025_s3 + $0xf28] ss:$16 sps:$4 sm:$0xff]   ;;  %9728 = vmatprep.mubr.bf16.mxu1 %v20795_v37 }
 0xc46   :  { %8590 = vmatprep.mubr.bf16.mxu0 %v20743_v47 }
 0xc4c   :  { %9729 = vmatmul.mubr.bf16.gmra.mrb[132].mxu1 %v20793_v10 }
 0xc4d   :  { %8591 = vmatmul.mubr.bf16.vlgmr.msra.gmra.mrb[128].mxu0 %v20741_v7 }
 0xc4e   :  { %19175 = vmatpush3.bf16.msra.mxu0 %v20744_v3  ;;  %8598 = vmatprep.mubr.bf16.mxu0 %v20748_v2  ;;  %v18190_v3 = vpop.f32.mrb[46].mxu1 }
 0xc4f   :  { %19176 = vmatprep.subr.bf16.mxu0 %v20745_v60  ;;  %v18191_v30 = vpop.f32.mrb[47].mxu1 }
 0xc50   :  { %v25085_v15 = vadd.f32 %v18191_v30, %v18190_v3  ;;  %v18193_v52 = vpop.f32.mrb[48].mxu1 }
 0xc51   :  { %v18194_v25 = vpop.f32.mrb[49].mxu1 }
 0xc52   :  { %19177 = vmatpush3.bf16.msra.mxu0 %v20745_v60  ;;  %v25093_v61 = vadd.f32 %v18194_v25, %v18193_v52  ;;  %v18196_v40 = vpop.f32.mrb[50].mxu1 }
 0xc53   :  { %19178 = vmatprep.subr.bf16.mxu0 %v20749_v5  ;;  %v18197_v54 = vpop.f32.mrb[51].mxu1 }
 0xc54   :  { %v25095_v34 = vadd.f32 %v18197_v54, %v18196_v40  ;;  %v18199_v62 = vpop.f32.mrb[52].mxu1 }
 0xc55   :  { %8599 = vmatmul.mubr.bf16.gmra.mrb[132].mxu0 %v20746_v27  ;;  %v18200_v45 = vpop.f32.mrb[53].mxu1 }
 0xc56   :  { %19179 = vmatpush3.bf16.msra.mxu0 %v20749_v5  ;;  %8606 = vmatprep.mubr.bf16.mxu0 %v20753_v32  ;;  %v25103_v11 = vadd.f32 %v18200_v45, %v18199_v62  ;;  %v18202_v9 = vpop.f32.mrb[54].mxu1  ;;  %v20798_v32 = vld [vmem:[%s27025_s3 + $0xf4c] ss:$16 sps:$4 sm:$0xff]  }
 0xc57   :  { %19180 = vmatprep.subr.bf16.mxu0 %v20750_v33  ;;  %v18203_v48 = vpop.f32.mrb[55].mxu1  ;;  %9736 = vmatprep.mubr.bf16.mxu1 %v20798_v32 }
 0xc58   :  { %v25105_v28 = vadd.f32 %v18203_v48, %v18202_v9  ;;  %v18205_v47 = vpop.f32.mrb[56].mxu1 }
 0xc59   :  { %v18206_v7 = vpop.f32.mrb[57].mxu1 }
 0xc5a   :  { %19181 = vmatpush3.bf16.msra.mxu0 %v20750_v33  ;;  %v25113_v2 = vadd.f32 %v18206_v7, %v18205_v47  ;;  %v18208_v60 = vpop.f32.mrb[58].mxu1 }
 0xc5b   :  { %18357 = vmatprep.subr.bf16.mxu0 %v24875_v59  ;;  %v20762_v59 = vld [vmem:[%s27025_s3 + $0xdac] ss:$16 sps:$4 sm:$0xff]   ;;  %v18209_v5 = vpop.f32.mrb[59].mxu1 }
 0xc5c   :  { %v25115_v27 = vadd.f32 %v18209_v5, %v18208_v60  ;;  %v18211_v33 = vpop.f32.mrb[60].mxu1 }
 0xc5d   :  { %8607 = vmatmul.mubr.bf16.gmra.mrb[136].mxu0 %v20751_v17  ;;  %v20796_v17 = vld [vmem:[%s27025_s3 + $0xf48] ss:$16 sps:$4 sm:$0xff]  }
 0xc5e   :  { %8614 = vmatprep.mubr.bf16.mxu0 %v20756_v31  ;;  %v18212_v31 = vpop.f32.mrb[61].mxu1  ;;  %9737 = vmatmul.mubr.bf16.gmra.mrb[136].mxu1 %v20796_v17 }
 0xc65   :  { %8615 = vmatmul.mubr.bf16.gmra.mrb[140].mxu0 %v20754_v6  ;;  %v25123_v6 = vadd.f32 %v18212_v31, %v18211_v33 }
 0xc66   :  { %8622 = vmatprep.mubr.bf16.mxu0 %v20759_v50  ;;  %v18214_v50 = vpop.f32.mrb[62].mxu1 }
 0xc6d   :  { %8623 = vmatmul.mubr.bf16.gmra.mrb[144].mxu0 %v20757_v14  ;;  %v18215_v14 = vpop.f32.mrb[63].mxu1 }
 0xc6e   :  { %8630 = vmatprep.mubr.bf16.mxu0 %v20762_v59  ;;  %v25125_v59 = vadd.f32 %v18215_v14, %v18214_v50  ;;  %v18309_v38 = vpop.f32.mrb[64].mxu1 }
 0xc6f   :  { %v18310_v46 = vpop.f32.mrb[65].mxu1 }
 0xc70   :  { %v25158_v58 = vadd.f32 %v18310_v46, %v18309_v38  ;;  %v18312_v13 = vpop.f32.mrb[66].mxu1 }
 0xc71   :  { %v18313_v3 = vpop.f32.mrb[67].mxu1 }
 0xc72   :  { %v25161_v19 = vadd.f32 %v18313_v3, %v18312_v13  ;;  %v18315_v52 = vpop.f32.mrb[68].mxu1 }
 0xc73   :  { %v18316_v63 = vpop.f32.mrb[69].mxu1 }
 0xc74   :  { %v25163_v54 = vadd.f32 %v18316_v63, %v18315_v52  ;;  %v18318_v42 = vpop.f32.mrb[70].mxu1 }
 0xc75   :  { %8631 = vmatmul.mubr.bf16.gmra.mrb[148].mxu0 %v20760_v57  ;;  %v20801_v57 = vld [vmem:[%s27025_s3 + $0xf6c] ss:$16 sps:$4 sm:$0xff]   ;;  %v18319_v18 = vpop.f32.mrb[71].mxu1 }
 0xc76   :  { %8638 = vmatprep.mubr.bf16.mxu0 %v20765_v20  ;;  %v20799_v20 = vld [vmem:[%s27025_s3 + $0xf68] ss:$16 sps:$4 sm:$0xff]   ;;  %9744 = vmatprep.mubr.bf16.mxu1 %v20801_v57  ;;  %v25166_v9 = vadd.f32 %v18319_v18, %v18318_v42  ;;  %v18321_v48 = vpop.f32.mrb[72].mxu1 }
 0xc77   :  { %9745 = vmatmul.mubr.bf16.gmra.mrb[140].mxu1 %v20799_v20 }
 0xc7d   :  { %8639 = vmatmul.mubr.bf16.gmra.mrb[152].mxu0 %v20763_v44  ;;  %v20804_v44 = vld [vmem:[%s27025_s3 + $0xf8c] ss:$16 sps:$4 sm:$0xff]  }
 0xc7e   :  { %8646 = vmatprep.mubr.bf16.mxu0 %v20768_v24  ;;  %v20802_v24 = vld [vmem:[%s27025_s3 + $0xf88] ss:$16 sps:$4 sm:$0xff]   ;;  %9752 = vmatprep.mubr.bf16.mxu1 %v20804_v44 }
 0xc7f   :  { %9753 = vmatmul.mubr.bf16.gmra.mrb[144].mxu1 %v20802_v24 }
 0xc85   :  { %8647 = vmatmul.mubr.bf16.gmra.mrb[156].mxu0 %v20766_v4  ;;  %v20810_v4 = vld [vmem:[%s27025_s3 + $0xfac] ss:$16 sps:$4 sm:$0xff]  }
 0xc86   :  { %9760 = vmatprep.mubr.bf16.mxu1 %v20810_v4 }
 0xc87   :  { %9761 = vmatmul.mubr.bf16.gmra.mrb[148].mxu1 %v20808_v23 }
 0xc88   :  { %9768 = vmatprep.mubr.bf16.mxu1 %v20816_v36 }
 0xc8f   :  { %9769 = vmatmul.mubr.bf16.gmra.mrb[152].mxu1 %v20814_v35  ;;  %v21438_v35 = vld [vmem:[#allocation2 + $0x80] sm:$0xff] }
 0xc90   :  { %9776 = vmatprep.mubr.bf16.mxu1 %v20822_v26 }
 0xc97   :  { %9777 = vmatmul.mubr.bf16.gmra.mrb[156].mxu1 %v20820_v21 }
 0xd20   :  { %v18233_v12 = vpop.f32.mrb[128].mxu0 }
 0xd21   :  { %v18234_v29 = vpop.f32.mrb[129].mxu0 }
 0xd22   :  { %v18235_v22 = vadd.f32 %v18234_v29, %v18233_v12  ;;  %v18236_v1 = vpop.f32.mrb[130].mxu0  ;;  %v21439_v29 = vld [vmem:[#allocation2 + $0xc8] sm:$0xff] }
 0xd23   :  { %v18237_v16 = vpop.f32.mrb[131].mxu0 }
 0xd24   :  { %v8593_v53 = vadd.f32 %v18235_v22, %v24944_v39  ;;  %v18238_v8 = vadd.f32 %v18237_v16, %v18236_v1 }
 0xd26   :  { %v8596_v30 = vadd.f32 %v18238_v8, %v24946_v56  ;;  %v18322_v56 = vpop.f32.mrb[73].mxu1  ;;  %v21440_v8 = vld [vmem:[#allocation2 + $0x88] sm:$0xff] }
 0xd27   :  { %v25169_v7 = vadd.f32 %v18322_v56, %v18321_v48  ;;  %v18324_v60 = vpop.f32.mrb[74].mxu1 }
 0xd28   :  { %v8655_v25 = vpack.c.bf16 %v8596_v30, %v8593_v53  ;;  %v18239_v40 = vpop.f32.mrb[132].mxu0  ;;  %v18325_v5 = vpop.f32.mrb[75].mxu1  ;;  %v21441_v30 = vld [vmem:[#allocation2 + $0xd0] sm:$0xff] }
 0xd29   :  { %v18240_v62 = vpop.f32.mrb[133].mxu0  ;;  %v25172_v33 = vadd.f32 %v18325_v5, %v18324_v60  ;;  %v18327_v17 = vpop.f32.mrb[76].mxu1 }
 0xd2a   :  { %v18241_v45 = vadd.f32 %v18240_v62, %v18239_v40  ;;  %v18242_v39 = vpop.f32.mrb[134].mxu0  ;;  %19182 = vmatprep.mubr.msk.bf16.mxu0 %vm892_vm4, %v8655_v25  ;;  %v18328_v31 = vpop.f32.mrb[77].mxu1 }
 0xd2b   :  { %v18243_v37 = vpop.f32.mrb[135].mxu0  ;;  %v25174_v57 = vadd.f32 %v18328_v31, %v18327_v17  ;;  %v18330_v20 = vpop.f32.mrb[78].mxu1 }
 0xd2c   :  { %v8601_v47 = vadd.f32 %v18241_v45, %v25063_v41  ;;  %v18244_v10 = vadd.f32 %v18243_v37, %v18242_v39  ;;  %v18331_v24 = vpop.f32.mrb[79].mxu1  ;;  %v21442_v45 = vld [vmem:[#allocation2 + $0x90] sm:$0xff] }
 0xd2d   :  { %v25177_v23 = vadd.f32 %v18331_v24, %v18330_v20  ;;  %v18333_v36 = vpop.f32.mrb[80].mxu1 }
 0xd2e   :  { %v8604_v32 = vadd.f32 %v18244_v10, %v25065_v55  ;;  %v18334_v26 = vpop.f32.mrb[81].mxu1 }
 0xd2f   :  { %v25180_v22 = vadd.f32 %v18334_v26, %v18333_v36  ;;  %v18336_v1 = vpop.f32.mrb[82].mxu1 }
 0xd30   :  { %v8656_v50 = vpack.c.bf16 %v8604_v32, %v8601_v47  ;;  %v18245_v14 = vpop.f32.mrb[136].mxu0  ;;  %v18337_v38 = vpop.f32.mrb[83].mxu1  ;;  %v21443_v47 = vld [vmem:[#allocation2 + $0xd8] sm:$0xff] }
 0xd31   :  { %v18246_v44 = vpop.f32.mrb[137].mxu0  ;;  %v25183_v46 = vadd.f32 %v18337_v38, %v18336_v1  ;;  %v18339_v53 = vpop.f32.mrb[84].mxu1 }
 0xd32   :  { %v18247_v4 = vadd.f32 %v18246_v44, %v18245_v14  ;;  %v18248_v41 = vpop.f32.mrb[138].mxu0  ;;  %19183 = vmatmul.mubr.msk.bf16.vlgmr.msra.gmra.mrb[96].mxu0 %vm892_vm4, %v8656_v50  ;;  %v18340_v13 = vpop.f32.mrb[85].mxu1  ;;  %v21444_v50 = vld [vmem:[#allocation2 + $0x98] sm:$0xff]  ;;  %v21445_v44 = vld [vmem:[#allocation2 + $0xe0] sm:$0xff] }
 0xd33   :  { %18358 = vmatpush3.bf16.msra.mxu0 %v21438_v35  ;;  %v18249_v55 = vpop.f32.mrb[139].mxu0  ;;  %v18342_v63 = vpop.f32.mrb[86].mxu1 }
 0xd34   :  { %v8609_v21 = vadd.f32 %v18247_v4, %v25073_v51  ;;  %v18250_v12 = vadd.f32 %v18249_v55, %v18248_v41  ;;  %18359 = vmatprep.subr.bf16.mxu0 %v21439_v29  ;;  %v25185_v51 = vadd.f32 %v18340_v13, %v18339_v53  ;;  %v18343_v40 = vpop.f32.mrb[87].mxu1 }
 0xd35   :  { %v18345_v18 = vpop.f32.mrb[88].mxu1 }
 0xd36   :  { %v8612_v16 = vadd.f32 %v18250_v12, %v25075_v49  ;;  %v25188_v49 = vadd.f32 %v18343_v40, %v18342_v63  ;;  %v18346_v48 = vpop.f32.mrb[89].mxu1  ;;  %v21448_v63 = vld [vmem:[#allocation2 + $0xa8] sm:$0xff] }
 0xd37   :  { %18360 = vmatpush3.bf16.msra.mxu0 %v21440_v8  ;;  %v25191_v10 = vadd.f32 %v18346_v48, %v18345_v18  ;;  %v18348_v60 = vpop.f32.mrb[90].mxu1 }
 0xd38   :  { %v8657_v3 = vpack.c.bf16 %v8612_v16, %v8609_v21  ;;  %18361 = vmatprep.subr.bf16.mxu0 %v21441_v30  ;;  %v18251_v52 = vpop.f32.mrb[140].mxu0  ;;  %v18349_v5 = vpop.f32.mrb[91].mxu1  ;;  %v21446_v21 = vld [vmem:[#allocation2 + $0xa0] sm:$0xff]  ;;  %v21447_v16 = vld [vmem:[#allocation2 + $0xe8] sm:$0xff] }
 0xd39   :  { %v18252_v25 = vpop.f32.mrb[141].mxu0  ;;  %v25194_v17 = vadd.f32 %v18349_v5, %v18348_v60  ;;  %v18351_v31 = vpop.f32.mrb[92].mxu1 }
 0xd3a   :  { %v18253_v42 = vadd.f32 %v18252_v25, %v18251_v52  ;;  %v18254_v62 = vpop.f32.mrb[142].mxu0  ;;  %19186 = vmatprep.mubr.msk.bf16.mxu0 %vm892_vm4, %v8657_v3  ;;  %v18352_v14 = vpop.f32.mrb[93].mxu1 }
 0xd3b   :  { %18362 = vmatpush3.bf16.msra.mxu0 %v21442_v45  ;;  %v18255_v39 = vpop.f32.mrb[143].mxu0  ;;  %v18354_v4 = vpop.f32.mrb[94].mxu1 }
 0xd3c   :  { %v8617_v37 = vadd.f32 %v18253_v42, %v25083_v0  ;;  %v18256_v56 = vadd.f32 %v18255_v39, %v18254_v62  ;;  %18363 = vmatprep.subr.bf16.mxu0 %v21443_v47  ;;  %v25196_v0 = vadd.f32 %v18352_v14, %v18351_v31  ;;  %v18355_v36 = vpop.f32.mrb[95].mxu1  ;;  %v21449_v42 = vld [vmem:[#allocation2 + $0xf0] sm:$0xff] }
 0xd3d   :  { %v18449_v26 = vpop.f32.mrb[96].mxu1  ;;  %v21450_v47 = vld [vmem:[#allocation2 + $0xb0] sm:$0xff] }
 0xd3e   :  { %v8620_v32 = vadd.f32 %v18256_v56, %v25085_v15  ;;  %v25199_v15 = vadd.f32 %v18355_v36, %v18354_v4  ;;  %v18450_v29 = vpop.f32.mrb[97].mxu1 }
 0xd3f   :  { %18364 = vmatpush3.bf16.msra.mxu0 %v21444_v50  ;;  %v25202_v53 = vadd.f32 %v18450_v29, %v18449_v26  ;;  %v18452_v8 = vpop.f32.mrb[98].mxu1  ;;  %v21451_v50 = vld [vmem:[#allocation2 + $0xf8] sm:$0xff] }
 0xd40   :  { %v8658_v20 = vpack.c.bf16 %v8620_v32, %v8617_v37  ;;  %18365 = vmatprep.subr.bf16.mxu0 %v21445_v44  ;;  %v18257_v24 = vpop.f32.mrb[144].mxu0  ;;  %v18453_v13 = vpop.f32.mrb[99].mxu1 }
 0xd41   :  { %v18258_v41 = vpop.f32.mrb[145].mxu0  ;;  %v25205_v30 = vadd.f32 %v18453_v13, %v18452_v8  ;;  %v18455_v52 = vpop.f32.mrb[100].mxu1 }
 0xd42   :  { %v18259_v35 = vadd.f32 %v18258_v41, %v18257_v24  ;;  %v18260_v55 = vpop.f32.mrb[146].mxu0  ;;  %19187 = vmatmul.mubr.msk.bf16.gmra.mrb[100].mxu0 %vm892_vm4, %v8658_v20  ;;  %v18456_v25 = vpop.f32.mrb[101].mxu1 }
 0xd43   :  { %18366 = vmatpush3.bf16.msra.mxu0 %v21446_v21  ;;  %v18261_v12 = vpop.f32.mrb[147].mxu0  ;;  %v18458_v18 = vpop.f32.mrb[102].mxu1 }
 0xd44   :  { %v8625_v1 = vadd.f32 %v18259_v35, %v25093_v61  ;;  %v18262_v38 = vadd.f32 %v18261_v12, %v18260_v55  ;;  %18367 = vmatprep.subr.bf16.mxu0 %v21447_v16  ;;  %v25207_v61 = vadd.f32 %v18456_v25, %v18455_v52  ;;  %v18459_v39 = vpop.f32.mrb[103].mxu1 }
 0xd45   :  { %v18461_v56 = vpop.f32.mrb[104].mxu1 }
 0xd46   :  { %v8628_v3 = vadd.f32 %v18262_v38, %v25095_v34  ;;  %v25210_v34 = vadd.f32 %v18459_v39, %v18458_v18  ;;  %v18462_v5 = vpop.f32.mrb[105].mxu1  ;;  %v20813_v39 = vld [vmem:[%s27025_s3 + $0xe2c] ss:$16 sps:$4 sm:$0xff]  }
 0xd47   :  { %18368 = vmatpush3.bf16.msra.mxu0 %v21448_v63  ;;  %v25213_v14 = vadd.f32 %v18462_v5, %v18461_v56  ;;  %v18464_v20 = vpop.f32.mrb[106].mxu1 }
 0xd48   :  { %v8659_v40 = vpack.c.bf16 %v8628_v3, %v8625_v1  ;;  %18369 = vmatprep.subr.bf16.mxu0 %v21449_v42  ;;  %v18263_v62 = vpop.f32.mrb[148].mxu0  ;;  %v18465_v44 = vpop.f32.mrb[107].mxu1 }
 0xd49   :  { %v18264_v45 = vpop.f32.mrb[149].mxu0  ;;  %v25216_v4 = vadd.f32 %v18465_v44, %v18464_v20  ;;  %v18467_v41 = vpop.f32.mrb[108].mxu1 }
 0xd4a   :  { %v18265_v48 = vadd.f32 %v18264_v45, %v18263_v62  ;;  %v18266_v37 = vpop.f32.mrb[150].mxu0  ;;  %19190 = vmatprep.mubr.msk.bf16.mxu0 %vm892_vm4, %v8659_v40  ;;  %v18468_v36 = vpop.f32.mrb[109].mxu1 }
 0xd4b   :  { %18370 = vmatpush3.bf16.msra.mxu0 %v21450_v47  ;;  %v18267_v60 = vpop.f32.mrb[151].mxu0  ;;  %v25219_v26 = vadd.f32 %v18468_v36, %v18467_v41 }
 0xd4c   :  { %v8633_v32 = vadd.f32 %v18265_v48, %v25103_v11  ;;  %v18268_v31 = vadd.f32 %v18267_v60, %v18266_v37  ;;  %18371 = vmatprep.subr.bf16.mxu0 %v21451_v50  ;;  %v18470_v11 = vpop.f32.mrb[110].mxu1  ;;  %v20817_v48 = vld [vmem:[%s27025_s3 + $0xe48] ss:$16 sps:$4 sm:$0xff]   ;;  %v20825_v37 = vld [vmem:[%s27025_s3 + $0xe6c] ss:$16 sps:$4 sm:$0xff]  }
 0xd4d   :  { %v18471_v12 = vpop.f32.mrb[111].mxu1  ;;  %v20828_v50 = vld [vmem:[%s27025_s3 + $0xe8c] ss:$16 sps:$4 sm:$0xff]  }
 0xd4e   :  { %v8636_v24 = vadd.f32 %v18268_v31, %v25105_v28  ;;  %v25222_v38 = vadd.f32 %v18471_v12, %v18470_v11  ;;  %v18473_v56 = vpop.f32.mrb[112].mxu1  ;;  %v20831_v11 = vld [vmem:[%s27025_s3 + $0xeac] ss:$16 sps:$4 sm:$0xff]  }
 0xd4f   :  { %18372 = vmatpush3.bf16.msra.mxu0 %v24989_v43  ;;  %v18474_v47 = vpop.f32.mrb[113].mxu1 }
 0xd50   :  { %v8660_v35 = vpack.c.bf16 %v8636_v24, %v8633_v32  ;;  %v18269_v55 = vpop.f32.mrb[152].mxu0  ;;  %v25251_v60 = vadd.f32 %v18474_v47, %v18473_v56  ;;  %v18476_v5 = vpop.f32.mrb[114].mxu1  ;;  %v20823_v32 = vld [vmem:[%s27025_s3 + $0xe68] ss:$16 sps:$4 sm:$0xff]  }
 0xd51   :  { %v18270_v21 = vpop.f32.mrb[153].mxu0  ;;  %v18477_v31 = vpop.f32.mrb[115].mxu1 }
 0xd52   :  { %v18271_v29 = vadd.f32 %v18270_v21, %v18269_v55  ;;  %v18272_v1 = vpop.f32.mrb[154].mxu0  ;;  %19191 = vmatmul.mubr.msk.bf16.gmra.mrb[104].mxu0 %vm892_vm4, %v8660_v35  ;;  %v25259_v20 = vadd.f32 %v18477_v31, %v18476_v5  ;;  %v18479_v44 = vpop.f32.mrb[116].mxu1  ;;  %v20826_v35 = vld [vmem:[%s27025_s3 + $0xe88] ss:$16 sps:$4 sm:$0xff]  }
 0xd53   :  { %v18273_v28 = vpop.f32.mrb[155].mxu0  ;;  %v18480_v24 = vpop.f32.mrb[117].mxu1 }
 0xd54   :  { %v8641_v16 = vadd.f32 %v18271_v29, %v25113_v2  ;;  %v18274_v8 = vadd.f32 %v18273_v28, %v18272_v1  ;;  %v20807_v2 = vld [vmem:[%s27025_s3 + $0xe0c] ss:$16 sps:$4 sm:$0xff]   ;;  %v25261_v41 = vadd.f32 %v18480_v24, %v18479_v44  ;;  %v18482_v36 = vpop.f32.mrb[118].mxu1 }
 0xd55   :  { %v18483_v55 = vpop.f32.mrb[119].mxu1 }
 0xd56   :  { %v8644_v43 = vadd.f32 %v18274_v8, %v25115_v27  ;;  %v20805_v27 = vld [vmem:[%s27025_s3 + $0xe08] ss:$16 sps:$4 sm:$0xff]   ;;  %v25269_v21 = vadd.f32 %v18483_v55, %v18482_v36  ;;  %v18485_v12 = vpop.f32.mrb[120].mxu1 }
 0xd57   :  { %v18486_v29 = vpop.f32.mrb[121].mxu1 }
 0xd58   :  { %v8661_v13 = vpack.c.bf16 %v8644_v43, %v8641_v16  ;;  %v18275_v3 = vpop.f32.mrb[156].mxu0  ;;  %v25271_v1 = vadd.f32 %v18486_v29, %v18485_v12  ;;  %v18488_v28 = vpop.f32.mrb[122].mxu1  ;;  %v20829_v16 = vld [vmem:[%s27025_s3 + $0xea8] ss:$16 sps:$4 sm:$0xff]   ;;  %v20834_v43 = vld [vmem:[%s27025_s3 + $0xecc] ss:$16 sps:$4 sm:$0xff]  }
 0xd59   :  { %v18276_v52 = vpop.f32.mrb[157].mxu0  ;;  %v18489_v8 = vpop.f32.mrb[123].mxu1 }
 0xd5a   :  { %v18277_v63 = vadd.f32 %v18276_v52, %v18275_v3  ;;  %v18278_v25 = vpop.f32.mrb[158].mxu0  ;;  %19194 = vmatprep.mubr.msk.bf16.mxu0 %vm892_vm4, %v8661_v13  ;;  %v25279_v13 = vadd.f32 %v18489_v8, %v18488_v28  ;;  %v18491_v3 = vpop.f32.mrb[124].mxu1 }
 0xd5b   :  { %v18279_v40 = vpop.f32.mrb[159].mxu0  ;;  %v18492_v52 = vpop.f32.mrb[125].mxu1 }
 0xd5c   :  { %v8649_v42 = vadd.f32 %v18277_v63, %v25123_v6  ;;  %v18280_v62 = vadd.f32 %v18279_v40, %v18278_v25  ;;  %v20811_v6 = vld [vmem:[%s27025_s3 + $0xe28] ss:$16 sps:$4 sm:$0xff]   ;;  %v25281_v63 = vadd.f32 %v18492_v52, %v18491_v3  ;;  %v18494_v25 = vpop.f32.mrb[126].mxu1 }
 0xd5d   :  { %v20832_v40 = vld [vmem:[%s27025_s3 + $0xec8] ss:$16 sps:$4 sm:$0xff]  }
 0xd5e   :  { %v8652_v18 = vadd.f32 %v18280_v62, %v25125_v59  ;;  %v20819_v59 = vld [vmem:[%s27025_s3 + $0xe4c] ss:$16 sps:$4 sm:$0xff]  }
 0xd5f   :  { %v20837_v62 = vld [vmem:[%s27025_s3 + $0xeec] ss:$16 sps:$4 sm:$0xff]  }
 0xd60   :  { %v8662_v45 = vpack.c.bf16 %v8652_v18, %v8649_v42  ;;  %v18495_v42 = vpop.f32.mrb[127].mxu1 }
 0xd61   :  { %v25289_v18 = vadd.f32 %v18495_v42, %v18494_v25 }
 0xd62   :  { %19195 = vmatmul.mubr.msk.bf16.gmra.mrb[108].mxu0 %vm892_vm4, %v8662_v45 }
 0xd63   :  { %9155 = vmatprep.mubr.bf16.mxu0 %v20807_v2  ;;  %v18513_v2 = vpop.f32.mrb[128].mxu1 }
 0xd64   :  { %v18514_v45 = vpop.f32.mrb[129].mxu1 }
 0xd6a   :  { %9156 = vmatmul.mubr.bf16.vlgmr.msra.gmra.mrb[160].mxu0 %v20805_v27  ;;  %v18515_v27 = vadd.f32 %v18514_v45, %v18513_v2 }
 0xd6b   :  { %9163 = vmatprep.mubr.bf16.mxu0 %v20813_v39  ;;  %v18516_v39 = vpop.f32.mrb[130].mxu1 }
 0xd72   :  { %9164 = vmatmul.mubr.bf16.gmra.mrb[164].mxu0 %v20811_v6  ;;  %v20835_v6 = vld [vmem:[%s27025_s3 + $0xee8] ss:$16 sps:$4 sm:$0xff]  }
 0xd73   :  { %9171 = vmatprep.mubr.bf16.mxu0 %v20819_v59  ;;  %v18517_v59 = vpop.f32.mrb[131].mxu1 }
 0xd74   :  { %v18519_v5 = vpop.f32.mrb[132].mxu1 }
 0xd7a   :  { %9172 = vmatmul.mubr.bf16.gmra.mrb[168].mxu0 %v20817_v48  ;;  %v25295_v48 = vadd.f32 %v18515_v27, %v25202_v53 }
 0xd7b   :  { %9179 = vmatprep.mubr.bf16.mxu0 %v20825_v37  ;;  %v18518_v37 = vadd.f32 %v18517_v59, %v18516_v39 }
 0xd7d   :  { %v25298_v56 = vadd.f32 %v18518_v37, %v25205_v30  ;;  %v20839_v37 = vld [vmem:[%s27027_s4 + $0x1c8] sm:$0xff]  }
 0xd7f   :  { %v9785_v47 = vpack.c.bf16 %v25298_v56, %v25295_v48 }
 0xd82   :  { %9180 = vmatmul.mubr.bf16.gmra.mrb[172].mxu0 %v20823_v32  ;;  %v18520_v32 = vpop.f32.mrb[133].mxu1 }
 0xd83   :  { %9187 = vmatprep.mubr.bf16.mxu0 %v20828_v50  ;;  %v18521_v31 = vadd.f32 %v18520_v32, %v18519_v5  ;;  %v18522_v50 = vpop.f32.mrb[134].mxu1 }
 0xd84   :  { %v18523_v44 = vpop.f32.mrb[135].mxu1 }
 0xd85   :  { %v25303_v24 = vadd.f32 %v18521_v31, %v25207_v61  ;;  %v18524_v36 = vadd.f32 %v18523_v44, %v18522_v50 }
 0xd87   :  { %v25306_v53 = vadd.f32 %v18524_v36, %v25210_v34 }
 0xd89   :  { %v9786_v30 = vpack.c.bf16 %v25306_v53, %v25303_v24 }
 0xd8a   :  { %9188 = vmatmul.mubr.bf16.gmra.mrb[176].mxu0 %v20826_v35  ;;  %v18525_v35 = vpop.f32.mrb[136].mxu1 }
 0xd8b   :  { %9195 = vmatprep.mubr.bf16.mxu0 %v20831_v11  ;;  %v18526_v55 = vpop.f32.mrb[137].mxu1 }
 0xd8c   :  { %v18527_v11 = vadd.f32 %v18526_v55, %v18525_v35  ;;  %v18528_v12 = vpop.f32.mrb[138].mxu1 }
 0xd8d   :  { %v18529_v29 = vpop.f32.mrb[139].mxu1 }
 0xd8e   :  { %v25311_v28 = vadd.f32 %v18527_v11, %v25213_v14  ;;  %v18531_v34 = vpop.f32.mrb[140].mxu1  ;;  %v20841_v11 = vld [vmem:[%s27027_s4 + $0x1d8] sm:$0xff]  }
 0xd92   :  { %9196 = vmatmul.mubr.bf16.gmra.mrb[180].mxu0 %v20829_v16  ;;  %v18530_v16 = vadd.f32 %v18529_v29, %v18528_v12 }
 0xd93   :  { %9203 = vmatprep.mubr.bf16.mxu0 %v20834_v43  ;;  %v18532_v43 = vpop.f32.mrb[141].mxu1 }
 0xd94   :  { %v25314_v8 = vadd.f32 %v18530_v16, %v25216_v4  ;;  %v18533_v3 = vadd.f32 %v18532_v43, %v18531_v34  ;;  %v18534_v52 = vpop.f32.mrb[142].mxu1 }
 0xd95   :  { %v18535_v25 = vpop.f32.mrb[143].mxu1 }
 0xd96   :  { %v9787_v61 = vpack.c.bf16 %v25314_v8, %v25311_v28  ;;  %v18536_v42 = vadd.f32 %v18535_v25, %v18534_v52  ;;  %v18537_v4 = vpop.f32.mrb[144].mxu1 }
 0xd97   :  { %v18538_v2 = vpop.f32.mrb[145].mxu1 }
 0xd98   :  { %v18539_v45 = vadd.f32 %v18538_v2, %v18537_v4  ;;  %v18540_v27 = vpop.f32.mrb[146].mxu1 }
 0xd99   :  { %v18541_v39 = vpop.f32.mrb[147].mxu1 }
 0xd9a   :  { %9204 = vmatmul.mubr.bf16.gmra.mrb[184].mxu0 %v20832_v40  ;;  %v25319_v40 = vadd.f32 %v18533_v3, %v25219_v26  ;;  %v25330_v59 = vadd.f32 %v18539_v45, %v25251_v60  ;;  %v18542_v26 = vadd.f32 %v18541_v39, %v18540_v27  ;;  %v18543_v32 = vpop.f32.mrb[148].mxu1 }
 0xd9b   :  { %9211 = vmatprep.mubr.bf16.mxu0 %v20837_v62  ;;  %v25322_v62 = vadd.f32 %v18536_v42, %v25222_v38  ;;  %v18544_v31 = vpop.f32.mrb[149].mxu1 }
 0xd9c   :  { %v25333_v38 = vadd.f32 %v18542_v26, %v25259_v20  ;;  %v18545_v50 = vadd.f32 %v18544_v31, %v18543_v32  ;;  %v18546_v60 = vpop.f32.mrb[150].mxu1  ;;  %v20840_v20 = vld [vmem:[%s27027_s4 + $0x1d0] sm:$0xff]  }
 0xd9d   :  { %v9788_v14 = vpack.c.bf16 %v25322_v62, %v25319_v40  ;;  %v18547_v44 = vpop.f32.mrb[151].mxu1 }
 0xd9e   :  { %v9789_v5 = vpack.c.bf16 %v25333_v38, %v25330_v59  ;;  %v25344_v36 = vadd.f32 %v18545_v50, %v25261_v41  ;;  %v18548_v35 = vadd.f32 %v18547_v44, %v18546_v60  ;;  %v18549_v29 = vpop.f32.mrb[152].mxu1  ;;  %v9988_v59 = vlaneseq }
 0xd9f   :  { %v18550_v16 = vpop.f32.mrb[153].mxu1 }
 0xda0   :  { %v25347_v55 = vadd.f32 %v18548_v35, %v25269_v21  ;;  %v18551_v34 = vadd.f32 %v18550_v16, %v18549_v29  ;;  %v18552_v41 = vpop.f32.mrb[154].mxu1 }
 0xda1   :  { %v18553_v43 = vpop.f32.mrb[155].mxu1 }
 0xda2   :  { %9212 = vmatmul.mubr.bf16.gmra.mrb[188].mxu0 %v20835_v6  ;;  %v20838_v6 = vld [vmem:[%s27027_s4 + $0x1c0] sm:$0xff]   ;;  %v9790_v12 = vpack.c.bf16 %v25347_v55, %v25344_v36  ;;  %v25355_v3 = vadd.f32 %v18551_v34, %v25271_v1  ;;  %v18554_v21 = vadd.f32 %v18553_v43, %v18552_v41  ;;  %v18555_v42 = vpop.f32.mrb[156].mxu1 }
 0xda3   :  { %19198 = vmatprep.subr.bf16.mxu0 %v20838_v6  ;;  %v18556_v4 = vpop.f32.mrb[157].mxu1 }
 0xda4   :  { %19199 = vmatpush3.bf16.msra.mxu0 %v20838_v6  ;;  %v25358_v52 = vadd.f32 %v18554_v21, %v25279_v13  ;;  %v18557_v2 = vadd.f32 %v18556_v4, %v18555_v42  ;;  %v18558_v45 = vpop.f32.mrb[158].mxu1  ;;  %v20842_v13 = vld [vmem:[%s27027_s4 + $0x1e0] sm:$0xff]  }
 0xda5   :  { %19200 = vmatprep.subr.bf16.mxu0 %v20839_v37  ;;  %v18559_v27 = vpop.f32.mrb[159].mxu1 }
 0xda6   :  { %v9791_v25 = vpack.c.bf16 %v25358_v52, %v25355_v3  ;;  %v25363_v39 = vadd.f32 %v18557_v2, %v25281_v63  ;;  %v18560_v6 = vadd.f32 %v18559_v27, %v18558_v45  ;;  %v25451_v3 = vshrl.u32 %v9988_v59, 7 }
 0xda8   :  { %19201 = vmatpush3.bf16.msra.mxu0 %v20839_v37  ;;  %v25366_v26 = vadd.f32 %v18560_v6, %v25289_v18 }
 0xda9   :  { %19202 = vmatprep.subr.bf16.mxu0 %v20840_v20 }
 0xdaa   :  { %v9792_v1 = vpack.c.bf16 %v25366_v26, %v25363_v39 }
 0xdac   :  { %19203 = vmatpush3.bf16.msra.mxu0 %v20840_v20 }
 0xdad   :  { %19204 = vmatprep.subr.bf16.mxu0 %v20841_v11 }
 0xdb0   :  { %19205 = vmatpush3.bf16.msra.mxu0 %v20841_v11 }
 0xdb1   :  { %19222 = vmatprep.subr.bf16.mxu0 %v20842_v13 }
 0xe3d   :  { %v18373_v37 = vpop.f32.mrb[160].mxu0 }
 0xe3e   :  { %v18374_v32 = vpop.f32.mrb[161].mxu0 }
 0xe3f   :  { %v18375_v31 = vadd.f32 %v18374_v32, %v18373_v37  ;;  %v18376_v50 = vpop.f32.mrb[162].mxu0 }
 0xe40   :  { %v18377_v60 = vpop.f32.mrb[163].mxu0 }
 0xe41   :  { %v9158_v63 = vadd.f32 %v18375_v31, %v25158_v58  ;;  %v18378_v44 = vadd.f32 %v18377_v60, %v18376_v50  ;;  %v20843_v58 = vld [vmem:[%s27027_s4 + $0x1e8] sm:$0xff]   ;;  %v20845_v50 = vld [vmem:[%s27027_s4 + $0x1f8] sm:$0xff]  }
 0xe43   :  { %v9161_v20 = vadd.f32 %v18378_v44, %v25161_v19 }
 0xe45   :  { %v9220_v18 = vpack.c.bf16 %v9161_v20, %v9158_v63  ;;  %v18379_v35 = vpop.f32.mrb[164].mxu0 }
 0xe46   :  { %v18380_v11 = vpop.f32.mrb[165].mxu0 }
 0xe47   :  { %v18381_v29 = vadd.f32 %v18380_v11, %v18379_v35  ;;  %v18382_v16 = vpop.f32.mrb[166].mxu0  ;;  %19206 = vmatprep.mubr.msk.bf16.mxu0 %vm892_vm4, %v9220_v18 }
 0xe48   :  { %v18383_v34 = vpop.f32.mrb[167].mxu0 }
 0xe49   :  { %v9166_v41 = vadd.f32 %v18381_v29, %v25163_v54  ;;  %v18384_v43 = vadd.f32 %v18383_v34, %v18382_v16  ;;  %v20844_v54 = vld [vmem:[%s27027_s4 + $0x1f0] sm:$0xff]  }
 0xe4b   :  { %v9169_v21 = vadd.f32 %v18384_v43, %v25166_v9 }
 0xe4d   :  { %v9221_v42 = vpack.c.bf16 %v9169_v21, %v9166_v41  ;;  %v18385_v4 = vpop.f32.mrb[168].mxu0 }
 0xe4e   :  { %v18386_v19 = vpop.f32.mrb[169].mxu0 }
 0xe4f   :  { %v18387_v2 = vadd.f32 %v18386_v19, %v18385_v4  ;;  %v18388_v45 = vpop.f32.mrb[170].mxu0  ;;  %19207 = vmatmul.mubr.msk.bf16.vlgmr.msra.gmra.mrb[96].mxu0 %vm892_vm4, %v9221_v42 }
 0xe50   :  { %v18389_v27 = vpop.f32.mrb[171].mxu0  ;;  %19223 = vmatpush3.bf16.msra.mxu0 %v20842_v13 }
 0xe51   :  { %v9174_v6 = vadd.f32 %v18387_v2, %v25169_v7  ;;  %v18390_v37 = vadd.f32 %v18389_v27, %v18388_v45  ;;  %19224 = vmatprep.subr.bf16.mxu0 %v20843_v58 }
 0xe53   :  { %v9177_v9 = vadd.f32 %v18390_v37, %v25172_v33 }
 0xe54   :  { %19225 = vmatpush3.bf16.msra.mxu0 %v20843_v58 }
 0xe55   :  { %v9222_v32 = vpack.c.bf16 %v9177_v9, %v9174_v6  ;;  %v18391_v31 = vpop.f32.mrb[172].mxu0  ;;  %19226 = vmatprep.subr.bf16.mxu0 %v20844_v54 }
 0xe56   :  { %v18392_v60 = vpop.f32.mrb[173].mxu0 }
 0xe57   :  { %v18393_v13 = vadd.f32 %v18392_v60, %v18391_v31  ;;  %v18394_v63 = vpop.f32.mrb[174].mxu0  ;;  %19210 = vmatprep.mubr.msk.bf16.mxu0 %vm892_vm4, %v9222_v32 }
 0xe58   :  { %v18395_v7 = vpop.f32.mrb[175].mxu0  ;;  %19227 = vmatpush3.bf16.msra.mxu0 %v20844_v54 }
 0xe59   :  { %v9182_v44 = vadd.f32 %v18393_v13, %v25174_v57  ;;  %v18396_v20 = vadd.f32 %v18395_v7, %v18394_v63  ;;  %19228 = vmatprep.subr.bf16.mxu0 %v20845_v50 }
 0xe5b   :  { %v9185_v33 = vadd.f32 %v18396_v20, %v25177_v23 }
 0xe5c   :  { %19229 = vmatpush3.bf16.msra.mxu0 %v20845_v50 }
 0xe5d   :  { %v9223_v18 = vpack.c.bf16 %v9185_v33, %v9182_v44  ;;  %v18397_v35 = vpop.f32.mrb[176].mxu0 }
 0xe5e   :  { %v18398_v11 = vpop.f32.mrb[177].mxu0 }
 0xe5f   :  { %v18399_v29 = vadd.f32 %v18398_v11, %v18397_v35  ;;  %v18400_v16 = vpop.f32.mrb[178].mxu0  ;;  %19211 = vmatmul.mubr.msk.bf16.gmra.mrb[100].mxu0 %vm892_vm4, %v9223_v18 }
 0xe60   :  { %v18401_v34 = vpop.f32.mrb[179].mxu0 }
 0xe61   :  { %v9190_v41 = vadd.f32 %v18399_v29, %v25180_v22  ;;  %v18402_v43 = vadd.f32 %v18401_v34, %v18400_v16  ;;  %v10001_v29 = vadd.s32 96, %v25451_v3 }
 0xe63   :  { %v9193_v21 = vadd.f32 %v18402_v43, %v25183_v46 }
 0xe65   :  { %v9224_v42 = vpack.c.bf16 %v9193_v21, %v9190_v41  ;;  %v18403_v57 = vpop.f32.mrb[180].mxu0 }
 0xe66   :  { %v18404_v4 = vpop.f32.mrb[181].mxu0 }
 0xe67   :  { %v18405_v58 = vadd.f32 %v18404_v4, %v18403_v57  ;;  %v18406_v19 = vpop.f32.mrb[182].mxu0  ;;  %19214 = vmatprep.mubr.msk.bf16.mxu0 %vm892_vm4, %v9224_v42 }
 0xe68   :  { %v18407_v23 = vpop.f32.mrb[183].mxu0 }
 0xe69   :  { %v9198_v2 = vadd.f32 %v18405_v58, %v25185_v51  ;;  %v18408_v45 = vadd.f32 %v18407_v23, %v18406_v19  ;;  %v21452_v19 = vmov 0.0  }
 0xe6b   :  { %v9201_v27 = vadd.f32 %v18408_v45, %v25188_v49 }
 0xe6d   :  { %v9225_v6 = vpack.c.bf16 %v9201_v27, %v9198_v2  ;;  %v18409_v37 = vpop.f32.mrb[184].mxu0 }
 0xe6e   :  { %v18410_v54 = vpop.f32.mrb[185].mxu0 }
 0xe6f   :  { %v18411_v22 = vadd.f32 %v18410_v54, %v18409_v37  ;;  %v18412_v9 = vpop.f32.mrb[186].mxu0  ;;  %19215 = vmatmul.mubr.msk.bf16.gmra.mrb[104].mxu0 %vm892_vm4, %v9225_v6 }
 0xe70   :  { %v18413_v46 = vpop.f32.mrb[187].mxu0 }
 0xe71   :  { %v9206_v32 = vadd.f32 %v18411_v22, %v25191_v10  ;;  %v18414_v31 = vadd.f32 %v18413_v46, %v18412_v9 }
 0xe73   :  { %v9209_v50 = vadd.f32 %v18414_v31, %v25194_v17  ;;  %v15690_v17 = vld [vmem:[%s27028_s5] ss:$0 sm:$0xff] }
 0xe75   :  { %v9226_v60 = vpack.c.bf16 %v9209_v50, %v9206_v32  ;;  %v18415_v13 = vpop.f32.mrb[188].mxu0 }
 0xe76   :  { %v18416_v63 = vpop.f32.mrb[189].mxu0 }
 0xe77   :  { %v18417_v51 = vadd.f32 %v18416_v63, %v18415_v13  ;;  %v18418_v7 = vpop.f32.mrb[190].mxu0  ;;  %19218 = vmatprep.mubr.msk.bf16.mxu0 %vm892_vm4, %v9226_v60 }
 0xe78   :  { %v18419_v49 = vpop.f32.mrb[191].mxu0 }
 0xe79   :  { %v9214_v44 = vadd.f32 %v18417_v51, %v25196_v0  ;;  %v18420_v20 = vadd.f32 %v18419_v49, %v18418_v7 }
 0xe7b   :  { %v9217_v33 = vadd.f32 %v18420_v20, %v25199_v15 }
 0xe7d   :  { %v9227_v18 = vpack.c.bf16 %v9217_v33, %v9214_v44  ;;  %v20846_v33 = vld [vmem:[%s27029_s8 + $0x10] sm:$0xff]  }
 0xe7e   :  { %19282 = vmatprep.mubr.bf16.mxu1 %v20846_v33 }
 0xe7f   :  { %19219 = vmatmul.mubr.msk.bf16.gmra.mrb[108].mxu0 %vm892_vm4, %v9227_v18 }
 0xe80   :  { %19230 = vmatprep.mubr.msk.bf16.mxu0 %vm892_vm4, %v9785_v47 }
 0xe87   :  { %19231 = vmatmul.mubr.msk.bf16.vlgmr.msra.gmra.mrb[96].mxu0 %vm892_vm4, %v9786_v30 }
 0xe88   :  { %19234 = vmatprep.mubr.msk.bf16.mxu0 %vm892_vm4, %v9787_v61 }
 0xe8f   :  { %19235 = vmatmul.mubr.msk.bf16.gmra.mrb[100].mxu0 %vm892_vm4, %v9788_v14 }
 0xe90   :  { %19238 = vmatprep.mubr.msk.bf16.mxu0 %vm892_vm4, %v9789_v5 }
 0xe97   :  { %19239 = vmatmul.mubr.msk.bf16.gmra.mrb[104].mxu0 %vm892_vm4, %v9790_v12 }
 0xe98   :  { %19242 = vmatprep.mubr.msk.bf16.mxu0 %vm892_vm4, %v9791_v25 }
 0xe9f   :  { %19243 = vmatmul.mubr.msk.bf16.gmra.mrb[108].mxu0 %vm892_vm4, %v9792_v1  ;;  %vm10017_vm4 = vcmp.lt.s32.totalorder %v10001_v29, 98 }
 0xea0   :  { %v15691_v23 = vsel %vm10017_vm4, 1.0, %v21452_v19 }
 0xf5a   :  { %v19232_v10 = vpop.f32.mrb[96].mxu0 }
 0xf5b   :  { %v9884_v0 = vpop.f32.mrb[97].mxu0  ;;  %v25445_v24 = vadd.f32 %v19232_v10, %v15690_v17 }
 0xf5c   :  { %v19233_v15 = vpop.f32.mrb[98].mxu0  ;;  %v25441_v56 = vadd.f32 %v15690_v17, %v9884_v0 }
 0xf5d   :  { %v9887_v48 = vpop.f32.mrb[99].mxu0  ;;  %v9973_v30 = vadd.f32 %v19233_v15, %v15690_v17 }
 0xf5e   :  { %v25443_v47 = vadd.f32 %v15690_v17, %v9887_v48 }
 0xf60   :  { %v10069_v53 = vadd.f32 %v25443_v47, %v25441_v56 }
 0xf62   :  { %v10070_v28 = vadd.f32 %v10069_v53, %v25445_v24  ;;  %v19236_v8 = vpop.f32.mrb[100].mxu0 }
 0xf63   :  { %v9900_v61 = vpop.f32.mrb[101].mxu0  ;;  %v9976_v55 = vadd.f32 %v19236_v8, %v15690_v17 }
 0xf64   :  { %v9974_v40 = vadd.f32 %v15690_v17, %v9900_v61  ;;  %v10071_v62 = vadd.f32 %v10070_v28, %v9973_v30  ;;  %v19237_v14 = vpop.f32.mrb[102].mxu0 }
 0xf65   :  { %v9903_v38 = vpop.f32.mrb[103].mxu0  ;;  %v9977_v52 = vadd.f32 %v19237_v14, %v15690_v17 }
 0xf66   :  { %v10072_v5 = vadd.f32 %v10071_v62, %v9974_v40  ;;  %v9975_v36 = vadd.f32 %v15690_v17, %v9903_v38 }
 0xf68   :  { %v10073_v12 = vadd.f32 %v10072_v5, %v9975_v36 }
 0xf6a   :  { %v10074_v25 = vadd.f32 %v10073_v12, %v9976_v55  ;;  %v19240_v39 = vpop.f32.mrb[104].mxu0 }
 0xf6b   :  { %v9916_v26 = vpop.f32.mrb[105].mxu0  ;;  %v9980_v43 = vadd.f32 %v19240_v39, %v15690_v17 }
 0xf6c   :  { %v9978_v1 = vadd.f32 %v15690_v17, %v9916_v26  ;;  %v10075_v35 = vadd.f32 %v10074_v25, %v9977_v52  ;;  %v19241_v11 = vpop.f32.mrb[106].mxu0 }
 0xf6d   :  { %v9919_v16 = vpop.f32.mrb[107].mxu0  ;;  %v9981_v42 = vadd.f32 %v19241_v11, %v15690_v17 }
 0xf6e   :  { %v10076_v34 = vadd.f32 %v10075_v35, %v9978_v1  ;;  %v9979_v41 = vadd.f32 %v15690_v17, %v9919_v16 }
 0xf70   :  { %v10077_v21 = vadd.f32 %v10076_v34, %v9979_v41 }
 0xf72   :  { %v10078_v57 = vadd.f32 %v10077_v21, %v9980_v43  ;;  %v19244_v4 = vpop.f32.mrb[108].mxu0 }
 0xf73   :  { %v9932_v58 = vpop.f32.mrb[109].mxu0  ;;  %v9984_v37 = vadd.f32 %v19244_v4, %v15690_v17 }
 0xf74   :  { %v9982_v2 = vadd.f32 %v15690_v17, %v9932_v58  ;;  %v10079_v45 = vadd.f32 %v10078_v57, %v9981_v42  ;;  %v19245_v27 = vpop.f32.mrb[110].mxu0  ;;  %v20848_v57 = vld [vmem:[%s27029_s8] sm:$0xff]  }
 0xf75   :  { %v9935_v6 = vpop.f32.mrb[111].mxu0  ;;  %v9985_v46 = vadd.f32 %v19245_v27, %v15690_v17  ;;  %v10067_v31 = vmul.f32 0.0, %v9984_v37  ;;  %19262 = vmatprep.mubr.bf16.mxu0 %v20848_v57 }
 0xf76   :  { %v10065_v54 = vmul.f32 %v15691_v23, %v9982_v2  ;;  %v9983_v22 = vadd.f32 %v15690_v17, %v9935_v6 }
 0xf77   :  { %v10068_v60 = vmul.f32 0.0, %v9985_v46 }
 0xf78   :  { %v10080_v9 = vadd.f32 %v10079_v45, %v10065_v54  ;;  %v10066_v32 = vmul.f32 0.0, %v9983_v22 }
 0xf7a   :  { %v10081_v50 = vadd.f32 %v10080_v9, %v10066_v32 }
 0xf7c   :  { %v10082_v13 = vadd.f32 %v10081_v50, %v10067_v31 }
 0xf7e   :  { %v10083_v63 = vadd.f32 %v10082_v13, %v10068_v60 }
 0xf80   :  { %v10084_v51 = vrot.slane %v10083_v63, 4 }
 0xf82   :  { %v10085_v7 = vadd.f32 %v10084_v51, %v10083_v63 }
 0xf84   :  { %v10086_v49 = vrot.slane %v10085_v7, 2 }
 0xf86   :  { %v10087_v44 = vadd.f32 %v10086_v49, %v10085_v7 }
 0xf88   :  { %v10088_v20 = vrot.slane %v10087_v44, 1 }
 0xf8a   :  { %v10089_v18 = vadd.f32 %v10088_v20, %v10087_v44 }
 0xf8c   :  { %v10090_v10 = vmul.f32 0.010204081, %v10089_v18 }
 0xf8e   :  { %v25459_v17 = vsub.f32 %v25441_v56, %v10090_v10  ;;  %v25462_v0 = vsub.f32 %v25443_v47, %v10090_v10  ;;  %v25465_v15 = vsub.f32 %v25445_v24, %v10090_v10  ;;  %v25467_v48 = vsub.f32 %v9973_v30, %v10090_v10 }
 0xf8f   :  { %v25469_v53 = vsub.f32 %v9974_v40, %v10090_v10  ;;  %v25471_v28 = vsub.f32 %v9975_v36, %v10090_v10  ;;  %v25473_v8 = vsub.f32 %v9976_v55, %v10090_v10  ;;  %v25475_v61 = vsub.f32 %v9977_v52, %v10090_v10 }
 0xf90   :  { %v25477_v62 = vsub.f32 %v9978_v1, %v10090_v10  ;;  %v25479_v56 = vsub.f32 %v9979_v41, %v10090_v10  ;;  %v25481_v14 = vsub.f32 %v9980_v43, %v10090_v10  ;;  %v25483_v47 = vsub.f32 %v9981_v42, %v10090_v10 }
 0xf91   :  { %v25485_v24 = vsub.f32 %v9982_v2, %v10090_v10  ;;  %v25487_v30 = vsub.f32 %v9983_v22, %v10090_v10  ;;  %v25489_v40 = vsub.f32 %v9984_v37, %v10090_v10  ;;  %v25491_v38 = vsub.f32 %v9985_v46, %v10090_v10 }
 0xf92   :  { %v10123_v5 = vmul.f32 %v25459_v17, %v25459_v17  ;;  %v10124_v36 = vmul.f32 %v25462_v0, %v25462_v0  ;;  %v10125_v55 = vmul.f32 %v25465_v15, %v25465_v15  ;;  %v10126_v52 = vmul.f32 %v25467_v48, %v25467_v48 }
 0xf93   :  { %v10127_v39 = vmul.f32 %v25469_v53, %v25469_v53  ;;  %v10128_v1 = vmul.f32 %v25471_v28, %v25471_v28  ;;  %v10129_v11 = vmul.f32 %v25473_v8, %v25473_v8  ;;  %v10130_v16 = vmul.f32 %v25475_v61, %v25475_v61 }
 0xf94   :  { %v10139_v12 = vadd.f32 %v10124_v36, %v10123_v5  ;;  %v10131_v41 = vmul.f32 %v25477_v62, %v25477_v62  ;;  %v10132_v21 = vmul.f32 %v25479_v56, %v25479_v56  ;;  %v10119_v4 = vmul.f32 %v15691_v23, %v25485_v24 }
 0xf95   :  { %v10133_v58 = vmul.f32 %v25481_v14, %v25481_v14  ;;  %v10120_v45 = vmul.f32 0.0, %v25487_v30  ;;  %v10134_v27 = vmul.f32 %v25483_v47, %v25483_v47  ;;  %v10121_v37 = vmul.f32 0.0, %v25489_v40 }
 0xf96   :  { %v10140_v25 = vadd.f32 %v10139_v12, %v10125_v55  ;;  %v10135_v54 = vmul.f32 %v10119_v4, %v10119_v4  ;;  %v10122_v9 = vmul.f32 0.0, %v25491_v38 }
 0xf97   :  { %v10136_v46 = vmul.f32 %v10120_v45, %v10120_v45  ;;  %v10137_v23 = vmul.f32 %v10121_v37, %v10121_v37 }
 0xf98   :  { %v10141_v26 = vadd.f32 %v10140_v25, %v10126_v52  ;;  %v10138_v50 = vmul.f32 %v10122_v9, %v10122_v9  ;;  %v15692_v52 = vld [vmem:[%s27030_s6] ss:$0 sm:$0xff] }
 0xf9a   :  { %v10142_v35 = vadd.f32 %v10141_v26, %v10127_v39 }
 0xf9c   :  { %v10143_v29 = vadd.f32 %v10142_v35, %v10128_v1 }
 0xf9e   :  { %v10144_v34 = vadd.f32 %v10143_v29, %v10129_v11 }
 0xfa0   :  { %v10145_v43 = vadd.f32 %v10144_v34, %v10130_v16 }
 0xfa2   :  { %v10146_v42 = vadd.f32 %v10145_v43, %v10131_v41 }
 0xfa4   :  { %v10147_v2 = vadd.f32 %v10146_v42, %v10132_v21 }
 0xfa6   :  { %v10148_v6 = vadd.f32 %v10147_v2, %v10133_v58 }
 0xfa8   :  { %v10149_v22 = vadd.f32 %v10148_v6, %v10134_v27 }
 0xfaa   :  { %v10150_v32 = vadd.f32 %v10149_v22, %v10135_v54 }
 0xfac   :  { %v10151_v31 = vadd.f32 %v10150_v32, %v10136_v46 }
 0xfae   :  { %v10152_v60 = vadd.f32 %v10151_v31, %v10137_v23 }
 0xfb0   :  { %v10153_v13 = vadd.f32 %v10152_v60, %v10138_v50 }
 0xfb2   :  { %v10154_v63 = vrot.slane %v10153_v13, 4 }
 0xfb4   :  { %v10155_v51 = vadd.f32 %v10154_v63, %v10153_v13 }
 0xfb6   :  { %v10156_v7 = vrot.slane %v10155_v51, 2 }
 0xfb8   :  { %v10157_v49 = vadd.f32 %v10156_v7, %v10155_v51 }
 0xfba   :  { %v10158_v44 = vrot.slane %v10157_v49, 1 }
 0xfbc   :  { %v10159_v20 = vadd.f32 %v10158_v44, %v10157_v49 }
 0xfbe   :  { %v10160_v33 = vmul.f32 0.010204081, %v10159_v20 }
 0xfc0   :  { %v10161_v18 = vadd.f32 1e-05, %v10160_v33 }
 0xfc2   :  { %21262 = vrsqrt.f32 %v10161_v18 }
 0xfcc   :  { %v21263_v10 = vpop.eup %21262 }
 0xfcd   :  { %v10163_v5 = vmul.f32 %v21263_v10, %v25459_v17  ;;  %v10164_v36 = vmul.f32 %v21263_v10, %v25462_v0  ;;  %v10165_v55 = vmul.f32 %v21263_v10, %v25465_v15  ;;  %v10166_v12 = vmul.f32 %v21263_v10, %v25467_v48 }
 0xfce   :  { %v10167_v25 = vmul.f32 %v21263_v10, %v25469_v53  ;;  %v10168_v39 = vmul.f32 %v21263_v10, %v25471_v28  ;;  %v10169_v26 = vmul.f32 %v21263_v10, %v25473_v8  ;;  %v10170_v1 = vmul.f32 %v21263_v10, %v25475_v61 }
 0xfcf   :  { %v10171_v17 = vmul.f32 %v21263_v10, %v25477_v62  ;;  %v10172_v0 = vmul.f32 %v21263_v10, %v25479_v56  ;;  %v10173_v15 = vmul.f32 %v21263_v10, %v25481_v14  ;;  %v10174_v48 = vmul.f32 %v21263_v10, %v25483_v47  ;;  %v15693_v62 = vld [vmem:[%s27031_s7] ss:$0 sm:$0xff] }
 0xfd0   :  { %v10175_v35 = vmul.f32 %v21263_v10, %v25485_v24  ;;  %v10176_v11 = vmul.f32 %v21263_v10, %v25487_v30  ;;  %v10177_v53 = vmul.f32 %v21263_v10, %v25489_v40  ;;  %v10178_v28 = vmul.f32 %v21263_v10, %v25491_v38 }
 0xfd1   :  { %v10185_v29 = vmul.f32 %v15692_v52, %v10163_v5  ;;  %v10186_v8 = vmul.f32 %v15692_v52, %v10164_v36  ;;  %v10187_v16 = vmul.f32 %v15692_v52, %v10165_v55  ;;  %v10188_v61 = vmul.f32 %v15692_v52, %v10166_v12 }
 0xfd2   :  { %v10189_v56 = vmul.f32 %v15692_v52, %v10167_v25  ;;  %v10190_v14 = vmul.f32 %v15692_v52, %v10168_v39  ;;  %v10191_v34 = vmul.f32 %v15692_v52, %v10169_v26  ;;  %v10192_v47 = vmul.f32 %v15692_v52, %v10170_v1 }
 0xfd3   :  { %v10193_v41 = vmul.f32 %v15692_v52, %v10171_v17  ;;  %v10194_v24 = vmul.f32 %v15692_v52, %v10172_v0  ;;  %v10195_v43 = vmul.f32 %v15692_v52, %v10173_v15  ;;  %v10196_v30 = vmul.f32 %v15692_v52, %v10174_v48 }
 0xfd4   :  { %v10197_v21 = vmul.f32 %v15692_v52, %v10175_v35  ;;  %v10198_v40 = vmul.f32 %v15692_v52, %v10176_v11  ;;  %v10199_v42 = vmul.f32 %v15692_v52, %v10177_v53  ;;  %v10200_v38 = vmul.f32 %v15692_v52, %v10178_v28 }
 0xfd5   :  { %v10207_v57 = vadd.f32 %v15693_v62, %v10185_v29  ;;  %v10208_v4 = vadd.f32 %v15693_v62, %v10186_v8  ;;  %v10209_v58 = vadd.f32 %v15693_v62, %v10187_v16  ;;  %v10210_v2 = vadd.f32 %v15693_v62, %v10188_v61 }
 0xfd6   :  { %v10211_v45 = vadd.f32 %v15693_v62, %v10189_v56  ;;  %v10212_v27 = vadd.f32 %v15693_v62, %v10190_v14  ;;  %v10213_v6 = vadd.f32 %v15693_v62, %v10191_v34  ;;  %v10214_v37 = vadd.f32 %v15693_v62, %v10192_v47 }
 0xfd7   :  { %v10215_v54 = vadd.f32 %v15693_v62, %v10193_v41  ;;  %v10216_v22 = vadd.f32 %v15693_v62, %v10194_v24  ;;  %v10217_v9 = vadd.f32 %v15693_v62, %v10195_v43  ;;  %v10218_v46 = vadd.f32 %v15693_v62, %v10196_v30  ;;  %v20847_v30 = vld [vmem:[%s27029_s8 + $0x18] sm:$0xff]  }
 0xfd8   :  { %v10219_v32 = vadd.f32 %v15693_v62, %v10197_v21  ;;  %v10220_v23 = vadd.f32 %v15693_v62, %v10198_v40  ;;  %v10221_v31 = vadd.f32 %v15693_v62, %v10199_v42  ;;  %v10222_v50 = vadd.f32 %v15693_v62, %v10200_v38  ;;  %v20849_v21 = vld [vmem:[%s27029_s8 + $0x8] sm:$0xff]   ;;  %v20850_v40 = vld [vmem:[%s27029_s8 + $0x20] sm:$0xff]   ;;  %v20852_v38 = vld [vmem:[%s27029_s8 + $0x30] sm:$0xff]  }
 0xfd9   :  { %vm10223_vm5 = vcmp.ge.f32.partialorder %v10207_v57, 0.0  ;;  %vm10224_vm6 = vcmp.ge.f32.partialorder %v10208_v4, 0.0  ;;  %vm10225_vm7 = vcmp.ge.f32.partialorder %v10209_v58, 0.0  ;;  %vm10226_vm8 = vcmp.ge.f32.partialorder %v10210_v2, 0.0  ;;  %v20851_v42 = vld [vmem:[%s27029_s8 + $0x28] sm:$0xff]  }
 0xfda   :  { %vm10227_vm9 = vcmp.ge.f32.partialorder %v10211_v45, 0.0  ;;  %vm10228_vm10 = vcmp.ge.f32.partialorder %v10212_v27, 0.0  ;;  %vm10229_vm11 = vcmp.ge.f32.partialorder %v10213_v6, 0.0  ;;  %vm10230_vm12 = vcmp.ge.f32.partialorder %v10214_v37, 0.0 }
 0xfdb   :  { %vm10231_vm13 = vcmp.ge.f32.partialorder %v10215_v54, 0.0  ;;  %vm10232_vm14 = vcmp.ge.f32.partialorder %v10216_v22, 0.0  ;;  %vm10233_vm15 = vcmp.ge.f32.partialorder %v10217_v9, 0.0  ;;  %vm10234_vm0 = vcmp.ge.f32.partialorder %v10218_v46, 0.0 }
 0xfdc   :  { %vm10235_vm1 = vcmp.ge.f32.partialorder %v10219_v32, 0.0  ;;  %vm10236_vm2 = vcmp.ge.f32.partialorder %v10220_v23, 0.0  ;;  %vm10237_vm3 = vcmp.ge.f32.partialorder %v10221_v31, 0.0  ;;  %vm10238_vm4 = vcmp.ge.f32.partialorder %v10222_v50, 0.0 }
 0xfdd   :  { %v10239_v60 = vmul.f32 0.2, %v10207_v57  ;;  %v10240_v13 = vmul.f32 0.2, %v10208_v4  ;;  %v10241_v63 = vmul.f32 0.2, %v10209_v58 }
 0xfde   :  { %v10242_v51 = vmul.f32 0.2, %v10210_v2  ;;  %v10243_v7 = vmul.f32 0.2, %v10211_v45  ;;  %v10244_v49 = vmul.f32 0.2, %v10212_v27 }
 0xfdf   :  { %v10245_v44 = vmul.f32 0.2, %v10213_v6  ;;  %v10246_v20 = vmul.f32 0.2, %v10214_v37  ;;  %v10247_v33 = vmul.f32 0.2, %v10215_v54  ;;  %v10255_v18 = vsel %vm10223_vm5, %v10207_v57, %v10239_v60 }
 0xfe0   :  { %v10248_v10 = vmul.f32 0.2, %v10216_v22  ;;  %v10249_v5 = vmul.f32 0.2, %v10217_v9  ;;  %v10250_v36 = vmul.f32 0.2, %v10218_v46  ;;  %v10256_v55 = vsel %vm10224_vm6, %v10208_v4, %v10240_v13 }
 0xfe1   :  { %v10251_v12 = vmul.f32 0.2, %v10219_v32  ;;  %v10252_v52 = vmul.f32 0.2, %v10220_v23  ;;  %v10253_v25 = vmul.f32 0.2, %v10221_v31  ;;  %v10257_v39 = vsel %vm10225_vm7, %v10209_v58, %v10241_v63 }
 0xfe2   :  { %v10254_v26 = vmul.f32 0.2, %v10222_v50  ;;  %v10258_v1 = vsel %vm10226_vm8, %v10210_v2, %v10242_v51  ;;  %v10259_v17 = vsel %vm10227_vm9, %v10211_v45, %v10243_v7  ;;  %v10260_v0 = vsel %vm10228_vm10, %v10212_v27, %v10244_v49  ;;  %v20860_v57 = vld [vmem:[%s27032_s9 + $0x80] ss:$8 sps:$4 sm:$0xff]   ;;  %v20862_v4 = vld [vmem:[%s27032_s9 + $0x84] ss:$8 sps:$4 sm:$0xff]  }
 0xfe3   :  { %v10261_v15 = vsel %vm10229_vm11, %v10213_v6, %v10245_v44  ;;  %v10262_v48 = vsel %vm10230_vm12, %v10214_v37, %v10246_v20  ;;  %v10263_v35 = vsel %vm10231_vm13, %v10215_v54, %v10247_v33  ;;  %v10264_v11 = vsel %vm10232_vm14, %v10216_v22, %v10248_v10  ;;  %v20853_v58 = vld [vmem:[%s27029_s8 + $0x38] sm:$0xff]   ;;  %v20854_v27 = vld [vmem:[%s27029_s8 + $0x40] sm:$0xff]   ;;  %v20855_v7 = vld [vmem:[%s27029_s8 + $0x48] sm:$0xff]  }
 0xfe4   :  { %v10265_v53 = vsel %vm10233_vm15, %v10217_v9, %v10249_v5  ;;  %v10266_v28 = vsel %vm10234_vm0, %v10218_v46, %v10250_v36  ;;  %v10267_v29 = vsel %vm10235_vm1, %v10219_v32, %v10251_v12  ;;  %v10268_v8 = vsel %vm10236_vm2, %v10220_v23, %v10252_v52  ;;  %v20863_v2 = vld [vmem:[%s27032_s9 + $0x90] ss:$8 sps:$4 sm:$0xff]   ;;  %v20865_v45 = vld [vmem:[%s27032_s9 + $0x94] ss:$8 sps:$4 sm:$0xff]   ;;  %v20868_v6 = vld [vmem:[%s27032_s9 + $0xa4] ss:$8 sps:$4 sm:$0xff]  }
 0xfe5   :  { %v10269_v16 = vsel %vm10237_vm3, %v10221_v31, %v10253_v25  ;;  %v10270_v61 = vsel %vm10238_vm4, %v10222_v50, %v10254_v26  ;;  %v25562_v62 = vpack.c.bf16 %v10256_v55, %v10255_v18  ;;  %v25564_v56 = vpack.c.bf16 %v10258_v1, %v10257_v39  ;;  %v20866_v37 = vld [vmem:[%s27032_s9 + $0xa0] ss:$8 sps:$4 sm:$0xff]   ;;  %v20871_v54 = vld [vmem:[%s27032_s9 + $0xb0] ss:$8 sps:$4 sm:$0xff]   ;;  %v20873_v22 = vld [vmem:[%s27032_s9 + $0xb4] ss:$8 sps:$4 sm:$0xff]  }
 0xfe6   :  { %v25566_v14 = vpack.c.bf16 %v10260_v0, %v10259_v17  ;;  %v25568_v34 = vpack.c.bf16 %v10262_v48, %v10261_v15  ;;  %v25570_v47 = vpack.c.bf16 %v10264_v11, %v10263_v35  ;;  %v25572_v41 = vpack.c.bf16 %v10266_v28, %v10265_v53  ;;  %v20874_v9 = vld [vmem:[%s27032_s9 + $0xc0] ss:$8 sps:$4 sm:$0xff]   ;;  %v20876_v46 = vld [vmem:[%s27032_s9 + $0xc4] ss:$8 sps:$4 sm:$0xff]   ;;  %v20877_v32 = vld [vmem:[%s27032_s9 + $0xd0] ss:$8 sps:$4 sm:$0xff]  }
 0xfe7   :  { %v25574_v24 = vpack.c.bf16 %v10268_v8, %v10267_v29  ;;  %v25576_v43 = vpack.c.bf16 %v10270_v61, %v10269_v16  ;;  %19246 = vmatprep.subr.bf16.mxu0 %v25562_v62  ;;  %19266 = vmatprep.subr.bf16.mxu1 %v25562_v62  ;;  %v20879_v23 = vld [vmem:[%s27032_s9 + $0xd4] ss:$8 sps:$4 sm:$0xff]   ;;  %v20880_v31 = vld [vmem:[%s27032_s9 + $0xe0] ss:$8 sps:$4 sm:$0xff]   ;;  %v20882_v50 = vld [vmem:[%s27032_s9 + $0xe4] ss:$8 sps:$4 sm:$0xff]  }
 0xfe8   :  { %19247 = vmatpush3.bf16.msra.mxu0 %v25562_v62  ;;  %19267 = vmatpush3.bf16.msra.mxu1 %v25562_v62  ;;  %v20883_v60 = vld [vmem:[%s27032_s9 + $0xf0] ss:$8 sps:$4 sm:$0xff]   ;;  %v20885_v13 = vld [vmem:[%s27032_s9 + $0xf4] ss:$8 sps:$4 sm:$0xff]   ;;  %v20888_v63 = vld [vmem:[%s27032_s9 + $0x4] ss:$8 sps:$4 sm:$0xff]  }
 0xfe9   :  { %19248 = vmatprep.subr.bf16.mxu0 %v25564_v56  ;;  %19268 = vmatprep.subr.bf16.mxu1 %v25564_v56  ;;  %v21453_v51 = vmov 0   ;;  %v20856_v49 = vld [vmem:[%s27029_s8 + $0x50] sm:$0xff]   ;;  %v20857_v44 = vld [vmem:[%s27029_s8 + $0x58] sm:$0xff]   ;;  %v20858_v20 = vld [vmem:[%s27029_s8 + $0x60] sm:$0xff]  }
 0xfea   :  { %v20859_v33 = vld [vmem:[%s27029_s8 + $0x68] sm:$0xff]   ;;  %v20869_v18 = vld [vmem:[%s27029_s8 + $0x70] sm:$0xff]   ;;  %v20870_v10 = vld [vmem:[%s27029_s8 + $0x78] sm:$0xff]  }
 0xfeb   :  { %v20895_v5 = vld [vmem:[%s27029_s8 + $0x80] sm:$0xff]   ;;  %v20891_v35 = vld [vmem:[%s27032_s9 + $0x14] ss:$8 sps:$4 sm:$0xff]   ;;  %v20889_v53 = vld [vmem:[%s27032_s9 + $0x10] ss:$8 sps:$4 sm:$0xff]  }
 0xfec   :  { %19249 = vmatpush3.bf16.msra.mxu0 %v25564_v56  ;;  %19269 = vmatpush3.bf16.msra.mxu1 %v25564_v56  ;;  %v20886_v17 = vld [vmem:[%s27032_s9] ss:$8 sps:$4 sm:$0xff]   ;;  %v20894_v28 = vld [vmem:[%s27032_s9 + $0x24] ss:$8 sps:$4 sm:$0xff]   ;;  %v20899_v16 = vld [vmem:[%s27032_s9 + $0x34] ss:$8 sps:$4 sm:$0xff]  }
 0xfed   :  { %19250 = vmatprep.subr.bf16.mxu0 %v25566_v14  ;;  %19270 = vmatprep.subr.bf16.mxu1 %v25566_v14  ;;  %v20896_v29 = vld [vmem:[%s27029_s8 + $0x88] sm:$0xff]   ;;  %v20921_v61 = vld [vmem:[%s27029_s8 + $0x90] sm:$0xff]  }
 0xfee   :  { %v20892_v8 = vld [vmem:[%s27032_s9 + $0x20] ss:$8 sps:$4 sm:$0xff]  }
 0xff0   :  { %19251 = vmatpush3.bf16.msra.mxu0 %v25566_v14  ;;  %19271 = vmatpush3.bf16.msra.mxu1 %v25566_v14 }
 0xff1   :  { %19252 = vmatprep.subr.bf16.mxu0 %v25568_v34  ;;  %19272 = vmatprep.subr.bf16.mxu1 %v25568_v34 }
 0xff4   :  { %19253 = vmatpush3.bf16.msra.mxu0 %v25568_v34  ;;  %19273 = vmatpush3.bf16.msra.mxu1 %v25568_v34 }
 0xff5   :  { %19254 = vmatprep.subr.bf16.mxu0 %v25570_v47  ;;  %19274 = vmatprep.subr.bf16.mxu1 %v25570_v47 }
 0xff8   :  { %19255 = vmatpush3.bf16.msra.mxu0 %v25570_v47  ;;  %19275 = vmatpush3.bf16.msra.mxu1 %v25570_v47 }
 0xff9   :  { %19256 = vmatprep.subr.bf16.mxu0 %v25572_v41  ;;  %19276 = vmatprep.subr.bf16.mxu1 %v25572_v41 }
 0xffc   :  { %19257 = vmatpush3.bf16.msra.mxu0 %v25572_v41  ;;  %19277 = vmatpush3.bf16.msra.mxu1 %v25572_v41 }
 0xffd   :  { %19258 = vmatprep.subr.bf16.mxu0 %v25574_v24  ;;  %19278 = vmatprep.subr.bf16.mxu1 %v25574_v24 }
0x1000   :  { %19259 = vmatpush3.bf16.msra.mxu0 %v25574_v24  ;;  %19279 = vmatpush3.bf16.msra.mxu1 %v25574_v24 }
0x1001   :  { %19260 = vmatprep.subr.bf16.mxu0 %v25576_v43  ;;  %19280 = vmatprep.subr.bf16.mxu1 %v25576_v43 }
0x1004   :  { %19261 = vmatpush3.bf16.msra.mxu0 %v25576_v43  ;;  %19281 = vmatpush3.bf16.msra.mxu1 %v25576_v43 }
0x1005   :  { %19286 = vmatprep.subr.bf16.mxu1 %v25562_v62  ;;  %10543 = vmatprep.subr.bf16.mxu0 %v20862_v4  ;;  %v20906_v4 = vld [vmem:[%s27032_s9 + $0x60] ss:$8 sps:$4 sm:$0xff]  }
0x1007   :  { %19283 = vmatmul.mubr.bf16.vlgmr.msra.gmra.mrb[160].mxu1 %v20847_v30  ;;  %19263 = vmatmul.mubr.bf16.vlgmr.msra.gmra.mrb[192].mxu0 %v20849_v21  ;;  %v20897_v30 = vld [vmem:[%s27032_s9 + $0x30] ss:$8 sps:$4 sm:$0xff]   ;;  %v20902_v21 = vld [vmem:[%s27032_s9 + $0x44] ss:$8 sps:$4 sm:$0xff]  }
0x1008   :  { %19287 = vmatpush3.bf16.msra.mxu1 %v25562_v62  ;;  %19302 = vmatprep.mubr.bf16.mxu1 %v20850_v40  ;;  %v20900_v40 = vld [vmem:[%s27032_s9 + $0x40] ss:$8 sps:$4 sm:$0xff]  }
0x1009   :  { %19288 = vmatprep.subr.bf16.mxu1 %v25564_v56  ;;  %10544 = vmatpush1.bf16.msra.mxu0 %v20860_v57  ;;  %v20908_v57 = vld [vmem:[%s27032_s9 + $0x64] ss:$8 sps:$4 sm:$0xff]  }
0x100a   :  { %10545 = vmatprep.subr.bf16.mxu0 %v20865_v45  ;;  %10575 = vmatprep.mubr.bf16.mxu0 %v21453_v51  ;;  %v20914_v45 = vld [vmem:[%s27032_s9 + $0x104] ss:$8 sps:$4 sm:$0xff]  }
0x100c   :  { %19289 = vmatpush3.bf16.msra.mxu1 %v25564_v56 }
0x100d   :  { %19290 = vmatprep.subr.bf16.mxu1 %v25566_v14  ;;  %10546 = vmatpush1.bf16.msra.mxu0 %v20863_v2  ;;  %v20909_v2 = vld [vmem:[%s27032_s9 + $0x70] ss:$8 sps:$4 sm:$0xff]  }
0x100e   :  { %10547 = vmatprep.subr.bf16.mxu0 %v20868_v6 }
0x1010   :  { %19291 = vmatpush3.bf16.msra.mxu1 %v25566_v14 }
0x1011   :  { %19292 = vmatprep.subr.bf16.mxu1 %v25568_v34  ;;  %10548 = vmatpush1.bf16.msra.mxu0 %v20866_v37 }
0x1012   :  { %10549 = vmatprep.subr.bf16.mxu0 %v20873_v22 }
0x1014   :  { %19293 = vmatpush3.bf16.msra.mxu1 %v25568_v34 }
0x1015   :  { %19294 = vmatprep.subr.bf16.mxu1 %v25570_v47  ;;  %10550 = vmatpush1.bf16.msra.mxu0 %v20871_v54  ;;  %v20912_v54 = vld [vmem:[%s27032_s9 + $0x100] ss:$8 sps:$4 sm:$0xff]  }
0x1016   :  { %10551 = vmatprep.subr.bf16.mxu0 %v20876_v46  ;;  %v20917_v46 = vld [vmem:[%s27032_s9 + $0x114] ss:$8 sps:$4 sm:$0xff]  }
0x1018   :  { %19295 = vmatpush3.bf16.msra.mxu1 %v25570_v47 }
0x1019   :  { %19296 = vmatprep.subr.bf16.mxu1 %v25572_v41  ;;  %10552 = vmatpush1.bf16.msra.mxu0 %v20874_v9 }
0x101a   :  { %10553 = vmatprep.subr.bf16.mxu0 %v20879_v23  ;;  %v20915_v23 = vld [vmem:[%s27032_s9 + $0x110] ss:$8 sps:$4 sm:$0xff]  }
0x101c   :  { %19297 = vmatpush3.bf16.msra.mxu1 %v25572_v41 }
0x101d   :  { %19298 = vmatprep.subr.bf16.mxu1 %v25574_v24  ;;  %10554 = vmatpush1.bf16.msra.mxu0 %v20877_v32 }
0x101e   :  { %10555 = vmatprep.subr.bf16.mxu0 %v20882_v50  ;;  %v20922_v50 = vld [vmem:[%s27029_s8 + $0x98] sm:$0xff]  }
0x1020   :  { %19299 = vmatpush3.bf16.msra.mxu1 %v25574_v24 }
0x1021   :  { %19300 = vmatprep.subr.bf16.mxu1 %v25576_v43  ;;  %10556 = vmatpush1.bf16.msra.mxu0 %v20880_v31  ;;  %v20920_v31 = vld [vmem:[%s27032_s9 + $0x124] ss:$8 sps:$4 sm:$0xff]  }
0x1022   :  { %10557 = vmatprep.subr.bf16.mxu0 %v20885_v13  ;;  %v20925_v13 = vld [vmem:[%s27032_s9 + $0x134] ss:$8 sps:$4 sm:$0xff]  }
0x1024   :  { %19301 = vmatpush3.bf16.msra.mxu1 %v25576_v43 }
0x1025   :  { %19306 = vmatprep.subr.bf16.mxu1 %v25562_v62  ;;  %10558 = vmatpush1.bf16.msra.mxu0 %v20883_v60  ;;  %v20918_v60 = vld [vmem:[%s27032_s9 + $0x120] ss:$8 sps:$4 sm:$0xff]  }
0x1026   :  { %10676 = vmatprep.subr.bf16.mxu0 %v20888_v63  ;;  %v20947_v63 = vld [vmem:[%s27029_s8 + $0xa0] sm:$0xff]  }
0x1027   :  { %19303 = vmatmul.mubr.bf16.vlgmr.msra.gmra.mrb[164].mxu1 %v20851_v42  ;;  %v20905_v42 = vld [vmem:[%s27032_s9 + $0x54] ss:$8 sps:$4 sm:$0xff]  }
0x1028   :  { %19307 = vmatpush3.bf16.msra.mxu1 %v25562_v62  ;;  %19322 = vmatprep.mubr.bf16.mxu1 %v20852_v38  ;;  %v20903_v38 = vld [vmem:[%s27032_s9 + $0x50] ss:$8 sps:$4 sm:$0xff]  }
0x1029   :  { %19308 = vmatprep.subr.bf16.mxu1 %v25564_v56 }
0x102c   :  { %19309 = vmatpush3.bf16.msra.mxu1 %v25564_v56 }
0x102d   :  { %19310 = vmatprep.subr.bf16.mxu1 %v25566_v14 }
0x1030   :  { %19311 = vmatpush3.bf16.msra.mxu1 %v25566_v14 }
0x1031   :  { %19312 = vmatprep.subr.bf16.mxu1 %v25568_v34 }
0x1034   :  { %19313 = vmatpush3.bf16.msra.mxu1 %v25568_v34 }
0x1035   :  { %19314 = vmatprep.subr.bf16.mxu1 %v25570_v47 }
0x1038   :  { %19315 = vmatpush3.bf16.msra.mxu1 %v25570_v47 }
0x1039   :  { %19316 = vmatprep.subr.bf16.mxu1 %v25572_v41 }
0x103c   :  { %19317 = vmatpush3.bf16.msra.mxu1 %v25572_v41 }
0x103d   :  { %19318 = vmatprep.subr.bf16.mxu1 %v25574_v24 }
0x1040   :  { %19319 = vmatpush3.bf16.msra.mxu1 %v25574_v24 }
0x1041   :  { %19320 = vmatprep.subr.bf16.mxu1 %v25576_v43 }
0x1044   :  { %19321 = vmatpush3.bf16.msra.mxu1 %v25576_v43 }
0x1045   :  { %19326 = vmatprep.subr.bf16.mxu1 %v25562_v62 }
0x1047   :  { %19323 = vmatmul.mubr.bf16.vlgmr.msra.gmra.mrb[168].mxu1 %v20853_v58  ;;  %v20911_v58 = vld [vmem:[%s27032_s9 + $0x74] ss:$8 sps:$4 sm:$0xff]  }
0x1048   :  { %19327 = vmatpush3.bf16.msra.mxu1 %v25562_v62  ;;  %19342 = vmatprep.mubr.bf16.mxu1 %v20854_v27 }
0x1049   :  { %19328 = vmatprep.subr.bf16.mxu1 %v25564_v56 }
0x104c   :  { %19329 = vmatpush3.bf16.msra.mxu1 %v25564_v56 }
0x104d   :  { %19330 = vmatprep.subr.bf16.mxu1 %v25566_v14 }
0x1050   :  { %19331 = vmatpush3.bf16.msra.mxu1 %v25566_v14 }
0x1051   :  { %19332 = vmatprep.subr.bf16.mxu1 %v25568_v34 }
0x1054   :  { %19333 = vmatpush3.bf16.msra.mxu1 %v25568_v34 }
0x1055   :  { %19334 = vmatprep.subr.bf16.mxu1 %v25570_v47 }
0x1058   :  { %19335 = vmatpush3.bf16.msra.mxu1 %v25570_v47 }
0x1059   :  { %19336 = vmatprep.subr.bf16.mxu1 %v25572_v41 }
0x105c   :  { %19337 = vmatpush3.bf16.msra.mxu1 %v25572_v41 }
0x105d   :  { %19338 = vmatprep.subr.bf16.mxu1 %v25574_v24 }
0x1060   :  { %19339 = vmatpush3.bf16.msra.mxu1 %v25574_v24 }
0x1061   :  { %19340 = vmatprep.subr.bf16.mxu1 %v25576_v43 }
0x1064   :  { %19341 = vmatpush3.bf16.msra.mxu1 %v25576_v43 }
0x1065   :  { %19346 = vmatprep.subr.bf16.mxu1 %v25562_v62 }
0x1067   :  { %19343 = vmatmul.mubr.bf16.vlgmr.msra.gmra.mrb[172].mxu1 %v20855_v7  ;;  %v20923_v7 = vld [vmem:[%s27032_s9 + $0x130] ss:$8 sps:$4 sm:$0xff]  }
0x1068   :  { %19347 = vmatpush3.bf16.msra.mxu1 %v25562_v62  ;;  %19362 = vmatprep.mubr.bf16.mxu1 %v20856_v49  ;;  %v20928_v49 = vld [vmem:[%s27032_s9 + $0x144] ss:$8 sps:$4 sm:$0xff]  }
0x1069   :  { %19348 = vmatprep.subr.bf16.mxu1 %v25564_v56 }
0x106c   :  { %19349 = vmatpush3.bf16.msra.mxu1 %v25564_v56 }
0x106d   :  { %19350 = vmatprep.subr.bf16.mxu1 %v25566_v14 }
0x1070   :  { %19351 = vmatpush3.bf16.msra.mxu1 %v25566_v14 }
0x1071   :  { %19352 = vmatprep.subr.bf16.mxu1 %v25568_v34 }
0x1074   :  { %19353 = vmatpush3.bf16.msra.mxu1 %v25568_v34 }
0x1075   :  { %19354 = vmatprep.subr.bf16.mxu1 %v25570_v47 }
0x1078   :  { %19355 = vmatpush3.bf16.msra.mxu1 %v25570_v47 }
0x1079   :  { %19356 = vmatprep.subr.bf16.mxu1 %v25572_v41 }
0x107c   :  { %19357 = vmatpush3.bf16.msra.mxu1 %v25572_v41 }
0x107d   :  { %19358 = vmatprep.subr.bf16.mxu1 %v25574_v24 }
0x1080   :  { %19359 = vmatpush3.bf16.msra.mxu1 %v25574_v24 }
0x1081   :  { %19360 = vmatprep.subr.bf16.mxu1 %v25576_v43 }
0x1084   :  { %19361 = vmatpush3.bf16.msra.mxu1 %v25576_v43 }
0x1085   :  { %19366 = vmatprep.subr.bf16.mxu1 %v25562_v62 }
0x1087   :  { %19363 = vmatmul.mubr.bf16.vlgmr.msra.gmra.mrb[176].mxu1 %v20857_v44  ;;  %v20926_v44 = vld [vmem:[%s27032_s9 + $0x140] ss:$8 sps:$4 sm:$0xff]  }
0x1088   :  { %19367 = vmatpush3.bf16.msra.mxu1 %v25562_v62  ;;  %19382 = vmatprep.mubr.bf16.mxu1 %v20858_v20  ;;  %v20931_v20 = vld [vmem:[%s27032_s9 + $0x154] ss:$8 sps:$4 sm:$0xff]  }
0x1089   :  { %19368 = vmatprep.subr.bf16.mxu1 %v25564_v56 }
0x108c   :  { %19369 = vmatpush3.bf16.msra.mxu1 %v25564_v56 }
0x108d   :  { %19370 = vmatprep.subr.bf16.mxu1 %v25566_v14 }
0x1090   :  { %19371 = vmatpush3.bf16.msra.mxu1 %v25566_v14 }
0x1091   :  { %19372 = vmatprep.subr.bf16.mxu1 %v25568_v34 }
0x1094   :  { %19373 = vmatpush3.bf16.msra.mxu1 %v25568_v34 }
0x1095   :  { %19374 = vmatprep.subr.bf16.mxu1 %v25570_v47 }
0x1098   :  { %19375 = vmatpush3.bf16.msra.mxu1 %v25570_v47 }
0x1099   :  { %19376 = vmatprep.subr.bf16.mxu1 %v25572_v41 }
0x109c   :  { %19377 = vmatpush3.bf16.msra.mxu1 %v25572_v41 }
0x109d   :  { %19378 = vmatprep.subr.bf16.mxu1 %v25574_v24 }
0x10a0   :  { %19379 = vmatpush3.bf16.msra.mxu1 %v25574_v24 }
0x10a1   :  { %19380 = vmatprep.subr.bf16.mxu1 %v25576_v43 }
0x10a4   :  { %19381 = vmatpush3.bf16.msra.mxu1 %v25576_v43 }
0x10a5   :  { %19386 = vmatprep.subr.bf16.mxu1 %v25562_v62 }
0x10a7   :  { %19383 = vmatmul.mubr.bf16.vlgmr.msra.gmra.mrb[180].mxu1 %v20859_v33  ;;  %v20929_v33 = vld [vmem:[%s27032_s9 + $0x150] ss:$8 sps:$4 sm:$0xff]  }
0x10a8   :  { %19387 = vmatpush3.bf16.msra.mxu1 %v25562_v62  ;;  %19402 = vmatprep.mubr.bf16.mxu1 %v20869_v18  ;;  %v20934_v18 = vld [vmem:[%s27032_s9 + $0x164] ss:$8 sps:$4 sm:$0xff]  }
0x10a9   :  { %19388 = vmatprep.subr.bf16.mxu1 %v25564_v56 }
0x10ac   :  { %19389 = vmatpush3.bf16.msra.mxu1 %v25564_v56 }
0x10ad   :  { %19390 = vmatprep.subr.bf16.mxu1 %v25566_v14 }
0x10b0   :  { %19391 = vmatpush3.bf16.msra.mxu1 %v25566_v14 }
0x10b1   :  { %19392 = vmatprep.subr.bf16.mxu1 %v25568_v34 }
0x10b4   :  { %19393 = vmatpush3.bf16.msra.mxu1 %v25568_v34 }
0x10b5   :  { %19394 = vmatprep.subr.bf16.mxu1 %v25570_v47 }
0x10b8   :  { %19395 = vmatpush3.bf16.msra.mxu1 %v25570_v47 }
0x10b9   :  { %19396 = vmatprep.subr.bf16.mxu1 %v25572_v41 }
0x10bc   :  { %19397 = vmatpush3.bf16.msra.mxu1 %v25572_v41 }
0x10bd   :  { %19398 = vmatprep.subr.bf16.mxu1 %v25574_v24 }
0x10c0   :  { %19399 = vmatpush3.bf16.msra.mxu1 %v25574_v24 }
0x10c1   :  { %19400 = vmatprep.subr.bf16.mxu1 %v25576_v43 }
0x10c4   :  { %19401 = vmatpush3.bf16.msra.mxu1 %v25576_v43 }
0x10c5   :  { %19406 = vmatprep.subr.bf16.mxu1 %v25562_v62 }
0x10c7   :  { %19403 = vmatmul.mubr.bf16.vlgmr.msra.gmra.mrb[184].mxu1 %v20870_v10  ;;  %v20932_v10 = vld [vmem:[%s27032_s9 + $0x160] ss:$8 sps:$4 sm:$0xff]  }
0x10c8   :  { %19407 = vmatpush3.bf16.msra.mxu1 %v25562_v62  ;;  %19422 = vmatprep.mubr.bf16.mxu1 %v20895_v5  ;;  %v20937_v5 = vld [vmem:[%s27032_s9 + $0x174] ss:$8 sps:$4 sm:$0xff]  }
0x10c9   :  { %19408 = vmatprep.subr.bf16.mxu1 %v25564_v56 }
0x10cc   :  { %19409 = vmatpush3.bf16.msra.mxu1 %v25564_v56 }
0x10cd   :  { %19410 = vmatprep.subr.bf16.mxu1 %v25566_v14 }
0x10d0   :  { %19411 = vmatpush3.bf16.msra.mxu1 %v25566_v14 }
0x10d1   :  { %19412 = vmatprep.subr.bf16.mxu1 %v25568_v34 }
0x10d4   :  { %19413 = vmatpush3.bf16.msra.mxu1 %v25568_v34 }
0x10d5   :  { %19414 = vmatprep.subr.bf16.mxu1 %v25570_v47 }
0x10d8   :  { %19415 = vmatpush3.bf16.msra.mxu1 %v25570_v47 }
0x10d9   :  { %19416 = vmatprep.subr.bf16.mxu1 %v25572_v41 }
0x10da   :  { %v19284_v36 = vpop.f32.mrb[160].mxu1  ;;  %v25814_v55 = vpop.f32.mrb[192].mxu0 }
0x10db   :  { %v10429_v12 = vpop.f32.mrb[161].mxu1  ;;  %v25816_v52 = vpop.f32.mrb[193].mxu0 }
0x10dc   :  { %v19285_v25 = vpop.f32.mrb[162].mxu1  ;;  %19417 = vmatpush3.bf16.msra.mxu1 %v25572_v41  ;;  %v25819_v39 = vpop.f32.mrb[194].mxu0 }
0x10dd   :  { %v10445_v26 = vpack.c.bf16 %v19285_v25, %v19284_v36  ;;  %v10432_v1 = vpop.f32.mrb[163].mxu1  ;;  %19418 = vmatprep.subr.bf16.mxu1 %v25574_v24  ;;  %v10361_v0 = vpack.c.bf16 %v25819_v39, %v25814_v55  ;;  %v25827_v15 = vpop.f32.mrb[195].mxu0  ;;  %v20935_v36 = vld [vmem:[%s27032_s9 + $0x170] ss:$8 sps:$4 sm:$0xff]   ;;  %v20940_v55 = vld [vmem:[%s27032_s9 + $0x184] ss:$8 sps:$4 sm:$0xff]  }
0x10de   :  { %v10444_v48 = vpack.c.bf16 %v10432_v1, %v10429_v12  ;;  %v10360_v11 = vpack.c.bf16 %v25827_v15, %v25816_v52  ;;  %v20938_v39 = vld [vmem:[%s27032_s9 + $0x180] ss:$8 sps:$4 sm:$0xff]   ;;  %v20941_v15 = vld [vmem:[%s27032_s9 + $0x190] ss:$8 sps:$4 sm:$0xff]  }
0x10e0   :  { %10576 = vmatmul.mubr.bf16.vlgmr.msra.gmra.mrb[196].mxu0 %v10444_v48  ;;  %19419 = vmatpush3.bf16.msra.mxu1 %v25574_v24  ;;  %v20946_v48 = vld [vmem:[%s27032_s9 + $0x1a4] ss:$8 sps:$4 sm:$0xff]  }
0x10e1   :  { %10677 = vmatpush1.bf16.msra.mxu0 %v20886_v17  ;;  %19420 = vmatprep.subr.bf16.mxu1 %v25576_v43  ;;  %v20943_v17 = vld [vmem:[%s27032_s9 + $0x194] ss:$8 sps:$4 sm:$0xff]  }
0x10e2   :  { %10678 = vmatprep.subr.bf16.mxu0 %v20891_v35  ;;  %10585 = vmatprep.mubr.bf16.mxu0 %v21453_v51  ;;  %v20948_v35 = vld [vmem:[%s27029_s8 + $0xa8] sm:$0xff]  }
0x10e4   :  { %19421 = vmatpush3.bf16.msra.mxu1 %v25576_v43 }
0x10e5   :  { %10679 = vmatpush1.bf16.msra.mxu0 %v20889_v53  ;;  %19426 = vmatprep.subr.bf16.mxu1 %v25562_v62  ;;  %v20951_v53 = vld [vmem:[%s27032_s9 + $0x1b4] ss:$8 sps:$4 sm:$0xff]  }
0x10e6   :  { %10680 = vmatprep.subr.bf16.mxu0 %v20894_v28  ;;  %v20973_v28 = vld [vmem:[%s27029_s8 + $0xb0] sm:$0xff]  }
0x10e7   :  { %19423 = vmatmul.mubr.bf16.vlgmr.msra.gmra.mrb[188].mxu1 %v20896_v29  ;;  %v20949_v29 = vld [vmem:[%s27032_s9 + $0x1b0] ss:$8 sps:$4 sm:$0xff]  }
0x10e8   :  { %19427 = vmatpush3.bf16.msra.mxu1 %v25562_v62  ;;  %10586 = vmatmul.mubr.bf16.gmra.mrb[200].mxu0 %v10445_v26 }
0x10e9   :  { %10681 = vmatpush1.bf16.msra.mxu0 %v20892_v8  ;;  %19428 = vmatprep.subr.bf16.mxu1 %v25564_v56  ;;  %v20954_v8 = vld [vmem:[%s27032_s9 + $0x1c4] ss:$8 sps:$4 sm:$0xff]  }
0x10ea   :  { %10682 = vmatprep.subr.bf16.mxu0 %v20899_v16  ;;  %10708 = vmatprep.mubr.bf16.mxu0 %v21453_v51  ;;  %v20952_v16 = vld [vmem:[%s27032_s9 + $0x1c0] ss:$8 sps:$4 sm:$0xff]  }
0x10eb   :  { %19442 = vmatprep.mubr.bf16.mxu1 %v20921_v61  ;;  %v20957_v61 = vld [vmem:[%s27032_s9 + $0x1d4] ss:$8 sps:$4 sm:$0xff]  }
0x10ec   :  { %19429 = vmatpush3.bf16.msra.mxu1 %v25564_v56 }
0x10ed   :  { %10683 = vmatpush1.bf16.msra.mxu0 %v20897_v30  ;;  %19430 = vmatprep.subr.bf16.mxu1 %v25566_v14  ;;  %v20955_v30 = vld [vmem:[%s27032_s9 + $0x1d0] ss:$8 sps:$4 sm:$0xff]  }
0x10ee   :  { %10684 = vmatprep.subr.bf16.mxu0 %v20902_v21  ;;  %v20960_v21 = vld [vmem:[%s27032_s9 + $0x1e4] ss:$8 sps:$4 sm:$0xff]  }
0x10f0   :  { %19431 = vmatpush3.bf16.msra.mxu1 %v25566_v14 }
0x10f1   :  { %10685 = vmatpush1.bf16.msra.mxu0 %v20900_v40  ;;  %19432 = vmatprep.subr.bf16.mxu1 %v25568_v34  ;;  %v20958_v40 = vld [vmem:[%s27032_s9 + $0x1e0] ss:$8 sps:$4 sm:$0xff]  }
0x10f2   :  { %10686 = vmatprep.subr.bf16.mxu0 %v20905_v42  ;;  %v20963_v42 = vld [vmem:[%s27032_s9 + $0x1f4] ss:$8 sps:$4 sm:$0xff]  }
0x10f4   :  { %19433 = vmatpush3.bf16.msra.mxu1 %v25568_v34 }
0x10f5   :  { %10687 = vmatpush1.bf16.msra.mxu0 %v20903_v38  ;;  %19434 = vmatprep.subr.bf16.mxu1 %v25570_v47  ;;  %v20961_v38 = vld [vmem:[%s27032_s9 + $0x1f0] ss:$8 sps:$4 sm:$0xff]  }
0x10f6   :  { %10688 = vmatprep.subr.bf16.mxu0 %v20908_v57  ;;  %v20966_v57 = vld [vmem:[%s27032_s9 + $0x204] ss:$8 sps:$4 sm:$0xff]  }
0x10f8   :  { %19435 = vmatpush3.bf16.msra.mxu1 %v25570_v47 }
0x10f9   :  { %10689 = vmatpush1.bf16.msra.mxu0 %v20906_v4  ;;  %19436 = vmatprep.subr.bf16.mxu1 %v25572_v41 }
0x10fa   :  { %10690 = vmatprep.subr.bf16.mxu0 %v20911_v58  ;;  %v25898_v27 = vpop.f32.mrb[164].mxu1 }
0x10fb   :  { %v25900_v6 = vpop.f32.mrb[165].mxu1 }
0x10fc   :  { %19437 = vmatpush3.bf16.msra.mxu1 %v25572_v41  ;;  %v25903_v37 = vpop.f32.mrb[166].mxu1 }
0x10fd   :  { %10691 = vmatpush1.bf16.msra.mxu0 %v20909_v2  ;;  %19438 = vmatprep.subr.bf16.mxu1 %v25574_v24  ;;  %v10796_v22 = vpack.c.bf16 %v25903_v37, %v25898_v27  ;;  %v25911_v9 = vpop.f32.mrb[167].mxu1  ;;  %v20969_v37 = vld [vmem:[%s27032_s9 + $0x214] ss:$8 sps:$4 sm:$0xff]  }
0x10fe   :  { %10894 = vmatprep.subr.bf16.mxu0 %v20914_v45  ;;  %v10795_v32 = vpack.c.bf16 %v25911_v9, %v25900_v6  ;;  %v20964_v45 = vld [vmem:[%s27032_s9 + $0x200] ss:$8 sps:$4 sm:$0xff]   ;;  %v20972_v9 = vld [vmem:[%s27032_s9 + $0x224] ss:$8 sps:$4 sm:$0xff]  }
0x1100   :  { %10709 = vmatmul.mubr.bf16.vlgmr.msra.gmra.mrb[196].mxu0 %v10360_v11  ;;  %19439 = vmatpush3.bf16.msra.mxu1 %v25574_v24  ;;  %v20944_v11 = vld [vmem:[%s27032_s9 + $0x1a0] ss:$8 sps:$4 sm:$0xff]  }
0x1101   :  { %10895 = vmatpush1.bf16.msra.mxu0 %v20912_v54  ;;  %19440 = vmatprep.subr.bf16.mxu1 %v25576_v43 }
0x1102   :  { %10896 = vmatprep.subr.bf16.mxu0 %v20917_v46  ;;  %10718 = vmatprep.mubr.bf16.mxu0 %v21453_v51  ;;  %v20974_v46 = vld [vmem:[%s27029_s8 + $0xb8] sm:$0xff]  }
0x1104   :  { %19441 = vmatpush3.bf16.msra.mxu1 %v25576_v43 }
0x1105   :  { %10897 = vmatpush1.bf16.msra.mxu0 %v20915_v23  ;;  %19446 = vmatprep.subr.bf16.mxu1 %v25562_v62  ;;  %v20977_v23 = vld [vmem:[%s27032_s9 + $0x234] ss:$8 sps:$4 sm:$0xff]  }
0x1106   :  { %10898 = vmatprep.subr.bf16.mxu0 %v20920_v31  ;;  %v20999_v31 = vld [vmem:[%s27029_s8 + $0xc0] sm:$0xff]  }
0x1107   :  { %19443 = vmatmul.mubr.bf16.vlgmr.msra.gmra.mrb[192].mxu1 %v20922_v50  ;;  %v20975_v50 = vld [vmem:[%s27032_s9 + $0x230] ss:$8 sps:$4 sm:$0xff]  }
0x1108   :  { %19447 = vmatpush3.bf16.msra.mxu1 %v25562_v62  ;;  %10719 = vmatmul.mubr.bf16.gmra.mrb[200].mxu0 %v10361_v0 }
0x1109   :  { %10899 = vmatpush1.bf16.msra.mxu0 %v20918_v60  ;;  %19448 = vmatprep.subr.bf16.mxu1 %v25564_v56  ;;  %v20980_v60 = vld [vmem:[%s27032_s9 + $0x244] ss:$8 sps:$4 sm:$0xff]  }
0x110a   :  { %10900 = vmatprep.subr.bf16.mxu0 %v20925_v13  ;;  %10926 = vmatprep.mubr.bf16.mxu0 %v21453_v51  ;;  %v20978_v13 = vld [vmem:[%s27032_s9 + $0x240] ss:$8 sps:$4 sm:$0xff]  }
0x110b   :  { %19462 = vmatprep.mubr.bf16.mxu1 %v20947_v63  ;;  %v20983_v63 = vld [vmem:[%s27032_s9 + $0x254] ss:$8 sps:$4 sm:$0xff]  }
0x110c   :  { %19449 = vmatpush3.bf16.msra.mxu1 %v25564_v56 }
0x110d   :  { %10901 = vmatpush1.bf16.msra.mxu0 %v20923_v7  ;;  %19450 = vmatprep.subr.bf16.mxu1 %v25566_v14  ;;  %v20981_v7 = vld [vmem:[%s27032_s9 + $0x250] ss:$8 sps:$4 sm:$0xff]  }
0x110e   :  { %10902 = vmatprep.subr.bf16.mxu0 %v20928_v49  ;;  %v20986_v49 = vld [vmem:[%s27032_s9 + $0x264] ss:$8 sps:$4 sm:$0xff]  }
0x1110   :  { %19451 = vmatpush3.bf16.msra.mxu1 %v25566_v14 }
0x1111   :  { %10903 = vmatpush1.bf16.msra.mxu0 %v20926_v44  ;;  %19452 = vmatprep.subr.bf16.mxu1 %v25568_v34  ;;  %v20984_v44 = vld [vmem:[%s27032_s9 + $0x260] ss:$8 sps:$4 sm:$0xff]  }
0x1112   :  { %10904 = vmatprep.subr.bf16.mxu0 %v20931_v20  ;;  %v20989_v20 = vld [vmem:[%s27032_s9 + $0x274] ss:$8 sps:$4 sm:$0xff]  }
0x1114   :  { %19453 = vmatpush3.bf16.msra.mxu1 %v25568_v34 }
0x1115   :  { %10905 = vmatpush1.bf16.msra.mxu0 %v20929_v33  ;;  %19454 = vmatprep.subr.bf16.mxu1 %v25570_v47  ;;  %v20987_v33 = vld [vmem:[%s27032_s9 + $0x270] ss:$8 sps:$4 sm:$0xff]  }
0x1116   :  { %10906 = vmatprep.subr.bf16.mxu0 %v20934_v18  ;;  %v20992_v18 = vld [vmem:[%s27032_s9 + $0x284] ss:$8 sps:$4 sm:$0xff]  }
0x1118   :  { %19455 = vmatpush3.bf16.msra.mxu1 %v25570_v47 }
0x1119   :  { %10907 = vmatpush1.bf16.msra.mxu0 %v20932_v10  ;;  %19456 = vmatprep.subr.bf16.mxu1 %v25572_v41 }
0x111a   :  { %10908 = vmatprep.subr.bf16.mxu0 %v20937_v5  ;;  %v25988_v12 = vpop.f32.mrb[168].mxu1 }
0x111b   :  { %v25990_v52 = vpop.f32.mrb[169].mxu1 }
0x111c   :  { %19457 = vmatpush3.bf16.msra.mxu1 %v25572_v41  ;;  %v25993_v25 = vpop.f32.mrb[170].mxu1 }
0x111d   :  { %10909 = vmatpush1.bf16.msra.mxu0 %v20935_v36  ;;  %19458 = vmatprep.subr.bf16.mxu1 %v25574_v24  ;;  %v11022_v26 = vpack.c.bf16 %v25993_v25, %v25988_v12  ;;  %v26001_v1 = vpop.f32.mrb[171].mxu1  ;;  %v20995_v25 = vld [vmem:[%s27032_s9 + $0x294] ss:$8 sps:$4 sm:$0xff]  }
0x111e   :  { %11120 = vmatprep.subr.bf16.mxu0 %v20940_v55  ;;  %v11021_v0 = vpack.c.bf16 %v26001_v1, %v25990_v52  ;;  %v20990_v55 = vld [vmem:[%s27032_s9 + $0x280] ss:$8 sps:$4 sm:$0xff]   ;;  %v20998_v1 = vld [vmem:[%s27032_s9 + $0x2a4] ss:$8 sps:$4 sm:$0xff]  }
0x1120   :  { %10927 = vmatmul.mubr.bf16.vlgmr.msra.gmra.mrb[196].mxu0 %v10795_v32  ;;  %19459 = vmatpush3.bf16.msra.mxu1 %v25574_v24  ;;  %v20970_v32 = vld [vmem:[%s27032_s9 + $0x220] ss:$8 sps:$4 sm:$0xff]  }
0x1121   :  { %11121 = vmatpush1.bf16.msra.mxu0 %v20938_v39  ;;  %19460 = vmatprep.subr.bf16.mxu1 %v25576_v43 }
0x1122   :  { %11122 = vmatprep.subr.bf16.mxu0 %v20943_v17  ;;  %10936 = vmatprep.mubr.bf16.mxu0 %v21453_v51  ;;  %v21000_v17 = vld [vmem:[%s27029_s8 + $0xc8] sm:$0xff]  }
0x1124   :  { %19461 = vmatpush3.bf16.msra.mxu1 %v25576_v43 }
0x1125   :  { %11123 = vmatpush1.bf16.msra.mxu0 %v20941_v15  ;;  %19466 = vmatprep.subr.bf16.mxu1 %v25562_v62  ;;  %v21003_v15 = vld [vmem:[%s27032_s9 + $0x2b4] ss:$8 sps:$4 sm:$0xff]  }
0x1126   :  { %11124 = vmatprep.subr.bf16.mxu0 %v20946_v48  ;;  %v21025_v48 = vld [vmem:[%s27029_s8 + $0xd0] sm:$0xff]  }
0x1127   :  { %19463 = vmatmul.mubr.bf16.vlgmr.msra.gmra.mrb[196].mxu1 %v20948_v35  ;;  %v21001_v35 = vld [vmem:[%s27032_s9 + $0x2b0] ss:$8 sps:$4 sm:$0xff]  }
0x1128   :  { %19467 = vmatpush3.bf16.msra.mxu1 %v25562_v62  ;;  %10937 = vmatmul.mubr.bf16.gmra.mrb[200].mxu0 %v10796_v22  ;;  %v20967_v22 = vld [vmem:[%s27032_s9 + $0x210] ss:$8 sps:$4 sm:$0xff]  }
0x1129   :  { %11125 = vmatpush1.bf16.msra.mxu0 %v20944_v11  ;;  %19468 = vmatprep.subr.bf16.mxu1 %v25564_v56  ;;  %v21006_v11 = vld [vmem:[%s27032_s9 + $0x2c4] ss:$8 sps:$4 sm:$0xff]  }
0x112a   :  { %11126 = vmatprep.subr.bf16.mxu0 %v20951_v53  ;;  %11152 = vmatprep.mubr.bf16.mxu0 %v21453_v51  ;;  %v21004_v53 = vld [vmem:[%s27032_s9 + $0x2c0] ss:$8 sps:$4 sm:$0xff]  }
0x112b   :  { %19482 = vmatprep.mubr.bf16.mxu1 %v20973_v28  ;;  %v21009_v28 = vld [vmem:[%s27032_s9 + $0x2d4] ss:$8 sps:$4 sm:$0xff]  }
0x112c   :  { %19469 = vmatpush3.bf16.msra.mxu1 %v25564_v56 }
0x112d   :  { %11127 = vmatpush1.bf16.msra.mxu0 %v20949_v29  ;;  %19470 = vmatprep.subr.bf16.mxu1 %v25566_v14  ;;  %v21007_v29 = vld [vmem:[%s27032_s9 + $0x2d0] ss:$8 sps:$4 sm:$0xff]  }
0x112e   :  { %11128 = vmatprep.subr.bf16.mxu0 %v20954_v8  ;;  %v21012_v8 = vld [vmem:[%s27032_s9 + $0x2e4] ss:$8 sps:$4 sm:$0xff]  }
0x1130   :  { %19471 = vmatpush3.bf16.msra.mxu1 %v25566_v14 }
0x1131   :  { %11129 = vmatpush1.bf16.msra.mxu0 %v20952_v16  ;;  %19472 = vmatprep.subr.bf16.mxu1 %v25568_v34  ;;  %v21010_v16 = vld [vmem:[%s27032_s9 + $0x2e0] ss:$8 sps:$4 sm:$0xff]  }
0x1132   :  { %11130 = vmatprep.subr.bf16.mxu0 %v20957_v61  ;;  %v21015_v61 = vld [vmem:[%s27032_s9 + $0x2f4] ss:$8 sps:$4 sm:$0xff]  }
0x1134   :  { %19473 = vmatpush3.bf16.msra.mxu1 %v25568_v34 }
0x1135   :  { %11131 = vmatpush1.bf16.msra.mxu0 %v20955_v30  ;;  %19474 = vmatprep.subr.bf16.mxu1 %v25570_v47  ;;  %v21013_v30 = vld [vmem:[%s27032_s9 + $0x2f0] ss:$8 sps:$4 sm:$0xff]  }
0x1136   :  { %11132 = vmatprep.subr.bf16.mxu0 %v20960_v21  ;;  %v21018_v21 = vld [vmem:[%s27032_s9 + $0x304] ss:$8 sps:$4 sm:$0xff]  }
0x1138   :  { %19475 = vmatpush3.bf16.msra.mxu1 %v25570_v47 }
0x1139   :  { %11133 = vmatpush1.bf16.msra.mxu0 %v20958_v40  ;;  %19476 = vmatprep.subr.bf16.mxu1 %v25572_v41 }
0x113a   :  { %11134 = vmatprep.subr.bf16.mxu0 %v20963_v42  ;;  %v26078_v4 = vpop.f32.mrb[172].mxu1 }
0x113b   :  { %v26080_v58 = vpop.f32.mrb[173].mxu1 }
0x113c   :  { %19477 = vmatpush3.bf16.msra.mxu1 %v25572_v41  ;;  %v26083_v2 = vpop.f32.mrb[174].mxu1 }
0x113d   :  { %11135 = vmatpush1.bf16.msra.mxu0 %v20961_v38  ;;  %19478 = vmatprep.subr.bf16.mxu1 %v25574_v24  ;;  %v11248_v27 = vpack.c.bf16 %v26083_v2, %v26078_v4  ;;  %v26091_v6 = vpop.f32.mrb[175].mxu1  ;;  %v21021_v2 = vld [vmem:[%s27032_s9 + $0x314] ss:$8 sps:$4 sm:$0xff]  }
0x113e   :  { %11346 = vmatprep.subr.bf16.mxu0 %v20966_v57  ;;  %v11247_v54 = vpack.c.bf16 %v26091_v6, %v26080_v58  ;;  %v21016_v57 = vld [vmem:[%s27032_s9 + $0x300] ss:$8 sps:$4 sm:$0xff]   ;;  %v21024_v6 = vld [vmem:[%s27032_s9 + $0x324] ss:$8 sps:$4 sm:$0xff]  }
0x1140   :  { %11153 = vmatmul.mubr.bf16.vlgmr.msra.gmra.mrb[196].mxu0 %v11021_v0  ;;  %19479 = vmatpush3.bf16.msra.mxu1 %v25574_v24  ;;  %v20996_v0 = vld [vmem:[%s27032_s9 + $0x2a0] ss:$8 sps:$4 sm:$0xff]  }
0x1141   :  { %11347 = vmatpush1.bf16.msra.mxu0 %v20964_v45  ;;  %19480 = vmatprep.subr.bf16.mxu1 %v25576_v43 }
0x1142   :  { %11348 = vmatprep.subr.bf16.mxu0 %v20969_v37  ;;  %11162 = vmatprep.mubr.bf16.mxu0 %v21453_v51  ;;  %v21026_v37 = vld [vmem:[%s27029_s8 + $0xd8] sm:$0xff]  }
0x1144   :  { %19481 = vmatpush3.bf16.msra.mxu1 %v25576_v43 }
0x1145   :  { %11349 = vmatpush1.bf16.msra.mxu0 %v20967_v22  ;;  %19486 = vmatprep.subr.bf16.mxu1 %v25562_v62  ;;  %v21029_v22 = vld [vmem:[%s27032_s9 + $0x334] ss:$8 sps:$4 sm:$0xff]  }
0x1146   :  { %11350 = vmatprep.subr.bf16.mxu0 %v20972_v9  ;;  %v21051_v9 = vld [vmem:[%s27029_s8 + $0xe0] sm:$0xff]  }
0x1147   :  { %19483 = vmatmul.mubr.bf16.vlgmr.msra.gmra.mrb[200].mxu1 %v20974_v46  ;;  %v21027_v46 = vld [vmem:[%s27032_s9 + $0x330] ss:$8 sps:$4 sm:$0xff]  }
0x1148   :  { %19487 = vmatpush3.bf16.msra.mxu1 %v25562_v62  ;;  %11163 = vmatmul.mubr.bf16.gmra.mrb[200].mxu0 %v11022_v26  ;;  %v20993_v26 = vld [vmem:[%s27032_s9 + $0x290] ss:$8 sps:$4 sm:$0xff]  }
0x1149   :  { %11351 = vmatpush1.bf16.msra.mxu0 %v20970_v32  ;;  %19488 = vmatprep.subr.bf16.mxu1 %v25564_v56  ;;  %v21032_v32 = vld [vmem:[%s27032_s9 + $0x344] ss:$8 sps:$4 sm:$0xff]  }
0x114a   :  { %11352 = vmatprep.subr.bf16.mxu0 %v20977_v23  ;;  %11378 = vmatprep.mubr.bf16.mxu0 %v21453_v51  ;;  %v21030_v23 = vld [vmem:[%s27032_s9 + $0x340] ss:$8 sps:$4 sm:$0xff]  }
0x114b   :  { %19502 = vmatprep.mubr.bf16.mxu1 %v20999_v31  ;;  %v21035_v31 = vld [vmem:[%s27032_s9 + $0x354] ss:$8 sps:$4 sm:$0xff]  }
0x114c   :  { %19489 = vmatpush3.bf16.msra.mxu1 %v25564_v56 }
0x114d   :  { %11353 = vmatpush1.bf16.msra.mxu0 %v20975_v50  ;;  %19490 = vmatprep.subr.bf16.mxu1 %v25566_v14  ;;  %v21033_v50 = vld [vmem:[%s27032_s9 + $0x350] ss:$8 sps:$4 sm:$0xff]  }
0x114e   :  { %11354 = vmatprep.subr.bf16.mxu0 %v20980_v60  ;;  %v21038_v60 = vld [vmem:[%s27032_s9 + $0x364] ss:$8 sps:$4 sm:$0xff]  }
0x1150   :  { %19491 = vmatpush3.bf16.msra.mxu1 %v25566_v14 }
0x1151   :  { %11355 = vmatpush1.bf16.msra.mxu0 %v20978_v13  ;;  %19492 = vmatprep.subr.bf16.mxu1 %v25568_v34  ;;  %v21036_v13 = vld [vmem:[%s27032_s9 + $0x360] ss:$8 sps:$4 sm:$0xff]  }
0x1152   :  { %11356 = vmatprep.subr.bf16.mxu0 %v20983_v63  ;;  %v21041_v63 = vld [vmem:[%s27032_s9 + $0x374] ss:$8 sps:$4 sm:$0xff]  }
0x1154   :  { %19493 = vmatpush3.bf16.msra.mxu1 %v25568_v34 }
0x1155   :  { %11357 = vmatpush1.bf16.msra.mxu0 %v20981_v7  ;;  %19494 = vmatprep.subr.bf16.mxu1 %v25570_v47  ;;  %v21039_v7 = vld [vmem:[%s27032_s9 + $0x370] ss:$8 sps:$4 sm:$0xff]  }
0x1156   :  { %11358 = vmatprep.subr.bf16.mxu0 %v20986_v49  ;;  %v21044_v49 = vld [vmem:[%s27032_s9 + $0x384] ss:$8 sps:$4 sm:$0xff]  }
0x1158   :  { %19495 = vmatpush3.bf16.msra.mxu1 %v25570_v47 }
0x1159   :  { %11359 = vmatpush1.bf16.msra.mxu0 %v20984_v44  ;;  %19496 = vmatprep.subr.bf16.mxu1 %v25572_v41 }
0x115a   :  { %11360 = vmatprep.subr.bf16.mxu0 %v20989_v20  ;;  %v26168_v10 = vpop.f32.mrb[176].mxu1 }
0x115b   :  { %v26170_v5 = vpop.f32.mrb[177].mxu1 }
0x115c   :  { %19497 = vmatpush3.bf16.msra.mxu1 %v25572_v41  ;;  %v26173_v36 = vpop.f32.mrb[178].mxu1 }
0x115d   :  { %11361 = vmatpush1.bf16.msra.mxu0 %v20987_v33  ;;  %19498 = vmatprep.subr.bf16.mxu1 %v25574_v24  ;;  %v11474_v12 = vpack.c.bf16 %v26173_v36, %v26168_v10  ;;  %v26181_v52 = vpop.f32.mrb[179].mxu1  ;;  %v21047_v36 = vld [vmem:[%s27032_s9 + $0x394] ss:$8 sps:$4 sm:$0xff]  }
0x115e   :  { %11572 = vmatprep.subr.bf16.mxu0 %v20992_v18  ;;  %v11473_v39 = vpack.c.bf16 %v26181_v52, %v26170_v5  ;;  %v21042_v18 = vld [vmem:[%s27032_s9 + $0x380] ss:$8 sps:$4 sm:$0xff]   ;;  %v21050_v52 = vld [vmem:[%s27032_s9 + $0x3a4] ss:$8 sps:$4 sm:$0xff]  }
0x1160   :  { %11379 = vmatmul.mubr.bf16.vlgmr.msra.gmra.mrb[196].mxu0 %v11247_v54  ;;  %19499 = vmatpush3.bf16.msra.mxu1 %v25574_v24  ;;  %v21022_v54 = vld [vmem:[%s27032_s9 + $0x320] ss:$8 sps:$4 sm:$0xff]  }
0x1161   :  { %11573 = vmatpush1.bf16.msra.mxu0 %v20990_v55  ;;  %19500 = vmatprep.subr.bf16.mxu1 %v25576_v43 }
0x1162   :  { %11574 = vmatprep.subr.bf16.mxu0 %v20995_v25  ;;  %11388 = vmatprep.mubr.bf16.mxu0 %v21453_v51  ;;  %v21052_v25 = vld [vmem:[%s27029_s8 + $0xe8] sm:$0xff]  }
0x1164   :  { %19501 = vmatpush3.bf16.msra.mxu1 %v25576_v43 }
0x1165   :  { %11575 = vmatpush1.bf16.msra.mxu0 %v20993_v26  ;;  %19506 = vmatprep.subr.bf16.mxu1 %v25562_v62  ;;  %v21055_v26 = vld [vmem:[%s27032_s9 + $0x3b4] ss:$8 sps:$4 sm:$0xff]  }
0x1166   :  { %11576 = vmatprep.subr.bf16.mxu0 %v20998_v1  ;;  %v21098_v1 = vld [vmem:[%s27029_s8 + $0xf0] sm:$0xff]  }
0x1167   :  { %19503 = vmatmul.mubr.bf16.vlgmr.msra.gmra.mrb[204].mxu1 %v21000_v17  ;;  %v21053_v17 = vld [vmem:[%s27032_s9 + $0x3b0] ss:$8 sps:$4 sm:$0xff]  }
0x1168   :  { %19507 = vmatpush3.bf16.msra.mxu1 %v25562_v62  ;;  %11389 = vmatmul.mubr.bf16.gmra.mrb[200].mxu0 %v11248_v27  ;;  %v21019_v27 = vld [vmem:[%s27032_s9 + $0x310] ss:$8 sps:$4 sm:$0xff]  }
0x1169   :  { %11577 = vmatpush1.bf16.msra.mxu0 %v20996_v0  ;;  %19508 = vmatprep.subr.bf16.mxu1 %v25564_v56  ;;  %v21058_v0 = vld [vmem:[%s27032_s9 + $0x3c4] ss:$8 sps:$4 sm:$0xff]  }
0x116a   :  { %11578 = vmatprep.subr.bf16.mxu0 %v21003_v15  ;;  %11604 = vmatprep.mubr.bf16.mxu0 %v21453_v51  ;;  %v21061_v15 = vld [vmem:[%s27032_s9 + $0x3d4] ss:$8 sps:$4 sm:$0xff]  }
0x116b   :  { %19522 = vmatprep.mubr.bf16.mxu1 %v21025_v48  ;;  %v21064_v48 = vld [vmem:[%s27032_s9 + $0x3e4] ss:$8 sps:$4 sm:$0xff]  }
0x116c   :  { %19509 = vmatpush3.bf16.msra.mxu1 %v25564_v56 }
0x116d   :  { %11579 = vmatpush1.bf16.msra.mxu0 %v21001_v35  ;;  %19510 = vmatprep.subr.bf16.mxu1 %v25566_v14  ;;  %v21067_v35 = vld [vmem:[%s27032_s9 + $0x3f4] ss:$8 sps:$4 sm:$0xff]  }
0x116e   :  { %11580 = vmatprep.subr.bf16.mxu0 %v21006_v11  ;;  %v21070_v11 = vld [vmem:[%s27032_s9 + $0x404] ss:$8 sps:$4 sm:$0xff]  }
0x1170   :  { %19511 = vmatpush3.bf16.msra.mxu1 %v25566_v14 }
0x1171   :  { %11581 = vmatpush1.bf16.msra.mxu0 %v21004_v53  ;;  %19512 = vmatprep.subr.bf16.mxu1 %v25568_v34 }
0x1172   :  { %11582 = vmatprep.subr.bf16.mxu0 %v21009_v28 }
0x1174   :  { %19513 = vmatpush3.bf16.msra.mxu1 %v25568_v34 }
0x1175   :  { %11583 = vmatpush1.bf16.msra.mxu0 %v21007_v29  ;;  %19514 = vmatprep.subr.bf16.mxu1 %v25570_v47 }
0x1176   :  { %11584 = vmatprep.subr.bf16.mxu0 %v21012_v8 }
0x1178   :  { %19515 = vmatpush3.bf16.msra.mxu1 %v25570_v47 }
0x1179   :  { %11585 = vmatpush1.bf16.msra.mxu0 %v21010_v16  ;;  %19516 = vmatprep.subr.bf16.mxu1 %v25572_v41 }
0x117a   :  { %11586 = vmatprep.subr.bf16.mxu0 %v21015_v61  ;;  %v26258_v40 = vpop.f32.mrb[180].mxu1  ;;  %v21073_v61 = vld [vmem:[%s27032_s9 + $0x414] ss:$8 sps:$4 sm:$0xff]  }
0x117b   :  { %v26260_v42 = vpop.f32.mrb[181].mxu1 }
0x117c   :  { %19517 = vmatpush3.bf16.msra.mxu1 %v25572_v41  ;;  %v26263_v38 = vpop.f32.mrb[182].mxu1 }
0x117d   :  { %11587 = vmatpush1.bf16.msra.mxu0 %v21013_v30  ;;  %19518 = vmatprep.subr.bf16.mxu1 %v25574_v24  ;;  %v11700_v4 = vpack.c.bf16 %v26263_v38, %v26258_v40  ;;  %v26271_v58 = vpop.f32.mrb[183].mxu1  ;;  %v21099_v40 = vld [vmem:[%s27029_s8 + $0xf8] sm:$0xff]   ;;  %v21082_v38 = vld [vmem:[%s27032_s9 + $0x444] ss:$8 sps:$4 sm:$0xff]  }
0x117e   :  { %11798 = vmatprep.subr.bf16.mxu0 %v21018_v21  ;;  %v11699_v45 = vpack.c.bf16 %v26271_v58, %v26260_v42  ;;  %v21076_v21 = vld [vmem:[%s27032_s9 + $0x424] ss:$8 sps:$4 sm:$0xff]   ;;  %v21079_v42 = vld [vmem:[%s27032_s9 + $0x434] ss:$8 sps:$4 sm:$0xff]   ;;  %v21083_v58 = vld [vmem:[%s27032_s9 + $0x450] ss:$8 sps:$4 sm:$0xff]  }
0x1180   :  { %11605 = vmatmul.mubr.bf16.vlgmr.msra.gmra.mrb[196].mxu0 %v11473_v39  ;;  %19519 = vmatpush3.bf16.msra.mxu1 %v25574_v24  ;;  %v21048_v39 = vld [vmem:[%s27032_s9 + $0x3a0] ss:$8 sps:$4 sm:$0xff]  }
0x1181   :  { %11799 = vmatpush1.bf16.msra.mxu0 %v21016_v57  ;;  %19520 = vmatprep.subr.bf16.mxu1 %v25576_v43  ;;  %v21080_v57 = vld [vmem:[%s27032_s9 + $0x440] ss:$8 sps:$4 sm:$0xff]  }
0x1182   :  { %11800 = vmatprep.subr.bf16.mxu0 %v21021_v2  ;;  %11614 = vmatprep.mubr.bf16.mxu0 %v21453_v51  ;;  %v21088_v2 = vld [vmem:[%s27032_s9 + $0x464] ss:$8 sps:$4 sm:$0xff]  }
0x1184   :  { %19521 = vmatpush3.bf16.msra.mxu1 %v25576_v43 }
0x1185   :  { %11801 = vmatpush1.bf16.msra.mxu0 %v21019_v27  ;;  %19526 = vmatprep.subr.bf16.mxu1 %v25562_v62  ;;  %v21091_v27 = vld [vmem:[%s27032_s9 + $0x474] ss:$8 sps:$4 sm:$0xff]  }
0x1186   :  { %11802 = vmatprep.subr.bf16.mxu0 %v21024_v6  ;;  %v21089_v6 = vld [vmem:[%s27032_s9 + $0x470] ss:$8 sps:$4 sm:$0xff]  }
0x1187   :  { %19523 = vmatmul.mubr.bf16.vlgmr.msra.gmra.mrb[208].mxu1 %v21026_v37  ;;  %v21094_v37 = vld [vmem:[%s27032_s9 + $0x484] ss:$8 sps:$4 sm:$0xff]  }
0x1188   :  { %19527 = vmatpush3.bf16.msra.mxu1 %v25562_v62  ;;  %11615 = vmatmul.mubr.bf16.gmra.mrb[200].mxu0 %v11474_v12  ;;  %v21045_v12 = vld [vmem:[%s27032_s9 + $0x390] ss:$8 sps:$4 sm:$0xff]  }
0x1189   :  { %11803 = vmatpush1.bf16.msra.mxu0 %v21022_v54  ;;  %19528 = vmatprep.subr.bf16.mxu1 %v25564_v56 }
0x118a   :  { %11804 = vmatprep.subr.bf16.mxu0 %v21029_v22  ;;  %11830 = vmatprep.mubr.bf16.mxu0 %v21453_v51 }
0x118b   :  { %19542 = vmatprep.mubr.bf16.mxu1 %v21051_v9 }
0x118c   :  { %19529 = vmatpush3.bf16.msra.mxu1 %v25564_v56 }
0x118d   :  { %11805 = vmatpush1.bf16.msra.mxu0 %v21027_v46  ;;  %19530 = vmatprep.subr.bf16.mxu1 %v25566_v14  ;;  %v21092_v46 = vld [vmem:[%s27032_s9 + $0x480] ss:$8 sps:$4 sm:$0xff]  }
0x118e   :  { %11806 = vmatprep.subr.bf16.mxu0 %v21032_v32 }
0x1190   :  { %19531 = vmatpush3.bf16.msra.mxu1 %v25566_v14 }
0x1191   :  { %11807 = vmatpush1.bf16.msra.mxu0 %v21030_v23  ;;  %19532 = vmatprep.subr.bf16.mxu1 %v25568_v34 }
0x1192   :  { %11808 = vmatprep.subr.bf16.mxu0 %v21035_v31  ;;  %v21097_v31 = vld [vmem:[%s27032_s9 + $0x494] ss:$8 sps:$4 sm:$0xff]  }
0x1194   :  { %19533 = vmatpush3.bf16.msra.mxu1 %v25568_v34 }
0x1195   :  { %11809 = vmatpush1.bf16.msra.mxu0 %v21033_v50  ;;  %19534 = vmatprep.subr.bf16.mxu1 %v25570_v47 }
0x1196   :  { %11810 = vmatprep.subr.bf16.mxu0 %v21038_v60  ;;  %v21095_v60 = vld [vmem:[%s27032_s9 + $0x490] ss:$8 sps:$4 sm:$0xff]  }
0x1198   :  { %19535 = vmatpush3.bf16.msra.mxu1 %v25570_v47 }
0x1199   :  { %11811 = vmatpush1.bf16.msra.mxu0 %v21036_v13  ;;  %19536 = vmatprep.subr.bf16.mxu1 %v25572_v41  ;;  %v21102_v13 = vld [vmem:[%s27032_s9 + $0x4a4] ss:$8 sps:$4 sm:$0xff]  }
0x119a   :  { %11812 = vmatprep.subr.bf16.mxu0 %v21041_v63  ;;  %v26348_v44 = vpop.f32.mrb[184].mxu1  ;;  %v21100_v63 = vld [vmem:[%s27032_s9 + $0x4a0] ss:$8 sps:$4 sm:$0xff]  }
0x119b   :  { %v26350_v20 = vpop.f32.mrb[185].mxu1 }
0x119c   :  { %19537 = vmatpush3.bf16.msra.mxu1 %v25572_v41  ;;  %v26353_v33 = vpop.f32.mrb[186].mxu1 }
0x119d   :  { %11813 = vmatpush1.bf16.msra.mxu0 %v21039_v7  ;;  %19538 = vmatprep.subr.bf16.mxu1 %v25574_v24  ;;  %v11926_v10 = vpack.c.bf16 %v26353_v33, %v26348_v44  ;;  %v26361_v5 = vpop.f32.mrb[187].mxu1  ;;  %v21105_v7 = vld [vmem:[%s27032_s9 + $0x4b4] ss:$8 sps:$4 sm:$0xff]   ;;  %v21108_v44 = vld [vmem:[%s27032_s9 + $0x4c4] ss:$8 sps:$4 sm:$0xff]  }
0x119e   :  { %12024 = vmatprep.subr.bf16.mxu0 %v21044_v49  ;;  %v11925_v55 = vpack.c.bf16 %v26361_v5, %v26350_v20  ;;  %v21103_v49 = vld [vmem:[%s27032_s9 + $0x4b0] ss:$8 sps:$4 sm:$0xff]   ;;  %v21106_v20 = vld [vmem:[%s27032_s9 + $0x4c0] ss:$8 sps:$4 sm:$0xff]   ;;  %v21111_v33 = vld [vmem:[%s27032_s9 + $0x4d4] ss:$8 sps:$4 sm:$0xff]  }
0x119f   :  { %v21112_v5 = vld [vmem:[%s27032_s9 + $0x4e0] ss:$8 sps:$4 sm:$0xff]  }
0x11a0   :  { %11831 = vmatmul.mubr.bf16.vlgmr.msra.gmra.mrb[196].mxu0 %v11699_v45  ;;  %19539 = vmatpush3.bf16.msra.mxu1 %v25574_v24  ;;  %v21086_v45 = vld [vmem:[%s27032_s9 + $0x460] ss:$8 sps:$4 sm:$0xff]  }
0x11a1   :  { %12025 = vmatpush1.bf16.msra.mxu0 %v21042_v18  ;;  %19540 = vmatprep.subr.bf16.mxu1 %v25576_v43  ;;  %v21109_v18 = vld [vmem:[%s27032_s9 + $0x4d0] ss:$8 sps:$4 sm:$0xff]  }
0x11a2   :  { %12026 = vmatprep.subr.bf16.mxu0 %v21047_v36  ;;  %11840 = vmatprep.mubr.bf16.mxu0 %v21453_v51  ;;  %v21117_v36 = vld [vmem:[%s27032_s9 + $0x4f4] ss:$8 sps:$4 sm:$0xff]  }
0x11a4   :  { %19541 = vmatpush3.bf16.msra.mxu1 %v25576_v43 }
0x11a5   :  { %12027 = vmatpush1.bf16.msra.mxu0 %v21045_v12  ;;  %19546 = vmatprep.subr.bf16.mxu1 %v25562_v62  ;;  %v21120_v12 = vld [vmem:[%s27032_s9 + $0x504] ss:$8 sps:$4 sm:$0xff]  }
0x11a6   :  { %12028 = vmatprep.subr.bf16.mxu0 %v21050_v52 }
0x11a7   :  { %19543 = vmatmul.mubr.bf16.vlgmr.msra.gmra.mrb[212].mxu1 %v21052_v25 }
0x11a8   :  { %19547 = vmatpush3.bf16.msra.mxu1 %v25562_v62  ;;  %11841 = vmatmul.mubr.bf16.gmra.mrb[200].mxu0 %v11700_v4  ;;  %v21056_v62 = vld [vmem:[%s27032_s9 + $0x3c0] ss:$8 sps:$4 sm:$0xff]   ;;  %v21085_v4 = vld [vmem:[%s27032_s9 + $0x454] ss:$8 sps:$4 sm:$0xff]  }
0x11a9   :  { %12029 = vmatpush1.bf16.msra.mxu0 %v21048_v39  ;;  %19548 = vmatprep.subr.bf16.mxu1 %v25564_v56 }
0x11aa   :  { %12030 = vmatprep.subr.bf16.mxu0 %v21055_v26  ;;  %12056 = vmatprep.mubr.bf16.mxu0 %v21453_v51  ;;  %v21118_v26 = vld [vmem:[%s27032_s9 + $0x500] ss:$8 sps:$4 sm:$0xff]  }
0x11ab   :  { %19562 = vmatprep.mubr.bf16.mxu1 %v21098_v1 }
0x11ac   :  { %19549 = vmatpush3.bf16.msra.mxu1 %v25564_v56  ;;  %v21059_v56 = vld [vmem:[%s27032_s9 + $0x3d0] ss:$8 sps:$4 sm:$0xff]  }
0x11ad   :  { %12031 = vmatpush1.bf16.msra.mxu0 %v21053_v17  ;;  %19550 = vmatprep.subr.bf16.mxu1 %v25566_v14 }
0x11ae   :  { %12032 = vmatprep.subr.bf16.mxu0 %v21058_v0  ;;  %v21123_v0 = vld [vmem:[%s27032_s9 + $0x514] ss:$8 sps:$4 sm:$0xff]  }
0x11b0   :  { %19551 = vmatpush3.bf16.msra.mxu1 %v25566_v14  ;;  %v21062_v14 = vld [vmem:[%s27032_s9 + $0x3e0] ss:$8 sps:$4 sm:$0xff]  }
0x11b1   :  { %12033 = vmatpush1.bf16.msra.mxu0 %v21056_v62  ;;  %19552 = vmatprep.subr.bf16.mxu1 %v25568_v34 }
0x11b2   :  { %12034 = vmatprep.subr.bf16.mxu0 %v21061_v15  ;;  %v21121_v15 = vld [vmem:[%s27032_s9 + $0x510] ss:$8 sps:$4 sm:$0xff]  }
0x11b4   :  { %19553 = vmatpush3.bf16.msra.mxu1 %v25568_v34  ;;  %v21065_v34 = vld [vmem:[%s27032_s9 + $0x3f0] ss:$8 sps:$4 sm:$0xff]  }
0x11b5   :  { %12035 = vmatpush1.bf16.msra.mxu0 %v21059_v56  ;;  %19554 = vmatprep.subr.bf16.mxu1 %v25570_v47  ;;  %v21126_v56 = vld [vmem:[%s27032_s9 + $0x524] ss:$8 sps:$4 sm:$0xff]  }
0x11b6   :  { %12036 = vmatprep.subr.bf16.mxu0 %v21064_v48  ;;  %v21124_v48 = vld [vmem:[%s27032_s9 + $0x520] ss:$8 sps:$4 sm:$0xff]  }
0x11b8   :  { %19555 = vmatpush3.bf16.msra.mxu1 %v25570_v47  ;;  %v21068_v47 = vld [vmem:[%s27032_s9 + $0x400] ss:$8 sps:$4 sm:$0xff]  }
0x11b9   :  { %12037 = vmatpush1.bf16.msra.mxu0 %v21062_v14  ;;  %19556 = vmatprep.subr.bf16.mxu1 %v25572_v41  ;;  %v21129_v14 = vld [vmem:[%s27032_s9 + $0x534] ss:$8 sps:$4 sm:$0xff]  }
0x11ba   :  { %12038 = vmatprep.subr.bf16.mxu0 %v21067_v35  ;;  %v26438_v53 = vpop.f32.mrb[188].mxu1  ;;  %v21127_v35 = vld [vmem:[%s27032_s9 + $0x530] ss:$8 sps:$4 sm:$0xff]  }
0x11bb   :  { %v12136_v28 = vpop.f32.mrb[189].mxu1 }
0x11bc   :  { %19557 = vmatpush3.bf16.msra.mxu1 %v25572_v41  ;;  %v26441_v29 = vpop.f32.mrb[190].mxu1  ;;  %v21071_v41 = vld [vmem:[%s27032_s9 + $0x410] ss:$8 sps:$4 sm:$0xff]  }
0x11bd   :  { %12039 = vmatpush1.bf16.msra.mxu0 %v21065_v34  ;;  %19558 = vmatprep.subr.bf16.mxu1 %v25574_v24  ;;  %v12152_v8 = vpack.c.bf16 %v26441_v29, %v26438_v53  ;;  %v12139_v16 = vpop.f32.mrb[191].mxu1  ;;  %v21132_v34 = vld [vmem:[%s27032_s9 + $0x544] ss:$8 sps:$4 sm:$0xff]   ;;  %v21135_v53 = vld [vmem:[%s27032_s9 + $0x554] ss:$8 sps:$4 sm:$0xff]  }
0x11be   :  { %12250 = vmatprep.subr.bf16.mxu0 %v21070_v11  ;;  %v12151_v30 = vpack.c.bf16 %v12139_v16, %v12136_v28  ;;  %v21130_v11 = vld [vmem:[%s27032_s9 + $0x540] ss:$8 sps:$4 sm:$0xff]   ;;  %v21133_v28 = vld [vmem:[%s27032_s9 + $0x550] ss:$8 sps:$4 sm:$0xff]   ;;  %v21138_v29 = vld [vmem:[%s27032_s9 + $0x564] ss:$8 sps:$4 sm:$0xff]  }
0x11bf   :  { %v21139_v16 = vld [vmem:[%s27032_s9 + $0x570] ss:$8 sps:$4 sm:$0xff]  }
0x11c0   :  { %12057 = vmatmul.mubr.bf16.vlgmr.msra.gmra.mrb[196].mxu0 %v11925_v55  ;;  %19559 = vmatpush3.bf16.msra.mxu1 %v25574_v24  ;;  %v21074_v24 = vld [vmem:[%s27032_s9 + $0x420] ss:$8 sps:$4 sm:$0xff]   ;;  %v21115_v55 = vld [vmem:[%s27032_s9 + $0x4f0] ss:$8 sps:$4 sm:$0xff]  }
0x11c1   :  { %12251 = vmatpush1.bf16.msra.mxu0 %v21068_v47  ;;  %19560 = vmatprep.subr.bf16.mxu1 %v25576_v43  ;;  %v21136_v47 = vld [vmem:[%s27032_s9 + $0x560] ss:$8 sps:$4 sm:$0xff]  }
0x11c2   :  { %12252 = vmatprep.subr.bf16.mxu0 %v21073_v61  ;;  %12066 = vmatprep.mubr.bf16.mxu0 %v21453_v51  ;;  %v21144_v61 = vld [vmem:[%s27032_s9 + $0x584] ss:$8 sps:$4 sm:$0xff]  }
0x11c4   :  { %19561 = vmatpush3.bf16.msra.mxu1 %v25576_v43  ;;  %v21077_v43 = vld [vmem:[%s27032_s9 + $0x430] ss:$8 sps:$4 sm:$0xff]  }
0x11c5   :  { %12253 = vmatpush1.bf16.msra.mxu0 %v21071_v41 }
0x11c6   :  { %12254 = vmatprep.subr.bf16.mxu0 %v21076_v21 }
0x11c7   :  { %19563 = vmatmul.mubr.bf16.vlgmr.msra.gmra.mrb[216].mxu1 %v21099_v40  ;;  %v21142_v40 = vld [vmem:[%s27032_s9 + $0x580] ss:$8 sps:$4 sm:$0xff]  }
0x11c8   :  { %12067 = vmatmul.mubr.bf16.gmra.mrb[200].mxu0 %v11926_v10  ;;  %v21114_v10 = vld [vmem:[%s27032_s9 + $0x4e4] ss:$8 sps:$4 sm:$0xff]  }
0x11c9   :  { %12255 = vmatpush1.bf16.msra.mxu0 %v21074_v24  ;;  %12282 = vmatprep.mubr.bf16.mxu0 %v21453_v51 }
0x11ca   :  { %12256 = vmatprep.subr.bf16.mxu0 %v21079_v42 }
0x11cd   :  { %12257 = vmatpush1.bf16.msra.mxu0 %v21077_v43  ;;  %v21147_v43 = vld [vmem:[%s27032_s9 + $0x594] ss:$8 sps:$4 sm:$0xff]  }
0x11ce   :  { %12258 = vmatprep.subr.bf16.mxu0 %v21082_v38 }
0x11d1   :  { %12259 = vmatpush1.bf16.msra.mxu0 %v21080_v57  ;;  %v21145_v57 = vld [vmem:[%s27032_s9 + $0x590] ss:$8 sps:$4 sm:$0xff]  }
0x11d2   :  { %12260 = vmatprep.subr.bf16.mxu0 %v21085_v4  ;;  %v21150_v4 = vld [vmem:[%s27032_s9 + $0x5a4] ss:$8 sps:$4 sm:$0xff]  }
0x11d5   :  { %12261 = vmatpush1.bf16.msra.mxu0 %v21083_v58  ;;  %v21148_v58 = vld [vmem:[%s27032_s9 + $0x5a0] ss:$8 sps:$4 sm:$0xff]  }
0x11d6   :  { %12262 = vmatprep.subr.bf16.mxu0 %v21088_v2  ;;  %v21153_v2 = vld [vmem:[%s27032_s9 + $0x5b4] ss:$8 sps:$4 sm:$0xff]  }
0x11d9   :  { %12263 = vmatpush1.bf16.msra.mxu0 %v21086_v45  ;;  %v21151_v45 = vld [vmem:[%s27032_s9 + $0x5b0] ss:$8 sps:$4 sm:$0xff]  }
0x11da   :  { %12264 = vmatprep.subr.bf16.mxu0 %v21091_v27  ;;  %v19444_v54 = vpop.f32.mrb[192].mxu1  ;;  %v21156_v27 = vld [vmem:[%s27032_s9 + $0x5c4] ss:$8 sps:$4 sm:$0xff]  }
0x11db   :  { %v12362_v22 = vpop.f32.mrb[193].mxu1 }
0x11dc   :  { %v19445_v9 = vpop.f32.mrb[194].mxu1 }
0x11dd   :  { %12265 = vmatpush1.bf16.msra.mxu0 %v21089_v6  ;;  %v12378_v32 = vpack.c.bf16 %v19445_v9, %v19444_v54  ;;  %v12365_v23 = vpop.f32.mrb[195].mxu1  ;;  %v21154_v6 = vld [vmem:[%s27032_s9 + $0x5c0] ss:$8 sps:$4 sm:$0xff]   ;;  %v21157_v54 = vld [vmem:[%s27032_s9 + $0x5d0] ss:$8 sps:$4 sm:$0xff]  }
0x11de   :  { %12476 = vmatprep.subr.bf16.mxu0 %v21094_v37  ;;  %v12377_v50 = vpack.c.bf16 %v12365_v23, %v12362_v22  ;;  %v21159_v37 = vld [vmem:[%s27032_s9 + $0x5d4] ss:$8 sps:$4 sm:$0xff]   ;;  %v21162_v22 = vld [vmem:[%s27032_s9 + $0x5e4] ss:$8 sps:$4 sm:$0xff]   ;;  %v21160_v9 = vld [vmem:[%s27032_s9 + $0x5e0] ss:$8 sps:$4 sm:$0xff]  }
0x11df   :  { %v21168_v23 = vld [vmem:[%s27032_s9 + $0x604] ss:$8 sps:$4 sm:$0xff]  }
0x11e0   :  { %12283 = vmatmul.mubr.bf16.vlgmr.msra.gmra.mrb[196].mxu0 %v12151_v30 }
0x11e1   :  { %12477 = vmatpush1.bf16.msra.mxu0 %v21092_v46  ;;  %12292 = vmatprep.mubr.bf16.mxu0 %v21453_v51  ;;  %v21165_v46 = vld [vmem:[%s27032_s9 + $0x5f4] ss:$8 sps:$4 sm:$0xff]  }
0x11e2   :  { %12478 = vmatprep.subr.bf16.mxu0 %v21097_v31 }
0x11e5   :  { %12479 = vmatpush1.bf16.msra.mxu0 %v21095_v60 }
0x11e6   :  { %12480 = vmatprep.subr.bf16.mxu0 %v21102_v13  ;;  %v21166_v13 = vld [vmem:[%s27032_s9 + $0x600] ss:$8 sps:$4 sm:$0xff]  }
0x11e8   :  { %12293 = vmatmul.mubr.bf16.gmra.mrb[200].mxu0 %v12152_v8  ;;  %v21141_v8 = vld [vmem:[%s27032_s9 + $0x574] ss:$8 sps:$4 sm:$0xff]  }
0x11e9   :  { %12481 = vmatpush1.bf16.msra.mxu0 %v21100_v63  ;;  %12508 = vmatprep.mubr.bf16.mxu0 %v21453_v51 }
0x11ea   :  { %12482 = vmatprep.subr.bf16.mxu0 %v21105_v7 }
0x11ed   :  { %12483 = vmatpush1.bf16.msra.mxu0 %v21103_v49  ;;  %v21171_v49 = vld [vmem:[%s27032_s9 + $0x614] ss:$8 sps:$4 sm:$0xff]  }
0x11ee   :  { %12484 = vmatprep.subr.bf16.mxu0 %v21108_v44 }
0x11f1   :  { %12485 = vmatpush1.bf16.msra.mxu0 %v21106_v20  ;;  %v21169_v20 = vld [vmem:[%s27032_s9 + $0x610] ss:$8 sps:$4 sm:$0xff]  }
0x11f2   :  { %12486 = vmatprep.subr.bf16.mxu0 %v21111_v33  ;;  %v21174_v33 = vld [vmem:[%s27032_s9 + $0x624] ss:$8 sps:$4 sm:$0xff]  }
0x11f5   :  { %12487 = vmatpush1.bf16.msra.mxu0 %v21109_v18  ;;  %v21172_v18 = vld [vmem:[%s27032_s9 + $0x620] ss:$8 sps:$4 sm:$0xff]  }
0x11f6   :  { %12488 = vmatprep.subr.bf16.mxu0 %v21114_v10  ;;  %v21177_v10 = vld [vmem:[%s27032_s9 + $0x634] ss:$8 sps:$4 sm:$0xff]  }
0x11f9   :  { %12489 = vmatpush1.bf16.msra.mxu0 %v21112_v5  ;;  %v21175_v5 = vld [vmem:[%s27032_s9 + $0x630] ss:$8 sps:$4 sm:$0xff]  }
0x11fa   :  { %12490 = vmatprep.subr.bf16.mxu0 %v21117_v36  ;;  %v19464_v52 = vpop.f32.mrb[196].mxu1  ;;  %v21180_v36 = vld [vmem:[%s27032_s9 + $0x644] ss:$8 sps:$4 sm:$0xff]  }
0x11fb   :  { %v12588_v25 = vpop.f32.mrb[197].mxu1 }
0x11fc   :  { %v19465_v39 = vpop.f32.mrb[198].mxu1 }
0x11fd   :  { %12491 = vmatpush1.bf16.msra.mxu0 %v21115_v55  ;;  %v12604_v1 = vpack.c.bf16 %v19465_v39, %v19464_v52  ;;  %v12591_v17 = vpop.f32.mrb[199].mxu1  ;;  %v21178_v55 = vld [vmem:[%s27032_s9 + $0x640] ss:$8 sps:$4 sm:$0xff]   ;;  %v21181_v52 = vld [vmem:[%s27032_s9 + $0x650] ss:$8 sps:$4 sm:$0xff]  }
0x11fe   :  { %12702 = vmatprep.subr.bf16.mxu0 %v21120_v12  ;;  %v12603_v62 = vpack.c.bf16 %v12591_v17, %v12588_v25  ;;  %v21183_v12 = vld [vmem:[%s27032_s9 + $0x654] ss:$8 sps:$4 sm:$0xff]   ;;  %v21186_v25 = vld [vmem:[%s27032_s9 + $0x664] ss:$8 sps:$4 sm:$0xff]   ;;  %v21184_v39 = vld [vmem:[%s27032_s9 + $0x660] ss:$8 sps:$4 sm:$0xff]  }
0x11ff   :  { %v21192_v17 = vld [vmem:[%s27032_s9 + $0x684] ss:$8 sps:$4 sm:$0xff]  }
0x1200   :  { %12509 = vmatmul.mubr.bf16.vlgmr.msra.gmra.mrb[196].mxu0 %v12377_v50 }
0x1201   :  { %12703 = vmatpush1.bf16.msra.mxu0 %v21118_v26  ;;  %12518 = vmatprep.mubr.bf16.mxu0 %v21453_v51  ;;  %v21189_v26 = vld [vmem:[%s27032_s9 + $0x674] ss:$8 sps:$4 sm:$0xff]  }
0x1202   :  { %12704 = vmatprep.subr.bf16.mxu0 %v21123_v0 }
0x1205   :  { %12705 = vmatpush1.bf16.msra.mxu0 %v21121_v15 }
0x1206   :  { %12706 = vmatprep.subr.bf16.mxu0 %v21126_v56  ;;  %v21190_v56 = vld [vmem:[%s27032_s9 + $0x680] ss:$8 sps:$4 sm:$0xff]  }
0x1208   :  { %12519 = vmatmul.mubr.bf16.gmra.mrb[200].mxu0 %v12378_v32  ;;  %v21163_v32 = vld [vmem:[%s27032_s9 + $0x5f0] ss:$8 sps:$4 sm:$0xff]  }
0x1209   :  { %12707 = vmatpush1.bf16.msra.mxu0 %v21124_v48  ;;  %12734 = vmatprep.mubr.bf16.mxu0 %v21453_v51 }
0x120a   :  { %12708 = vmatprep.subr.bf16.mxu0 %v21129_v14 }
0x120d   :  { %12709 = vmatpush1.bf16.msra.mxu0 %v21127_v35  ;;  %v21195_v35 = vld [vmem:[%s27032_s9 + $0x694] ss:$8 sps:$4 sm:$0xff]  }
0x120e   :  { %12710 = vmatprep.subr.bf16.mxu0 %v21132_v34 }
0x1211   :  { %12711 = vmatpush1.bf16.msra.mxu0 %v21130_v11  ;;  %v21193_v11 = vld [vmem:[%s27032_s9 + $0x690] ss:$8 sps:$4 sm:$0xff]  }
0x1212   :  { %12712 = vmatprep.subr.bf16.mxu0 %v21135_v53  ;;  %v21198_v53 = vld [vmem:[%s27032_s9 + $0x6a4] ss:$8 sps:$4 sm:$0xff]  }
0x1215   :  { %12713 = vmatpush1.bf16.msra.mxu0 %v21133_v28  ;;  %v21196_v28 = vld [vmem:[%s27032_s9 + $0x6a0] ss:$8 sps:$4 sm:$0xff]  }
0x1216   :  { %12714 = vmatprep.subr.bf16.mxu0 %v21138_v29  ;;  %v21201_v29 = vld [vmem:[%s27032_s9 + $0x6b4] ss:$8 sps:$4 sm:$0xff]  }
0x1219   :  { %12715 = vmatpush1.bf16.msra.mxu0 %v21136_v47  ;;  %v21199_v47 = vld [vmem:[%s27032_s9 + $0x6b0] ss:$8 sps:$4 sm:$0xff]  }
0x121a   :  { %12716 = vmatprep.subr.bf16.mxu0 %v21141_v8  ;;  %v19484_v30 = vpop.f32.mrb[200].mxu1  ;;  %v21204_v8 = vld [vmem:[%s27032_s9 + $0x6c4] ss:$8 sps:$4 sm:$0xff]  }
0x121b   :  { %v12814_v41 = vpop.f32.mrb[201].mxu1 }
0x121c   :  { %v19485_v21 = vpop.f32.mrb[202].mxu1 }
0x121d   :  { %12717 = vmatpush1.bf16.msra.mxu0 %v21139_v16  ;;  %v12830_v24 = vpack.c.bf16 %v19485_v21, %v19484_v30  ;;  %v12817_v42 = vpop.f32.mrb[203].mxu1  ;;  %v21202_v16 = vld [vmem:[%s27032_s9 + $0x6c0] ss:$8 sps:$4 sm:$0xff]   ;;  %v21205_v30 = vld [vmem:[%s27032_s9 + $0x6d0] ss:$8 sps:$4 sm:$0xff]  }
0x121e   :  { %12928 = vmatprep.subr.bf16.mxu0 %v21144_v61  ;;  %v12829_v38 = vpack.c.bf16 %v12817_v42, %v12814_v41  ;;  %v21207_v61 = vld [vmem:[%s27032_s9 + $0x6d4] ss:$8 sps:$4 sm:$0xff]   ;;  %v21210_v41 = vld [vmem:[%s27032_s9 + $0x6e4] ss:$8 sps:$4 sm:$0xff]   ;;  %v21208_v21 = vld [vmem:[%s27032_s9 + $0x6e0] ss:$8 sps:$4 sm:$0xff]  }
0x121f   :  { %v21216_v42 = vld [vmem:[%s27032_s9 + $0x704] ss:$8 sps:$4 sm:$0xff]  }
0x1220   :  { %12735 = vmatmul.mubr.bf16.vlgmr.msra.gmra.mrb[196].mxu0 %v12603_v62 }
0x1221   :  { %12929 = vmatpush1.bf16.msra.mxu0 %v21142_v40  ;;  %12744 = vmatprep.mubr.bf16.mxu0 %v21453_v51  ;;  %v21213_v40 = vld [vmem:[%s27032_s9 + $0x6f4] ss:$8 sps:$4 sm:$0xff]  }
0x1222   :  { %12930 = vmatprep.subr.bf16.mxu0 %v21147_v43 }
0x1225   :  { %12931 = vmatpush1.bf16.msra.mxu0 %v21145_v57 }
0x1226   :  { %12932 = vmatprep.subr.bf16.mxu0 %v21150_v4  ;;  %v21214_v4 = vld [vmem:[%s27032_s9 + $0x700] ss:$8 sps:$4 sm:$0xff]  }
0x1228   :  { %12745 = vmatmul.mubr.bf16.gmra.mrb[200].mxu0 %v12604_v1  ;;  %v21187_v1 = vld [vmem:[%s27032_s9 + $0x670] ss:$8 sps:$4 sm:$0xff]  }
0x1229   :  { %12933 = vmatpush1.bf16.msra.mxu0 %v21148_v58  ;;  %12960 = vmatprep.mubr.bf16.mxu0 %v21453_v51 }
0x122a   :  { %12934 = vmatprep.subr.bf16.mxu0 %v21153_v2 }
0x122d   :  { %12935 = vmatpush1.bf16.msra.mxu0 %v21151_v45  ;;  %v21219_v45 = vld [vmem:[%s27032_s9 + $0x714] ss:$8 sps:$4 sm:$0xff]  }
0x122e   :  { %12936 = vmatprep.subr.bf16.mxu0 %v21156_v27 }
0x1231   :  { %12937 = vmatpush1.bf16.msra.mxu0 %v21154_v6  ;;  %v21217_v6 = vld [vmem:[%s27032_s9 + $0x710] ss:$8 sps:$4 sm:$0xff]  }
0x1232   :  { %12938 = vmatprep.subr.bf16.mxu0 %v21159_v37  ;;  %v21222_v37 = vld [vmem:[%s27032_s9 + $0x724] ss:$8 sps:$4 sm:$0xff]  }
0x1235   :  { %12939 = vmatpush1.bf16.msra.mxu0 %v21157_v54  ;;  %v21220_v54 = vld [vmem:[%s27032_s9 + $0x720] ss:$8 sps:$4 sm:$0xff]  }
0x1236   :  { %12940 = vmatprep.subr.bf16.mxu0 %v21162_v22  ;;  %v21225_v22 = vld [vmem:[%s27032_s9 + $0x734] ss:$8 sps:$4 sm:$0xff]  }
0x1239   :  { %12941 = vmatpush1.bf16.msra.mxu0 %v21160_v9  ;;  %v21223_v9 = vld [vmem:[%s27032_s9 + $0x730] ss:$8 sps:$4 sm:$0xff]  }
0x123a   :  { %12942 = vmatprep.subr.bf16.mxu0 %v21165_v46  ;;  %v19504_v31 = vpop.f32.mrb[204].mxu1  ;;  %v21228_v46 = vld [vmem:[%s27032_s9 + $0x744] ss:$8 sps:$4 sm:$0xff]  }
0x123b   :  { %v13040_v50 = vpop.f32.mrb[205].mxu1 }
0x123c   :  { %v19505_v60 = vpop.f32.mrb[206].mxu1 }
0x123d   :  { %12943 = vmatpush1.bf16.msra.mxu0 %v21163_v32  ;;  %v13056_v63 = vpack.c.bf16 %v19505_v60, %v19504_v31  ;;  %v13043_v7 = vpop.f32.mrb[207].mxu1  ;;  %v21226_v32 = vld [vmem:[%s27032_s9 + $0x740] ss:$8 sps:$4 sm:$0xff]   ;;  %v21229_v31 = vld [vmem:[%s27032_s9 + $0x750] ss:$8 sps:$4 sm:$0xff]  }
0x123e   :  { %13154 = vmatprep.subr.bf16.mxu0 %v21168_v23  ;;  %v13055_v44 = vpack.c.bf16 %v13043_v7, %v13040_v50  ;;  %v21231_v23 = vld [vmem:[%s27032_s9 + $0x754] ss:$8 sps:$4 sm:$0xff]   ;;  %v21234_v50 = vld [vmem:[%s27032_s9 + $0x764] ss:$8 sps:$4 sm:$0xff]   ;;  %v21232_v60 = vld [vmem:[%s27032_s9 + $0x760] ss:$8 sps:$4 sm:$0xff]  }
0x123f   :  { %v21240_v7 = vld [vmem:[%s27032_s9 + $0x784] ss:$8 sps:$4 sm:$0xff]  }
0x1240   :  { %12961 = vmatmul.mubr.bf16.vlgmr.msra.gmra.mrb[196].mxu0 %v12829_v38 }
0x1241   :  { %13155 = vmatpush1.bf16.msra.mxu0 %v21166_v13  ;;  %12970 = vmatprep.mubr.bf16.mxu0 %v21453_v51  ;;  %v21237_v13 = vld [vmem:[%s27032_s9 + $0x774] ss:$8 sps:$4 sm:$0xff]  }
0x1242   :  { %13156 = vmatprep.subr.bf16.mxu0 %v21171_v49 }
0x1245   :  { %13157 = vmatpush1.bf16.msra.mxu0 %v21169_v20 }
0x1246   :  { %13158 = vmatprep.subr.bf16.mxu0 %v21174_v33  ;;  %v21238_v33 = vld [vmem:[%s27032_s9 + $0x780] ss:$8 sps:$4 sm:$0xff]  }
0x1248   :  { %12971 = vmatmul.mubr.bf16.gmra.mrb[200].mxu0 %v12830_v24  ;;  %v21211_v24 = vld [vmem:[%s27032_s9 + $0x6f0] ss:$8 sps:$4 sm:$0xff]  }
0x1249   :  { %13159 = vmatpush1.bf16.msra.mxu0 %v21172_v18  ;;  %13186 = vmatprep.mubr.bf16.mxu0 %v21453_v51 }
0x124a   :  { %13160 = vmatprep.subr.bf16.mxu0 %v21177_v10 }
0x124d   :  { %13161 = vmatpush1.bf16.msra.mxu0 %v21175_v5  ;;  %v21243_v5 = vld [vmem:[%s27032_s9 + $0x794] ss:$8 sps:$4 sm:$0xff]  }
0x124e   :  { %13162 = vmatprep.subr.bf16.mxu0 %v21180_v36 }
0x1251   :  { %13163 = vmatpush1.bf16.msra.mxu0 %v21178_v55  ;;  %v21241_v55 = vld [vmem:[%s27032_s9 + $0x790] ss:$8 sps:$4 sm:$0xff]  }
0x1252   :  { %13164 = vmatprep.subr.bf16.mxu0 %v21183_v12  ;;  %v21246_v12 = vld [vmem:[%s27032_s9 + $0x7a4] ss:$8 sps:$4 sm:$0xff]  }
0x1255   :  { %13165 = vmatpush1.bf16.msra.mxu0 %v21181_v52  ;;  %v21244_v52 = vld [vmem:[%s27032_s9 + $0x7a0] ss:$8 sps:$4 sm:$0xff]  }
0x1256   :  { %13166 = vmatprep.subr.bf16.mxu0 %v21186_v25  ;;  %v21249_v25 = vld [vmem:[%s27032_s9 + $0x7b4] ss:$8 sps:$4 sm:$0xff]  }
0x1259   :  { %13167 = vmatpush1.bf16.msra.mxu0 %v21184_v39  ;;  %v21247_v39 = vld [vmem:[%s27032_s9 + $0x7b0] ss:$8 sps:$4 sm:$0xff]  }
0x125a   :  { %13168 = vmatprep.subr.bf16.mxu0 %v21189_v26  ;;  %v19524_v0 = vpop.f32.mrb[208].mxu1  ;;  %v21252_v26 = vld [vmem:[%s27032_s9 + $0x7c4] ss:$8 sps:$4 sm:$0xff]  }
0x125b   :  { %v13266_v62 = vpop.f32.mrb[209].mxu1 }
0x125c   :  { %v19525_v15 = vpop.f32.mrb[210].mxu1 }
0x125d   :  { %13169 = vmatpush1.bf16.msra.mxu0 %v21187_v1  ;;  %v13282_v48 = vpack.c.bf16 %v19525_v15, %v19524_v0  ;;  %v13269_v14 = vpop.f32.mrb[211].mxu1  ;;  %v21250_v1 = vld [vmem:[%s27032_s9 + $0x7c0] ss:$8 sps:$4 sm:$0xff]   ;;  %v21253_v0 = vld [vmem:[%s27032_s9 + $0x7d0] ss:$8 sps:$4 sm:$0xff]  }
0x125e   :  { %13380 = vmatprep.subr.bf16.mxu0 %v21192_v17  ;;  %v13281_v34 = vpack.c.bf16 %v13269_v14, %v13266_v62  ;;  %v21255_v17 = vld [vmem:[%s27032_s9 + $0x7d4] ss:$8 sps:$4 sm:$0xff]   ;;  %v21258_v62 = vld [vmem:[%s27032_s9 + $0x7e4] ss:$8 sps:$4 sm:$0xff]   ;;  %v21256_v15 = vld [vmem:[%s27032_s9 + $0x7e0] ss:$8 sps:$4 sm:$0xff]  }
0x125f   :  { %v14089_v14 = vld [vmem:[%s27033_s13 + $0x80] sm:$0xff] }
0x1260   :  { %13187 = vmatmul.mubr.bf16.vlgmr.msra.gmra.mrb[196].mxu0 %v13055_v44 }
0x1261   :  { %13381 = vmatpush1.bf16.msra.mxu0 %v21190_v56  ;;  %13196 = vmatprep.mubr.bf16.mxu0 %v21453_v51  ;;  %v21261_v56 = vld [vmem:[%s27032_s9 + $0x7f4] ss:$8 sps:$4 sm:$0xff]  }
0x1262   :  { %13382 = vmatprep.subr.bf16.mxu0 %v21195_v35  ;;  %v14090_v35 = vld [vmem:[%s27033_s13 + $0x88] sm:$0xff] }
0x1265   :  { %13383 = vmatpush1.bf16.msra.mxu0 %v21193_v11  ;;  %v14073_v11 = vld [vmem:[%s27033_s13] sm:$0xff] }
0x1266   :  { %13384 = vmatprep.subr.bf16.mxu0 %v21198_v53  ;;  %v14074_v53 = vld [vmem:[%s27033_s13 + $0x8] sm:$0xff] }
0x1268   :  { %13197 = vmatmul.mubr.bf16.gmra.mrb[200].mxu0 %v13056_v63  ;;  %v21235_v63 = vld [vmem:[%s27032_s9 + $0x770] ss:$8 sps:$4 sm:$0xff]  }
0x1269   :  { %13385 = vmatpush1.bf16.msra.mxu0 %v21196_v28  ;;  %13412 = vmatprep.mubr.bf16.mxu0 %v21453_v51  ;;  %v19579_v28 = vpack.c.bf16 %v14074_v53, %v14073_v11 }
0x126a   :  { %13386 = vmatprep.subr.bf16.mxu0 %v21201_v29  ;;  %v14092_v29 = vld [vmem:[%s27033_s13 + $0x98] sm:$0xff] }
0x126d   :  { %13387 = vmatpush1.bf16.msra.mxu0 %v21199_v47 }
0x126e   :  { %13388 = vmatprep.subr.bf16.mxu0 %v21204_v8  ;;  %v14075_v8 = vld [vmem:[%s27033_s13 + $0x10] sm:$0xff] }
0x1271   :  { %13389 = vmatpush1.bf16.msra.mxu0 %v21202_v16  ;;  %v14076_v16 = vld [vmem:[%s27033_s13 + $0x18] sm:$0xff] }
0x1272   :  { %13390 = vmatprep.subr.bf16.mxu0 %v21207_v61  ;;  %v19583_v61 = vpack.c.bf16 %v14076_v16, %v14075_v8 }
0x1275   :  { %13391 = vmatpush1.bf16.msra.mxu0 %v21205_v30  ;;  %v14093_v30 = vld [vmem:[%s27033_s13 + $0xa0] sm:$0xff] }
0x1276   :  { %13392 = vmatprep.subr.bf16.mxu0 %v21210_v41  ;;  %v14094_v41 = vld [vmem:[%s27033_s13 + $0xa8] sm:$0xff] }
0x1279   :  { %13393 = vmatpush1.bf16.msra.mxu0 %v21208_v21  ;;  %v19585_v21 = vpack.c.bf16 %v14094_v41, %v14093_v30 }
0x127a   :  { %13394 = vmatprep.subr.bf16.mxu0 %v21213_v40  ;;  %v19544_v43 = vpop.f32.mrb[212].mxu1  ;;  %v14077_v40 = vld [vmem:[%s27033_s13 + $0x20] sm:$0xff] }
0x127b   :  { %v13492_v38 = vpop.f32.mrb[213].mxu1 }
0x127c   :  { %v19545_v57 = vpop.f32.mrb[214].mxu1 }
0x127d   :  { %13395 = vmatpush1.bf16.msra.mxu0 %v21211_v24  ;;  %v13508_v58 = vpack.c.bf16 %v19545_v57, %v19544_v43  ;;  %v13495_v2 = vpop.f32.mrb[215].mxu1  ;;  %v14078_v24 = vld [vmem:[%s27033_s13 + $0x28] sm:$0xff]  ;;  %v14095_v43 = vld [vmem:[%s27033_s13 + $0xb0] sm:$0xff] }
0x127e   :  { %13606 = vmatprep.subr.bf16.mxu0 %v21216_v42  ;;  %v13507_v27 = vpack.c.bf16 %v13495_v2, %v13492_v38  ;;  %v19587_v42 = vpack.c.bf16 %v14078_v24, %v14077_v40  ;;  %v14096_v38 = vld [vmem:[%s27033_s13 + $0xb8] sm:$0xff] }
0x127f   :  { %v19589_v57 = vpack.c.bf16 %v14096_v38, %v14095_v43 }
0x1280   :  { %13413 = vmatmul.mubr.bf16.vlgmr.msra.gmra.mrb[196].mxu0 %v13281_v34  ;;  %v19577_v34 = vpack.c.bf16 %v14090_v35, %v14089_v14 }
0x1281   :  { %13607 = vmatpush1.bf16.msra.mxu0 %v21214_v4  ;;  %13422 = vmatprep.mubr.bf16.mxu0 %v21453_v51  ;;  %v14079_v4 = vld [vmem:[%s27033_s13 + $0x30] sm:$0xff] }
0x1282   :  { %13608 = vmatprep.subr.bf16.mxu0 %v21219_v45  ;;  %19578 = vmatprep.subr.bf16.mxu1 %v19577_v34  ;;  %v14097_v45 = vld [vmem:[%s27033_s13 + $0xc0] sm:$0xff] }
0x1283   :  { %19580 = vmatpush3.bf16.msra.mxu1 %v19579_v28 }
0x1285   :  { %13609 = vmatpush1.bf16.msra.mxu0 %v21217_v6 }
0x1286   :  { %13610 = vmatprep.subr.bf16.mxu0 %v21222_v37  ;;  %v14081_v37 = vld [vmem:[%s27033_s13 + $0x40] sm:$0xff] }
0x1288   :  { %13423 = vmatmul.mubr.bf16.gmra.mrb[200].mxu0 %v13282_v48  ;;  %v21259_v48 = vld [vmem:[%s27032_s9 + $0x7f0] ss:$8 sps:$4 sm:$0xff]  }
0x1289   :  { %13611 = vmatpush1.bf16.msra.mxu0 %v21220_v54  ;;  %13638 = vmatprep.mubr.bf16.mxu0 %v21453_v51  ;;  %v14082_v54 = vld [vmem:[%s27033_s13 + $0x48] sm:$0xff] }
0x128a   :  { %13612 = vmatprep.subr.bf16.mxu0 %v21225_v22  ;;  %v19595_v22 = vpack.c.bf16 %v14082_v54, %v14081_v37 }
0x128d   :  { %13613 = vmatpush1.bf16.msra.mxu0 %v21223_v9  ;;  %v14099_v9 = vld [vmem:[%s27033_s13 + $0xd0] sm:$0xff] }
0x128e   :  { %13614 = vmatprep.subr.bf16.mxu0 %v21228_v46  ;;  %v14100_v46 = vld [vmem:[%s27033_s13 + $0xd8] sm:$0xff] }
0x1291   :  { %13615 = vmatpush1.bf16.msra.mxu0 %v21226_v32  ;;  %v19597_v32 = vpack.c.bf16 %v14100_v46, %v14099_v9 }
0x1292   :  { %13616 = vmatprep.subr.bf16.mxu0 %v21231_v23  ;;  %v14083_v23 = vld [vmem:[%s27033_s13 + $0x50] sm:$0xff] }
0x1295   :  { %13617 = vmatpush1.bf16.msra.mxu0 %v21229_v31  ;;  %v14084_v31 = vld [vmem:[%s27033_s13 + $0x58] sm:$0xff] }
0x1296   :  { %13618 = vmatprep.subr.bf16.mxu0 %v21234_v50  ;;  %v19599_v50 = vpack.c.bf16 %v14084_v31, %v14083_v23 }
0x1299   :  { %13619 = vmatpush1.bf16.msra.mxu0 %v21232_v60  ;;  %v14101_v60 = vld [vmem:[%s27033_s13 + $0xe0] sm:$0xff] }
0x129a   :  { %13620 = vmatprep.subr.bf16.mxu0 %v21237_v13  ;;  %v19564_v49 = vpop.f32.mrb[216].mxu1  ;;  %v14102_v13 = vld [vmem:[%s27033_s13 + $0xe8] sm:$0xff] }
0x129b   :  { %v13718_v44 = vpop.f32.mrb[217].mxu1 }
0x129c   :  { %v19565_v20 = vpop.f32.mrb[218].mxu1 }
0x129d   :  { %13621 = vmatpush1.bf16.msra.mxu0 %v21235_v63  ;;  %v13734_v18 = vpack.c.bf16 %v19565_v20, %v19564_v49  ;;  %v13721_v10 = vpop.f32.mrb[219].mxu1  ;;  %v19601_v63 = vpack.c.bf16 %v14102_v13, %v14101_v60  ;;  %v14086_v49 = vld [vmem:[%s27033_s13 + $0x68] sm:$0xff]  ;;  %v14103_v20 = vld [vmem:[%s27033_s13 + $0xf0] sm:$0xff] }
0x129e   :  { %13832 = vmatprep.subr.bf16.mxu0 %v21240_v7  ;;  %v13733_v36 = vpack.c.bf16 %v13721_v10, %v13718_v44  ;;  %v14085_v7 = vld [vmem:[%s27033_s13 + $0x60] sm:$0xff] }
0x129f   :  { %v19603_v44 = vpack.c.bf16 %v14086_v49, %v14085_v7 }
0x12a0   :  { %13639 = vmatmul.mubr.bf16.vlgmr.msra.gmra.mrb[196].mxu0 %v13507_v27  ;;  %v14098_v27 = vld [vmem:[%s27033_s13 + $0xc8] sm:$0xff] }
0x12a1   :  { %13833 = vmatpush1.bf16.msra.mxu0 %v21238_v33  ;;  %13648 = vmatprep.mubr.bf16.mxu0 %v21453_v51  ;;  %v19593_v6 = vpack.c.bf16 %v14098_v27, %v14097_v45  ;;  %v14104_v33 = vld [vmem:[%s27033_s13 + $0xf8] sm:$0xff] }
0x12a2   :  { %13834 = vmatprep.subr.bf16.mxu0 %v21243_v5  ;;  %v19605_v10 = vpack.c.bf16 %v14104_v33, %v14103_v20  ;;  %v14088_v5 = vld [vmem:[%s27033_s13 + $0x78] sm:$0xff] }
0x12a5   :  { %13835 = vmatpush1.bf16.msra.mxu0 %v21241_v55  ;;  %v26953_v55 = vsub.s32 0, %v25451_v3 }
0x12a6   :  { %13836 = vmatprep.subr.bf16.mxu0 %v21246_v12  ;;  %v13893_v12 = vld [vmem:[%s27034_s10] sm:$0x3] }
0x12a8   :  { %13649 = vmatmul.mubr.bf16.gmra.mrb[200].mxu0 %v13508_v58  ;;  %v14080_v58 = vld [vmem:[%s27033_s13 + $0x38] sm:$0xff] }
0x12a9   :  { %13837 = vmatpush1.bf16.msra.mxu0 %v21244_v52  ;;  %13864 = vmatprep.mubr.bf16.mxu0 %v21453_v51  ;;  %v19591_v2 = vpack.c.bf16 %v14080_v58, %v14079_v4  ;;  %v26959_v52 = vsub.s32 1, %v25451_v3 }
0x12aa   :  { %13838 = vmatprep.subr.bf16.mxu0 %v21249_v25  ;;  %v13898_v25 = vrot.slane %v13893_v12, %v26953_v55 }
0x12ad   :  { %13839 = vmatpush1.bf16.msra.mxu0 %v21247_v39 }
0x12ae   :  { %13840 = vmatprep.subr.bf16.mxu0 %v21252_v26  ;;  %v13902_v26 = vrot.slane %v13893_v12, %v26959_v52 }
0x12b1   :  { %13841 = vmatpush1.bf16.msra.mxu0 %v21250_v1 }
0x12b2   :  { %13842 = vmatprep.subr.bf16.mxu0 %v21255_v17  ;;  %v26964_v17 = vadd.s32 16, %v25451_v3 }
0x12b4   :  { %vm13917_vm5 = vcmp.lt.s32.totalorder %v26964_v17, 18 }
0x12b5   :  { %13843 = vmatpush1.bf16.msra.mxu0 %v21253_v0  ;;  %v16282_v53 = vsel %vm13917_vm5, 1.0, %v21452_v19 }
0x12b6   :  { %13844 = vmatprep.subr.bf16.mxu0 %v21258_v62 }
0x12b9   :  { %13845 = vmatpush1.bf16.msra.mxu0 %v21256_v15 }
0x12ba   :  { %13846 = vmatprep.subr.bf16.mxu0 %v21261_v56 }
0x12bd   :  { %13847 = vmatpush1.bf16.msra.mxu0 %v21259_v48 }
0x12c0   :  { %13865 = vmatmul.mubr.bf16.vlgmr.msra.gmra.mrb[196].mxu0 %v13733_v36 }
0x12c1   :  { %13874 = vmatprep.mubr.bf16.mxu0 %v21453_v51  ;;  %v14091_v51 = vld [vmem:[%s27033_s13 + $0x90] sm:$0xff] }
0x12c2   :  { %v19581_v47 = vpack.c.bf16 %v14092_v29, %v14091_v51 }
0x12c4   :  { %19582 = vmatprep.subr.bf16.mxu1 %v19581_v47 }
0x12c5   :  { %19584 = vmatpush3.bf16.msra.mxu1 %v19583_v61 }
0x12c6   :  { %19586 = vmatprep.subr.bf16.mxu1 %v19585_v21 }
0x12c8   :  { %13875 = vmatmul.mubr.bf16.gmra.mrb[200].mxu0 %v13734_v18  ;;  %v14087_v18 = vld [vmem:[%s27033_s13 + $0x70] sm:$0xff] }
0x12c9   :  { %19588 = vmatpush3.bf16.msra.mxu1 %v19587_v42  ;;  %v19607_v36 = vpack.c.bf16 %v14088_v5, %v14087_v18 }
0x12ca   :  { %19590 = vmatprep.subr.bf16.mxu1 %v19589_v57 }
0x12cd   :  { %19592 = vmatpush3.bf16.msra.mxu1 %v19591_v2 }
0x12ce   :  { %19594 = vmatprep.subr.bf16.mxu1 %v19593_v6 }
0x12d1   :  { %19596 = vmatpush3.bf16.msra.mxu1 %v19595_v22 }
0x12d2   :  { %19598 = vmatprep.subr.bf16.mxu1 %v19597_v32 }
0x12d5   :  { %19600 = vmatpush3.bf16.msra.mxu1 %v19599_v50 }
0x12d6   :  { %19602 = vmatprep.subr.bf16.mxu1 %v19601_v63 }
0x12d9   :  { %19604 = vmatpush3.bf16.msra.mxu1 %v19603_v44 }
0x12da   :  { %19606 = vmatprep.subr.bf16.mxu1 %v19605_v10 }
0x12dd   :  { %19608 = vmatpush3.bf16.msra.mxu1 %v19607_v36 }
0x1393   :  { %v13866_v39 = vpop.f32.mrb[196].mxu0 }
0x1394   :  { %v13868_v1 = vpop.f32.mrb[197].mxu0  ;;  %v13905_v62 = vadd.f32 %v13898_v25, %v13866_v39 }
0x1395   :  { %v13870_v0 = vpop.f32.mrb[198].mxu0  ;;  %v13906_v48 = vadd.f32 %v13902_v26, %v13868_v1 }
0x1396   :  { %v13907_v15 = vadd.f32 %v13898_v25, %v13870_v0  ;;  %v13872_v56 = vpop.f32.mrb[199].mxu0 }
0x1397   :  { %v13908_v14 = vadd.f32 %v13902_v26, %v13872_v56 }
0x1398   :  { %v13935_v35 = vadd.f32 %v13907_v15, %v13905_v62 }
0x1399   :  { %v13944_v34 = vadd.f32 %v13908_v14, %v13906_v48 }
0x139b   :  { %v13876_v11 = vpop.f32.mrb[200].mxu0 }
0x139c   :  { %v13909_v28 = vadd.f32 %v13898_v25, %v13876_v11  ;;  %v13878_v51 = vpop.f32.mrb[201].mxu0 }
0x139d   :  { %v13910_v29 = vadd.f32 %v13902_v26, %v13878_v51  ;;  %v13880_v47 = vpop.f32.mrb[202].mxu0 }
0x139e   :  { %v13931_v8 = vmul.f32 %v16282_v53, %v13909_v28  ;;  %v13911_v16 = vadd.f32 %v13898_v25, %v13880_v47  ;;  %v13882_v61 = vpop.f32.mrb[203].mxu0 }
0x139f   :  { %v13932_v30 = vmul.f32 %v16282_v53, %v13910_v29  ;;  %v13912_v41 = vadd.f32 %v13902_v26, %v13882_v61 }
0x13a0   :  { %v13936_v21 = vadd.f32 %v13935_v35, %v13931_v8  ;;  %v13933_v40 = vmul.f32 0.0, %v13911_v16 }
0x13a1   :  { %v13945_v24 = vadd.f32 %v13944_v34, %v13932_v30  ;;  %v13934_v42 = vmul.f32 0.0, %v13912_v41 }
0x13a2   :  { %v13937_v43 = vadd.f32 %v13936_v21, %v13933_v40 }
0x13a3   :  { %v13946_v38 = vadd.f32 %v13945_v24, %v13934_v42 }
0x13a4   :  { %v13938_v57 = vrot.slane %v13937_v43, 4 }
0x13a5   :  { %v13947_v4 = vrot.slane %v13946_v38, 4 }
0x13a6   :  { %v13939_v58 = vadd.f32 %v13938_v57, %v13937_v43  ;;  %v13913_v43 = vld [vmem:[%s27035_s11] sm:$0x3] }
0x13a7   :  { %v13948_v2 = vadd.f32 %v13947_v4, %v13946_v38  ;;  %v13914_v38 = vld [vmem:[%s27036_s12] sm:$0x3]  ;;  %v14015_v57 = vrot.slane %v13913_v43, %v26953_v55 }
0x13a8   :  { %v13940_v45 = vrot.slane %v13939_v58, 2 }
0x13a9   :  { %v13949_v27 = vrot.slane %v13948_v2, 2 }
0x13aa   :  { %v13941_v6 = vadd.f32 %v13940_v45, %v13939_v58  ;;  %v14034_v58 = vrot.slane %v13914_v38, %v26953_v55  ;;  %v14038_v45 = vrot.slane %v13914_v38, %v26959_v52 }
0x13ab   :  { %v13950_v37 = vadd.f32 %v13949_v27, %v13948_v2  ;;  %v14019_v2 = vrot.slane %v13913_v43, %v26959_v52 }
0x13ac   :  { %v13942_v54 = vrot.slane %v13941_v6, 1 }
0x13ad   :  { %v13951_v22 = vrot.slane %v13950_v37, 1 }
0x13ae   :  { %v13943_v9 = vadd.f32 %v13942_v54, %v13941_v6 }
0x13af   :  { %v13952_v46 = vadd.f32 %v13951_v22, %v13950_v37 }
0x13b0   :  { %v13953_v32 = vmul.f32 0.055555556, %v13943_v9 }
0x13b1   :  { %v13954_v23 = vmul.f32 0.055555556, %v13952_v46 }
0x13b2   :  { %v13955_v31 = vsub.f32 %v13905_v62, %v13953_v32  ;;  %v13957_v50 = vsub.f32 %v13907_v15, %v13953_v32  ;;  %v13959_v60 = vsub.f32 %v13909_v28, %v13953_v32  ;;  %v13961_v13 = vsub.f32 %v13911_v16, %v13953_v32 }
0x13b3   :  { %v13956_v63 = vsub.f32 %v13906_v48, %v13954_v23  ;;  %v13958_v7 = vsub.f32 %v13908_v14, %v13954_v23  ;;  %v13960_v49 = vsub.f32 %v13910_v29, %v13954_v23  ;;  %v13962_v44 = vsub.f32 %v13912_v41, %v13954_v23 }
0x13b4   :  { %v13967_v20 = vmul.f32 %v16282_v53, %v13959_v60  ;;  %v13969_v33 = vmul.f32 0.0, %v13961_v13  ;;  %v13971_v18 = vmul.f32 %v13955_v31, %v13955_v31  ;;  %v13973_v10 = vmul.f32 %v13957_v50, %v13957_v50 }
0x13b5   :  { %v13968_v5 = vmul.f32 %v16282_v53, %v13960_v49  ;;  %v13970_v36 = vmul.f32 0.0, %v13962_v44  ;;  %v13972_v12 = vmul.f32 %v13956_v63, %v13956_v63  ;;  %v13974_v25 = vmul.f32 %v13958_v7, %v13958_v7 }
0x13b6   :  { %v13975_v39 = vmul.f32 %v13967_v20, %v13967_v20  ;;  %v13979_v26 = vadd.f32 %v13973_v10, %v13971_v18  ;;  %v13977_v62 = vmul.f32 %v13969_v33, %v13969_v33 }
0x13b7   :  { %v13976_v1 = vmul.f32 %v13968_v5, %v13968_v5  ;;  %v13988_v0 = vadd.f32 %v13974_v25, %v13972_v12  ;;  %v13978_v56 = vmul.f32 %v13970_v36, %v13970_v36 }
0x13b8   :  { %v13980_v15 = vadd.f32 %v13979_v26, %v13975_v39 }
0x13b9   :  { %v13989_v35 = vadd.f32 %v13988_v0, %v13976_v1 }
0x13ba   :  { %v13981_v48 = vadd.f32 %v13980_v15, %v13977_v62 }
0x13bb   :  { %v13990_v14 = vadd.f32 %v13989_v35, %v13978_v56 }
0x13bc   :  { %v13982_v34 = vrot.slane %v13981_v48, 4 }
0x13bd   :  { %v13991_v11 = vrot.slane %v13990_v14, 4 }
0x13be   :  { %v13983_v28 = vadd.f32 %v13982_v34, %v13981_v48 }
0x13bf   :  { %v13992_v51 = vadd.f32 %v13991_v11, %v13990_v14 }
0x13c0   :  { %v13984_v29 = vrot.slane %v13983_v28, 2 }
0x13c1   :  { %v13993_v47 = vrot.slane %v13992_v51, 2 }
0x13c2   :  { %v13985_v53 = vadd.f32 %v13984_v29, %v13983_v28  ;;  %v26979_v29 = vand.u32 127, %v9988_v59 }
0x13c3   :  { %v13994_v8 = vadd.f32 %v13993_v47, %v13992_v51  ;;  %v9990_v47 = vadd.s32 8, %v25451_v3 }
0x13c4   :  { %v13986_v16 = vrot.slane %v13985_v53, 1  ;;  %vm14200_vm15 = vcmp.lt.s32.totalorder %v26979_v29, 9 }
0x13c5   :  { %v13995_v61 = vrot.slane %v13994_v8, 1 }
0x13c6   :  { %v13987_v30 = vadd.f32 %v13986_v16, %v13985_v53  ;;  %v14192_v53 = vsub.s32 %v25451_v3, %v26979_v29  ;;  %v14194_v16 = vsub.s32 %v26964_v17, %v26979_v29 }
0x13c7   :  { %v13996_v41 = vadd.f32 %v13995_v61, %v13994_v8  ;;  %v14193_v8 = vsub.s32 %v9990_v47, %v26979_v29  ;;  %v9992_v61 = vadd.s32 24, %v25451_v3 }
0x13c8   :  { %v13997_v21 = vmul.f32 0.055555556, %v13987_v30  ;;  %vm14196_vm14 = vcmp.eq.s32.totalorder %v14192_v53, 0  ;;  %vm14198_vm5 = vcmp.eq.s32.totalorder %v14194_v16, 0 }
0x13c9   :  { %v13998_v40 = vmul.f32 0.055555556, %v13996_v41  ;;  %vm14197_vm0 = vcmp.eq.s32.totalorder %v14193_v8, 0  ;;  %vm14218_vm1 = vcmp.eq.s32.totalorder %v14193_v8, 9  ;;  %vm14201_vm2 = vmand %vm14196_vm14, %vm14200_vm15  ;;  %v14195_v59 = vsub.s32 %v9992_v61, %v26979_v29 }
0x13ca   :  { %v13999_v24 = vadd.f32 1e-05, %v13997_v21  ;;  %vm14202_vm3 = vmand %vm14197_vm0, %vm14200_vm15  ;;  %v16283_v17 = vsel %vm14201_vm2, 1.0, %v21452_v19 }
0x13cb   :  { %v14000_v42 = vadd.f32 1e-05, %v13998_v40  ;;  %vm14222_vm4 = vmand %vm14218_vm1, %vm14200_vm15  ;;  %v16284_v21 = vsel %vm14202_vm3, 1.0, %v21452_v19  ;;  %vm14254_vm1 = vcmp.lt.s32.totalorder %v25451_v3, 2  ;;  %vm14260_vm3 = vcmask 261120  }
0x13cc   :  { %21264 = vrsqrt.f32 %v13999_v24  ;;  %v16287_v40 = vsel %vm14222_vm4, 1.0, %v21452_v19 }
0x13cd   :  { %21266 = vrsqrt.f32 %v14000_v42  ;;  %v14234_v38 = vadd.f32 %v16287_v40, %v16284_v21 }
0x13d6   :  { %v21265_v4 = vpop.eup %21264 }
0x13d7   :  { %v21267_v27 = vpop.eup %21266  ;;  %v14009_v6 = vmul.f32 %v21265_v4, %v13961_v13  ;;  %v14003_v37 = vmul.f32 %v21265_v4, %v13955_v31  ;;  %v14005_v54 = vmul.f32 %v21265_v4, %v13957_v50  ;;  %v14007_v22 = vmul.f32 %v21265_v4, %v13959_v60 }
0x13d8   :  { %v14010_v9 = vmul.f32 %v21267_v27, %v13962_v44  ;;  %v14004_v46 = vmul.f32 %v21267_v27, %v13956_v63  ;;  %v14006_v32 = vmul.f32 %v21267_v27, %v13958_v7  ;;  %v14008_v23 = vmul.f32 %v21267_v27, %v13960_v49 }
0x13d9   :  { %v14028_v20 = vmul.f32 %v14015_v57, %v14009_v6  ;;  %v14022_v33 = vmul.f32 %v14015_v57, %v14003_v37  ;;  %v14024_v18 = vmul.f32 %v14015_v57, %v14005_v54  ;;  %v14026_v10 = vmul.f32 %v14015_v57, %v14007_v22 }
0x13da   :  { %v14029_v5 = vmul.f32 %v14019_v2, %v14010_v9  ;;  %v14023_v36 = vmul.f32 %v14019_v2, %v14004_v46  ;;  %v14025_v55 = vmul.f32 %v14019_v2, %v14006_v32  ;;  %v14027_v12 = vmul.f32 %v14019_v2, %v14008_v23 }
0x13db   :  { %v14047_v25 = vadd.f32 %v14034_v58, %v14028_v20  ;;  %v14041_v39 = vadd.f32 %v14034_v58, %v14022_v33  ;;  %v14043_v52 = vadd.f32 %v14034_v58, %v14024_v18  ;;  %v14045_v26 = vadd.f32 %v14034_v58, %v14026_v10 }
0x13dc   :  { %v14042_v13 = vadd.f32 %v14038_v45, %v14023_v36  ;;  %v14044_v31 = vadd.f32 %v14038_v45, %v14025_v55  ;;  %v14046_v50 = vadd.f32 %v14038_v45, %v14027_v12  ;;  %v14048_v60 = vadd.f32 %v14038_v45, %v14029_v5 }
0x13dd   :  { %v14057_v44 = vmul.f32 0.2, %v14041_v39  ;;  %vm14049_vm7 = vcmp.ge.f32.partialorder %v14041_v39, 0.0  ;;  %v14059_v0 = vmul.f32 0.2, %v14043_v52  ;;  %vm14051_vm9 = vcmp.ge.f32.partialorder %v14043_v52, 0.0 }
0x13de   :  { %vm14050_vm6 = vcmp.ge.f32.partialorder %v14042_v13, 0.0  ;;  %v14058_v63 = vmul.f32 0.2, %v14042_v13  ;;  %v14060_v7 = vmul.f32 0.2, %v14044_v31  ;;  %vm14052_vm8 = vcmp.ge.f32.partialorder %v14044_v31, 0.0 }
0x13df   :  { %v14065_v1 = vsel %vm14049_vm7, %v14041_v39, %v14057_v44  ;;  %v14062_v15 = vmul.f32 0.2, %v14046_v50  ;;  %vm14054_vm10 = vcmp.ge.f32.partialorder %v14046_v50, 0.0  ;;  %v14067_v56 = vsel %vm14051_vm9, %v14043_v52, %v14059_v0  ;;  %vm14203_vm7 = vmand %vm14198_vm5, %vm14200_vm15 }
0x13e0   :  { %v14066_v49 = vsel %vm14050_vm6, %v14042_v13, %v14058_v63  ;;  %v14068_v62 = vsel %vm14052_vm8, %v14044_v31, %v14060_v7  ;;  %v14061_v35 = vmul.f32 0.2, %v14045_v26  ;;  %vm14053_vm11 = vcmp.ge.f32.partialorder %v14045_v26, 0.0 }
0x13e1   :  { %14169 = vmatprep.mubr.f32.mxu1 %v14066_v49  ;;  %v14070_v48 = vsel %vm14054_vm10, %v14046_v50, %v14062_v15  ;;  %v14064_v14 = vmul.f32 0.2, %v14048_v60  ;;  %vm14056_vm12 = vcmp.ge.f32.partialorder %v14048_v60, 0.0  ;;  %v14063_v11 = vmul.f32 0.2, %v14047_v25 }
0x13e2   :  { %14170 = vmatmul.mubr.f32.vlgmr.msra.gmra.mrb[220].mxu1 %v14065_v1  ;;  %v14069_v34 = vsel %vm14053_vm11, %v14045_v26, %v14061_v35  ;;  %vm14055_vm13 = vcmp.ge.f32.partialorder %v14047_v25, 0.0  ;;  %vm14219_vm6 = vcmp.eq.s32.totalorder %v14194_v16, 9  ;;  %vm14199_vm9 = vcmp.eq.s32.totalorder %v14195_v59, 0 }
0x13e3   :  { %14174 = vmatprep.mubr.f32.mxu1 %v14068_v62  ;;  %v14072_v28 = vsel %vm14056_vm12, %v14048_v60, %v14064_v14  ;;  %v14071_v51 = vsel %vm14055_vm13, %v14047_v25, %v14063_v11  ;;  %vm14223_vm8 = vmand %vm14219_vm6, %vm14200_vm15  ;;  %vm14220_vm10 = vcmp.eq.s32.totalorder %v14195_v59, 9  ;;  %v16285_v4 = vsel %vm14203_vm7, 1.0, %v21452_v19 }
0x13e4   :  { %v16288_v58 = vsel %vm14223_vm8, 1.0, %v21452_v19  ;;  %vm14204_vm11 = vmand %vm14199_vm9, %vm14200_vm15  ;;  %v21454_v10 = vmov 0.0|0.0   ;;  %vm21455_vm13 = vmmov 0   ;;  %v14249_v5 = vmul.u32 9, %v25451_v3 }
0x13e5   :  { %vm14224_vm12 = vmand %vm14220_vm10, %vm14200_vm15  ;;  %v14235_v6 = vadd.f32 %v16288_v58, %v16285_v4  ;;  %v16286_v54 = vsel %vm14204_vm11, 1.0, %v21452_v19  ;;  %19609 = vmatprep.subr.bf16.mxu1 %v21454_v10  ;;  %v14259_v31 = vstv %s27037_s14 }
0x13e6   :  { %14175 = vmatmul.mubr.f32.gmra.mrb[222].mxu1 %v14067_v56  ;;  %v16289_v22 = vsel %vm14224_vm12, 1.0, %v21452_v19  ;;  %v14251_v55 = vadd.s32 9, %v14249_v5  ;;  %vm14250_vm14 = vcmp.ge.s32.totalorder %v26979_v29, %v14249_v5 }
0x13e7   :  { %14179 = vmatprep.mubr.f32.mxu1 %v14070_v48  ;;  %v14236_v23 = vadd.f32 %v16289_v22, %v16286_v54 }
0x13e8   :  { %vm14252_vm15 = vcmp.lt.s32.totalorder %v26979_v29, %v14251_v55 }
0x13e9   :  { %vm14253_vm0 = vmand %vm14250_vm14, %vm14252_vm15 }
0x13ea   :  { %14180 = vmatmul.mubr.f32.gmra.mrb[224].mxu1 %v14069_v34  ;;  %vm14255_vm2 = vmand %vm14253_vm0, %vm14254_vm1 }
0x13eb   :  { %14184 = vmatprep.mubr.f32.mxu1 %v14072_v28  ;;  %v16290_v13 = vsel %vm14255_vm2, 1.0, %v21452_v19 }
0x13ee   :  { %14185 = vmatmul.mubr.f32.gmra.mrb[226].mxu1 %v14071_v51 }
0x13ef   :  { %19574 = vmatprep.mubr.msk.f32.mxu1 %vm21455_vm13, %v21452_v19 }
0x14b5   :  { %v18765_v30 = vpop.f32.mrb[220].mxu1 }
0x14b6   :  { %v18766_v41 = vpop.f32.mrb[221].mxu1 }
0x14b7   :  { %v18767_v24 = vadd.f32 %v18766_v41, %v18765_v30 }
0x14b9   :  { %v18768_v42 = vpop.f32.mrb[222].mxu1  ;;  %v14237_v43 = vmul.f32 %v18767_v24, %v16283_v17 }
0x14ba   :  { %v18769_v57 = vpop.f32.mrb[223].mxu1 }
0x14bb   :  { %v18770_v2 = vadd.f32 %v18769_v57, %v18768_v42  ;;  %14241 = vadd.xlane.f32.xlu0 %v14237_v43 }
0x14bd   :  { %v18771_v45 = vpop.f32.mrb[224].mxu1  ;;  %v14238_v27 = vmul.f32 %v18770_v2, %v14234_v38 }
0x14be   :  { %v18772_v37 = vpop.f32.mrb[225].mxu1 }
0x14bf   :  { %v18773_v9 = vadd.f32 %v18772_v37, %v18771_v45  ;;  %14243 = vadd.xlane.f32.xlu0 %v14238_v27 }
0x14c1   :  { %v18774_v46 = vpop.f32.mrb[226].mxu1  ;;  %v14239_v32 = vmul.f32 %v18773_v9, %v14235_v6 }
0x14c2   :  { %v18775_v20 = vpop.f32.mrb[227].mxu1 }
0x14c3   :  { %v18776_v33 = vadd.f32 %v18775_v20, %v18774_v46  ;;  %14245 = vadd.xlane.f32.xlu1 %v14239_v32 }
0x14c5   :  { %v14240_v18 = vmul.f32 %v18776_v33, %v14236_v23 }
0x14c7   :  { %14247 = vadd.xlane.f32.xlu1 %v14240_v18 }
0x1548   :  { %v14242_v36 = vpop.xlane.xlu0 %14241 }
0x154c   :  { %v14244_v12 = vpop.xlane.xlu0 %14243 }
0x154d   :  { %v19610_v25 = vpack.c.bf16 %v14244_v12, %v14242_v36 }
0x154f   :  { %19611 = vmatpush3.bf16.msra.mxu1 %v19610_v25 }
0x1550   :  { %v14246_v39 = vpop.xlane.xlu1 %14245  ;;  %19612 = vmatprep.subr.bf16.mxu1 %v21454_v10 }
0x1554   :  { %v14248_v52 = vpop.xlane.xlu1 %14247 }
0x1555   :  { %v19613_v26 = vpack.c.bf16 %v14248_v52, %v14246_v39 }
0x1557   :  { %19614 = vmatpush3.bf16.msra.mxu1 %v19613_v26 }
0x155a   :  { %19575 = vmatmul.mubr.msk.f32.vlgmr.msra.gmra.mrb[228].mxu1 %vm14260_vm3, %v16290_v13 }
0x162d   :  { %v14330_v50 = vpop.f32.mrb[228].mxu1 }
0x162e   :  { %v14331_v60 = vadd.f32 %v14330_v50, %v14259_v31  ;;  %v19576_v44 = vpop.f32.mrb[229].mxu1 }
0x1630   :  { %v16292_v63 = vmul.f32 -1.442695, %v14331_v60 }
0x1632   :  { %21268 = vpow2.f32 %v16292_v63 }
0x163c   :  { %v21269_v7 = vpop.eup %21268 }
0x163d   :  { %v14337_v49 = vadd.f32 1.0, %v21269_v7 }
0x163f   :  { %21270 = vrcp.f32 %v14337_v49 }
0x1649   :  { %v21271_v3 = vpop.eup %21270 }
0x164a   :  { %14340 = vst [vmem:[%s27038_s15] sm:$0xff] %v21271_v3 }

</bundles_post_ra>
